<compile_context>
chip_gen: v7x
topology: tpu7x:2x2x1
jax: 0.10.0
libtpu: 0.0.40
codegen_flags: <defaults>
</compile_context>

<pallas_src>
import math

import jax
import jax.numpy as jnp
from jax.experimental import pallas as pl
from jax.experimental.pallas import tpu as pltpu

D = 128
HEADS = 4
DIM_HEAD = D // HEADS            # 32
NUM_LAYERS = 3
T_FRAMES = 2
H_SP = W_SP = 3
PIX = H_SP * W_SP                # 9
N_TOK = T_FRAMES * PIX           # 18
VOCAB = 84
VOCAB_PAD = 128                  # pad LM head to a full 128-lane store
LN_EPS = 1e-5
ATT_SCALE = 1.0 / math.sqrt(DIM_HEAD)
NEG_INF = -1e30
SQRT1_2 = 0.7071067811865476


# ------------------------------ fused Pallas kernel ------------------------------

def _fused_st_kernel(x0_ref, cos_sp_ref, sin_sp_ref, cos_tm_ref, sin_tm_ref,
                     mask_sp_ref, mask_tm_ref,
                     ln_w_ref, ln_b_ref,
                     wqkv_sp_ref, wout_sp_ref, bout_sp_ref,
                     wqkv_tm_ref, wout_tm_ref, bout_tm_ref,
                     mlp_w1_ref, mlp_b1_ref, mlp_w2_ref, mlp_b2_ref,
                     head_w_ref, head_b_ref,
                     out_ref, x_scr):
    """One grid step == one transformer layer; x stays resident in VMEM scratch."""
    l = pl.program_id(0)

    @pl.when(l == 0)
    def _():
        x_scr[...] = x0_ref[...]

    x = x_scr[...]                                     # (R_PAD, D) f32
    cos_sp = cos_sp_ref[...]
    sin_sp = sin_sp_ref[...]
    cos_tm = cos_tm_ref[...]
    sin_tm = sin_tm_ref[...]
    mask_sp = mask_sp_ref[...]                         # (R_PAD, R_PAD) additive
    mask_tm = mask_tm_ref[...]

    def layer_norm(y, w, b):                           # w, b: (1, D) f32
        mu = jnp.mean(y, axis=-1, keepdims=True)
        yc = y - mu
        var = jnp.mean(yc * yc, axis=-1, keepdims=True)
        return yc * jax.lax.rsqrt(var + LN_EPS) * w + b

    def erf(z):
        # Abramowitz & Stegun 7.1.26, |err| < 1.5e-7: keeps exact-erf GELU
        # semantics (NOT the tanh approximation). Math stays in f32.
        az = jnp.abs(z)
        t = 1.0 / (1.0 + 0.3275911 * az)
        poly = ((((1.061405429 * t - 1.453152027) * t + 1.421413741) * t
                 - 0.284496736) * t + 0.254829592) * t
        y = 1.0 - poly * jnp.exp(-az * az)
        return jnp.where(z < 0.0, -y, y)

    def gelu_exact(z):
        return 0.5 * z * (1.0 + erf(z * SQRT1_2))

    def rotate_half(z):
        # Interleaved-pair rotate_half (rotary_embedding_torch convention):
        #   out[2i] = -z[2i+1], out[2i+1] = z[2i]
        # Heads are packed on lanes (32 lanes each, even) so pairs never cross
        # head boundaries; wrapped lanes (0/127) are never selected.
        up = pltpu.roll(z, shift=1, axis=1)            # up[i]   = z[i-1]
        down = pltpu.roll(z, shift=D - 1, axis=1)      # down[i] = z[i+1]
        lane = jax.lax.broadcasted_iota(jnp.int32, z.shape, 1)
        is_even = (lane & 1) == 0
        return jnp.where(is_even, -down, up)

    def attention(y, wqkv_ref, wout_ref, bout, cos, sin, mask):
        yb = y.astype(jnp.bfloat16)
        # three separate K=128 dots against weight-ref slices (low vreg pressure)
        q = jnp.dot(yb, wqkv_ref[:, 0 * D:1 * D], preferred_element_type=jnp.float32)
        k = jnp.dot(yb, wqkv_ref[:, 1 * D:2 * D], preferred_element_type=jnp.float32)
        v = jnp.dot(yb, wqkv_ref[:, 2 * D:3 * D], preferred_element_type=jnp.float32)
        q = q * cos + rotate_half(q) * sin             # RoPE, f32
        k = k * cos + rotate_half(k) * sin
        heads_out = []
        for h in range(HEADS):                         # static unroll (4 heads)
            lo = h * DIM_HEAD
            qh = q[:, lo:lo + DIM_HEAD].astype(jnp.bfloat16)
            kh = k[:, lo:lo + DIM_HEAD].astype(jnp.bfloat16)
            vh = v[:, lo:lo + DIM_HEAD].astype(jnp.bfloat16)
            # scores = qh @ kh^T  (contract dim 1 of both; no transpose materialized)
            s = jax.lax.dot_general(qh, kh, (((1,), (1,)), ((), ())),
                                    preferred_element_type=jnp.float32)
            s = s * ATT_SCALE + mask
            m = jnp.max(s, axis=-1, keepdims=True)
            p = jnp.exp(s - m)
            denom = jnp.sum(p, axis=-1, keepdims=True)
            oh = jnp.dot(p.astype(jnp.bfloat16), vh,
                         preferred_element_type=jnp.float32)
            heads_out.append(oh / denom)
        # fuse the 4 per-head (K=32) output projections into one K=128 matmul
        o_all = jnp.concatenate(heads_out, axis=-1).astype(jnp.bfloat16)
        return jnp.dot(o_all, wout_ref[...], preferred_element_type=jnp.float32) + bout

    # ---- spatial axial attention (per-frame, non-causal) ----
    y = layer_norm(x, ln_w_ref[0], ln_b_ref[0])
    x = x + attention(y, wqkv_sp_ref, wout_sp_ref, bout_sp_ref[...],
                      cos_sp, sin_sp, mask_sp)
    # ---- temporal axial attention (per-pixel, causal over T=2) ----
    y = layer_norm(x, ln_w_ref[1], ln_b_ref[1])
    x = x + attention(y, wqkv_tm_ref, wout_tm_ref, bout_tm_ref[...],
                      cos_tm, sin_tm, mask_tm)
    # ---- MLP: LN -> Linear(d, 4d) -> exact GELU -> Linear(4d, d) ----
    y = layer_norm(x, ln_w_ref[2], ln_b_ref[2])
    h1 = jnp.dot(y.astype(jnp.bfloat16), mlp_w1_ref[...],
                 preferred_element_type=jnp.float32) + mlp_b1_ref[...]
    h1 = gelu_exact(h1)
    x = x + jnp.dot(h1.astype(jnp.bfloat16), mlp_w2_ref[...],
                    preferred_element_type=jnp.float32) + mlp_b2_ref[...]

    x_scr[...] = x                                     # carry to next layer

    @pl.when(l == pl.num_programs(0) - 1)
    def _():
        out_ref[...] = (jnp.dot(x.astype(jnp.bfloat16), head_w_ref[...],
                                preferred_element_type=jnp.float32)
                        + head_b_ref[...])


# ----------------------- rotary-embedding tables (host side) -----------------------

def spatial_axial_freqs(H, W, dim_head):
    # RotaryEmbedding(dim=dim_head//2, freqs_for='pixel', max_freq=10).get_axial_freqs(H, W)
    rot = dim_head // 2
    base = jnp.linspace(1.0, 10.0 / 2.0, rot // 2) * jnp.pi          # (rot//2,)
    fh = jnp.linspace(-1.0, 1.0, H)[:, None] * base[None, :]         # (H, rot//2)
    fw = jnp.linspace(-1.0, 1.0, W)[:, None] * base[None, :]         # (W, rot//2)
    fh = jnp.repeat(fh, 2, axis=-1)                                  # (H, rot)
    fw = jnp.repeat(fw, 2, axis=-1)                                  # (W, rot)
    fh = jnp.broadcast_to(fh[:, None, :], (H, W, rot))
    fw = jnp.broadcast_to(fw[None, :, :], (H, W, rot))
    return jnp.concatenate([fh, fw], axis=-1)                        # (H, W, dim_head)


def temporal_axial_freqs(T, dim_head):
    # RotaryEmbedding(dim=dim_head, freqs_for='lang', theta=10000), positions 0..T-1
    exps = jnp.arange(0, dim_head, 2, dtype=jnp.float32)[: dim_head // 2] / dim_head
    inv = 1.0 / (10000.0 ** exps)
    f = jnp.arange(T, dtype=jnp.float32)[:, None] * inv[None, :]
    return jnp.repeat(f, 2, axis=-1)                                 # (T, dim_head)


# ------------------------------ parameter init / packing ------------------------------

def init_params(key):
    def nrm(k, shape, scale=0.02):
        return scale * jax.random.normal(k, shape, dtype=jnp.float32)

    keys = iter(jax.random.split(key, 64))
    params = {
        "token_emb": nrm(next(keys), (VOCAB, D), 1.0),
        # PyTorch inits time_emb / pos2d to zeros; small deterministic randoms
        # keep the synthetic test non-degenerate.
        "time_emb": nrm(next(keys), (T_FRAMES, D)),
        "pos2d": nrm(next(keys), (PIX, D)),
        "head_w": nrm(next(keys), (D, VOCAB)),
        "head_b": jnp.zeros((VOCAB,), jnp.float32),
        "blocks": [],
    }
    for _ in range(NUM_LAYERS):
        blk = {
            "norm1_w": jnp.ones((D,), jnp.float32), "norm1_b": jnp.zeros((D,), jnp.float32),
            "norm2_w": jnp.ones((D,), jnp.float32), "norm2_b": jnp.zeros((D,), jnp.float32),
            "mlp_ln_w": jnp.ones((D,), jnp.float32), "mlp_ln_b": jnp.zeros((D,), jnp.float32),
            "mlp_w1": nrm(next(keys), (D, 4 * D)), "mlp_b1": jnp.zeros((4 * D,), jnp.float32),
            "mlp_w2": nrm(next(keys), (4 * D, D)), "mlp_b2": jnp.zeros((D,), jnp.float32),
            # to_qkv has bias=False in the PyTorch module; to_out has a bias.
            "spatial": {"wqkv": nrm(next(keys), (D, 3 * D)),
                        "wout": nrm(next(keys), (D, D)),
                        "bout": jnp.zeros((D,), jnp.float32)},
            "temporal": {"wqkv": nrm(next(keys), (D, 3 * D)),
                         "wout": nrm(next(keys), (D, D)),
                         "bout": jnp.zeros((D,), jnp.float32)},
        }
        params["blocks"].append(blk)
    return params


def pack_params(params, batch_size):
    """Stack per-layer tensors (bf16 matmul weights, f32 biases/LN) and
    precompute the B-tiled RoPE tables + additive attention masks so the
    per-call wrapper does nothing but the token-embedding gather."""
    bf16 = lambda w: w.astype(jnp.bfloat16)
    ln_w, ln_b = [], []
    wsp, wosp, bosp = [], [], []
    wtm, wotm, botm = [], [], []
    w1, b1, w2, b2 = [], [], [], []
    for blk in params["blocks"]:
        ln_w += [blk["norm1_w"], blk["norm2_w"], blk["mlp_ln_w"]]
        ln_b += [blk["norm1_b"], blk["norm2_b"], blk["mlp_ln_b"]]
        for name, wl, wol, bl in (("spatial", wsp, wosp, bosp),
                                  ("temporal", wtm, wotm, botm)):
            p = blk[name]
            wl.append(bf16(p["wqkv"]))                 # (D, 3D) bf16
            wol.append(bf16(p["wout"]))                # (D, D)  bf16
            bl.append(p["bout"].reshape(1, D))
        w1.append(bf16(blk["mlp_w1"])); b1.append(blk["mlp_b1"].reshape(1, 4 * D))
        w2.append(bf16(blk["mlp_w2"])); b2.append(blk["mlp_b2"].reshape(1, D))

    R = batch_size * N_TOK
    R_PAD = ((R + 7) // 8) * 8                         # pad rows to 8 sublanes

    # per-token-position RoPE tables, heads tiled on lanes, B-tiled, row-padded
    f_sp = spatial_axial_freqs(H_SP, W_SP, DIM_HEAD).reshape(PIX, DIM_HEAD)
    f_sp = jnp.tile(f_sp, (T_FRAMES, 1))                              # (N_TOK, 32)
    f_tm = jnp.repeat(temporal_axial_freqs(T_FRAMES, DIM_HEAD), PIX, axis=0)

    def row_table(f):                                   # (N_TOK, 32) -> (R_PAD, D)
        full = jnp.tile(jnp.tile(f, (1, HEADS)), (batch_size, 1))
        return jnp.pad(full, ((0, R_PAD - R), (0, 0)))

    cos_sp, sin_sp = jnp.cos(row_table(f_sp)), jnp.sin(row_table(f_sp))
    cos_tm, sin_tm = jnp.cos(row_table(f_tm)), jnp.sin(row_table(f_tm))

    # additive attention masks (pad rows keep their diagonal so no softmax row
    # is ever fully masked, and real rows never attend to pad rows)
    idx = jnp.arange(R_PAD)
    same_frame = (idx[:, None] // PIX) == (idx[None, :] // PIX)
    mask_sp = jnp.where(same_frame, 0.0, NEG_INF).astype(jnp.float32)
    b_i = idx // N_TOK
    p_i = idx % PIX
    t_i = (idx % N_TOK) // PIX
    same_pix = (b_i[:, None] == b_i[None, :]) & (p_i[:, None] == p_i[None, :])
    causal = t_i[:, None] >= t_i[None, :]
    mask_tm = jnp.where(same_pix & causal, 0.0, NEG_INF).astype(jnp.float32)

    return {
        "token_emb": params["token_emb"],
        "pos_time": (jnp.tile(params["pos2d"], (T_FRAMES, 1))
                     + jnp.repeat(params["time_emb"], PIX, axis=0)),  # (N_TOK, D)
        "cos_sp": cos_sp, "sin_sp": sin_sp, "cos_tm": cos_tm, "sin_tm": sin_tm,
        "mask_sp": mask_sp, "mask_tm": mask_tm,
        "ln_w": jnp.stack([w.reshape(1, D) for w in ln_w], 0),        # (3L, 1, D) f32
        "ln_b": jnp.stack([b.reshape(1, D) for b in ln_b], 0),
        "wsp": jnp.stack(wsp, 0), "wosp": jnp.stack(wosp, 0), "bosp": jnp.stack(bosp, 0),
        "wtm": jnp.stack(wtm, 0), "wotm": jnp.stack(wotm, 0), "botm": jnp.stack(botm, 0),
        "mlp_w1": jnp.stack(w1, 0), "mlp_b1": jnp.stack(b1, 0),
        "mlp_w2": jnp.stack(w2, 0), "mlp_b2": jnp.stack(b2, 0),
        "head_w": bf16(jnp.pad(params["head_w"], ((0, 0), (0, VOCAB_PAD - VOCAB)))),
        "head_b": jnp.pad(params["head_b"], ((0, VOCAB_PAD - VOCAB),)).reshape(1, VOCAB_PAD),
    }


# ------------------------------ forward pass ------------------------------

def st_model_forward(seq, packed):
    B, N = seq.shape
    assert N == N_TOK
    R = B * N
    R_PAD = packed["cos_sp"].shape[0]                  # pack_params was keyed by B
    assert R_PAD >= R and R_PAD % 8 == 0

    # TODO(synk): the data-dependent embedding gather stays as one XLA gather;
    # it could be moved in-kernel via scalar-prefetched indices if needed.
    tok = packed["token_emb"][seq]                     # (B, N, D)
    x = (tok + packed["pos_time"][None]).reshape(R, D)
    x = jnp.pad(x, ((0, R_PAD - R), (0, 0)))

    const2d = lambda: pl.BlockSpec((R_PAD, D), lambda l: (0, 0))
    per_layer = lambda *shape: pl.BlockSpec((None,) + shape, lambda l: (l, 0, 0))

    grid_spec = pltpu.PrefetchScalarGridSpec(
        num_scalar_prefetch=0,
        grid=(NUM_LAYERS,),
        in_specs=[
            const2d(),                                              # x0
            const2d(), const2d(), const2d(), const2d(),             # cos/sin tables
            pl.BlockSpec((R_PAD, R_PAD), lambda l: (0, 0)),         # mask_sp
            pl.BlockSpec((R_PAD, R_PAD), lambda l: (0, 0)),         # mask_tm
            pl.BlockSpec((3, 1, D), lambda l: (l, 0, 0)),           # ln_w (3 per layer)
            pl.BlockSpec((3, 1, D), lambda l: (l, 0, 0)),           # ln_b
            per_layer(D, 3 * D),                                    # wqkv_sp
            per_layer(D, D),                                        # wout_sp
            per_layer(1, D),                                        # bout_sp
            per_layer(D, 3 * D),                                    # wqkv_tm
            per_layer(D, D),                                        # wout_tm
            per_layer(1, D),                                        # bout_tm
            per_layer(D, 4 * D),                                    # mlp_w1
            per_layer(1, 4 * D),                                    # mlp_b1
            per_layer(4 * D, D),                                    # mlp_w2
            per_layer(1, D),                                        # mlp_b2
            pl.BlockSpec((D, VOCAB_PAD), lambda l: (0, 0)),         # head_w
            pl.BlockSpec((1, VOCAB_PAD), lambda l: (0, 0)),         # head_b
        ],
        out_specs=pl.BlockSpec((R_PAD, VOCAB_PAD), lambda l: (0, 0)),
        scratch_shapes=[pltpu.VMEM((R_PAD, D), jnp.float32)],       # resident token slab
    )

    out = pl.pallas_call(
        _fused_st_kernel,
        out_shape=jax.ShapeDtypeStruct((R_PAD, VOCAB_PAD), jnp.float32),
        grid_spec=grid_spec,
        compiler_params=pltpu.CompilerParams(
            dimension_semantics=("arbitrary",),
            vmem_limit_bytes=32 * 1024 * 1024),
        cost_estimate=pl.CostEstimate(flops=70_000_000,
                                      transcendentals=130_000,
                                      bytes_accessed=2_500_000),
    )(x,
      packed["cos_sp"], packed["sin_sp"], packed["cos_tm"], packed["sin_tm"],
      packed["mask_sp"], packed["mask_tm"],
      packed["ln_w"], packed["ln_b"],
      packed["wsp"], packed["wosp"], packed["bosp"],
      packed["wtm"], packed["wotm"], packed["botm"],
      packed["mlp_w1"], packed["mlp_b1"], packed["mlp_w2"], packed["mlp_b2"],
      packed["head_w"], packed["head_b"])

    return out[:R, :VOCAB].reshape(B, N, VOCAB)


if __name__ == "__main__":
    key = jax.random.PRNGKey(0)
    pkey, skey = jax.random.split(key)
    params = init_params(pkey)
    B = 2
    packed = pack_params(params, batch_size=B)
    seq = jax.random.randint(skey, (B, N_TOK), 0, VOCAB, dtype=jnp.int32)
    out = jax.jit(st_model_forward)(seq, packed)
    jax.block_until_ready(out)
    assert out.shape == (B, N_TOK, VOCAB)
    assert bool(jnp.all(jnp.isfinite(out)))
    print("KERNEL_OK")
</pallas_src>

<mosaic_0001>
module attributes {stable_mosaic.version = 11 : i64} {
  func.func @_fused_st_kernel(%arg0: i32, %arg1: memref<40x128xf32, #tpu.memory_space<vmem>>, %arg2: memref<40x128xf32, #tpu.memory_space<vmem>>, %arg3: memref<40x128xf32, #tpu.memory_space<vmem>>, %arg4: memref<40x128xf32, #tpu.memory_space<vmem>>, %arg5: memref<40x128xf32, #tpu.memory_space<vmem>>, %arg6: memref<40x40xf32, #tpu.memory_space<vmem>>, %arg7: memref<40x40xf32, #tpu.memory_space<vmem>>, %arg8: memref<3x1x128xf32, #tpu.memory_space<vmem>>, %arg9: memref<3x1x128xf32, #tpu.memory_space<vmem>>, %arg10: memref<1x128x384xbf16, #tpu.memory_space<vmem>>, %arg11: memref<1x128x128xbf16, #tpu.memory_space<vmem>>, %arg12: memref<1x1x128xf32, #tpu.memory_space<vmem>>, %arg13: memref<1x128x384xbf16, #tpu.memory_space<vmem>>, %arg14: memref<1x128x128xbf16, #tpu.memory_space<vmem>>, %arg15: memref<1x1x128xf32, #tpu.memory_space<vmem>>, %arg16: memref<1x128x512xbf16, #tpu.memory_space<vmem>>, %arg17: memref<1x1x512xf32, #tpu.memory_space<vmem>>, %arg18: memref<1x512x128xbf16, #tpu.memory_space<vmem>>, %arg19: memref<1x1x128xf32, #tpu.memory_space<vmem>>, %arg20: memref<128x128xbf16, #tpu.memory_space<vmem>>, %arg21: memref<1x128xf32, #tpu.memory_space<vmem>>, %arg22: memref<40x128xf32, #tpu.memory_space<vmem>>, %arg23: memref<40x128xf32, #tpu.memory_space<vmem>>) attributes {dimension_semantics = [#tpu.dimension_semantics<arbitrary>], iteration_bounds = array<i64: 3>, scalar_prefetch = 0 : i64, scratch_operands = 1 : i64, tpu.core_type = #tpu.core_type<tc>, window_params = [{pipeline_mode = #tpu.pipeline_mode<synchronous>, transform_indices = @transform_0, window_bounds = array<i64: 40, 128>}, {pipeline_mode = #tpu.pipeline_mode<synchronous>, transform_indices = @transform_1, window_bounds = array<i64: 40, 128>}, {pipeline_mode = #tpu.pipeline_mode<synchronous>, transform_indices = @transform_2, window_bounds = array<i64: 40, 128>}, {pipeline_mode = #tpu.pipeline_mode<synchronous>, transform_indices = @transform_3, window_bounds = array<i64: 40, 128>}, {pipeline_mode = #tpu.pipeline_mode<synchronous>, transform_indices = @transform_4, window_bounds = array<i64: 40, 128>}, {pipeline_mode = #tpu.pipeline_mode<synchronous>, transform_indices = @transform_5, window_bounds = array<i64: 40, 40>}, {pipeline_mode = #tpu.pipeline_mode<synchronous>, transform_indices = @transform_6, window_bounds = array<i64: 40, 40>}, {transform_indices = @transform_7, window_bounds = array<i64: 3, 1, 128>}, {transform_indices = @transform_8, window_bounds = array<i64: 3, 1, 128>}, {transform_indices = @transform_9, window_bounds = array<i64: 1, 128, 384>}, {transform_indices = @transform_10, window_bounds = array<i64: 1, 128, 128>}, {transform_indices = @transform_11, window_bounds = array<i64: 1, 1, 128>}, {transform_indices = @transform_12, window_bounds = array<i64: 1, 128, 384>}, {transform_indices = @transform_13, window_bounds = array<i64: 1, 128, 128>}, {transform_indices = @transform_14, window_bounds = array<i64: 1, 1, 128>}, {transform_indices = @transform_15, window_bounds = array<i64: 1, 128, 512>}, {transform_indices = @transform_16, window_bounds = array<i64: 1, 1, 512>}, {transform_indices = @transform_17, window_bounds = array<i64: 1, 512, 128>}, {transform_indices = @transform_18, window_bounds = array<i64: 1, 1, 128>}, {pipeline_mode = #tpu.pipeline_mode<synchronous>, transform_indices = @transform_19, window_bounds = array<i64: 128, 128>}, {pipeline_mode = #tpu.pipeline_mode<synchronous>, transform_indices = @transform_20, window_bounds = array<i64: 1, 128>}, {pipeline_mode = #tpu.pipeline_mode<synchronous>, transform_indices = @transform_21, window_bounds = array<i64: 40, 128>}]} {
    %c0_i32 = arith.constant 0 : i32
    %0 = arith.cmpi eq, %arg0, %c0_i32 : i32
    %1 = arith.extui %0 : i1 to i32
    %c0_i32_0 = arith.constant 0 : i32
    %2 = arith.cmpi ne, %1, %c0_i32_0 : i32
    scf.if %2 {
      %c0_170 = arith.constant 0 : index
      %c0_171 = arith.constant 0 : index
      %403 = vector.load %arg1[%c0_170, %c0_171] : memref<40x128xf32, #tpu.memory_space<vmem>>, vector<40x128xf32>
      %c0_172 = arith.constant 0 : index
      %c0_173 = arith.constant 0 : index
      %404 = vector.load %arg23[%c0_172, %c0_173] : memref<40x128xf32, #tpu.memory_space<vmem>>, vector<40x128xf32>
      tpu.vector_store %arg23[%c0_172, %c0_173], %403 {strides = array<i32>} : memref<40x128xf32, #tpu.memory_space<vmem>>, vector<40x128xf32>,
    } else {
    }
    %c0 = arith.constant 0 : index
    %c0_1 = arith.constant 0 : index
    %3 = vector.load %arg23[%c0, %c0_1] : memref<40x128xf32, #tpu.memory_space<vmem>>, vector<40x128xf32>
    %c0_2 = arith.constant 0 : index
    %c0_3 = arith.constant 0 : index
    %4 = vector.load %arg2[%c0_2, %c0_3] : memref<40x128xf32, #tpu.memory_space<vmem>>, vector<40x128xf32>
    %c0_4 = arith.constant 0 : index
    %c0_5 = arith.constant 0 : index
    %5 = vector.load %arg3[%c0_4, %c0_5] : memref<40x128xf32, #tpu.memory_space<vmem>>, vector<40x128xf32>
    %c0_6 = arith.constant 0 : index
    %c0_7 = arith.constant 0 : index
    %6 = vector.load %arg4[%c0_6, %c0_7] : memref<40x128xf32, #tpu.memory_space<vmem>>, vector<40x128xf32>
    %c0_8 = arith.constant 0 : index
    %c0_9 = arith.constant 0 : index
    %7 = vector.load %arg5[%c0_8, %c0_9] : memref<40x128xf32, #tpu.memory_space<vmem>>, vector<40x128xf32>
    %c0_10 = arith.constant 0 : index
    %c0_11 = arith.constant 0 : index
    %8 = vector.load %arg6[%c0_10, %c0_11] : memref<40x40xf32, #tpu.memory_space<vmem>>, vector<40x40xf32>
    %c0_12 = arith.constant 0 : index
    %c0_13 = arith.constant 0 : index
    %9 = vector.load %arg7[%c0_12, %c0_13] : memref<40x40xf32, #tpu.memory_space<vmem>>, vector<40x40xf32>
    %c0_14 = arith.constant 0 : index
    %c0_15 = arith.constant 0 : index
    %c0_16 = arith.constant 0 : index
    %10 = vector.load %arg8[%c0_14, %c0_15, %c0_16] : memref<3x1x128xf32, #tpu.memory_space<vmem>>, vector<1x1x128xf32>
    %11 = vector.shape_cast %10 : vector<1x1x128xf32> to vector<1x128xf32>
    %c0_17 = arith.constant 0 : index
    %c0_18 = arith.constant 0 : index
    %c0_19 = arith.constant 0 : index
    %12 = vector.load %arg9[%c0_17, %c0_18, %c0_19] : memref<3x1x128xf32, #tpu.memory_space<vmem>>, vector<1x1x128xf32>
    %13 = vector.shape_cast %12 : vector<1x1x128xf32> to vector<1x128xf32>
    %cst = arith.constant dense<0.000000e+00> : vector<40xf32>
    %14 = vector.multi_reduction <add>, %3, %cst [1] : vector<40x128xf32> to vector<40xf32>
    %15 = vector.shape_cast %14 : vector<40xf32> to vector<40x1xf32>
    %cst_20 = arith.constant 1.280000e+02 : f32
    %16 = vector.broadcast %cst_20 : f32 to vector<40x1xf32>
    %17 = arith.divf %15, %16 : vector<40x1xf32>
    %18 = vector.broadcast %17 : vector<40x1xf32> to vector<40x128xf32>
    %19 = arith.subf %3, %18 : vector<40x128xf32>
    %20 = arith.mulf %19, %19 : vector<40x128xf32>
    %cst_21 = arith.constant dense<0.000000e+00> : vector<40xf32>
    %21 = vector.multi_reduction <add>, %20, %cst_21 [1] : vector<40x128xf32> to vector<40xf32>
    %22 = vector.shape_cast %21 : vector<40xf32> to vector<40x1xf32>
    %cst_22 = arith.constant 1.280000e+02 : f32
    %23 = vector.broadcast %cst_22 : f32 to vector<40x1xf32>
    %24 = arith.divf %22, %23 : vector<40x1xf32>
    %cst_23 = arith.constant 9.99999974E-6 : f32
    %25 = vector.broadcast %cst_23 : f32 to vector<40x1xf32>
    %26 = arith.addf %24, %25 : vector<40x1xf32>
    %27 = math.rsqrt %26 : vector<40x1xf32>
    %28 = vector.broadcast %27 : vector<40x1xf32> to vector<40x128xf32>
    %29 = arith.mulf %19, %28 : vector<40x128xf32>
    %30 = vector.broadcast %11 : vector<1x128xf32> to vector<40x128xf32>
    %31 = arith.mulf %29, %30 : vector<40x128xf32>
    %32 = vector.broadcast %13 : vector<1x128xf32> to vector<40x128xf32>
    %33 = arith.addf %31, %32 : vector<40x128xf32>
    %c0_24 = arith.constant 0 : index
    %c0_25 = arith.constant 0 : index
    %c0_26 = arith.constant 0 : index
    %34 = vector.load %arg12[%c0_24, %c0_25, %c0_26] : memref<1x1x128xf32, #tpu.memory_space<vmem>>, vector<1x1x128xf32>
    %35 = vector.shape_cast %34 : vector<1x1x128xf32> to vector<1x128xf32>
    %36 = arith.truncf %33 : vector<40x128xf32> to vector<40x128xbf16>
    %c0_27 = arith.constant 0 : index
    %c0_28 = arith.constant 0 : index
    %c0_29 = arith.constant 0 : index
    %37 = vector.load %arg10[%c0_27, %c0_28, %c0_29] : memref<1x128x384xbf16, #tpu.memory_space<vmem>>, vector<1x128x128xbf16>
    %38 = vector.shape_cast %37 : vector<1x128x128xbf16> to vector<128x128xbf16>
    %cst_30 = arith.constant dense<0.000000e+00> : vector<40x128xf32>
    %39 = tpu.matmul %36, %38, %cst_30 {dimension_numbers = #tpu.dot_dimension_numbers<[1], [0], [0], [1], [0, 0, 1, 1], [], []>} : vector<40x128xbf16>, vector<128x128xbf16>, vector<40x128xf32> -> vector<40x128xf32>
    %c0_31 = arith.constant 0 : index
    %c0_32 = arith.constant 0 : index
    %c128 = arith.constant 128 : index
    %40 = vector.load %arg10[%c0_31, %c0_32, %c128] : memref<1x128x384xbf16, #tpu.memory_space<vmem>>, vector<1x128x128xbf16>
    %41 = vector.shape_cast %40 : vector<1x128x128xbf16> to vector<128x128xbf16>
    %cst_33 = arith.constant dense<0.000000e+00> : vector<40x128xf32>
    %42 = tpu.matmul %36, %41, %cst_33 {dimension_numbers = #tpu.dot_dimension_numbers<[1], [0], [0], [1], [0, 0, 1, 1], [], []>} : vector<40x128xbf16>, vector<128x128xbf16>, vector<40x128xf32> -> vector<40x128xf32>
    %c0_34 = arith.constant 0 : index
    %c0_35 = arith.constant 0 : index
    %c256 = arith.constant 256 : index
    %43 = vector.load %arg10[%c0_34, %c0_35, %c256] : memref<1x128x384xbf16, #tpu.memory_space<vmem>>, vector<1x128x128xbf16>
    %44 = vector.shape_cast %43 : vector<1x128x128xbf16> to vector<128x128xbf16>
    %cst_36 = arith.constant dense<0.000000e+00> : vector<40x128xf32>
    %45 = tpu.matmul %36, %44, %cst_36 {dimension_numbers = #tpu.dot_dimension_numbers<[1], [0], [0], [1], [0, 0, 1, 1], [], []>} : vector<40x128xbf16>, vector<128x128xbf16>, vector<40x128xf32> -> vector<40x128xf32>
    %46 = arith.mulf %39, %4 : vector<40x128xf32>
    %c1_i32 = arith.constant 1 : i32
    %47 = tpu.dynamic_rotate %39 by %c1_i32 dim 1 : vector<40x128xf32>, i32 -> vector<40x128xf32>
    %c127_i32 = arith.constant 127 : i32
    %48 = tpu.dynamic_rotate %39 by %c127_i32 dim 1 : vector<40x128xf32>, i32 -> vector<40x128xf32>
    %49 = tpu.iota {dimensions = array<i32: 1>} : vector<40x128xi32>
    %c1_i32_37 = arith.constant 1 : i32
    %50 = vector.broadcast %c1_i32_37 : i32 to vector<40x128xi32>
    %51 = arith.andi %49, %50 : vector<40x128xi32>
    %c0_i32_38 = arith.constant 0 : i32
    %52 = vector.broadcast %c0_i32_38 : i32 to vector<40x128xi32>
    %53 = arith.cmpi eq, %51, %52 : vector<40x128xi32>
    %cst_39 = arith.constant 0.000000e+00 : f32
    %54 = vector.broadcast %cst_39 : f32 to vector<40x128xf32>
    %55 = arith.subf %54, %48 : vector<40x128xf32>
    %56 = arith.select %53, %55, %47 : vector<40x128xi1>, vector<40x128xf32>
    %57 = arith.mulf %56, %5 : vector<40x128xf32>
    %58 = arith.addf %46, %57 : vector<40x128xf32>
    %59 = arith.mulf %42, %4 : vector<40x128xf32>
    %c1_i32_40 = arith.constant 1 : i32
    %60 = tpu.dynamic_rotate %42 by %c1_i32_40 dim 1 : vector<40x128xf32>, i32 -> vector<40x128xf32>
    %c127_i32_41 = arith.constant 127 : i32
    %61 = tpu.dynamic_rotate %42 by %c127_i32_41 dim 1 : vector<40x128xf32>, i32 -> vector<40x128xf32>
    %62 = tpu.iota {dimensions = array<i32: 1>} : vector<40x128xi32>
    %c1_i32_42 = arith.constant 1 : i32
    %63 = vector.broadcast %c1_i32_42 : i32 to vector<40x128xi32>
    %64 = arith.andi %62, %63 : vector<40x128xi32>
    %c0_i32_43 = arith.constant 0 : i32
    %65 = vector.broadcast %c0_i32_43 : i32 to vector<40x128xi32>
    %66 = arith.cmpi eq, %64, %65 : vector<40x128xi32>
    %cst_44 = arith.constant 0.000000e+00 : f32
    %67 = vector.broadcast %cst_44 : f32 to vector<40x128xf32>
    %68 = arith.subf %67, %61 : vector<40x128xf32>
    %69 = arith.select %66, %68, %60 : vector<40x128xi1>, vector<40x128xf32>
    %70 = arith.mulf %69, %5 : vector<40x128xf32>
    %71 = arith.addf %59, %70 : vector<40x128xf32>
    %72 = vector.extract_strided_slice %58 {offsets = [0, 0], sizes = [40, 32], strides = [1, 1]} : vector<40x128xf32> to vector<40x32xf32>
    %73 = arith.truncf %72 : vector<40x32xf32> to vector<40x32xbf16>
    %74 = vector.extract_strided_slice %71 {offsets = [0, 0], sizes = [40, 32], strides = [1, 1]} : vector<40x128xf32> to vector<40x32xf32>
    %75 = arith.truncf %74 : vector<40x32xf32> to vector<40x32xbf16>
    %76 = vector.extract_strided_slice %45 {offsets = [0, 0], sizes = [40, 32], strides = [1, 1]} : vector<40x128xf32> to vector<40x32xf32>
    %77 = arith.truncf %76 : vector<40x32xf32> to vector<40x32xbf16>
    %cst_45 = arith.constant dense<0.000000e+00> : vector<40x40xf32>
    %78 = tpu.matmul %73, %75, %cst_45 {dimension_numbers = #tpu.dot_dimension_numbers<[1], [1], [0], [0], [0, 0, 1, 0], [], []>} : vector<40x32xbf16>, vector<40x32xbf16>, vector<40x40xf32> -> vector<40x40xf32>
    %cst_46 = arith.constant 0.176776692 : f32
    %79 = vector.broadcast %cst_46 : f32 to vector<40x40xf32>
    %80 = arith.mulf %78, %79 : vector<40x40xf32>
    %81 = arith.addf %80, %8 : vector<40x40xf32>
    %cst_47 = arith.constant dense<0xFF800000> : vector<40xf32>
    %82 = vector.multi_reduction <maximumf>, %81, %cst_47 [1] : vector<40x40xf32> to vector<40xf32>
    %83 = vector.shape_cast %82 : vector<40xf32> to vector<40x1xf32>
    %84 = vector.broadcast %83 : vector<40x1xf32> to vector<40x40xf32>
    %85 = arith.subf %81, %84 : vector<40x40xf32>
    %86 = math.exp %85 : vector<40x40xf32>
    %cst_48 = arith.constant dense<0.000000e+00> : vector<40xf32>
    %87 = vector.multi_reduction <add>, %86, %cst_48 [1] : vector<40x40xf32> to vector<40xf32>
    %88 = vector.shape_cast %87 : vector<40xf32> to vector<40x1xf32>
    %89 = arith.truncf %86 : vector<40x40xf32> to vector<40x40xbf16>
    %cst_49 = arith.constant dense<0.000000e+00> : vector<40x32xf32>
    %90 = tpu.matmul %89, %77, %cst_49 {dimension_numbers = #tpu.dot_dimension_numbers<[1], [0], [0], [1], [0, 0, 1, 1], [], []>} : vector<40x40xbf16>, vector<40x32xbf16>, vector<40x32xf32> -> vector<40x32xf32>
    %91 = vector.broadcast %88 : vector<40x1xf32> to vector<40x32xf32>
    %92 = arith.divf %90, %91 : vector<40x32xf32>
    %93 = vector.extract_strided_slice %58 {offsets = [0, 32], sizes = [40, 32], strides = [1, 1]} : vector<40x128xf32> to vector<40x32xf32>
    %94 = arith.truncf %93 : vector<40x32xf32> to vector<40x32xbf16>
    %95 = vector.extract_strided_slice %71 {offsets = [0, 32], sizes = [40, 32], strides = [1, 1]} : vector<40x128xf32> to vector<40x32xf32>
    %96 = arith.truncf %95 : vector<40x32xf32> to vector<40x32xbf16>
    %97 = vector.extract_strided_slice %45 {offsets = [0, 32], sizes = [40, 32], strides = [1, 1]} : vector<40x128xf32> to vector<40x32xf32>
    %98 = arith.truncf %97 : vector<40x32xf32> to vector<40x32xbf16>
    %cst_50 = arith.constant dense<0.000000e+00> : vector<40x40xf32>
    %99 = tpu.matmul %94, %96, %cst_50 {dimension_numbers = #tpu.dot_dimension_numbers<[1], [1], [0], [0], [0, 0, 1, 0], [], []>} : vector<40x32xbf16>, vector<40x32xbf16>, vector<40x40xf32> -> vector<40x40xf32>
    %cst_51 = arith.constant 0.176776692 : f32
    %100 = vector.broadcast %cst_51 : f32 to vector<40x40xf32>
    %101 = arith.mulf %99, %100 : vector<40x40xf32>
    %102 = arith.addf %101, %8 : vector<40x40xf32>
    %cst_52 = arith.constant dense<0xFF800000> : vector<40xf32>
    %103 = vector.multi_reduction <maximumf>, %102, %cst_52 [1] : vector<40x40xf32> to vector<40xf32>
    %104 = vector.shape_cast %103 : vector<40xf32> to vector<40x1xf32>
    %105 = vector.broadcast %104 : vector<40x1xf32> to vector<40x40xf32>
    %106 = arith.subf %102, %105 : vector<40x40xf32>
    %107 = math.exp %106 : vector<40x40xf32>
    %cst_53 = arith.constant dense<0.000000e+00> : vector<40xf32>
    %108 = vector.multi_reduction <add>, %107, %cst_53 [1] : vector<40x40xf32> to vector<40xf32>
    %109 = vector.shape_cast %108 : vector<40xf32> to vector<40x1xf32>
    %110 = arith.truncf %107 : vector<40x40xf32> to vector<40x40xbf16>
    %cst_54 = arith.constant dense<0.000000e+00> : vector<40x32xf32>
    %111 = tpu.matmul %110, %98, %cst_54 {dimension_numbers = #tpu.dot_dimension_numbers<[1], [0], [0], [1], [0, 0, 1, 1], [], []>} : vector<40x40xbf16>, vector<40x32xbf16>, vector<40x32xf32> -> vector<40x32xf32>
    %112 = vector.broadcast %109 : vector<40x1xf32> to vector<40x32xf32>
    %113 = arith.divf %111, %112 : vector<40x32xf32>
    %114 = vector.extract_strided_slice %58 {offsets = [0, 64], sizes = [40, 32], strides = [1, 1]} : vector<40x128xf32> to vector<40x32xf32>
    %115 = arith.truncf %114 : vector<40x32xf32> to vector<40x32xbf16>
    %116 = vector.extract_strided_slice %71 {offsets = [0, 64], sizes = [40, 32], strides = [1, 1]} : vector<40x128xf32> to vector<40x32xf32>
    %117 = arith.truncf %116 : vector<40x32xf32> to vector<40x32xbf16>
    %118 = vector.extract_strided_slice %45 {offsets = [0, 64], sizes = [40, 32], strides = [1, 1]} : vector<40x128xf32> to vector<40x32xf32>
    %119 = arith.truncf %118 : vector<40x32xf32> to vector<40x32xbf16>
    %cst_55 = arith.constant dense<0.000000e+00> : vector<40x40xf32>
    %120 = tpu.matmul %115, %117, %cst_55 {dimension_numbers = #tpu.dot_dimension_numbers<[1], [1], [0], [0], [0, 0, 1, 0], [], []>} : vector<40x32xbf16>, vector<40x32xbf16>, vector<40x40xf32> -> vector<40x40xf32>
    %cst_56 = arith.constant 0.176776692 : f32
    %121 = vector.broadcast %cst_56 : f32 to vector<40x40xf32>
    %122 = arith.mulf %120, %121 : vector<40x40xf32>
    %123 = arith.addf %122, %8 : vector<40x40xf32>
    %cst_57 = arith.constant dense<0xFF800000> : vector<40xf32>
    %124 = vector.multi_reduction <maximumf>, %123, %cst_57 [1] : vector<40x40xf32> to vector<40xf32>
    %125 = vector.shape_cast %124 : vector<40xf32> to vector<40x1xf32>
    %126 = vector.broadcast %125 : vector<40x1xf32> to vector<40x40xf32>
    %127 = arith.subf %123, %126 : vector<40x40xf32>
    %128 = math.exp %127 : vector<40x40xf32>
    %cst_58 = arith.constant dense<0.000000e+00> : vector<40xf32>
    %129 = vector.multi_reduction <add>, %128, %cst_58 [1] : vector<40x40xf32> to vector<40xf32>
    %130 = vector.shape_cast %129 : vector<40xf32> to vector<40x1xf32>
    %131 = arith.truncf %128 : vector<40x40xf32> to vector<40x40xbf16>
    %cst_59 = arith.constant dense<0.000000e+00> : vector<40x32xf32>
    %132 = tpu.matmul %131, %119, %cst_59 {dimension_numbers = #tpu.dot_dimension_numbers<[1], [0], [0], [1], [0, 0, 1, 1], [], []>} : vector<40x40xbf16>, vector<40x32xbf16>, vector<40x32xf32> -> vector<40x32xf32>
    %133 = vector.broadcast %130 : vector<40x1xf32> to vector<40x32xf32>
    %134 = arith.divf %132, %133 : vector<40x32xf32>
    %135 = vector.extract_strided_slice %58 {offsets = [0, 96], sizes = [40, 32], strides = [1, 1]} : vector<40x128xf32> to vector<40x32xf32>
    %136 = arith.truncf %135 : vector<40x32xf32> to vector<40x32xbf16>
    %137 = vector.extract_strided_slice %71 {offsets = [0, 96], sizes = [40, 32], strides = [1, 1]} : vector<40x128xf32> to vector<40x32xf32>
    %138 = arith.truncf %137 : vector<40x32xf32> to vector<40x32xbf16>
    %139 = vector.extract_strided_slice %45 {offsets = [0, 96], sizes = [40, 32], strides = [1, 1]} : vector<40x128xf32> to vector<40x32xf32>
    %140 = arith.truncf %139 : vector<40x32xf32> to vector<40x32xbf16>
    %cst_60 = arith.constant dense<0.000000e+00> : vector<40x40xf32>
    %141 = tpu.matmul %136, %138, %cst_60 {dimension_numbers = #tpu.dot_dimension_numbers<[1], [1], [0], [0], [0, 0, 1, 0], [], []>} : vector<40x32xbf16>, vector<40x32xbf16>, vector<40x40xf32> -> vector<40x40xf32>
    %cst_61 = arith.constant 0.176776692 : f32
    %142 = vector.broadcast %cst_61 : f32 to vector<40x40xf32>
    %143 = arith.mulf %141, %142 : vector<40x40xf32>
    %144 = arith.addf %143, %8 : vector<40x40xf32>
    %cst_62 = arith.constant dense<0xFF800000> : vector<40xf32>
    %145 = vector.multi_reduction <maximumf>, %144, %cst_62 [1] : vector<40x40xf32> to vector<40xf32>
    %146 = vector.shape_cast %145 : vector<40xf32> to vector<40x1xf32>
    %147 = vector.broadcast %146 : vector<40x1xf32> to vector<40x40xf32>
    %148 = arith.subf %144, %147 : vector<40x40xf32>
    %149 = math.exp %148 : vector<40x40xf32>
    %cst_63 = arith.constant dense<0.000000e+00> : vector<40xf32>
    %150 = vector.multi_reduction <add>, %149, %cst_63 [1] : vector<40x40xf32> to vector<40xf32>
    %151 = vector.shape_cast %150 : vector<40xf32> to vector<40x1xf32>
    %152 = arith.truncf %149 : vector<40x40xf32> to vector<40x40xbf16>
    %cst_64 = arith.constant dense<0.000000e+00> : vector<40x32xf32>
    %153 = tpu.matmul %152, %140, %cst_64 {dimension_numbers = #tpu.dot_dimension_numbers<[1], [0], [0], [1], [0, 0, 1, 1], [], []>} : vector<40x40xbf16>, vector<40x32xbf16>, vector<40x32xf32> -> vector<40x32xf32>
    %154 = vector.broadcast %151 : vector<40x1xf32> to vector<40x32xf32>
    %155 = arith.divf %153, %154 : vector<40x32xf32>
    %156 = tpu.concatenate %92, %113, %134, %155 in 1 : vector<40x32xf32>, vector<40x32xf32>, vector<40x32xf32>, vector<40x32xf32> -> vector<40x128xf32>
    %157 = arith.truncf %156 : vector<40x128xf32> to vector<40x128xbf16>
    %c0_65 = arith.constant 0 : index
    %c0_66 = arith.constant 0 : index
    %c0_67 = arith.constant 0 : index
    %158 = vector.load %arg11[%c0_65, %c0_66, %c0_67] : memref<1x128x128xbf16, #tpu.memory_space<vmem>>, vector<1x128x128xbf16>
    %159 = vector.shape_cast %158 : vector<1x128x128xbf16> to vector<128x128xbf16>
    %cst_68 = arith.constant dense<0.000000e+00> : vector<40x128xf32>
    %160 = tpu.matmul %157, %159, %cst_68 {dimension_numbers = #tpu.dot_dimension_numbers<[1], [0], [0], [1], [0, 0, 1, 1], [], []>} : vector<40x128xbf16>, vector<128x128xbf16>, vector<40x128xf32> -> vector<40x128xf32>
    %161 = vector.broadcast %35 : vector<1x128xf32> to vector<40x128xf32>
    %162 = arith.addf %160, %161 : vector<40x128xf32>
    %163 = arith.addf %3, %162 : vector<40x128xf32>
    %c1 = arith.constant 1 : index
    %c0_69 = arith.constant 0 : index
    %c0_70 = arith.constant 0 : index
    %164 = vector.load %arg8[%c1, %c0_69, %c0_70] : memref<3x1x128xf32, #tpu.memory_space<vmem>>, vector<1x1x128xf32>
    %165 = vector.shape_cast %164 : vector<1x1x128xf32> to vector<1x128xf32>
    %c1_71 = arith.constant 1 : index
    %c0_72 = arith.constant 0 : index
    %c0_73 = arith.constant 0 : index
    %166 = vector.load %arg9[%c1_71, %c0_72, %c0_73] : memref<3x1x128xf32, #tpu.memory_space<vmem>>, vector<1x1x128xf32>
    %167 = vector.shape_cast %166 : vector<1x1x128xf32> to vector<1x128xf32>
    %cst_74 = arith.constant dense<0.000000e+00> : vector<40xf32>
    %168 = vector.multi_reduction <add>, %163, %cst_74 [1] : vector<40x128xf32> to vector<40xf32>
    %169 = vector.shape_cast %168 : vector<40xf32> to vector<40x1xf32>
    %cst_75 = arith.constant 1.280000e+02 : f32
    %170 = vector.broadcast %cst_75 : f32 to vector<40x1xf32>
    %171 = arith.divf %169, %170 : vector<40x1xf32>
    %172 = vector.broadcast %171 : vector<40x1xf32> to vector<40x128xf32>
    %173 = arith.subf %163, %172 : vector<40x128xf32>
    %174 = arith.mulf %173, %173 : vector<40x128xf32>
    %cst_76 = arith.constant dense<0.000000e+00> : vector<40xf32>
    %175 = vector.multi_reduction <add>, %174, %cst_76 [1] : vector<40x128xf32> to vector<40xf32>
    %176 = vector.shape_cast %175 : vector<40xf32> to vector<40x1xf32>
    %cst_77 = arith.constant 1.280000e+02 : f32
    %177 = vector.broadcast %cst_77 : f32 to vector<40x1xf32>
    %178 = arith.divf %176, %177 : vector<40x1xf32>
    %cst_78 = arith.constant 9.99999974E-6 : f32
    %179 = vector.broadcast %cst_78 : f32 to vector<40x1xf32>
    %180 = arith.addf %178, %179 : vector<40x1xf32>
    %181 = math.rsqrt %180 : vector<40x1xf32>
    %182 = vector.broadcast %181 : vector<40x1xf32> to vector<40x128xf32>
    %183 = arith.mulf %173, %182 : vector<40x128xf32>
    %184 = vector.broadcast %165 : vector<1x128xf32> to vector<40x128xf32>
    %185 = arith.mulf %183, %184 : vector<40x128xf32>
    %186 = vector.broadcast %167 : vector<1x128xf32> to vector<40x128xf32>
    %187 = arith.addf %185, %186 : vector<40x128xf32>
    %c0_79 = arith.constant 0 : index
    %c0_80 = arith.constant 0 : index
    %c0_81 = arith.constant 0 : index
    %188 = vector.load %arg15[%c0_79, %c0_80, %c0_81] : memref<1x1x128xf32, #tpu.memory_space<vmem>>, vector<1x1x128xf32>
    %189 = vector.shape_cast %188 : vector<1x1x128xf32> to vector<1x128xf32>
    %190 = arith.truncf %187 : vector<40x128xf32> to vector<40x128xbf16>
    %c0_82 = arith.constant 0 : index
    %c0_83 = arith.constant 0 : index
    %c0_84 = arith.constant 0 : index
    %191 = vector.load %arg13[%c0_82, %c0_83, %c0_84] : memref<1x128x384xbf16, #tpu.memory_space<vmem>>, vector<1x128x128xbf16>
    %192 = vector.shape_cast %191 : vector<1x128x128xbf16> to vector<128x128xbf16>
    %cst_85 = arith.constant dense<0.000000e+00> : vector<40x128xf32>
    %193 = tpu.matmul %190, %192, %cst_85 {dimension_numbers = #tpu.dot_dimension_numbers<[1], [0], [0], [1], [0, 0, 1, 1], [], []>} : vector<40x128xbf16>, vector<128x128xbf16>, vector<40x128xf32> -> vector<40x128xf32>
    %c0_86 = arith.constant 0 : index
    %c0_87 = arith.constant 0 : index
    %c128_88 = arith.constant 128 : index
    %194 = vector.load %arg13[%c0_86, %c0_87, %c128_88] : memref<1x128x384xbf16, #tpu.memory_space<vmem>>, vector<1x128x128xbf16>
    %195 = vector.shape_cast %194 : vector<1x128x128xbf16> to vector<128x128xbf16>
    %cst_89 = arith.constant dense<0.000000e+00> : vector<40x128xf32>
    %196 = tpu.matmul %190, %195, %cst_89 {dimension_numbers = #tpu.dot_dimension_numbers<[1], [0], [0], [1], [0, 0, 1, 1], [], []>} : vector<40x128xbf16>, vector<128x128xbf16>, vector<40x128xf32> -> vector<40x128xf32>
    %c0_90 = arith.constant 0 : index
    %c0_91 = arith.constant 0 : index
    %c256_92 = arith.constant 256 : index
    %197 = vector.load %arg13[%c0_90, %c0_91, %c256_92] : memref<1x128x384xbf16, #tpu.memory_space<vmem>>, vector<1x128x128xbf16>
    %198 = vector.shape_cast %197 : vector<1x128x128xbf16> to vector<128x128xbf16>
    %cst_93 = arith.constant dense<0.000000e+00> : vector<40x128xf32>
    %199 = tpu.matmul %190, %198, %cst_93 {dimension_numbers = #tpu.dot_dimension_numbers<[1], [0], [0], [1], [0, 0, 1, 1], [], []>} : vector<40x128xbf16>, vector<128x128xbf16>, vector<40x128xf32> -> vector<40x128xf32>
    %200 = arith.mulf %193, %6 : vector<40x128xf32>
    %c1_i32_94 = arith.constant 1 : i32
    %201 = tpu.dynamic_rotate %193 by %c1_i32_94 dim 1 : vector<40x128xf32>, i32 -> vector<40x128xf32>
    %c127_i32_95 = arith.constant 127 : i32
    %202 = tpu.dynamic_rotate %193 by %c127_i32_95 dim 1 : vector<40x128xf32>, i32 -> vector<40x128xf32>
    %203 = tpu.iota {dimensions = array<i32: 1>} : vector<40x128xi32>
    %c1_i32_96 = arith.constant 1 : i32
    %204 = vector.broadcast %c1_i32_96 : i32 to vector<40x128xi32>
    %205 = arith.andi %203, %204 : vector<40x128xi32>
    %c0_i32_97 = arith.constant 0 : i32
    %206 = vector.broadcast %c0_i32_97 : i32 to vector<40x128xi32>
    %207 = arith.cmpi eq, %205, %206 : vector<40x128xi32>
    %cst_98 = arith.constant 0.000000e+00 : f32
    %208 = vector.broadcast %cst_98 : f32 to vector<40x128xf32>
    %209 = arith.subf %208, %202 : vector<40x128xf32>
    %210 = arith.select %207, %209, %201 : vector<40x128xi1>, vector<40x128xf32>
    %211 = arith.mulf %210, %7 : vector<40x128xf32>
    %212 = arith.addf %200, %211 : vector<40x128xf32>
    %213 = arith.mulf %196, %6 : vector<40x128xf32>
    %c1_i32_99 = arith.constant 1 : i32
    %214 = tpu.dynamic_rotate %196 by %c1_i32_99 dim 1 : vector<40x128xf32>, i32 -> vector<40x128xf32>
    %c127_i32_100 = arith.constant 127 : i32
    %215 = tpu.dynamic_rotate %196 by %c127_i32_100 dim 1 : vector<40x128xf32>, i32 -> vector<40x128xf32>
    %216 = tpu.iota {dimensions = array<i32: 1>} : vector<40x128xi32>
    %c1_i32_101 = arith.constant 1 : i32
    %217 = vector.broadcast %c1_i32_101 : i32 to vector<40x128xi32>
    %218 = arith.andi %216, %217 : vector<40x128xi32>
    %c0_i32_102 = arith.constant 0 : i32
    %219 = vector.broadcast %c0_i32_102 : i32 to vector<40x128xi32>
    %220 = arith.cmpi eq, %218, %219 : vector<40x128xi32>
    %cst_103 = arith.constant 0.000000e+00 : f32
    %221 = vector.broadcast %cst_103 : f32 to vector<40x128xf32>
    %222 = arith.subf %221, %215 : vector<40x128xf32>
    %223 = arith.select %220, %222, %214 : vector<40x128xi1>, vector<40x128xf32>
    %224 = arith.mulf %223, %7 : vector<40x128xf32>
    %225 = arith.addf %213, %224 : vector<40x128xf32>
    %226 = vector.extract_strided_slice %212 {offsets = [0, 0], sizes = [40, 32], strides = [1, 1]} : vector<40x128xf32> to vector<40x32xf32>
    %227 = arith.truncf %226 : vector<40x32xf32> to vector<40x32xbf16>
    %228 = vector.extract_strided_slice %225 {offsets = [0, 0], sizes = [40, 32], strides = [1, 1]} : vector<40x128xf32> to vector<40x32xf32>
    %229 = arith.truncf %228 : vector<40x32xf32> to vector<40x32xbf16>
    %230 = vector.extract_strided_slice %199 {offsets = [0, 0], sizes = [40, 32], strides = [1, 1]} : vector<40x128xf32> to vector<40x32xf32>
    %231 = arith.truncf %230 : vector<40x32xf32> to vector<40x32xbf16>
    %cst_104 = arith.constant dense<0.000000e+00> : vector<40x40xf32>
    %232 = tpu.matmul %227, %229, %cst_104 {dimension_numbers = #tpu.dot_dimension_numbers<[1], [1], [0], [0], [0, 0, 1, 0], [], []>} : vector<40x32xbf16>, vector<40x32xbf16>, vector<40x40xf32> -> vector<40x40xf32>
    %cst_105 = arith.constant 0.176776692 : f32
    %233 = vector.broadcast %cst_105 : f32 to vector<40x40xf32>
    %234 = arith.mulf %232, %233 : vector<40x40xf32>
    %235 = arith.addf %234, %9 : vector<40x40xf32>
    %cst_106 = arith.constant dense<0xFF800000> : vector<40xf32>
    %236 = vector.multi_reduction <maximumf>, %235, %cst_106 [1] : vector<40x40xf32> to vector<40xf32>
    %237 = vector.shape_cast %236 : vector<40xf32> to vector<40x1xf32>
    %238 = vector.broadcast %237 : vector<40x1xf32> to vector<40x40xf32>
    %239 = arith.subf %235, %238 : vector<40x40xf32>
    %240 = math.exp %239 : vector<40x40xf32>
    %cst_107 = arith.constant dense<0.000000e+00> : vector<40xf32>
    %241 = vector.multi_reduction <add>, %240, %cst_107 [1] : vector<40x40xf32> to vector<40xf32>
    %242 = vector.shape_cast %241 : vector<40xf32> to vector<40x1xf32>
    %243 = arith.truncf %240 : vector<40x40xf32> to vector<40x40xbf16>
    %cst_108 = arith.constant dense<0.000000e+00> : vector<40x32xf32>
    %244 = tpu.matmul %243, %231, %cst_108 {dimension_numbers = #tpu.dot_dimension_numbers<[1], [0], [0], [1], [0, 0, 1, 1], [], []>} : vector<40x40xbf16>, vector<40x32xbf16>, vector<40x32xf32> -> vector<40x32xf32>
    %245 = vector.broadcast %242 : vector<40x1xf32> to vector<40x32xf32>
    %246 = arith.divf %244, %245 : vector<40x32xf32>
    %247 = vector.extract_strided_slice %212 {offsets = [0, 32], sizes = [40, 32], strides = [1, 1]} : vector<40x128xf32> to vector<40x32xf32>
    %248 = arith.truncf %247 : vector<40x32xf32> to vector<40x32xbf16>
    %249 = vector.extract_strided_slice %225 {offsets = [0, 32], sizes = [40, 32], strides = [1, 1]} : vector<40x128xf32> to vector<40x32xf32>
    %250 = arith.truncf %249 : vector<40x32xf32> to vector<40x32xbf16>
    %251 = vector.extract_strided_slice %199 {offsets = [0, 32], sizes = [40, 32], strides = [1, 1]} : vector<40x128xf32> to vector<40x32xf32>
    %252 = arith.truncf %251 : vector<40x32xf32> to vector<40x32xbf16>
    %cst_109 = arith.constant dense<0.000000e+00> : vector<40x40xf32>
    %253 = tpu.matmul %248, %250, %cst_109 {dimension_numbers = #tpu.dot_dimension_numbers<[1], [1], [0], [0], [0, 0, 1, 0], [], []>} : vector<40x32xbf16>, vector<40x32xbf16>, vector<40x40xf32> -> vector<40x40xf32>
    %cst_110 = arith.constant 0.176776692 : f32
    %254 = vector.broadcast %cst_110 : f32 to vector<40x40xf32>
    %255 = arith.mulf %253, %254 : vector<40x40xf32>
    %256 = arith.addf %255, %9 : vector<40x40xf32>
    %cst_111 = arith.constant dense<0xFF800000> : vector<40xf32>
    %257 = vector.multi_reduction <maximumf>, %256, %cst_111 [1] : vector<40x40xf32> to vector<40xf32>
    %258 = vector.shape_cast %257 : vector<40xf32> to vector<40x1xf32>
    %259 = vector.broadcast %258 : vector<40x1xf32> to vector<40x40xf32>
    %260 = arith.subf %256, %259 : vector<40x40xf32>
    %261 = math.exp %260 : vector<40x40xf32>
    %cst_112 = arith.constant dense<0.000000e+00> : vector<40xf32>
    %262 = vector.multi_reduction <add>, %261, %cst_112 [1] : vector<40x40xf32> to vector<40xf32>
    %263 = vector.shape_cast %262 : vector<40xf32> to vector<40x1xf32>
    %264 = arith.truncf %261 : vector<40x40xf32> to vector<40x40xbf16>
    %cst_113 = arith.constant dense<0.000000e+00> : vector<40x32xf32>
    %265 = tpu.matmul %264, %252, %cst_113 {dimension_numbers = #tpu.dot_dimension_numbers<[1], [0], [0], [1], [0, 0, 1, 1], [], []>} : vector<40x40xbf16>, vector<40x32xbf16>, vector<40x32xf32> -> vector<40x32xf32>
    %266 = vector.broadcast %263 : vector<40x1xf32> to vector<40x32xf32>
    %267 = arith.divf %265, %266 : vector<40x32xf32>
    %268 = vector.extract_strided_slice %212 {offsets = [0, 64], sizes = [40, 32], strides = [1, 1]} : vector<40x128xf32> to vector<40x32xf32>
    %269 = arith.truncf %268 : vector<40x32xf32> to vector<40x32xbf16>
    %270 = vector.extract_strided_slice %225 {offsets = [0, 64], sizes = [40, 32], strides = [1, 1]} : vector<40x128xf32> to vector<40x32xf32>
    %271 = arith.truncf %270 : vector<40x32xf32> to vector<40x32xbf16>
    %272 = vector.extract_strided_slice %199 {offsets = [0, 64], sizes = [40, 32], strides = [1, 1]} : vector<40x128xf32> to vector<40x32xf32>
    %273 = arith.truncf %272 : vector<40x32xf32> to vector<40x32xbf16>
    %cst_114 = arith.constant dense<0.000000e+00> : vector<40x40xf32>
    %274 = tpu.matmul %269, %271, %cst_114 {dimension_numbers = #tpu.dot_dimension_numbers<[1], [1], [0], [0], [0, 0, 1, 0], [], []>} : vector<40x32xbf16>, vector<40x32xbf16>, vector<40x40xf32> -> vector<40x40xf32>
    %cst_115 = arith.constant 0.176776692 : f32
    %275 = vector.broadcast %cst_115 : f32 to vector<40x40xf32>
    %276 = arith.mulf %274, %275 : vector<40x40xf32>
    %277 = arith.addf %276, %9 : vector<40x40xf32>
    %cst_116 = arith.constant dense<0xFF800000> : vector<40xf32>
    %278 = vector.multi_reduction <maximumf>, %277, %cst_116 [1] : vector<40x40xf32> to vector<40xf32>
    %279 = vector.shape_cast %278 : vector<40xf32> to vector<40x1xf32>
    %280 = vector.broadcast %279 : vector<40x1xf32> to vector<40x40xf32>
    %281 = arith.subf %277, %280 : vector<40x40xf32>
    %282 = math.exp %281 : vector<40x40xf32>
    %cst_117 = arith.constant dense<0.000000e+00> : vector<40xf32>
    %283 = vector.multi_reduction <add>, %282, %cst_117 [1] : vector<40x40xf32> to vector<40xf32>
    %284 = vector.shape_cast %283 : vector<40xf32> to vector<40x1xf32>
    %285 = arith.truncf %282 : vector<40x40xf32> to vector<40x40xbf16>
    %cst_118 = arith.constant dense<0.000000e+00> : vector<40x32xf32>
    %286 = tpu.matmul %285, %273, %cst_118 {dimension_numbers = #tpu.dot_dimension_numbers<[1], [0], [0], [1], [0, 0, 1, 1], [], []>} : vector<40x40xbf16>, vector<40x32xbf16>, vector<40x32xf32> -> vector<40x32xf32>
    %287 = vector.broadcast %284 : vector<40x1xf32> to vector<40x32xf32>
    %288 = arith.divf %286, %287 : vector<40x32xf32>
    %289 = vector.extract_strided_slice %212 {offsets = [0, 96], sizes = [40, 32], strides = [1, 1]} : vector<40x128xf32> to vector<40x32xf32>
    %290 = arith.truncf %289 : vector<40x32xf32> to vector<40x32xbf16>
    %291 = vector.extract_strided_slice %225 {offsets = [0, 96], sizes = [40, 32], strides = [1, 1]} : vector<40x128xf32> to vector<40x32xf32>
    %292 = arith.truncf %291 : vector<40x32xf32> to vector<40x32xbf16>
    %293 = vector.extract_strided_slice %199 {offsets = [0, 96], sizes = [40, 32], strides = [1, 1]} : vector<40x128xf32> to vector<40x32xf32>
    %294 = arith.truncf %293 : vector<40x32xf32> to vector<40x32xbf16>
    %cst_119 = arith.constant dense<0.000000e+00> : vector<40x40xf32>
    %295 = tpu.matmul %290, %292, %cst_119 {dimension_numbers = #tpu.dot_dimension_numbers<[1], [1], [0], [0], [0, 0, 1, 0], [], []>} : vector<40x32xbf16>, vector<40x32xbf16>, vector<40x40xf32> -> vector<40x40xf32>
    %cst_120 = arith.constant 0.176776692 : f32
    %296 = vector.broadcast %cst_120 : f32 to vector<40x40xf32>
    %297 = arith.mulf %295, %296 : vector<40x40xf32>
    %298 = arith.addf %297, %9 : vector<40x40xf32>
    %cst_121 = arith.constant dense<0xFF800000> : vector<40xf32>
    %299 = vector.multi_reduction <maximumf>, %298, %cst_121 [1] : vector<40x40xf32> to vector<40xf32>
    %300 = vector.shape_cast %299 : vector<40xf32> to vector<40x1xf32>
    %301 = vector.broadcast %300 : vector<40x1xf32> to vector<40x40xf32>
    %302 = arith.subf %298, %301 : vector<40x40xf32>
    %303 = math.exp %302 : vector<40x40xf32>
    %cst_122 = arith.constant dense<0.000000e+00> : vector<40xf32>
    %304 = vector.multi_reduction <add>, %303, %cst_122 [1] : vector<40x40xf32> to vector<40xf32>
    %305 = vector.shape_cast %304 : vector<40xf32> to vector<40x1xf32>
    %306 = arith.truncf %303 : vector<40x40xf32> to vector<40x40xbf16>
    %cst_123 = arith.constant dense<0.000000e+00> : vector<40x32xf32>
    %307 = tpu.matmul %306, %294, %cst_123 {dimension_numbers = #tpu.dot_dimension_numbers<[1], [0], [0], [1], [0, 0, 1, 1], [], []>} : vector<40x40xbf16>, vector<40x32xbf16>, vector<40x32xf32> -> vector<40x32xf32>
    %308 = vector.broadcast %305 : vector<40x1xf32> to vector<40x32xf32>
    %309 = arith.divf %307, %308 : vector<40x32xf32>
    %310 = tpu.concatenate %246, %267, %288, %309 in 1 : vector<40x32xf32>, vector<40x32xf32>, vector<40x32xf32>, vector<40x32xf32> -> vector<40x128xf32>
    %311 = arith.truncf %310 : vector<40x128xf32> to vector<40x128xbf16>
    %c0_124 = arith.constant 0 : index
    %c0_125 = arith.constant 0 : index
    %c0_126 = arith.constant 0 : index
    %312 = vector.load %arg14[%c0_124, %c0_125, %c0_126] : memref<1x128x128xbf16, #tpu.memory_space<vmem>>, vector<1x128x128xbf16>
    %313 = vector.shape_cast %312 : vector<1x128x128xbf16> to vector<128x128xbf16>
    %cst_127 = arith.constant dense<0.000000e+00> : vector<40x128xf32>
    %314 = tpu.matmul %311, %313, %cst_127 {dimension_numbers = #tpu.dot_dimension_numbers<[1], [0], [0], [1], [0, 0, 1, 1], [], []>} : vector<40x128xbf16>, vector<128x128xbf16>, vector<40x128xf32> -> vector<40x128xf32>
    %315 = vector.broadcast %189 : vector<1x128xf32> to vector<40x128xf32>
    %316 = arith.addf %314, %315 : vector<40x128xf32>
    %317 = arith.addf %163, %316 : vector<40x128xf32>
    %c2 = arith.constant 2 : index
    %c0_128 = arith.constant 0 : index
    %c0_129 = arith.constant 0 : index
    %318 = vector.load %arg8[%c2, %c0_128, %c0_129] : memref<3x1x128xf32, #tpu.memory_space<vmem>>, vector<1x1x128xf32>
    %319 = vector.shape_cast %318 : vector<1x1x128xf32> to vector<1x128xf32>
    %c2_130 = arith.constant 2 : index
    %c0_131 = arith.constant 0 : index
    %c0_132 = arith.constant 0 : index
    %320 = vector.load %arg9[%c2_130, %c0_131, %c0_132] : memref<3x1x128xf32, #tpu.memory_space<vmem>>, vector<1x1x128xf32>
    %321 = vector.shape_cast %320 : vector<1x1x128xf32> to vector<1x128xf32>
    %cst_133 = arith.constant dense<0.000000e+00> : vector<40xf32>
    %322 = vector.multi_reduction <add>, %317, %cst_133 [1] : vector<40x128xf32> to vector<40xf32>
    %323 = vector.shape_cast %322 : vector<40xf32> to vector<40x1xf32>
    %cst_134 = arith.constant 1.280000e+02 : f32
    %324 = vector.broadcast %cst_134 : f32 to vector<40x1xf32>
    %325 = arith.divf %323, %324 : vector<40x1xf32>
    %326 = vector.broadcast %325 : vector<40x1xf32> to vector<40x128xf32>
    %327 = arith.subf %317, %326 : vector<40x128xf32>
    %328 = arith.mulf %327, %327 : vector<40x128xf32>
    %cst_135 = arith.constant dense<0.000000e+00> : vector<40xf32>
    %329 = vector.multi_reduction <add>, %328, %cst_135 [1] : vector<40x128xf32> to vector<40xf32>
    %330 = vector.shape_cast %329 : vector<40xf32> to vector<40x1xf32>
    %cst_136 = arith.constant 1.280000e+02 : f32
    %331 = vector.broadcast %cst_136 : f32 to vector<40x1xf32>
    %332 = arith.divf %330, %331 : vector<40x1xf32>
    %cst_137 = arith.constant 9.99999974E-6 : f32
    %333 = vector.broadcast %cst_137 : f32 to vector<40x1xf32>
    %334 = arith.addf %332, %333 : vector<40x1xf32>
    %335 = math.rsqrt %334 : vector<40x1xf32>
    %336 = vector.broadcast %335 : vector<40x1xf32> to vector<40x128xf32>
    %337 = arith.mulf %327, %336 : vector<40x128xf32>
    %338 = vector.broadcast %319 : vector<1x128xf32> to vector<40x128xf32>
    %339 = arith.mulf %337, %338 : vector<40x128xf32>
    %340 = vector.broadcast %321 : vector<1x128xf32> to vector<40x128xf32>
    %341 = arith.addf %339, %340 : vector<40x128xf32>
    %342 = arith.truncf %341 : vector<40x128xf32> to vector<40x128xbf16>
    %c0_138 = arith.constant 0 : index
    %c0_139 = arith.constant 0 : index
    %c0_140 = arith.constant 0 : index
    %343 = vector.load %arg16[%c0_138, %c0_139, %c0_140] : memref<1x128x512xbf16, #tpu.memory_space<vmem>>, vector<1x128x512xbf16>
    %344 = vector.shape_cast %343 : vector<1x128x512xbf16> to vector<128x512xbf16>
    %cst_141 = arith.constant dense<0.000000e+00> : vector<40x512xf32>
    %345 = tpu.matmul %342, %344, %cst_141 {dimension_numbers = #tpu.dot_dimension_numbers<[1], [0], [0], [1], [0, 0, 1, 1], [], []>} : vector<40x128xbf16>, vector<128x512xbf16>, vector<40x512xf32> -> vector<40x512xf32>
    %c0_142 = arith.constant 0 : index
    %c0_143 = arith.constant 0 : index
    %c0_144 = arith.constant 0 : index
    %346 = vector.load %arg17[%c0_142, %c0_143, %c0_144] : memref<1x1x512xf32, #tpu.memory_space<vmem>>, vector<1x1x512xf32>
    %347 = vector.shape_cast %346 : vector<1x1x512xf32> to vector<1x512xf32>
    %348 = vector.broadcast %347 : vector<1x512xf32> to vector<40x512xf32>
    %349 = arith.addf %345, %348 : vector<40x512xf32>
    %cst_145 = arith.constant 5.000000e-01 : f32
    %350 = vector.broadcast %cst_145 : f32 to vector<40x512xf32>
    %351 = arith.mulf %350, %349 : vector<40x512xf32>
    %cst_146 = arith.constant 0.707106769 : f32
    %352 = vector.broadcast %cst_146 : f32 to vector<40x512xf32>
    %353 = arith.mulf %349, %352 : vector<40x512xf32>
    %354 = math.absf %353 : vector<40x512xf32>
    %cst_147 = arith.constant 0.327591091 : f32
    %355 = vector.broadcast %cst_147 : f32 to vector<40x512xf32>
    %356 = arith.mulf %355, %354 : vector<40x512xf32>
    %cst_148 = arith.constant 1.000000e+00 : f32
    %357 = vector.broadcast %cst_148 : f32 to vector<40x512xf32>
    %358 = arith.addf %357, %356 : vector<40x512xf32>
    %cst_149 = arith.constant 1.000000e+00 : f32
    %359 = vector.broadcast %cst_149 : f32 to vector<40x512xf32>
    %360 = arith.divf %359, %358 : vector<40x512xf32>
    %cst_150 = arith.constant 1.06140542 : f32
    %361 = vector.broadcast %cst_150 : f32 to vector<40x512xf32>
    %362 = arith.mulf %361, %360 : vector<40x512xf32>
    %cst_151 = arith.constant 1.45315206 : f32
    %363 = vector.broadcast %cst_151 : f32 to vector<40x512xf32>
    %364 = arith.subf %362, %363 : vector<40x512xf32>
    %365 = arith.mulf %364, %360 : vector<40x512xf32>
    %cst_152 = arith.constant 1.42141378 : f32
    %366 = vector.broadcast %cst_152 : f32 to vector<40x512xf32>
    %367 = arith.addf %365, %366 : vector<40x512xf32>
    %368 = arith.mulf %367, %360 : vector<40x512xf32>
    %cst_153 = arith.constant 0.284496725 : f32
    %369 = vector.broadcast %cst_153 : f32 to vector<40x512xf32>
    %370 = arith.subf %368, %369 : vector<40x512xf32>
    %371 = arith.mulf %370, %360 : vector<40x512xf32>
    %cst_154 = arith.constant 0.254829586 : f32
    %372 = vector.broadcast %cst_154 : f32 to vector<40x512xf32>
    %373 = arith.addf %371, %372 : vector<40x512xf32>
    %374 = arith.mulf %373, %360 : vector<40x512xf32>
    %cst_155 = arith.constant 0.000000e+00 : f32
    %375 = vector.broadcast %cst_155 : f32 to vector<40x512xf32>
    %376 = arith.subf %375, %354 : vector<40x512xf32>
    %377 = arith.mulf %376, %354 : vector<40x512xf32>
    %378 = math.exp %377 : vector<40x512xf32>
    %379 = arith.mulf %374, %378 : vector<40x512xf32>
    %cst_156 = arith.constant 1.000000e+00 : f32
    %380 = vector.broadcast %cst_156 : f32 to vector<40x512xf32>
    %381 = arith.subf %380, %379 : vector<40x512xf32>
    %cst_157 = arith.constant 0.000000e+00 : f32
    %382 = vector.broadcast %cst_157 : f32 to vector<40x512xf32>
    %383 = arith.cmpf olt, %353, %382 : vector<40x512xf32>
    %cst_158 = arith.constant 0.000000e+00 : f32
    %384 = vector.broadcast %cst_158 : f32 to vector<40x512xf32>
    %385 = arith.subf %384, %381 : vector<40x512xf32>
    %386 = arith.select %383, %385, %381 : vector<40x512xi1>, vector<40x512xf32>
    %cst_159 = arith.constant 1.000000e+00 : f32
    %387 = vector.broadcast %cst_159 : f32 to vector<40x512xf32>
    %388 = arith.addf %387, %386 : vector<40x512xf32>
    %389 = arith.mulf %351, %388 : vector<40x512xf32>
    %390 = arith.truncf %389 : vector<40x512xf32> to vector<40x512xbf16>
    %c0_160 = arith.constant 0 : index
    %c0_161 = arith.constant 0 : index
    %c0_162 = arith.constant 0 : index
    %391 = vector.load %arg18[%c0_160, %c0_161, %c0_162] : memref<1x512x128xbf16, #tpu.memory_space<vmem>>, vector<1x512x128xbf16>
    %392 = vector.shape_cast %391 : vector<1x512x128xbf16> to vector<512x128xbf16>
    %cst_163 = arith.constant dense<0.000000e+00> : vector<40x128xf32>
    %393 = tpu.matmul %390, %392, %cst_163 {dimension_numbers = #tpu.dot_dimension_numbers<[1], [0], [0], [1], [0, 0, 1, 1], [], []>} : vector<40x512xbf16>, vector<512x128xbf16>, vector<40x128xf32> -> vector<40x128xf32>
    %394 = arith.addf %317, %393 : vector<40x128xf32>
    %c0_164 = arith.constant 0 : index
    %c0_165 = arith.constant 0 : index
    %c0_166 = arith.constant 0 : index
    %395 = vector.load %arg19[%c0_164, %c0_165, %c0_166] : memref<1x1x128xf32, #tpu.memory_space<vmem>>, vector<1x1x128xf32>
    %396 = vector.shape_cast %395 : vector<1x1x128xf32> to vector<1x128xf32>
    %397 = vector.broadcast %396 : vector<1x128xf32> to vector<40x128xf32>
    %398 = arith.addf %394, %397 : vector<40x128xf32>
    %c0_167 = arith.constant 0 : index
    %c0_168 = arith.constant 0 : index
    %399 = vector.load %arg23[%c0_167, %c0_168] : memref<40x128xf32, #tpu.memory_space<vmem>>, vector<40x128xf32>
    tpu.vector_store %arg23[%c0_167, %c0_168], %398 {strides = array<i32>} : memref<40x128xf32, #tpu.memory_space<vmem>>, vector<40x128xf32>,
    %c2_i32 = arith.constant 2 : i32
    %400 = arith.cmpi eq, %arg0, %c2_i32 : i32
    %401 = arith.extui %400 : i1 to i32
    %c0_i32_169 = arith.constant 0 : i32
    %402 = arith.cmpi ne, %401, %c0_i32_169 : i32
    scf.if %402 {
      %403 = arith.truncf %398 : vector<40x128xf32> to vector<40x128xbf16>
      %c0_170 = arith.constant 0 : index
      %c0_171 = arith.constant 0 : index
      %404 = vector.load %arg20[%c0_170, %c0_171] : memref<128x128xbf16, #tpu.memory_space<vmem>>, vector<128x128xbf16>
      %cst_172 = arith.constant dense<0.000000e+00> : vector<40x128xf32>
      %405 = tpu.matmul %403, %404, %cst_172 {dimension_numbers = #tpu.dot_dimension_numbers<[1], [0], [0], [1], [0, 0, 1, 1], [], []>} : vector<40x128xbf16>, vector<128x128xbf16>, vector<40x128xf32> -> vector<40x128xf32>
      %c0_173 = arith.constant 0 : index
      %c0_174 = arith.constant 0 : index
      %406 = vector.load %arg21[%c0_173, %c0_174] : memref<1x128xf32, #tpu.memory_space<vmem>>, vector<1x128xf32>
      %407 = vector.broadcast %406 : vector<1x128xf32> to vector<40x128xf32>
      %408 = arith.addf %405, %407 : vector<40x128xf32>
      %c0_175 = arith.constant 0 : index
      %c0_176 = arith.constant 0 : index
      %409 = vector.load %arg22[%c0_175, %c0_176] : memref<40x128xf32, #tpu.memory_space<vmem>>, vector<40x128xf32>
      tpu.vector_store %arg22[%c0_175, %c0_176], %408 {strides = array<i32>} : memref<40x128xf32, #tpu.memory_space<vmem>>, vector<40x128xf32>,
    } else {
    }
    return
  }
  func.func @transform_0(%arg0: i32) -> (i32, i32) {
    %c0_i32 = arith.constant 0 : i32
    %c0_i32_0 = arith.constant 0 : i32
    %c0_i32_1 = arith.constant 0 : i32
    return %c0_i32, %c0_i32_0 : i32, i32
  }
  func.func @transform_1(%arg0: i32) -> (i32, i32) {
    %c0_i32 = arith.constant 0 : i32
    %c0_i32_0 = arith.constant 0 : i32
    %c0_i32_1 = arith.constant 0 : i32
    return %c0_i32, %c0_i32_0 : i32, i32
  }
  func.func @transform_2(%arg0: i32) -> (i32, i32) {
    %c0_i32 = arith.constant 0 : i32
    %c0_i32_0 = arith.constant 0 : i32
    %c0_i32_1 = arith.constant 0 : i32
    return %c0_i32, %c0_i32_0 : i32, i32
  }
  func.func @transform_3(%arg0: i32) -> (i32, i32) {
    %c0_i32 = arith.constant 0 : i32
    %c0_i32_0 = arith.constant 0 : i32
    %c0_i32_1 = arith.constant 0 : i32
    return %c0_i32, %c0_i32_0 : i32, i32
  }
  func.func @transform_4(%arg0: i32) -> (i32, i32) {
    %c0_i32 = arith.constant 0 : i32
    %c0_i32_0 = arith.constant 0 : i32
    %c0_i32_1 = arith.constant 0 : i32
    return %c0_i32, %c0_i32_0 : i32, i32
  }
  func.func @transform_5(%arg0: i32) -> (i32, i32) {
    %c0_i32 = arith.constant 0 : i32
    %c0_i32_0 = arith.constant 0 : i32
    %c0_i32_1 = arith.constant 0 : i32
    return %c0_i32, %c0_i32_0 : i32, i32
  }
  func.func @transform_6(%arg0: i32) -> (i32, i32) {
    %c0_i32 = arith.constant 0 : i32
    %c0_i32_0 = arith.constant 0 : i32
    %c0_i32_1 = arith.constant 0 : i32
    return %c0_i32, %c0_i32_0 : i32, i32
  }
  func.func @transform_7(%arg0: i32) -> (i32, i32, i32) {
    %c0_i32 = arith.constant 0 : i32
    %c0_i32_0 = arith.constant 0 : i32
    %c0_i32_1 = arith.constant 0 : i32
    return %arg0, %c0_i32, %c0_i32_0 : i32, i32, i32
  }
  func.func @transform_8(%arg0: i32) -> (i32, i32, i32) {
    %c0_i32 = arith.constant 0 : i32
    %c0_i32_0 = arith.constant 0 : i32
    %c0_i32_1 = arith.constant 0 : i32
    return %arg0, %c0_i32, %c0_i32_0 : i32, i32, i32
  }
  func.func @transform_9(%arg0: i32) -> (i32, i32, i32) {
    %c0_i32 = arith.constant 0 : i32
    %c0_i32_0 = arith.constant 0 : i32
    %c0_i32_1 = arith.constant 0 : i32
    return %arg0, %c0_i32, %c0_i32_0 : i32, i32, i32
  }
  func.func @transform_10(%arg0: i32) -> (i32, i32, i32) {
    %c0_i32 = arith.constant 0 : i32
    %c0_i32_0 = arith.constant 0 : i32
    %c0_i32_1 = arith.constant 0 : i32
    return %arg0, %c0_i32, %c0_i32_0 : i32, i32, i32
  }
  func.func @transform_11(%arg0: i32) -> (i32, i32, i32) {
    %c0_i32 = arith.constant 0 : i32
    %c0_i32_0 = arith.constant 0 : i32
    %c0_i32_1 = arith.constant 0 : i32
    return %arg0, %c0_i32, %c0_i32_0 : i32, i32, i32
  }
  func.func @transform_12(%arg0: i32) -> (i32, i32, i32) {
    %c0_i32 = arith.constant 0 : i32
    %c0_i32_0 = arith.constant 0 : i32
    %c0_i32_1 = arith.constant 0 : i32
    return %arg0, %c0_i32, %c0_i32_0 : i32, i32, i32
  }
  func.func @transform_13(%arg0: i32) -> (i32, i32, i32) {
    %c0_i32 = arith.constant 0 : i32
    %c0_i32_0 = arith.constant 0 : i32
    %c0_i32_1 = arith.constant 0 : i32
    return %arg0, %c0_i32, %c0_i32_0 : i32, i32, i32
  }
  func.func @transform_14(%arg0: i32) -> (i32, i32, i32) {
    %c0_i32 = arith.constant 0 : i32
    %c0_i32_0 = arith.constant 0 : i32
    %c0_i32_1 = arith.constant 0 : i32
    return %arg0, %c0_i32, %c0_i32_0 : i32, i32, i32
  }
  func.func @transform_15(%arg0: i32) -> (i32, i32, i32) {
    %c0_i32 = arith.constant 0 : i32
    %c0_i32_0 = arith.constant 0 : i32
    %c0_i32_1 = arith.constant 0 : i32
    return %arg0, %c0_i32, %c0_i32_0 : i32, i32, i32
  }
  func.func @transform_16(%arg0: i32) -> (i32, i32, i32) {
    %c0_i32 = arith.constant 0 : i32
    %c0_i32_0 = arith.constant 0 : i32
    %c0_i32_1 = arith.constant 0 : i32
    return %arg0, %c0_i32, %c0_i32_0 : i32, i32, i32
  }
  func.func @transform_17(%arg0: i32) -> (i32, i32, i32) {
    %c0_i32 = arith.constant 0 : i32
    %c0_i32_0 = arith.constant 0 : i32
    %c0_i32_1 = arith.constant 0 : i32
    return %arg0, %c0_i32, %c0_i32_0 : i32, i32, i32
  }
  func.func @transform_18(%arg0: i32) -> (i32, i32, i32) {
    %c0_i32 = arith.constant 0 : i32
    %c0_i32_0 = arith.constant 0 : i32
    %c0_i32_1 = arith.constant 0 : i32
    return %arg0, %c0_i32, %c0_i32_0 : i32, i32, i32
  }
  func.func @transform_19(%arg0: i32) -> (i32, i32) {
    %c0_i32 = arith.constant 0 : i32
    %c0_i32_0 = arith.constant 0 : i32
    %c0_i32_1 = arith.constant 0 : i32
    return %c0_i32, %c0_i32_0 : i32, i32
  }
  func.func @transform_20(%arg0: i32) -> (i32, i32) {
    %c0_i32 = arith.constant 0 : i32
    %c0_i32_0 = arith.constant 0 : i32
    %c0_i32_1 = arith.constant 0 : i32
    return %c0_i32, %c0_i32_0 : i32, i32
  }
  func.func @transform_21(%arg0: i32) -> (i32, i32) {
    %c0_i32 = arith.constant 0 : i32
    %c0_i32_0 = arith.constant 0 : i32
    %c0_i32_1 = arith.constant 0 : i32
    return %c0_i32, %c0_i32_0 : i32, i32
  }
}

</mosaic_0001>

<bundles_post_ra>
// kernel: st_model_forward.1
= control target key start
LH: loop header
LB: loop body
LE: loop exit
PB: predicated region body
PF: predicated region fallthrough
CT: control target
= control target key end

     0   :  { %s11319_s0 = inlined_call_operand.vmem [shape: f32[40,128], index: 0, kind: input, shape index: {}]   ;;  %s11320_s1 = inlined_call_operand.vmem [shape: f32[40,128], index: 1, kind: input, shape index: {}]   ;;  %s11321_s2 = inlined_call_operand.hbm [shape: f32[40,128], index: 2, kind: input, shape index: {}]   ;;  %s11322_s3 = inlined_call_operand.hbm [shape: f32[40,128], index: 3, kind: input, shape index: {}]   ;;  %s11323_s4 = inlined_call_operand.hbm [shape: f32[40,128], index: 4, kind: input, shape index: {}]   ;;  %s11324_s5 = inlined_call_operand.hbm [shape: f32[40,40], index: 5, kind: input, shape index: {}]   ;;  %s11325_s6 = inlined_call_operand.hbm [shape: f32[40,40], index: 6, kind: input, shape index: {}]   ;;  %s11326_s7 = inlined_call_operand.hbm [shape: f32[9,1,128], index: 7, kind: input, shape index: {}]   ;;  %s11327_s8 = inlined_call_operand.hbm [shape: f32[9,1,128], index: 8, kind: input, shape index: {}]   ;;  %s11328_s9 = inlined_call_operand.hbm [shape: bf16[3,128,384], index: 9, kind: input, shape index: {}]   ;;  %s11329_s10 = inlined_call_operand.hbm [shape: bf16[3,128,128], index: 10, kind: input, shape index: {}]   ;;  %s11330_s11 = inlined_call_operand.vmem [shape: f32[3,1,128], index: 11, kind: input, shape index: {}]   ;;  %s11331_s12 = inlined_call_operand.hbm [shape: bf16[3,128,384], index: 12, kind: input, shape index: {}]   ;;  %s11332_s13 = inlined_call_operand.hbm [shape: bf16[3,128,128], index: 13, kind: input, shape index: {}]   ;;  %s11333_s14 = inlined_call_operand.hbm [shape: f32[3,1,128], index: 14, kind: input, shape index: {}]   ;;  %s11334_s15 = inlined_call_operand.vmem [shape: bf16[3,128,512], index: 15, kind: input, shape index: {}]   ;;  %s11335_s16 = inlined_call_operand.hbm [shape: f32[3,1,512], index: 16, kind: input, shape index: {}]   ;;  %s11336_s17 = inlined_call_operand.hbm [shape: bf16[3,512,128], index: 17, kind: input, shape index: {}]   ;;  %s11337_s18 = inlined_call_operand.hbm [shape: f32[3,1,128], index: 18, kind: input, shape index: {}]   ;;  %s11338_s19 = inlined_call_operand.vmem [shape: bf16[128,128], index: 19, kind: input, shape index: {}]   ;;  %s11339_s20 = inlined_call_operand.vmem [shape: f32[1,128], index: 20, kind: input, shape index: {}]   ;;  %s11340_s21 = inlined_call_operand.vmem [shape: f32[40,128], index: 21, kind: output, shape index: {}]  }
   0x1   :  { %11399 = sst [smem:[#allocation50_spill]] %s11319_s0 }
   0x2   :  { %11400 = sst [smem:[#allocation51_spill]] %s11320_s1 }
   0x3   :  { %11401 = sst [smem:[#allocation52_spill]] %s11321_s2 }
   0x4   :  { %11402 = sst [smem:[#allocation53_spill]] %s11322_s3 }
   0x5   :  { %11403 = sst [smem:[#allocation54_spill]] %s11323_s4 }
   0x6   :  { %11404 = sst [smem:[#allocation55_spill]] %s11324_s5 }
   0x7   :  { %11405 = sst [smem:[#allocation56_spill]] %s11325_s6 }
   0x8   :  { %11406 = sst [smem:[#allocation57_spill]] %s11326_s7 }
   0x9   :  { %11407 = sst [smem:[#allocation58_spill]] %s11327_s8 }
   0xa   :  { %11408 = sst [smem:[#allocation59_spill]] %s11328_s9 }
   0xb   :  { %11409 = sst [smem:[#allocation60_spill]] %s11329_s10 }
   0xc   :  { %11410 = sst [smem:[#allocation61_spill]] %s11330_s11 }
   0xd   :  { %11411 = sst [smem:[#allocation62_spill]] %s11331_s12 }
   0xe   :  { %11412 = sst [smem:[#allocation63_spill]] %s11332_s13 }
   0xf   :  { %11413 = sst [smem:[#allocation64_spill]] %s11333_s14 }
  0x10   :  { %11414 = sst [smem:[#allocation65_spill]] %s11334_s15 }
  0x11   :  { %11415 = sst [smem:[#allocation66_spill]] %s11335_s16 }
  0x12   :  { %11416 = sst [smem:[#allocation67_spill]] %s11336_s17 }
  0x13   :  { %11417 = sst [smem:[#allocation68_spill]] %s11337_s18 }
  0x14   :  { %11418 = sst [smem:[#allocation69_spill]] %s11338_s19 }
  0x15   :  { %11419 = sst [smem:[#allocation70_spill]] %s11339_s20 }
  0x16   :  { %11420 = sst [smem:[#allocation71_spill]] %s11340_s21 }
  0x17   :  { %26 = vsyncpa [#allocation4], 0 }
  0x18   :  { %27 = vsyncpa [#allocation6], 0 }
  0x19   :  { %28 = vsyncpa [#allocation9], 0 }
  0x1a   :  { %29 = vsyncpa [#allocation12], 0 }
  0x1b   :  { %31 = vsyncpa [#allocation12 + $0x1], 0 }
  0x1c   :  { %32 = vsyncpa [#allocation15], 0 }
  0x1d   :  { %34 = vsyncpa [#allocation15 + $0x1], 0 }
  0x1e   :  { %35 = vsyncpa [#allocation18], 0 }
  0x1f   :  { %37 = vsyncpa [#allocation18 + $0x1], 0 }
  0x20   :  { %38 = vsyncpa [#allocation21], 0 }
  0x21   :  { %40 = vsyncpa [#allocation21 + $0x1], 0 }
  0x22   :  { %41 = vsyncpa [#allocation24], 0 }
  0x23   :  { %43 = vsyncpa [#allocation24 + $0x1], 0  ;;  %s8682_s2 = smov 0   ;;  %s8684_s25 = smov 0  }
  0x24   :  { %s8686_s26 = smov 0   ;;  %s8688_s27 = smov 0  }
  0x25 LB: > { %11421 = sst [smem:[#allocation34_spill]] %s8529_s25  ;;  %s8701_s3 = sadd.s32 4294967295, %s8537_s27   ;;  %s8537_s27 = sphi %s8688_s27, %s11517_s27   ;;  %s8533_s26 = sphi %s8686_s26, %s11521_s26   ;;  %s8529_s25 = sphi %s8684_s25, %s11520_s25   ;;  %s8525_s2 = sphi %s8682_s2, %s11518_s2  }
  0x26   : > { %11422 = sst [smem:[#allocation35_spill]] %s8701_s3  ;;  %s8704_s28 = sadd.s32 1, %s8537_s27  }
  0x27   : > { %11423 = sst [smem:[#allocation36_spill]] %s8704_s28  ;;  %s200_s29 = ssub.s32 %s8537_s27, %s8704_s28 }
  0x28   : > { %s203_s0 = sadd.s32 1, %s8533_s26  ;;  %p201_p0 = scmp.eq.s32.totalorder %s200_s29, 0 }
  0x29   : > { %p210_p1 = scmp.ne.s32.totalorder %s8533_s26, %s8529_s25  ;;  %p211_p2 = scmp.eq.s32.totalorder %s8537_s27, 0 }
  0x2a   : > { %p216_p3 = scmp.ne.s32.totalorder %s8529_s25, %s8525_s2  ;;  %p11351_p5 = scmp.eq.s32.totalorder %s8701_s3, 0 }
  0x2b   : > { %s8714_s4 = scalar_select %p201_p0, %s8533_s26, %s203_s0  }
  0x2c   : > { %p8716_p4 = por %p211_p2, %p210_p1  ;;  %p6282_p6 = scmp.ge.s32.totalorder %s8537_s27, 1 }
  0x2d   : > { %11424 = sst [smem:[#allocation37_spill]] %s8714_s4  ;;  %p576_p7 = scmp.lt.s32.totalorder %s8537_s27, 4 }
  0x2e   : > { %p8725_p8 = por %p11351_p5, %p216_p3  ;;  %s8539_s23 = smov [#allocation5]  }
  0x2f   : > { %p8730_p10 = pnand %p6282_p6, %p576_p7  ;;  %s607_s1 = sshll.u32 %s8539_s23, 4  ;;  %s608_s1 = int_to_ptr.vmem [resolvable:$true] %s607_s1 }
  0x30   : > { %s11426_s5 = scalar_select %p8725_p8, 1, 0 }
  0x31   : > { %s11428_s22 = scalar_select %p8730_p10, 1, 0 }
  0x32   : > { %11427 = sst [smem:[#allocation38_spill]] %s11426_s5  ;;  %p7435_p11 = pneg %p8730_p10 }
  0x33   : > { %11429 = sst [smem:[#allocation39_spill]] %s11428_s22  ;;  %p7487_p13 = scmp.lt.s32.totalorder %s8537_s27, 3 }
  0x34   : > { %p8738_p12 = pnand %p7435_p11, %p11351_p5  ;;  %s8744_s2 = sand.u32 1, %s8537_s27  }
  0x35   : > { %p8748_p0 = pnand %p7487_p13, %p8716_p4  ;;  %s11432_s28 = sld [smem:[#allocation53_spill]] }
  0x36   : > { %s11430_s24 = scalar_select %p8738_p12, 1, 0 }
  0x37   : > { %s11431_s29 = scalar_select %p8748_p0, 1, 0 }
  0x38   : > { %p8760_p2 = pneg %p8738_p12 }
  0x3a   : > { %s11433_s19 = scalar_select %p8760_p2, 1, 0 }
  0x3b   : > { %s8035_s21 = scalar_lea.hbm %s11432_s28, 640 }
  0x3c   : > { %p8036_p1 = scmp.ne.s32.totalorder %s11432_s28, %s8035_s21  ;;  %p8042_p6 = scmp.lt.u32.totalorder %s8035_s21, %s11432_s28 }
  0x3e   : > { %p8038_p3 = pnand %p8760_p2, %p8036_p1 }
  0x40   : > { %p8039_p4 = pneg %p8038_p3 }
  0x42   : > { %p8044_p7 = pnand %p8042_p6, %p8039_p4 }
  0x44   : > { %8047 = shalt.err (!%p8044_p7)
}
  0x45   : > { %s8048_s4 = scalar_lea.vmem %s608_s1, 640  ;;  %p8056_p5 = scmp.lt.s32.totalorder %s608_s1, %s608_s1 }
  0x46   : > { %p8049_p11 = scmp.ne.s32.totalorder %s608_s1, %s8048_s4  ;;  %p8057_p8 = scmp.lt.s32.totalorder %s8048_s4, %s8048_s4 }
  0x48   : > { %p8051_p13 = pnand %p8049_p11, %p8760_p2  ;;  %p8058_p10 = por %p8057_p8, %p8056_p5 }
  0x4a   : > { %p8052_p9 = pneg %p8051_p13 }
  0x4c   : > { %p8059_p0 = pnand %p8058_p10, %p8052_p9 }
  0x4e   : > { %8062 = shalt.err (!%p8059_p0)
}
  0x4f   : > { %s11363_s20 = smov 128   ;;  %s11367_s0 = smov 8  }
  0x50   : > { %7441 = dma.hbm_to_vmem [thread:$0]  (!%p8738_p12), %s11432_s28, 640, %s608_s1, [#allocation6], %s11363_s20, %s11363_s20, %s11367_s0  }
  0x51   : > { %s8542_s23 = smov [#allocation8]   ;;  %s11434_s5 = sld [smem:[#allocation55_spill]] }
  0x52   : > { %s633_s30 = sshll.u32 %s8542_s23, 4  ;;  %s634_s30 = int_to_ptr.vmem [resolvable:$true] %s633_s30 }
  0x57   : > { %s8063_s25 = scalar_lea.hbm %s11434_s5, 640 }
  0x58   : > { %p8064_p5 = scmp.ne.s32.totalorder %s11434_s5, %s8063_s25  ;;  %p8070_p10 = scmp.lt.u32.totalorder %s8063_s25, %s11434_s5 }
  0x5a   : > { %p8066_p8 = pnand %p8064_p5, %p8760_p2 }
  0x5c   : > { %p8067_p9 = pneg %p8066_p8 }
  0x5e   : > { %p8072_p0 = pnand %p8070_p10, %p8067_p9 }
  0x60   : > { %8075 = shalt.err (!%p8072_p0)
}
  0x61   : > { %s8076_s1 = scalar_lea.vmem %s634_s30, 640  ;;  %p8084_p6 = scmp.lt.s32.totalorder %s634_s30, %s634_s30 }
  0x62   : > { %p8077_p1 = scmp.ne.s32.totalorder %s634_s30, %s8076_s1  ;;  %p8085_p7 = scmp.lt.s32.totalorder %s8076_s1, %s8076_s1 }
  0x64   : > { %p8079_p3 = pnand %p8077_p1, %p8760_p2  ;;  %p8086_p11 = por %p8085_p7, %p8084_p6 }
  0x66   : > { %p8080_p4 = pneg %p8079_p3 }
  0x68   : > { %p8087_p13 = pnand %p8086_p11, %p8080_p4 }
  0x6a   : > { %8090 = shalt.err (!%p8087_p13)
}
  0x6b   : > { %7447 = dma.hbm_to_vmem [thread:$0]  (!%p8738_p12), %s11434_s5, 640, %s634_s30, [#allocation9], %s11363_s20, %s11363_s20, %s11367_s0  }
  0x6c   : > { %s8801_s18 = sand.u32 1, %s8533_s26   ;;  %s11366_s25 = smul.u32 48, %s8537_s27 }
  0x6d   : > { %s11365_s3 = smul.u32 3, %s8801_s18  ;;  %s11435_s7 = sld [smem:[#allocation57_spill]] }
  0x6e   : > { %s7389_s4 = smul.u32 192, %s8801_s18  ;;  %s11374_s11 = scalar_lea.sflag [#allocation12], %s8744_s2 }
  0x6f   : > { %s670_s23 = scalar_lea.vmem [#allocation11], %s11365_s3  ;;  %s7390_s1 = smul.u32 3072, %s8537_s27 }
  0x70   : > { %s677_s30 = sshll.u32 %s670_s23, 4  ;;  %p11436_p8 = scmp.ne.s32.totalorder %s11431_s29, 0  ;;  %s8815_s30 = int_to_ptr.vmem [resolvable:$true] %s677_s30 }
  0x72   : > { %p8823_p9 = pneg %p11436_p8 }
  0x73   : > { %s8810_s21 = scalar_lea.hbm %s11435_s7, %s11366_s25  ;;  %s8096_s23 = scalar_lea.hbm %s11435_s7, 144 }
  0x74   : > { %s8091_s16 = scalar_lea.hbm %s8810_s21, 48  ;;  %p8097_p1 = scmp.lt.u32.totalorder %s8810_s21, %s11435_s7 }
  0x75   : > { %p8092_p5 = scmp.ne.s32.totalorder %s8810_s21, %s8091_s16  ;;  %p8098_p3 = scmp.lt.u32.totalorder %s8096_s23, %s8091_s16 }
  0x76   : > { %s11437_s20 = scalar_select %p8823_p9, 1, 0 }
  0x77   : > { %p8094_p10 = pnand %p8823_p9, %p8092_p5  ;;  %p8099_p4 = por %p8098_p3, %p8097_p1 }
  0x78   : > { %p8100_p6 = scmp.lt.u32.totalorder %s8091_s16, %s8810_s21 }
  0x79   : > { %p8095_p0 = pneg %p8094_p10 }
  0x7a   : > { %p8101_p7 = por %p8100_p6, %p8099_p4 }
  0x7c   : > { %p8102_p11 = pnand %p8101_p7, %p8095_p0 }
  0x7e   : > { %8105 = shalt.err (!%p8102_p11)
}
  0x7f   : > { %s8106_s0 = scalar_lea.vmem %s8815_s30, 48  ;;  %s8543_s22 = smov [#allocation11]  }
  0x80   : > { %p8107_p13 = scmp.ne.s32.totalorder %s8815_s30, %s8106_s0  ;;  %s8111_s15 = sshll.u32 %s8543_s22, 4  ;;  %s8112_s15 = int_to_ptr.vmem [resolvable:$false] %s8111_s15 }
  0x81   : > { %s8113_s25 = scalar_lea.vmem %s8112_s15, 96  ;;  %p8114_p12 = scmp.lt.s32.totalorder %s8815_s30, %s8112_s15 }
  0x82   : > { %p8109_p5 = pnand %p8107_p13, %p8823_p9  ;;  %p8115_p2 = scmp.lt.s32.totalorder %s8113_s25, %s8106_s0 }
  0x84   : > { %p8110_p10 = pneg %p8109_p5  ;;  %p8116_p1 = por %p8115_p2, %p8114_p12 }
  0x86   : > { %p8117_p3 = pnand %p8116_p1, %p8110_p10 }
  0x88   : > { %8120 = shalt.err (!%p8117_p3)
}
  0x89   : > { %s11375_s3 = smov 16   ;;  %s11376_s16 = smov 1  }
  0x8a   : > { %7454 = dma.hbm_to_vmem [thread:$0]  (!%p11436_p8), %s8810_s21, 48, %s8815_s30, %s11374_s11, %s11375_s3, %s11375_s3, %s11376_s16  }
  0x8b   : > { %s11438_s9 = sld [smem:[#allocation59_spill]]  ;;  %s712_s15 = scalar_lea.vmem [#allocation14], %s7389_s4 }
  0x8c   : > { %s719_s25 = sshll.u32 %s712_s15, 4  ;;  %s11381_s5 = scalar_lea.sflag [#allocation15], %s8744_s2  ;;  %s8860_s25 = int_to_ptr.vmem [resolvable:$true] %s719_s25 }
  0x91   : > { %s8856_s22 = scalar_lea.hbm %s11438_s9, %s7390_s1  ;;  %s8126_s0 = scalar_lea.hbm %s11438_s9, 9216 }
  0x92   : > { %s8121_s7 = scalar_lea.hbm %s8856_s22, 3072  ;;  %p8127_p4 = scmp.lt.u32.totalorder %s8856_s22, %s11438_s9 }
  0x93   : > { %p8122_p12 = scmp.ne.s32.totalorder %s8856_s22, %s8121_s7  ;;  %p8128_p6 = scmp.lt.u32.totalorder %s8126_s0, %s8121_s7 }
  0x94   : > { %p8130_p11 = scmp.lt.u32.totalorder %s8121_s7, %s8856_s22 }
  0x95   : > { %p8124_p2 = pnand %p8122_p12, %p8823_p9  ;;  %p8129_p7 = por %p8128_p6, %p8127_p4 }
  0x97   : > { %p8125_p0 = pneg %p8124_p2  ;;  %p8131_p13 = por %p8130_p11, %p8129_p7 }
  0x99   : > { %p8132_p5 = pnand %p8131_p13, %p8125_p0 }
  0x9b   : > { %8135 = shalt.err (!%p8132_p5)
}
  0x9c   : > { %s8136_s15 = scalar_lea.vmem %s8860_s25, 3072  ;;  %s8546_s21 = smov [#allocation14]  }
  0x9d   : > { %p8137_p10 = scmp.ne.s32.totalorder %s8860_s25, %s8136_s15  ;;  %s8141_s30 = sshll.u32 %s8546_s21, 4  ;;  %s8142_s30 = int_to_ptr.vmem [resolvable:$false] %s8141_s30 }
  0x9e   : > { %s8143_s11 = scalar_lea.vmem %s8142_s30, 6144  ;;  %p8144_p12 = scmp.lt.s32.totalorder %s8860_s25, %s8142_s30 }
  0x9f   : > { %p8139_p1 = pnand %p8137_p10, %p8823_p9  ;;  %p8145_p2 = scmp.lt.s32.totalorder %s8143_s11, %s8136_s15 }
  0xa1   : > { %p8140_p3 = pneg %p8139_p1  ;;  %p8146_p4 = por %p8145_p2, %p8144_p12 }
  0xa3   : > { %p8147_p6 = pnand %p8146_p4, %p8140_p3 }
  0xa5   : > { %8150 = shalt.err (!%p8147_p6)
}
  0xa6   : > { %s8547_s7 = smov 192   ;;  %s8548_s0 = smov 12  }
  0xa7   : > { %7460 = dma.hbm_to_vmem [thread:$0]  (!%p11436_p8), %s8856_s22, 3072, %s8860_s25, %s11381_s5, %s8547_s7, %s8547_s7, %s8548_s0  }
  0xa8   : > { %s11439_s12 = sld [smem:[#allocation62_spill]]  ;;  %s760_s30 = scalar_lea.vmem [#allocation17], %s7389_s4 }
  0xa9   : > { %s767_s11 = sshll.u32 %s760_s30, 4  ;;  %s11380_s3 = scalar_lea.sflag [#allocation18], %s8744_s2  ;;  %s8898_s11 = int_to_ptr.vmem [resolvable:$true] %s767_s11 }
  0xae   : > { %s8894_s21 = scalar_lea.hbm %s11439_s12, %s7390_s1  ;;  %s8156_s1 = scalar_lea.hbm %s11439_s12, 9216 }
  0xaf   : > { %s8151_s16 = scalar_lea.hbm %s8894_s21, 3072  ;;  %p8157_p13 = scmp.lt.u32.totalorder %s8894_s21, %s11439_s12 }
  0xb0   : > { %p8152_p0 = scmp.ne.s32.totalorder %s8894_s21, %s8151_s16  ;;  %p8158_p5 = scmp.lt.u32.totalorder %s8156_s1, %s8151_s16 }
  0xb1   : > { %p8160_p1 = scmp.lt.u32.totalorder %s8151_s16, %s8894_s21 }
  0xb2   : > { %p8154_p7 = pnand %p8152_p0, %p8823_p9  ;;  %p8159_p10 = por %p8158_p5, %p8157_p13 }
  0xb4   : > { %p8155_p11 = pneg %p8154_p7  ;;  %p8161_p3 = por %p8160_p1, %p8159_p10 }
  0xb6   : > { %p8162_p12 = pnand %p8161_p3, %p8155_p11 }
  0xb8   : > { %8165 = shalt.err (!%p8162_p12)
}
  0xb9   : > { %s8166_s4 = scalar_lea.vmem %s8898_s11, 3072  ;;  %s8549_s30 = smov [#allocation17]  }
  0xba   : > { %p8167_p2 = scmp.ne.s32.totalorder %s8898_s11, %s8166_s4  ;;  %s8171_s22 = sshll.u32 %s8549_s30, 4  ;;  %s8172_s22 = int_to_ptr.vmem [resolvable:$false] %s8171_s22 }
  0xbb   : > { %s8173_s25 = scalar_lea.vmem %s8172_s22, 6144  ;;  %p8174_p0 = scmp.lt.s32.totalorder %s8898_s11, %s8172_s22 }
  0xbc   : > { %p8169_p4 = pnand %p8167_p2, %p8823_p9  ;;  %p8175_p7 = scmp.lt.s32.totalorder %s8173_s25, %s8166_s4 }
  0xbe   : > { %p8170_p6 = pneg %p8169_p4  ;;  %p8176_p13 = por %p8175_p7, %p8174_p0 }
  0xc0   : > { %p8177_p5 = pnand %p8176_p13, %p8170_p6 }
  0xc2   : > { %8180 = shalt.err (!%p8177_p5)
}
  0xc3   : > { %7466 = dma.hbm_to_vmem [thread:$0]  (!%p11436_p8), %s8894_s21, 3072, %s8898_s11, %s11380_s3, %s8547_s7, %s8547_s7, %s8548_s0  }
  0xc4   : > { %s11377_s16 = sshll.u32 %s8537_s27, 4  ;;  %s11440_s14 = sld [smem:[#allocation64_spill]] }
  0xc5   : > { %s801_s4 = scalar_lea.vmem [#allocation20], %s8801_s18  ;;  %s11379_s22 = scalar_lea.sflag [#allocation21], %s8744_s2 }
  0xc6   : > { %s808_s30 = sshll.u32 %s801_s4, 4  ;;  %s809_s30 = int_to_ptr.vmem [resolvable:$true] %s808_s30 }
  0xca   : > { %s8933_s15 = scalar_lea.hbm %s11440_s14, %s11377_s16  ;;  %s8186_s21 = scalar_lea.hbm %s11440_s14, 48 }
  0xcb   : > { %s8181_s25 = scalar_lea.hbm %s8933_s15, 16  ;;  %p8187_p3 = scmp.lt.u32.totalorder %s8933_s15, %s11440_s14 }
  0xcc   : > { %p8182_p11 = scmp.ne.s32.totalorder %s8933_s15, %s8181_s25  ;;  %p8188_p12 = scmp.lt.u32.totalorder %s8186_s21, %s8181_s25 }
  0xcd   : > { %p8190_p4 = scmp.lt.u32.totalorder %s8181_s25, %s8933_s15 }
  0xce   : > { %p8184_p10 = pnand %p8182_p11, %p8823_p9  ;;  %p8189_p2 = por %p8188_p12, %p8187_p3 }
  0xd0   : > { %p8185_p1 = pneg %p8184_p10  ;;  %p8191_p6 = por %p8190_p4, %p8189_p2 }
  0xd2   : > { %p8192_p0 = pnand %p8191_p6, %p8185_p1 }
  0xd4   : > { %8195 = shalt.err (!%p8192_p0)
}
  0xd5   : > { %s8196_s23 = scalar_lea.vmem %s809_s30, 16  ;;  %s8550_s4 = smov [#allocation20]  }
  0xd6   : > { %p8197_p7 = scmp.ne.s32.totalorder %s809_s30, %s8196_s23  ;;  %s8201_s16 = sshll.u32 %s8550_s4, 4  ;;  %s8202_s16 = int_to_ptr.vmem [resolvable:$false] %s8201_s16 }
  0xd7   : > { %s8203_s7 = scalar_lea.vmem %s8202_s16, 32  ;;  %p8204_p11 = scmp.lt.s32.totalorder %s809_s30, %s8202_s16 }
  0xd8   : > { %p8199_p13 = pnand %p8197_p7, %p8823_p9  ;;  %p8205_p10 = scmp.lt.s32.totalorder %s8203_s7, %s8196_s23 }
  0xda   : > { %p8200_p5 = pneg %p8199_p13  ;;  %p8206_p8 = por %p8205_p10, %p8204_p11 }
  0xdc   : > { %p8207_p3 = pnand %p8206_p8, %p8200_p5 }
  0xde   : > { %8210 = shalt.err (!%p8207_p3)
}
  0xdf   : > { %p11441_p12 = scmp.ne.s32.totalorder %s11431_s29, 0  ;;  %s6303_s25 = sshll.u32 %s8801_s18, 8 }
  0xe0   : > { %s6566_s0 = sshll.u32 %s8537_s27, 12  ;;  %s11442_s17 = sld [smem:[#allocation67_spill]] }
  0xe1   : > { %7472 = dma.hbm_to_vmem [thread:$0]  (!%p11441_p12), %s8933_s15, 16, %s809_s30, %s11379_s22  }
  0xe2   : > { %s846_s1 = scalar_lea.vmem [#allocation23], %s6303_s25  ;;  %s11383_s4 = scalar_lea.sflag [#allocation24], %s8744_s2 }
  0xe3   : > { %s853_s23 = sshll.u32 %s846_s1, 4  ;;  %s8963_s23 = int_to_ptr.vmem [resolvable:$true] %s853_s23 }
  0xe6   : > { %s8961_s16 = scalar_lea.hbm %s11442_s17, %s6566_s0  ;;  %s8216_s21 = scalar_lea.hbm %s11442_s17, 12288 }
  0xe7   : > { %s8211_s7 = scalar_lea.hbm %s8961_s16, 4096  ;;  %p8217_p4 = scmp.lt.u32.totalorder %s8961_s16, %s11442_s17 }
  0xe8   : > { %p8212_p8 = scmp.ne.s32.totalorder %s8961_s16, %s8211_s7  ;;  %p8218_p6 = scmp.lt.u32.totalorder %s8216_s21, %s8211_s7 }
  0xe9   : > { %p8220_p7 = scmp.lt.u32.totalorder %s8211_s7, %s8961_s16 }
  0xea   : > { %p8214_p1 = pnand %p8212_p8, %p8823_p9  ;;  %p8219_p0 = por %p8218_p6, %p8217_p4 }
  0xec   : > { %p8215_p2 = pneg %p8214_p1  ;;  %p8221_p13 = por %p8220_p7, %p8219_p0 }
  0xee   : > { %p8222_p5 = pnand %p8221_p13, %p8215_p2 }
  0xf0   : > { %8225 = shalt.err (!%p8222_p5)
}
  0xf1   : > { %s8226_s25 = scalar_lea.vmem %s8963_s23, 4096  ;;  %s8551_s1 = smov [#allocation23]  }
  0xf2   : > { %p8227_p11 = scmp.ne.s32.totalorder %s8963_s23, %s8226_s25  ;;  %s8231_s15 = sshll.u32 %s8551_s1, 4  ;;  %s8232_s15 = int_to_ptr.vmem [resolvable:$false] %s8231_s15 }
  0xf3   : > { %s8233_s30 = scalar_lea.vmem %s8232_s15, 8192  ;;  %p8234_p8 = scmp.lt.s32.totalorder %s8963_s23, %s8232_s15 }
  0xf4   : > { %p8229_p10 = pnand %p8227_p11, %p8823_p9  ;;  %p8235_p1 = scmp.lt.s32.totalorder %s8233_s30, %s8226_s25 }
  0xf6   : > { %p8230_p3 = pneg %p8229_p10  ;;  %p8236_p4 = por %p8235_p1, %p8234_p8 }
  0xf8   : > { %p8237_p6 = pnand %p8236_p4, %p8230_p3 }
  0xfa   : > { %8240 = shalt.err (!%p8237_p6)
}
  0xfb   : > { %s11386_s7 = smov 64   ;;  %s11388_s21 = smov 4  }
  0xfc   : > { %7478 = dma.hbm_to_vmem [thread:$0]  (!%p11441_p12), %s8961_s16, 4096, %s8963_s23, %s11383_s4, %s11386_s7, %s11386_s7, %s11388_s21  }
  0xfd   : > { %s8554_s0 = smov [#allocation3]   ;;  %s8555_s25 = smov [#allocation7]  }
  0xfe   : > { %s594_s11 = sshll.u32 %s8554_s0, 4  ;;  %s620_s1 = sshll.u32 %s8555_s25, 4  ;;  %s595_s11 = int_to_ptr.vmem [resolvable:$true] %s594_s11  ;;  %s621_s1 = int_to_ptr.vmem [resolvable:$true] %s620_s1 }
  0xff   : > { %s11443_s22 = sld [smem:[#allocation52_spill]]  ;;  %p11444_p0 = scmp.ne.s32.totalorder %s11433_s19, 0 }
 0x105   : > { %s8241_s3 = scalar_lea.hbm %s11443_s22, 640 }
 0x106   : > { %p8242_p2 = scmp.ne.s32.totalorder %s11443_s22, %s8241_s3  ;;  %p8248_p5 = scmp.lt.u32.totalorder %s8241_s3, %s11443_s22 }
 0x108   : > { %p8244_p7 = pnand %p8242_p2, %p11444_p0 }
 0x10a   : > { %p8245_p13 = pneg %p8244_p7 }
 0x10c   : > { %p8250_p11 = pnand %p8248_p5, %p8245_p13 }
 0x10e   : > { %8253 = shalt.err (!%p8250_p11)
}
 0x10f   : > { %s8254_s16 = scalar_lea.vmem %s595_s11, 640  ;;  %p8262_p1 = scmp.lt.s32.totalorder %s595_s11, %s595_s11 }
 0x110   : > { %p8255_p10 = scmp.ne.s32.totalorder %s595_s11, %s8254_s16  ;;  %p8263_p4 = scmp.lt.s32.totalorder %s8254_s16, %s8254_s16 }
 0x112   : > { %p8257_p3 = pnand %p8255_p10, %p11444_p0  ;;  %p8264_p6 = por %p8263_p4, %p8262_p1 }
 0x114   : > { %p8258_p8 = pneg %p8257_p3 }
 0x116   : > { %p8265_p12 = pnand %p8264_p6, %p8258_p8 }
 0x118   : > { %8268 = shalt.err (!%p8265_p12)
}
 0x119   : > { %p11445_p2 = scmp.ne.s32.totalorder %s11430_s24, 0  ;;  %s11446_s9 = smov 8  }
 0x11a   : > { %s11447_s5 = smov 128   ;;  %s11448_s0 = sld [smem:[#allocation54_spill]] }
 0x11b   : > { %7438 = dma.hbm_to_vmem [thread:$0]  (!%p11445_p2), %s11443_s22, 640, %s595_s11, [#allocation4], %s11447_s5, %s11447_s5, %s11446_s9  }
 0x120   : > { %s8269_s25 = scalar_lea.hbm %s11448_s0, 640 }
 0x121   : > { %p8270_p7 = scmp.ne.s32.totalorder %s11448_s0, %s8269_s25  ;;  %p8276_p5 = scmp.lt.u32.totalorder %s8269_s25, %s11448_s0 }
 0x123   : > { %p8272_p12 = pnand %p8270_p7, %p11444_p0 }
 0x125   : > { %p8273_p13 = pneg %p8272_p12 }
 0x127   : > { %p8278_p11 = pnand %p8276_p5, %p8273_p13 }
 0x129   : > { %8281 = shalt.err (!%p8278_p11)
}
 0x12a   : > { %s8282_s12 = scalar_lea.vmem %s621_s1, 640  ;;  %p8290_p1 = scmp.lt.s32.totalorder %s621_s1, %s621_s1 }
 0x12b   : > { %p8283_p10 = scmp.ne.s32.totalorder %s621_s1, %s8282_s12  ;;  %p8291_p4 = scmp.lt.s32.totalorder %s8282_s12, %s8282_s12 }
 0x12d   : > { %p8285_p3 = pnand %p8283_p10, %p11444_p0  ;;  %p8292_p6 = por %p8291_p4, %p8290_p1 }
 0x12f   : > { %p8286_p8 = pneg %p8285_p3 }
 0x131   : > { %p8293_p9 = pnand %p8292_p6, %p8286_p8 }
 0x133   : > { %8296 = shalt.err (!%p8293_p9)
}
 0x134   : > { %7444 = dma.hbm_to_vmem [thread:$0]  (!%p11445_p2), %s11448_s0, 640, %s621_s1, [#allocation6], %s11447_s5, %s11447_s5, %s11446_s9  }
 0x135   : > { %s8556_s14 = smov [#allocation10]   ;;  %s11449_s23 = smul.u32 48, %s8537_s27 }
 0x136   : > { %s646_s3 = sshll.u32 %s8556_s14, 4  ;;  %s11450_s8 = sld [smem:[#allocation58_spill]]  ;;  %s647_s3 = int_to_ptr.vmem [resolvable:$true] %s646_s3 }
 0x137   : > { %s11451_s6 = sld [smem:[#allocation56_spill]] }
 0x13c   : > { %s9039_s30 = scalar_lea.hbm %s11450_s8, %s11449_s23 }
 0x13d   : > { %s8297_s7 = scalar_lea.hbm %s11451_s6, 640 }
 0x13e   : > { %p8298_p9 = scmp.ne.s32.totalorder %s11451_s6, %s8297_s7  ;;  %p8304_p13 = scmp.lt.u32.totalorder %s8297_s7, %s11451_s6 }
 0x140   : > { %p8300_p7 = pnand %p8298_p9, %p11444_p0 }
 0x142   : > { %p8301_p12 = pneg %p8300_p7 }
 0x144   : > { %p8306_p5 = pnand %p8304_p13, %p8301_p12 }
 0x146   : > { %8309 = shalt.err (!%p8306_p5)
}
 0x147   : > { %s8310_s11 = scalar_lea.vmem %s647_s3, 640  ;;  %p8318_p8 = scmp.lt.s32.totalorder %s647_s3, %s647_s3 }
 0x148   : > { %p8311_p11 = scmp.ne.s32.totalorder %s647_s3, %s8310_s11  ;;  %p8319_p1 = scmp.lt.s32.totalorder %s8310_s11, %s8310_s11 }
 0x14a   : > { %p8313_p10 = pnand %p8311_p11, %p11444_p0  ;;  %p8320_p4 = por %p8319_p1, %p8318_p8 }
 0x14c   : > { %p8314_p3 = pneg %p8313_p10 }
 0x14e   : > { %p8321_p6 = pnand %p8320_p4, %p8314_p3 }
 0x150   : > { %8324 = shalt.err (!%p8321_p6)
}
 0x151   : > { %7450 = dma.hbm_to_vmem [thread:$0]  (!%p11445_p2), %s11451_s6, 640, %s647_s3, [#allocation9], %s11447_s5, %s11447_s5, %s11446_s9  }
 0x152   : > { %s11452_s19 = smul.u32 3, %s8801_s18  ;;  %s6292_s23 = sshll.u32 %s8801_s18, 6 }
 0x153   : > { %s8325_s24 = scalar_lea.hbm %s9039_s30, 48  ;;  %p11453_p9 = scmp.ne.s32.totalorder %s11437_s20, 0 }
 0x154   : > { %s691_s21 = scalar_lea.vmem [#allocation13], %s11452_s19  ;;  %p8326_p0 = scmp.ne.s32.totalorder %s9039_s30, %s8325_s24 }
 0x155   : > { %s698_s14 = sshll.u32 %s691_s21, 4  ;;  %s8330_s16 = scalar_lea.hbm %s11450_s8, 144  ;;  %s9065_s14 = int_to_ptr.vmem [resolvable:$true] %s698_s14 }
 0x156   : > { %p8328_p7 = pnand %p8326_p0, %p11453_p9  ;;  %p8331_p13 = scmp.lt.u32.totalorder %s9039_s30, %s11450_s8 }
 0x157   : > { %p8332_p2 = scmp.lt.u32.totalorder %s8330_s16, %s8325_s24  ;;  %p8334_p11 = scmp.lt.u32.totalorder %s8325_s24, %s9039_s30 }
 0x158   : > { %p8329_p12 = pneg %p8328_p7 }
 0x159   : > { %p8333_p5 = por %p8332_p2, %p8331_p13 }
 0x15b   : > { %p8335_p10 = por %p8334_p11, %p8333_p5 }
 0x15d   : > { %p8336_p3 = pnand %p8335_p10, %p8329_p12 }
 0x15f   : > { %8339 = shalt.err (!%p8336_p3)
}
 0x160   : > { %s8340_s9 = scalar_lea.vmem %s9065_s14, 48  ;;  %s8557_s5 = smov [#allocation13]  }
 0x161   : > { %p8341_p8 = scmp.ne.s32.totalorder %s9065_s14, %s8340_s9  ;;  %s8345_s3 = sshll.u32 %s8557_s5, 4  ;;  %s8346_s3 = int_to_ptr.vmem [resolvable:$false] %s8345_s3 }
 0x162   : > { %s8347_s4 = scalar_lea.vmem %s8346_s3, 96  ;;  %p8348_p6 = scmp.lt.s32.totalorder %s9065_s14, %s8346_s3 }
 0x163   : > { %p8343_p1 = pnand %p8341_p8, %p11453_p9  ;;  %p8349_p0 = scmp.lt.s32.totalorder %s8347_s4, %s8340_s9 }
 0x165   : > { %p8344_p4 = pneg %p8343_p1  ;;  %p8350_p7 = por %p8349_p0, %p8348_p6 }
 0x167   : > { %p8351_p13 = pnand %p8350_p7, %p8344_p4 }
 0x169   : > { %8354 = shalt.err (!%p8351_p13)
}
 0x16a   : > { %p11454_p12 = scmp.ne.s32.totalorder %s11431_s29, 0  ;;  %s11455_s11 = smov 1  }
 0x16b   : > { %s11456_s17 = smov 16   ;;  %s11457_s7 = scalar_lea.sflag [#allocation12], %s8744_s2 }
 0x16c   : > { %7457 = dma.hbm_to_vmem [thread:$0]  (!%p11454_p12), %s9039_s30, 48, %s9065_s14, %s11457_s7, %s11456_s17, %s11456_s17, %s11455_s11  }
 0x16d   : > { %s6563_s19 = sshll.u32 %s8537_s27, 10  ;;  %s733_s21 = scalar_lea.vmem [#allocation16], %s6292_s23 }
 0x16e   : > { %s740_s24 = sshll.u32 %s733_s21, 4  ;;  %s11458_s10 = sld [smem:[#allocation60_spill]]  ;;  %s9103_s24 = int_to_ptr.vmem [resolvable:$true] %s740_s24 }
 0x174   : > { %s9101_s16 = scalar_lea.hbm %s11458_s10, %s6563_s19  ;;  %s8360_s1 = scalar_lea.hbm %s11458_s10, 3072 }
 0x175   : > { %s8355_s12 = scalar_lea.hbm %s9101_s16, 1024  ;;  %p8361_p10 = scmp.lt.u32.totalorder %s9101_s16, %s11458_s10 }
 0x176   : > { %p8356_p2 = scmp.ne.s32.totalorder %s9101_s16, %s8355_s12  ;;  %p8362_p3 = scmp.lt.u32.totalorder %s8360_s1, %s8355_s12 }
 0x177   : > { %p8364_p1 = scmp.lt.u32.totalorder %s8355_s12, %s9101_s16 }
 0x178   : > { %p8358_p5 = pnand %p8356_p2, %p11453_p9  ;;  %p8363_p8 = por %p8362_p3, %p8361_p10 }
 0x17a   : > { %p8359_p11 = pneg %p8358_p5  ;;  %p8365_p4 = por %p8364_p1, %p8363_p8 }
 0x17c   : > { %p8366_p6 = pnand %p8365_p4, %p8359_p11 }
 0x17e   : > { %8369 = shalt.err (!%p8366_p6)
}
 0x17f   : > { %s8370_s3 = scalar_lea.vmem %s9103_s24, 1024  ;;  %s8558_s4 = smov [#allocation16]  }
 0x180   : > { %p8371_p0 = scmp.ne.s32.totalorder %s9103_s24, %s8370_s3  ;;  %s8375_s11 = sshll.u32 %s8558_s4, 4  ;;  %s8376_s11 = int_to_ptr.vmem [resolvable:$false] %s8375_s11 }
 0x181   : > { %s8377_s17 = scalar_lea.vmem %s8376_s11, 2048  ;;  %p8378_p2 = scmp.lt.s32.totalorder %s9103_s24, %s8376_s11 }
 0x182   : > { %p8373_p7 = pnand %p8371_p0, %p11453_p9  ;;  %p8379_p5 = scmp.lt.s32.totalorder %s8377_s17, %s8370_s3 }
 0x184   : > { %p8374_p13 = pneg %p8373_p7  ;;  %p8380_p10 = por %p8379_p5, %p8378_p2 }
 0x186   : > { %p8381_p3 = pnand %p8380_p10, %p8374_p13 }
 0x188   : > { %8384 = shalt.err (!%p8381_p3)
}
 0x189   : > { %s11459_s7 = smov 4   ;;  %s11460_s21 = smov 64  }
 0x18a   : > { %s11461_s25 = scalar_lea.sflag [#allocation15], %s8744_s2  ;;  %s11462_s13 = sld [smem:[#allocation63_spill]] }
 0x18b   : > { %7463 = dma.hbm_to_vmem [thread:$0]  (!%p11454_p12), %s9101_s16, 1024, %s9103_s24, %s11461_s25, %s11460_s21, %s11460_s21, %s11459_s7  }
 0x18c   : > { %s781_s14 = scalar_lea.vmem [#allocation19], %s6292_s23  ;;  %s6300_s9 = sshll.u32 %s8801_s18, 2 }
 0x18d   : > { %s788_s1 = sshll.u32 %s781_s14, 4  ;;  %s9141_s1 = int_to_ptr.vmem [resolvable:$true] %s788_s1 }
 0x190   : > { %s9136_s30 = scalar_lea.hbm %s11462_s13, %s6563_s19  ;;  %s8390_s19 = scalar_lea.hbm %s11462_s13, 3072 }
 0x191   : > { %s8385_s5 = scalar_lea.hbm %s9136_s30, 1024  ;;  %p8391_p4 = scmp.lt.u32.totalorder %s9136_s30, %s11462_s13 }
 0x192   : > { %p8386_p11 = scmp.ne.s32.totalorder %s9136_s30, %s8385_s5  ;;  %p8392_p6 = scmp.lt.u32.totalorder %s8390_s19, %s8385_s5 }
 0x193   : > { %p8394_p7 = scmp.lt.u32.totalorder %s8385_s5, %s9136_s30 }
 0x194   : > { %p8388_p8 = pnand %p8386_p11, %p11453_p9  ;;  %p8393_p0 = por %p8392_p6, %p8391_p4 }
 0x196   : > { %p8389_p1 = pneg %p8388_p8  ;;  %p8395_p13 = por %p8394_p7, %p8393_p0 }
 0x198   : > { %p8396_p2 = pnand %p8395_p13, %p8389_p1 }
 0x19a   : > { %8399 = shalt.err (!%p8396_p2)
}
 0x19b   : > { %s8400_s23 = scalar_lea.vmem %s9141_s1, 1024  ;;  %s8559_s11 = smov [#allocation19]  }
 0x19c   : > { %p8401_p5 = scmp.ne.s32.totalorder %s9141_s1, %s8400_s23  ;;  %s8405_s17 = sshll.u32 %s8559_s11, 4  ;;  %s8406_s17 = int_to_ptr.vmem [resolvable:$false] %s8405_s17 }
 0x19d   : > { %s8407_s25 = scalar_lea.vmem %s8406_s17, 2048  ;;  %p8408_p11 = scmp.lt.s32.totalorder %s9141_s1, %s8406_s17 }
 0x19e   : > { %p8403_p10 = pnand %p8401_p5, %p11453_p9  ;;  %p8409_p8 = scmp.lt.s32.totalorder %s8407_s25, %s8400_s23 }
 0x1a0   : > { %p8404_p3 = pneg %p8403_p10  ;;  %p8410_p4 = por %p8409_p8, %p8408_p11 }
 0x1a2   : > { %p8411_p6 = pnand %p8410_p4, %p8404_p3 }
 0x1a4   : > { %8414 = shalt.err (!%p8411_p6)
}
 0x1a5   : > { %s11463_s15 = scalar_lea.sflag [#allocation18], %s8744_s2  ;;  %s6565_s12 = sshll.u32 %s8537_s27, 6 }
 0x1a6   : > { %7469 = dma.hbm_to_vmem [thread:$0]  (!%p11454_p12), %s9136_s30, 1024, %s9141_s1, %s11463_s15, %s11460_s21, %s11460_s21, %s11459_s7  }
 0x1a7   : > { %s827_s14 = scalar_lea.vmem [#allocation22], %s6300_s9  ;;  %s11464_s19 = sld [smem:[#allocation66_spill]] }
 0x1a8   : > { %s835_s5 = sshll.u32 %s827_s14, 4  ;;  %s836_s5 = int_to_ptr.vmem [resolvable:$true] %s835_s5 }
 0x1ad   : > { %s833_s3 = scalar_lea.hbm %s11464_s19, %s6565_s12  ;;  %s8420_s17 = scalar_lea.hbm %s11464_s19, 192 }
 0x1ae   : > { %s8415_s4 = scalar_lea.hbm %s833_s3, 64  ;;  %p8421_p13 = scmp.lt.u32.totalorder %s833_s3, %s11464_s19 }
 0x1af   : > { %p8416_p1 = scmp.ne.s32.totalorder %s833_s3, %s8415_s4  ;;  %p8422_p2 = scmp.lt.u32.totalorder %s8420_s17, %s8415_s4 }
 0x1b0   : > { %p8424_p10 = scmp.lt.u32.totalorder %s8415_s4, %s833_s3 }
 0x1b1   : > { %p8418_p0 = pnand %p8416_p1, %p11453_p9  ;;  %p8423_p5 = por %p8422_p2, %p8421_p13 }
 0x1b3   : > { %p8419_p7 = pneg %p8418_p0  ;;  %p8425_p3 = por %p8424_p10, %p8423_p5 }
 0x1b5   : > { %p8426_p11 = pnand %p8425_p3, %p8419_p7 }
 0x1b7   : > { %8429 = shalt.err (!%p8426_p11)
}
 0x1b8   : > { %s8430_s21 = scalar_lea.vmem %s836_s5, 64  ;;  %s8560_s30 = smov [#allocation22]  }
 0x1b9   : > { %p8431_p8 = scmp.ne.s32.totalorder %s836_s5, %s8430_s21  ;;  %s8435_s1 = sshll.u32 %s8560_s30, 4  ;;  %s8436_s1 = int_to_ptr.vmem [resolvable:$false] %s8435_s1 }
 0x1ba   : > { %s8437_s9 = scalar_lea.vmem %s8436_s1, 128  ;;  %p8438_p1 = scmp.lt.s32.totalorder %s836_s5, %s8436_s1 }
 0x1bb   : > { %p8433_p4 = pnand %p8431_p8, %p11453_p9  ;;  %p8439_p0 = scmp.lt.s32.totalorder %s8437_s9, %s8430_s21 }
 0x1bd   : > { %p8434_p6 = pneg %p8433_p4  ;;  %p8440_p12 = por %p8439_p0, %p8438_p1 }
 0x1bf   : > { %p8441_p2 = pnand %p8440_p12, %p8434_p6 }
 0x1c1   : > { %8444 = shalt.err (!%p8441_p2)
}
 0x1c2   : > { %p11465_p13 = scmp.ne.s32.totalorder %s11431_s29, 0  ;;  %s11466_s15 = scalar_lea.sflag [#allocation21], %s8744_s2 }
 0x1c3   : > { %s11467_s12 = sshll.u32 %s8537_s27, 4  ;;  %s11468_s16 = sld [smem:[#allocation68_spill]] }
 0x1c4   : > { %7475 = dma.hbm_to_vmem [thread:$0]  (!%p11465_p13), %s833_s3, 64, %s836_s5, %s11466_s15  }
 0x1c5   : > { %s866_s23 = scalar_lea.vmem [#allocation25], %s8801_s18 }
 0x1c6   : > { %s873_s11 = sshll.u32 %s866_s23, 4  ;;  %s874_s11 = int_to_ptr.vmem [resolvable:$true] %s873_s11 }
 0x1c9   : > { %s9194_s4 = scalar_lea.hbm %s11468_s16, %s11467_s12  ;;  %s8450_s27 = scalar_lea.hbm %s11468_s16, 48 }
 0x1ca   : > { %s8445_s17 = scalar_lea.hbm %s9194_s4, 16  ;;  %p8451_p10 = scmp.lt.u32.totalorder %s9194_s4, %s11468_s16 }
 0x1cb   : > { %p8446_p12 = scmp.ne.s32.totalorder %s9194_s4, %s8445_s17  ;;  %p8452_p3 = scmp.lt.u32.totalorder %s8450_s27, %s8445_s17 }
 0x1cc   : > { %p8454_p8 = scmp.lt.u32.totalorder %s8445_s17, %s9194_s4 }
 0x1cd   : > { %p8448_p7 = pnand %p8446_p12, %p11453_p9  ;;  %p8453_p11 = por %p8452_p3, %p8451_p10 }
 0x1cf   : > { %p8449_p5 = pneg %p8448_p7  ;;  %p8455_p4 = por %p8454_p8, %p8453_p11 }
 0x1d1   : > { %p8456_p6 = pnand %p8455_p4, %p8449_p5 }
 0x1d3   : > { %8459 = shalt.err (!%p8456_p6)
}
 0x1d4   : > { %s8460_s18 = scalar_lea.vmem %s874_s11, 16  ;;  %s8561_s21 = smov [#allocation25]  }
 0x1d5   : > { %p8461_p1 = scmp.ne.s32.totalorder %s874_s11, %s8460_s18  ;;  %s8465_s30 = sshll.u32 %s8561_s21, 4  ;;  %s8466_s30 = int_to_ptr.vmem [resolvable:$false] %s8465_s30 }
 0x1d6   : > { %s8467_s1 = scalar_lea.vmem %s8466_s30, 32  ;;  %p8468_p12 = scmp.lt.s32.totalorder %s874_s11, %s8466_s30 }
 0x1d7   : > { %p8463_p0 = pnand %p8461_p1, %p11453_p9  ;;  %p8469_p7 = scmp.lt.s32.totalorder %s8467_s1, %s8460_s18 }
 0x1d9   : > { %p8464_p2 = pneg %p8463_p0  ;;  %p8470_p13 = por %p8469_p7, %p8468_p12 }
 0x1db   : > { %p8471_p3 = pnand %p8470_p13, %p8464_p2 }
 0x1dd   : > { %8474 = shalt.err (!%p8471_p3)
}
 0x1de   : > { %p11469_p10 = scmp.ne.s32.totalorder %s11431_s29, 0  ;;  %s11470_s9 = scalar_lea.sflag [#allocation24], %s8744_s2 }
 0x1df   : > { %s11471_s15 = sld [smem:[#allocation39_spill]] }
 0x1e0   : > { %7481 = dma.hbm_to_vmem [thread:$0]  (!%p11469_p10), %s9194_s4, 16, %s874_s11, %s11470_s9  }
 0x1e5   : > { %p11472_p5 = scmp.ne.s32.totalorder %s11471_s15, 0 }
 0x1e7   : > { %882 = sbr.rel (%p11472_p5) target bundleno = 5331 (0x14d3), region = 104 }
 0x1ee   : > { %s11473_s20 = sld [smem:[#allocation35_spill]] }
 0x1f4   : > { %p11474_p9 = scmp.eq.s32.totalorder %s11473_s20, 0 }
 0x1f6   : > { %8492 = dma.done.wait (%p11474_p9), [#allocation4], 640   ;;  %p11475_p11 = pmov %p11474_p9 }
 0x1f7   : > { %p11476_p8 = pmov %p11474_p9 }
 0x1f8   : > { %8494 = vsyncadd (%p11475_p11), [#allocation4], 4294966656 }
 0x1f9   : > { %8496 = dma.done.wait (%p11476_p8), [#allocation6], 1280   ;;  %p11477_p13 = pmov %p11476_p8 }
 0x1fa   : > { %p11478_p4 = pmov %p11476_p8 }
 0x1fb   : > { %8498 = vsyncadd (%p11477_p13), [#allocation6], 4294966016 }
 0x1fc   : > { %8500 = dma.done.wait (%p11478_p4), [#allocation9], 1280   ;;  %p11479_p6 = pmov %p11478_p4 }
 0x1fd   : > { %s11480_s2 = sld [smem:[#allocation34_spill]]  ;;  %s11481_s29 = sld [smem:[#allocation38_spill]] }
 0x1fe   : > { %8502 = vsyncadd (%p11479_p6), [#allocation9], 4294966016  ;;  %s9231_s12 = sand.u32 1, %s11473_s20  }
 0x1ff   : > { %s905_s4 = scalar_lea.sflag [#allocation12], %s9231_s12 }
 0x203   : > { %s9234_s14 = sand.u32 1, %s11480_s2   ;;  %p11482_p1 = scmp.ne.s32.totalorder %s11481_s29, 0 }
 0x204   : > { %s7393_s24 = smul.u32 3, %s9234_s14 }
 0x206   : > { %s9238_s23 = scalar_lea.vmem [#allocation11], %s7393_s24 }
 0x207   : > { %8504 = dma.done.wait (%p11482_p1), %s905_s4, 96  }
 0x208   : > { %8506 = vsyncadd (%p11482_p1), %s905_s4, 4294967200  ;;  %s7394_s11 = smul.u32 192, %s9234_s14  ;;  %s9245_s17 = scalar_lea.vmem [#allocation13], %s7393_s24 }
 0x209   : > { %s923_s25 = scalar_lea.sflag [#allocation15], %s9231_s12 }
 0x20a   : > { %s9248_s5 = scalar_lea.vmem [#allocation14], %s7394_s11 }
 0x20b   : > { %8508 = dma.done.wait (%p11482_p1), %s923_s25, 4096  }
 0x20c   : > { %8510 = vsyncadd (%p11482_p1), %s923_s25, 4294963200  ;;  %s6313_s27 = sshll.u32 %s9234_s14, 6  ;;  %s941_s7 = scalar_lea.sflag [#allocation18], %s9231_s12 }
 0x20d   : > { %s9255_s3 = scalar_lea.vmem [#allocation16], %s6313_s27  ;;  %s9258_s18 = scalar_lea.vmem [#allocation17], %s7394_s11 }
 0x20e   : > { %8512 = dma.done.wait (%p11482_p1), %s941_s7, 4096  }
 0x20f   : > { %8514 = vsyncadd (%p11482_p1), %s941_s7, 4294963200  ;;  %s9264_s21 = scalar_lea.vmem [#allocation19], %s6313_s27  ;;  %s959_s30 = scalar_lea.sflag [#allocation21], %s9231_s12 }
 0x210   : > { %8516 = dma.done.wait (%p11482_p1), %s959_s30, 80  }
 0x211   : > { %8518 = vsyncadd (%p11482_p1), %s959_s30, 4294967216  ;;  %s6315_s9 = sshll.u32 %s9234_s14, 2  ;;  %s6316_s15 = sshll.u32 %s9234_s14, 8 }
 0x212   : > { %s9274_s2 = scalar_lea.vmem [#allocation22], %s6315_s9  ;;  %s976_s24 = scalar_lea.sflag [#allocation24], %s9231_s12 }
 0x213   : > { %s9277_s4 = scalar_lea.vmem [#allocation23], %s6316_s15 }
 0x214   : > { %8520 = dma.done.wait (%p11482_p1), %s976_s24, 4112  }
 0x215   : > { %8522 = vsyncadd (%p11482_p1), %s976_s24, 4294963184  ;;  %p1094_p0 = scmp.lt.s32.totalorder %s11473_s20, 2  ;;  %s11483_s7 = sld [smem:[#allocation61_spill]] }
 0x216   : > { %s11484_s1 = sld [smem:[#allocation65_spill]]  ;;  %s987_s29 = scalar_lea.vmem [#allocation25], %s9234_s14 }
 0x217   : > { %s9285_s11 = scalar_select %p1094_p0, %s11473_s20, 2 }
 0x218   : > { %p11485_p2 = scmp.ne.s32.totalorder %s11473_s20, 0 }
 0x219   : > { %s6567_s12 = sshll.u32 %s9285_s11, 8  ;;  %s11486_s8 = sld [smem:[#allocation50_spill]] (!%p11485_p2) }
 0x21a   : > { %1106 = sbr.rel (%p11485_p2) target bundleno = 547 (0x223), region = 168 }
 0x21b   : > { %s1096_s30 = scalar_lea.vmem %s11483_s7, %s9285_s11 }
 0x21c   : > { %s9295_s0 = scalar_lea.vmem %s11484_s1, %s6567_s12 }
 0x21f   : > { %v1107_v0 = vld [vmem:[%s11486_s8] sm:$0xff] (!%p11485_p2)  ;;  %v1108_v1 = vld [vmem:[%s11486_s8 + $0x8] sm:$0xff] (!%p11485_p2)  ;;  %v1109_v2 = vld [vmem:[%s11486_s8 + $0x10] sm:$0xff] (!%p11485_p2) }
 0x220   : > { %1112 = vst [vmem:[#allocation2] sm:$0xff] (!%p11485_p2), %v1107_v0  ;;  %1113 = vst [vmem:[#allocation2 + $0x8] sm:$0xff] (!%p11485_p2), %v1108_v1  ;;  %v1110_v3 = vld [vmem:[%s11486_s8 + $0x18] sm:$0xff] (!%p11485_p2)  ;;  %v1111_v4 = vld [vmem:[%s11486_s8 + $0x20] sm:$0xff] (!%p11485_p2) }
 0x221   : > { %1114 = vst [vmem:[#allocation2 + $0x10] sm:$0xff] %v1109_v2  ;;  %1115 = vst [vmem:[#allocation2 + $0x18] sm:$0xff] %v1110_v3 }
 0x222   : > { %1116 = vst [vmem:[#allocation2 + $0x20] sm:$0xff] %v1111_v4 }
 0x223 PF: > { %v7608_v10 = vld [vmem:[%s9248_s5] ss:$12 sps:$4 sm:$0xff]   ;;  %v7609_v11 = vld [vmem:[%s9248_s5 + $0x4] ss:$12 sps:$4 sm:$0xff]   ;;  %v8562_v12 = vmov 0.0   ;;  %vm8563_vm0 = vmmov 0  }
 0x224   : > { %6831 = vmatprep.subr.bf16.mxu0 %v8562_v12  ;;  %6859 = vmatprep.subr.bf16.mxu1 %v8562_v12  ;;  %v7610_v13 = vld [vmem:[%s9248_s5 + $0x18] ss:$12 sps:$4 sm:$0xff]   ;;  %v7611_v34 = vld [vmem:[%s9248_s5 + $0x1c] ss:$12 sps:$4 sm:$0xff]   ;;  %v7613_v36 = vld [vmem:[%s9248_s5 + $0x34] ss:$12 sps:$4 sm:$0xff]  }
 0x225   : > { %6832 = vmatpush3.bf16.msra.mxu0 %v7608_v10  ;;  %6860 = vmatpush3.bf16.msra.mxu1 %v7609_v11  ;;  %v7612_v35 = vld [vmem:[%s9248_s5 + $0x30] ss:$12 sps:$4 sm:$0xff]   ;;  %v7614_v37 = vld [vmem:[%s9248_s5 + $0x48] ss:$12 sps:$4 sm:$0xff]   ;;  %v7615_v38 = vld [vmem:[%s9248_s5 + $0x4c] ss:$12 sps:$4 sm:$0xff]  }
 0x226   : > { %6833 = vmatprep.subr.bf16.mxu0 %v8562_v12  ;;  %6861 = vmatprep.subr.bf16.mxu1 %v8562_v12  ;;  %v7616_v39 = vld [vmem:[%s9248_s5 + $0x60] ss:$12 sps:$4 sm:$0xff]   ;;  %v7617_v40 = vld [vmem:[%s9248_s5 + $0x64] ss:$12 sps:$4 sm:$0xff]   ;;  %v7619_v42 = vld [vmem:[%s9248_s5 + $0x7c] ss:$12 sps:$4 sm:$0xff]  }
 0x227   : > { %v7618_v41 = vld [vmem:[%s9248_s5 + $0x78] ss:$12 sps:$4 sm:$0xff]   ;;  %v7620_v43 = vld [vmem:[%s9248_s5 + $0x90] ss:$12 sps:$4 sm:$0xff]   ;;  %6847 = vmatprep.mubr.msk.bf16.mxu0 %vm8563_vm0, %v8562_v12  ;;  %v7621_v44 = vld [vmem:[%s9248_s5 + $0x94] ss:$12 sps:$4 sm:$0xff]   ;;  %6875 = vmatprep.mubr.msk.bf16.mxu1 %vm8563_vm0, %v8562_v12 }
 0x228   : > { %v7622_v45 = vld [vmem:[%s9248_s5 + $0xa8] ss:$12 sps:$4 sm:$0xff]   ;;  %v7623_v46 = vld [vmem:[%s9248_s5 + $0xac] ss:$12 sps:$4 sm:$0xff]   ;;  %s8564_s6 = smov 1   ;;  %s8565_s10 = smov 127  }
 0x229   : > { %v1117_v5 = vld [vmem:[#allocation2] sm:$0xff]  ;;  %v1118_v7 = vld [vmem:[#allocation2 + $0x8] sm:$0xff]  ;;  %6834 = vmatpush3.bf16.msra.mxu0 %v7610_v13  ;;  %6862 = vmatpush3.bf16.msra.mxu1 %v7611_v34  ;;  %v6320_v0 = vld [vmem:[%s9238_s23] ss:$0 sm:$0xff]  ;;  %s11489_s9 = sld [smem:[#allocation51_spill]]  ;;  %vm1699_vm2 = vcmask 261120  }
 0x22a   : > { %v1119_v6 = vld [vmem:[#allocation2 + $0x10] sm:$0xff]  ;;  %1154 = vadd.xlane.f32.xlu0 %v1117_v5  ;;  %v1120_v8 = vld [vmem:[#allocation2 + $0x18] sm:$0xff]  ;;  %v1121_v9 = vld [vmem:[#allocation2 + $0x20] sm:$0xff]  ;;  %6835 = vmatprep.subr.bf16.mxu0 %v8562_v12  ;;  %s8566_s20 = smov 96   ;;  %s8568_s15 = smov 32   ;;  %vm1842_vm3 = vcmask 1043456  }
 0x22b   : > { %1158 = vadd.xlane.f32.xlu1 %v1119_v6  ;;  %6863 = vmatprep.subr.bf16.mxu1 %v8562_v12  ;;  %v7624_v13 = vld [vmem:[%s9248_s5 + $0x8] ss:$12 sps:$4 sm:$0xff]   ;;  %vm1784_vm4 = vcmask 326656   ;;  %vm2676_vm5 = vcmask 523264   ;;  %vm2682_vm6 = vcmask 785408  }
 0x22d   : > { %6836 = vmatpush3.bf16.msra.mxu0 %v7612_v35  ;;  %6864 = vmatpush3.bf16.msra.mxu1 %v7613_v36 }
 0x22e   : > { %1156 = vadd.xlane.f32.xlu0 %v1118_v7  ;;  %6837 = vmatprep.subr.bf16.mxu0 %v8562_v12 }
 0x22f   : > { %1160 = vadd.xlane.f32.xlu1 %v1120_v8  ;;  %6865 = vmatprep.subr.bf16.mxu1 %v8562_v12 }
 0x231   : > { %6838 = vmatpush3.bf16.msra.mxu0 %v7614_v37  ;;  %6866 = vmatpush3.bf16.msra.mxu1 %v7615_v38 }
 0x232   : > { %1162 = vadd.xlane.f32.xlu0 %v1121_v9  ;;  %6839 = vmatprep.subr.bf16.mxu0 %v8562_v12 }
 0x233   : > { %6867 = vmatprep.subr.bf16.mxu1 %v8562_v12 }
 0x235   : > { %6840 = vmatpush3.bf16.msra.mxu0 %v7616_v39  ;;  %6868 = vmatpush3.bf16.msra.mxu1 %v7617_v40 }
 0x236   : > { %6841 = vmatprep.subr.bf16.mxu0 %v8562_v12  ;;  %6869 = vmatprep.subr.bf16.mxu1 %v8562_v12 }
 0x239   : > { %6842 = vmatpush3.bf16.msra.mxu0 %v7618_v41  ;;  %6870 = vmatpush3.bf16.msra.mxu1 %v7619_v42 }
 0x23a   : > { %6843 = vmatprep.subr.bf16.mxu0 %v8562_v12  ;;  %6871 = vmatprep.subr.bf16.mxu1 %v8562_v12 }
 0x23d   : > { %6844 = vmatpush3.bf16.msra.mxu0 %v7620_v43  ;;  %6872 = vmatpush3.bf16.msra.mxu1 %v7621_v44 }
 0x23e   : > { %6845 = vmatprep.subr.bf16.mxu0 %v8562_v12  ;;  %6873 = vmatprep.subr.bf16.mxu1 %v8562_v12 }
 0x241   : > { %6846 = vmatpush3.bf16.msra.mxu0 %v7622_v45  ;;  %6874 = vmatpush3.bf16.msra.mxu1 %v7623_v46 }
 0x242   : > { %6887 = vmatprep.subr.bf16.mxu0 %v8562_v12  ;;  %6915 = vmatprep.subr.bf16.mxu1 %v8562_v12 }
 0x2b7   : > { %v1155_v14 = vpop.xlane.xlu0 %1154 }
 0x2b8   : > { %v1159_v15 = vpop.xlane.xlu1 %1158  ;;  %v1165_v16 = vmul.f32 0.0078125, %v1155_v14 }
 0x2b9   : > { %v1167_v17 = vmul.f32 0.0078125, %v1159_v15 }
 0x2ba   : > { %v9323_v18 = vsub.f32 %v1117_v5, %v1165_v16  ;;  %v6321_v5 = vld [vmem:[%s9245_s17] ss:$0 sm:$0xff] }
 0x2bb   : > { %v9325_v19 = vsub.f32 %v1119_v6, %v1167_v17  ;;  %v1157_v20 = vpop.xlane.xlu0 %1156 }
 0x2bc   : > { %v1161_v21 = vpop.xlane.xlu1 %1160  ;;  %v1166_v22 = vmul.f32 0.0078125, %v1157_v20  ;;  %v1175_v23 = vmul.f32 %v9323_v18, %v9323_v18 }
 0x2bd   : > { %v1168_v24 = vmul.f32 0.0078125, %v1161_v21  ;;  %v1177_v25 = vmul.f32 %v9325_v19, %v9325_v19 }
 0x2be   : > { %1180 = vadd.xlane.f32.xlu1 %v1175_v23  ;;  %v9331_v26 = vsub.f32 %v1118_v7, %v1166_v22  ;;  %v7626_v22 = vld [vmem:[%s9248_s5 + $0x38] ss:$12 sps:$4 sm:$0xff]  }
 0x2bf   : > { %v9333_v27 = vsub.f32 %v1120_v8, %v1168_v24  ;;  %v1163_v28 = vpop.xlane.xlu0 %1162 }
 0x2c0   : > { %v1169_v29 = vmul.f32 0.0078125, %v1163_v28  ;;  %v1176_v30 = vmul.f32 %v9331_v26, %v9331_v26 }
 0x2c1   : > { %v1178_v31 = vmul.f32 %v9333_v27, %v9333_v27 }
 0x2c2   : > { %1184 = vadd.xlane.f32.xlu1 %v1177_v25  ;;  %1182 = vadd.xlane.f32.xlu0 %v1176_v30  ;;  %v9339_v32 = vsub.f32 %v1121_v9, %v1169_v29  ;;  %v7627_v25 = vld [vmem:[%s9248_s5 + $0x50] ss:$12 sps:$4 sm:$0xff]   ;;  %v7629_v29 = vld [vmem:[%s9248_s5 + $0x80] ss:$12 sps:$4 sm:$0xff]   ;;  %v7630_v30 = vld [vmem:[%s9248_s5 + $0x98] ss:$12 sps:$4 sm:$0xff]  }
 0x2c4   : > { %v1179_v33 = vmul.f32 %v9339_v32, %v9339_v32 }
 0x2c6   : > { %1186 = vadd.xlane.f32.xlu0 %v1178_v31  ;;  %1188 = vadd.xlane.f32.xlu1 %v1179_v33  ;;  %v7631_v31 = vld [vmem:[%s9248_s5 + $0xb0] ss:$12 sps:$4 sm:$0xff]  }
 0x34b   : > { %v1181_v47 = vpop.xlane.xlu1 %1180 }
 0x34c   : > { %v1190_v48 = vmul.f32 0.0078125, %v1181_v47 }
 0x34e   : > { %v1195_v49 = vadd.f32 1e-05, %v1190_v48 }
 0x34f   : > { %v1185_v50 = vpop.xlane.xlu1 %1184  ;;  %v1183_v51 = vpop.xlane.xlu0 %1182 }
 0x350   : > { %7752 = vrsqrt.f32 %v1195_v49  ;;  %v1192_v52 = vmul.f32 0.0078125, %v1185_v50  ;;  %v1191_v53 = vmul.f32 0.0078125, %v1183_v51 }
 0x352   : > { %v1196_v54 = vadd.f32 1e-05, %v1191_v53  ;;  %v1197_v55 = vadd.f32 1e-05, %v1192_v52 }
 0x353   : > { %v1189_v56 = vpop.xlane.xlu1 %1188  ;;  %v1187_v57 = vpop.xlane.xlu0 %1186 }
 0x354   : > { %v1193_v58 = vmul.f32 0.0078125, %v1187_v57  ;;  %7754 = vrsqrt.f32 %v1196_v54  ;;  %v1194_v59 = vmul.f32 0.0078125, %v1189_v56 }
 0x355   : > { %7756 = vrsqrt.f32 %v1197_v55 }
 0x356   : > { %v1198_v60 = vadd.f32 1e-05, %v1193_v58  ;;  %v1199_v61 = vadd.f32 1e-05, %v1194_v59 }
 0x358   : > { %7758 = vrsqrt.f32 %v1198_v60 }
 0x359   : > { %7760 = vrsqrt.f32 %v1199_v61 }
 0x35a   : > { %v7753_v62 = vpop.eup %7752 }
 0x35b   : > { %v1205_v63 = vmul.f32 %v7753_v62, %v9323_v18  ;;  %v7625_v18 = vld [vmem:[%s9248_s5 + $0x20] ss:$12 sps:$4 sm:$0xff]  }
 0x35d   : > { %v1216_v3 = vmul.f32 %v6320_v0, %v1205_v63 }
 0x35e   : > { %v7755_v1 = vpop.eup %7754 }
 0x35f   : > { %v1206_v2 = vmul.f32 %v7755_v1, %v9331_v26  ;;  %v7757_v4 = vpop.eup %7756  ;;  %v1227_v8 = vadd.f32 %v6321_v5, %v1216_v3 }
 0x360   : > { %v1207_v10 = vmul.f32 %v7757_v4, %v9325_v19 }
 0x361   : > { %v1217_v6 = vmul.f32 %v6320_v0, %v1206_v2 }
 0x362   : > { %v7759_v7 = vpop.eup %7758  ;;  %v1218_v17 = vmul.f32 %v6320_v0, %v1207_v10 }
 0x363   : > { %v1228_v9 = vadd.f32 %v6321_v5, %v1217_v6  ;;  %v1208_v11 = vmul.f32 %v7759_v7, %v9333_v27  ;;  %v7761_v16 = vpop.eup %7760  ;;  %v7628_v27 = vld [vmem:[%s9248_s5 + $0x68] ss:$12 sps:$4 sm:$0xff]   ;;  %v1621_v6 = vlaneseq  ;;  %s8567_s5 = smov 64  }
 0x364   : > { %v1209_v20 = vmul.f32 %v7761_v16, %v9339_v32  ;;  %v1229_v21 = vadd.f32 %v6321_v5, %v1218_v17  ;;  %v9490_v17 = vld [vmem:[%s11489_s9] sm:$0xff] }
 0x365   : > { %v1233_v14 = vpack.c.bf16 %v1228_v9, %v1227_v8  ;;  %v1219_v15 = vmul.f32 %v6320_v0, %v1208_v11  ;;  %v1622_v7 = vand.u32 127, %v1621_v6 }
 0x366   : > { %v1220_v24 = vmul.f32 %v6320_v0, %v1209_v20  ;;  %v1128_v20 = vld [vmem:[#allocation3 + $0x8] sm:$0xff] }
 0x367   : > { %6848 = vmatmul.mubr.bf16.vlgmr.msra.gmra.mrb[0].mxu0 %v1233_v14  ;;  %6876 = vmatmul.mubr.bf16.vlgmr.msra.gmra.mrb[0].mxu1 %v1233_v14  ;;  %v1230_v19 = vadd.f32 %v6321_v5, %v1219_v15  ;;  %v1623_v8 = vand.u32 1, %v1622_v7  ;;  %v1127_v15 = vld [vmem:[#allocation3] sm:$0xff] }
 0x368   : > { %6888 = vmatpush3.bf16.msra.mxu0 %v7624_v13  ;;  %6851 = vmatprep.mubr.msk.bf16.mxu0 %vm8563_vm0, %v8562_v12  ;;  %v1231_v26 = vadd.f32 %v6321_v5, %v1220_v24 }
 0x369   : > { %6889 = vmatprep.subr.bf16.mxu0 %v8562_v12  ;;  %6879 = vmatprep.mubr.msk.bf16.mxu1 %vm8563_vm0, %v8562_v12  ;;  %v1234_v23 = vpack.c.bf16 %v1230_v19, %v1229_v21  ;;  %vm9481_vm1 = vcmp.eq.s32.totalorder %v1623_v8, 0 }
 0x36a   : > { %v1235_v28 = vpack.c.bf16 %v1231_v26, %v1231_v26 }
 0x36c   : > { %6890 = vmatpush3.bf16.msra.mxu0 %v7625_v18  ;;  %v9495_v18 = vld [vmem:[%s11489_s9 + $0x8] sm:$0xff] }
 0x36d   : > { %6891 = vmatprep.subr.bf16.mxu0 %v8562_v12 }
 0x36f   : > { %6852 = vmatmul.mubr.bf16.gmra.mrb[4].mxu0 %v1234_v23  ;;  %6880 = vmatmul.mubr.bf16.gmra.mrb[4].mxu1 %v1234_v23 }
 0x370   : > { %6892 = vmatpush3.bf16.msra.mxu0 %v7626_v22  ;;  %6855 = vmatprep.mubr.msk.bf16.mxu0 %vm8563_vm0, %v8562_v12 }
 0x371   : > { %6893 = vmatprep.subr.bf16.mxu0 %v8562_v12  ;;  %6883 = vmatprep.mubr.msk.bf16.mxu1 %vm8563_vm0, %v8562_v12 }
 0x374   : > { %6894 = vmatpush3.bf16.msra.mxu0 %v7627_v25 }
 0x375   : > { %6895 = vmatprep.subr.bf16.mxu0 %v8562_v12 }
 0x377   : > { %6856 = vmatmul.mubr.bf16.gmra.mrb[8].mxu0 %v1235_v28  ;;  %6884 = vmatmul.mubr.bf16.gmra.mrb[8].mxu1 %v1235_v28 }
 0x378   : > { %6896 = vmatpush3.bf16.msra.mxu0 %v7628_v27  ;;  %6903 = vmatprep.mubr.msk.bf16.mxu0 %vm8563_vm0, %v8562_v12 }
 0x379   : > { %6897 = vmatprep.subr.bf16.mxu0 %v8562_v12  ;;  %6921 = vmatprep.mubr.msk.bf16.mxu1 %vm8563_vm0, %v8562_v12 }
 0x37c   : > { %6898 = vmatpush3.bf16.msra.mxu0 %v7629_v29 }
 0x37d   : > { %6899 = vmatprep.subr.bf16.mxu0 %v8562_v12 }
 0x380   : > { %6900 = vmatpush3.bf16.msra.mxu0 %v7630_v30 }
 0x381   : > { %6901 = vmatprep.subr.bf16.mxu0 %v8562_v12 }
 0x384   : > { %6902 = vmatpush3.bf16.msra.mxu0 %v7631_v31 }
 0x385   : > { %6951 = vmatprep.subr.bf16.mxu0 %v8562_v12 }
 0x387   : > { %6904 = vmatmul.mubr.bf16.vlgmr.msra.gmra.mrb[12].mxu0 %v1233_v14 }
 0x388   : > { %6907 = vmatprep.mubr.msk.bf16.mxu0 %vm8563_vm0, %v8562_v12 }
 0x38f   : > { %6908 = vmatmul.mubr.bf16.gmra.mrb[16].mxu0 %v1234_v23 }
 0x390   : > { %6911 = vmatprep.mubr.msk.bf16.mxu0 %vm8563_vm0, %v8562_v12 }
 0x397   : > { %6912 = vmatmul.mubr.bf16.gmra.mrb[20].mxu0 %v1235_v28 }
 0x398   : > { %6957 = vmatprep.mubr.msk.bf16.mxu0 %vm8563_vm0, %v8562_v12 }
 0x43a   : > { %v9414_v32 = vpop.f32.mrb[0].mxu0  ;;  %v9416_v33 = vpop.f32.mrb[0].mxu1 }
 0x43b   : > { %1650 = vrot.lane.b32.xlu1 %v9416_v33, %s8564_s6  ;;  %1660 = vrot.lane.b32.xlu0 %v9416_v33, %s8565_s10  ;;  %v6849_v34 = vpop.f32.mrb[1].mxu0  ;;  %v6877_v35 = vpop.f32.mrb[1].mxu1  ;;  %v1645_v25 = vmul.f32 %v9416_v33, %v9490_v17  ;;  %v9512_v33 = vld [vmem:[%s11489_s9 + $0x10] sm:$0xff] }
 0x43c   : > { %v9422_v36 = vpop.f32.mrb[2].mxu0  ;;  %v9424_v37 = vpop.f32.mrb[2].mxu1  ;;  %v9503_v35 = vld [vmem:[#allocation3 + $0x10] sm:$0xff] }
 0x43d   : > { %v6850_v38 = vpop.f32.mrb[3].mxu0  ;;  %v6878_v39 = vpop.f32.mrb[3].mxu1  ;;  %v1646_v26 = vmul.f32 %v9424_v37, %v9495_v18 }
 0x43f   : > { %1662 = vrot.lane.b32.xlu1 %v9424_v37, %s8565_s10 }
 0x442   : > { %v9428_v40 = vpop.f32.mrb[4].mxu0  ;;  %v9430_v41 = vpop.f32.mrb[4].mxu1 }
 0x443   : > { %1652 = vrot.lane.b32.xlu1 %v9424_v37, %s8564_s6  ;;  %1664 = vrot.lane.b32.xlu0 %v9430_v41, %s8565_s10  ;;  %v6853_v42 = vpop.f32.mrb[5].mxu0  ;;  %v6881_v43 = vpop.f32.mrb[5].mxu1  ;;  %v9517_v37 = vld [vmem:[%s11489_s9 + $0x18] sm:$0xff] }
 0x444   : > { %v9436_v44 = vpop.f32.mrb[6].mxu0  ;;  %v9438_v45 = vpop.f32.mrb[6].mxu1  ;;  %v9519_v43 = vld [vmem:[#allocation3 + $0x18] sm:$0xff] }
 0x445   : > { %v6854_v46 = vpop.f32.mrb[7].mxu0  ;;  %v6882_v47 = vpop.f32.mrb[7].mxu1 }
 0x447   : > { %1654 = vrot.lane.b32.xlu0 %v9430_v41, %s8564_s6  ;;  %1666 = vrot.lane.b32.xlu1 %v9438_v45, %s8565_s10 }
 0x44a   : > { %v9444_v48 = vpop.f32.mrb[8].mxu0  ;;  %v9446_v49 = vpop.f32.mrb[8].mxu1 }
 0x44b   : > { %1656 = vrot.lane.b32.xlu1 %v9438_v45, %s8564_s6  ;;  %1668 = vrot.lane.b32.xlu0 %v9446_v49, %s8565_s10  ;;  %v6857_v50 = vpop.f32.mrb[9].mxu0  ;;  %v6885_v51 = vpop.f32.mrb[9].mxu1 }
 0x44c   : > { %v1353_v52 = vpop.f32.mrb[10].mxu0  ;;  %v1473_v53 = vpop.f32.mrb[10].mxu1 }
 0x44d   : > { %v6858_v54 = vpop.f32.mrb[11].mxu0  ;;  %v6886_v55 = vpop.f32.mrb[11].mxu1  ;;  %v1647_v53 = vmul.f32 %v9430_v41, %v9512_v33 }
 0x44e   : > { %v1648_v54 = vmul.f32 %v9438_v45, %v9517_v37 }
 0x44f   : > { %1658 = vrot.lane.b32.xlu1 %v9446_v49, %s8564_s6  ;;  %1611 = vrot.lane.b32.xlu0 %v9414_v32, %s8565_s10 }
 0x453   : > { %1613 = vrot.lane.b32.xlu1 %v9422_v36, %s8565_s10  ;;  %1601 = vrot.lane.b32.xlu0 %v9414_v32, %s8564_s6 }
 0x457   : > { %1603 = vrot.lane.b32.xlu1 %v9422_v36, %s8564_s6  ;;  %1615 = vrot.lane.b32.xlu0 %v9428_v40, %s8565_s10 }
 0x45a   : > { %v1574_v56 = vpop.f32.mrb[12].mxu0 }
 0x45b   : > { %v6905_v57 = vpop.f32.mrb[13].mxu0  ;;  %1605 = vrot.lane.b32.xlu0 %v9428_v40, %s8564_s6  ;;  %1617 = vrot.lane.b32.xlu1 %v9436_v44, %s8565_s10 }
 0x45c   : > { %v1577_v58 = vpop.f32.mrb[14].mxu0 }
 0x45d   : > { %v9468_v59 = vpack.c.bf16 %v1577_v58, %v1574_v56  ;;  %v6906_v60 = vpop.f32.mrb[15].mxu0  ;;  %v1126_v56 = vld [vmem:[%s11489_s9 + $0x20] sm:$0xff] }
 0x45e   : > { %v1131_v58 = vld [vmem:[#allocation3 + $0x20] sm:$0xff] }
 0x45f   : > { %1607 = vrot.lane.b32.xlu1 %v9436_v44, %s8564_s6  ;;  %1619 = vrot.lane.b32.xlu0 %v9444_v48, %s8565_s10 }
 0x462   : > { %v1582_v61 = vpop.f32.mrb[16].mxu0 }
 0x463   : > { %v6909_v62 = vpop.f32.mrb[17].mxu0  ;;  %1609 = vrot.lane.b32.xlu1 %v9444_v48, %s8564_s6 }
 0x464   : > { %v1585_v63 = vpop.f32.mrb[18].mxu0 }
 0x465   : > { %v9476_v0 = vpack.c.bf16 %v1585_v63, %v1582_v61  ;;  %v6910_v1 = vpop.f32.mrb[19].mxu0 }
 0x466   : > { %v1649_v1 = vmul.f32 %v9446_v49, %v1126_v56 }
 0x46a   : > { %v9478_v2 = vpop.f32.mrb[20].mxu0 }
 0x46b   : > { %v6913_v3 = vpop.f32.mrb[21].mxu0 }
 0x46c   : > { %v1593_v4 = vpop.f32.mrb[22].mxu0 }
 0x46d   : > { %v6914_v5 = vpop.f32.mrb[23].mxu0 }
 0x4ad   : > { %v1651_v9 = vpop.permute.xlu1 %1650  ;;  %v1661_v10 = vpop.permute.xlu0 %1660 }
 0x4ae   : > { %v1670_v11 = vsub.f32 0.0, %v1661_v10 }
 0x4b0   : > { %v1675_v16 = vsel %vm9481_vm1, %v1670_v11, %v1651_v9 }
 0x4b1   : > { %v1663_v14 = vpop.permute.xlu1 %1662  ;;  %v1680_v21 = vmul.f32 %v1675_v16, %v1127_v15 }
 0x4b2   : > { %v1671_v19 = vsub.f32 0.0, %v1663_v14 }
 0x4b3   : > { %v1685_v29 = vadd.f32 %v1680_v21, %v1645_v25 }
 0x4b5   : > { %v1653_v22 = vpop.permute.xlu1 %1652  ;;  %v1665_v23 = vpop.permute.xlu0 %1664 }
 0x4b6   : > { %v1676_v24 = vsel %vm9481_vm1, %v1671_v19, %v1653_v22  ;;  %v1672_v28 = vsub.f32 0.0, %v1665_v23  ;;  %v1596_v22 = vmul.f32 %v9414_v32, %v9490_v17  ;;  %v1597_v23 = vmul.f32 %v9422_v36, %v9495_v18 }
 0x4b7   : > { %v1681_v27 = vmul.f32 %v1676_v24, %v1128_v20 }
 0x4b9   : > { %v1686_v30 = vadd.f32 %v1681_v27, %v1646_v26  ;;  %v1667_v31 = vpop.permute.xlu1 %1666  ;;  %v1655_v34 = vpop.permute.xlu0 %1654 }
 0x4ba   : > { %v1677_v38 = vsel %vm9481_vm1, %v1672_v28, %v1655_v34  ;;  %v1673_v42 = vsub.f32 0.0, %v1667_v31  ;;  %v1598_v34 = vmul.f32 %v9428_v40, %v9512_v33  ;;  %v1600_v40 = vmul.f32 %v9444_v48, %v1126_v56 }
 0x4bb   : > { %v9507_v39 = vpack.c.bf16 %v1686_v30, %v1685_v29  ;;  %v1682_v46 = vmul.f32 %v1677_v38, %v9503_v35  ;;  %v1599_v38 = vmul.f32 %v9436_v44, %v9517_v37  ;;  %v9584_v37 = vpack.c.bf16 %v9478_v2, %v9478_v2 }
 0x4bd   : > { %v1657_v47 = vpop.permute.xlu1 %1656  ;;  %1924 = vrot.lane.b32.xlu0 %v9507_v39, %s8566_s20  ;;  %v1669_v50 = vpop.permute.xlu0 %1668  ;;  %v1710_v51 = vsel %vm1699_vm2, %v9507_v39, 0  ;;  %v1687_v60 = vadd.f32 %v1682_v46, %v1647_v53  ;;  %v1844_v48 = vsel %vm1842_vm3, %v9584_v37, 0 }
 0x4be   : > { %v1678_v52 = vsel %vm9481_vm1, %v1673_v42, %v1657_v47  ;;  %6916 = vmatpush3.bf16.xpose.msra.mxu1 %v1710_v51  ;;  %v1674_v57 = vsub.f32 0.0, %v1669_v50 }
 0x4bf   : > { %v1683_v55 = vmul.f32 %v1678_v52, %v9519_v43  ;;  %6917 = vmatprep.subr.bf16.mxu1 %v8562_v12 }
 0x4c1   : > { %v1688_v61 = vadd.f32 %v1683_v55, %v1648_v54  ;;  %v1659_v62 = vpop.permute.xlu1 %1658  ;;  %v1612_v63 = vpop.permute.xlu0 %1611 }
 0x4c2   : > { %v1679_v41 = vsel %vm9481_vm1, %v1674_v57, %v1659_v62  ;;  %v1625_v4 = vsub.f32 0.0, %v1612_v63 }
 0x4c3   : > { %v9540_v45 = vpack.c.bf16 %v1688_v61, %v1687_v60  ;;  %v1684_v3 = vmul.f32 %v1679_v41, %v1131_v58 }
 0x4c5   : > { %v1689_v5 = vadd.f32 %v1684_v3, %v1649_v1  ;;  %v1614_v7 = vpop.permute.xlu1 %1613  ;;  %1926 = vrot.lane.b32.xlu1 %v9540_v45, %s8566_s20  ;;  %v1602_v8 = vpop.permute.xlu0 %1601  ;;  %v1713_v9 = vsel %vm1699_vm2, %v9540_v45, 0 }
 0x4c6   : > { %v1630_v10 = vsel %vm9481_vm1, %v1625_v4, %v1602_v8  ;;  %6918 = vmatpush3.bf16.xpose.msra.mxu1 %v1713_v9  ;;  %v1626_v49 = vsub.f32 0.0, %v1614_v7 }
 0x4c7   : > { %v1695_v11 = vpack.c.bf16 %v1689_v5, %v1689_v5  ;;  %6919 = vmatprep.subr.bf16.mxu1 %v8562_v12  ;;  %v1635_v14 = vmul.f32 %v1630_v10, %v1127_v15 }
 0x4c9   : > { %v1604_v16 = vpop.permute.xlu1 %1603  ;;  %1928 = vrot.lane.b32.xlu0 %v1695_v11, %s8566_s20  ;;  %v1616_v19 = vpop.permute.xlu0 %1615  ;;  %v1640_v26 = vadd.f32 %v1635_v14, %v1596_v22  ;;  %v1716_v29 = vsel %vm1699_vm2, %v1695_v11, 0  ;;  %v9663_v22 = vld [vmem:[#allocation8] sm:$0xff] }
 0x4ca   : > { %v1631_v21 = vsel %vm9481_vm1, %v1626_v49, %v1604_v16  ;;  %v1627_v25 = vsub.f32 0.0, %v1616_v19 }
 0x4cb   : > { %v1636_v24 = vmul.f32 %v1631_v21, %v1128_v20 }
 0x4cd   : > { %v1641_v27 = vadd.f32 %v1636_v24, %v1597_v23  ;;  %v1618_v28 = vpop.permute.xlu1 %1617  ;;  %2157 = vrot.lane.b32.xlu0 %v9507_v39, %s8567_s5  ;;  %v1606_v15 = vpop.permute.xlu0 %1605 }
 0x4ce   : > { %v1632_v30 = vsel %vm9481_vm1, %v1627_v25, %v1606_v15  ;;  %6920 = vmatpush3.bf16.xpose.msra.mxu1 %v1716_v29  ;;  %v1628_v36 = vsub.f32 0.0, %v1618_v28 }
 0x4cf   : > { %v1690_v32 = vpack.c.bf16 %v1641_v27, %v1640_v26  ;;  %6933 = vmatprep.subr.bf16.mxu1 %v8562_v12  ;;  %v1637_v17 = vmul.f32 %v1632_v30, %v9503_v35  ;;  %v9665_v26 = vld [vmem:[#allocation8 + $0x8] sm:$0xff] }
 0x4d1   : > { %v1608_v18 = vpop.permute.xlu1 %1607  ;;  %2159 = vrot.lane.b32.xlu0 %v9540_v45, %s8567_s5  ;;  %1915 = vrot.lane.b32.xlu1 %v1690_v32, %s8566_s20  ;;  %v1620_v20 = vpop.permute.xlu0 %1619  ;;  %v1642_v35 = vadd.f32 %v1637_v17, %v1598_v34  ;;  %v9677_v17 = vld [vmem:[#allocation8 + $0x10] sm:$0xff]  ;;  %v9679_v34 = vld [vmem:[#allocation8 + $0x18] sm:$0xff] }
 0x4d2   : > { %v1633_v31 = vsel %vm9481_vm1, %v1628_v36, %v1608_v18  ;;  %v1629_v46 = vsub.f32 0.0, %v1620_v20 }
 0x4d3   : > { %v1638_v42 = vmul.f32 %v1633_v31, %v9519_v43 }
 0x4d5   : > { %v1643_v47 = vadd.f32 %v1638_v42, %v1599_v38  ;;  %v1610_v50 = vpop.permute.xlu1 %1609  ;;  %2161 = vrot.lane.b32.xlu0 %v1695_v11, %s8567_s5  ;;  %6922 = vmatmul.mubr.msk.bf16.vlgmr.msra.gmra.mrb[12].mxu1 %vm1699_vm2, %v1690_v32 }
 0x4d6   : > { %v1634_v51 = vsel %vm9481_vm1, %v1629_v46, %v1610_v50  ;;  %6934 = vmatpush3.bf16.msra.mxu1 %v9468_v59  ;;  %6925 = vmatprep.mubr.msk.bf16.mxu1 %vm8563_vm0, %v8562_v12 }
 0x4d7   : > { %v1691_v44 = vpack.c.bf16 %v1643_v47, %v1642_v35  ;;  %v1639_v33 = vmul.f32 %v1634_v51, %v1131_v58  ;;  %6935 = vmatprep.subr.bf16.mxu1 %v8562_v12  ;;  %v9689_v51 = vld [vmem:[#allocation8 + $0x20] sm:$0xff] }
 0x4d9   : > { %v1644_v43 = vadd.f32 %v1639_v33, %v1600_v40  ;;  %2387 = vrot.lane.b32.xlu0 %v9507_v39, %s8568_s15  ;;  %1917 = vrot.lane.b32.xlu1 %v1691_v44, %s8566_s20 }
 0x4da   : > { %6936 = vmatpush3.bf16.msra.mxu1 %v9476_v0 }
 0x4db   : > { %v1692_v52 = vpack.c.bf16 %v1644_v43, %v1644_v43  ;;  %6937 = vmatprep.subr.bf16.mxu1 %v8562_v12 }
 0x4dd   : > { %2389 = vrot.lane.b32.xlu0 %v9540_v45, %s8568_s15  ;;  %6926 = vmatmul.mubr.msk.bf16.gmra.mrb[16].mxu1 %vm1699_vm2, %v1691_v44 }
 0x4de   : > { %1919 = vrot.lane.b32.xlu1 %v1692_v52, %s8566_s20  ;;  %6938 = vmatpush3.bf16.msra.mxu1 %v1844_v48 }
 0x4df   : > { %6929 = vmatprep.mubr.msk.bf16.mxu1 %vm8563_vm0, %v8562_v12  ;;  %6969 = vmatprep.subr.bf16.mxu1 %v8562_v12 }
 0x4e1   : > { %2391 = vrot.lane.b32.xlu0 %v1695_v11, %s8568_s15 }
 0x4e2   : > { %2151 = vrot.lane.b32.xlu1 %v1690_v32, %s8567_s5 }
 0x4e5   : > { %2383 = vrot.lane.b32.xlu0 %v1691_v44, %s8568_s15  ;;  %6930 = vmatmul.mubr.msk.bf16.gmra.mrb[20].mxu1 %vm1699_vm2, %v1692_v52 }
 0x4e6   : > { %2153 = vrot.lane.b32.xlu1 %v1691_v44, %s8567_s5  ;;  %6939 = vmatprep.mubr.msk.bf16.mxu1 %vm8563_vm0, %v8562_v12 }
 0x4e9   : > { %2065 = vrot.lane.b32.xlu0 %v9468_v59, %s8566_s20 }
 0x4ea   : > { %2155 = vrot.lane.b32.xlu1 %v1692_v52, %s8567_s5 }
 0x4ed   : > { %2069 = vrot.lane.b32.xlu0 %v9584_v37, %s8566_s20 }
 0x4ee   : > { %2381 = vrot.lane.b32.xlu1 %v1690_v32, %s8568_s15 }
 0x4f2   : > { %2385 = vrot.lane.b32.xlu1 %v1692_v52, %s8568_s15 }
 0x4f6   : > { %2067 = vrot.lane.b32.xlu1 %v9476_v0, %s8566_s20 }
 0x4fa   : > { %2295 = vrot.lane.b32.xlu1 %v9468_v59, %s8567_s5 }
 0x52f   : > { %v1925_v2 = vpop.permute.xlu0 %1924 }
 0x530   : > { %v1940_v39 = vsel %vm1699_vm2, %v1925_v2, 0 }
 0x531   : > { %6952 = vmatpush3.bf16.xpose.msra.mxu0 %v1940_v39 }
 0x532   : > { %6953 = vmatprep.subr.bf16.mxu0 %v8562_v12 }
 0x537   : > { %v1927_v53 = vpop.permute.xlu1 %1926 }
 0x538   : > { %v1943_v54 = vsel %vm1699_vm2, %v1927_v53, 0 }
 0x539   : > { %6954 = vmatpush3.bf16.xpose.msra.mxu0 %v1943_v54 }
 0x53a   : > { %6955 = vmatprep.subr.bf16.mxu0 %v8562_v12 }
 0x53b   : > { %v1929_v55 = vpop.permute.xlu0 %1928 }
 0x53c   : > { %v1946_v56 = vsel %vm1699_vm2, %v1929_v55, 0 }
 0x53f   : > { %v2158_v57 = vpop.permute.xlu0 %2157 }
 0x540   : > { %v2173_v60 = vsel %vm1699_vm2, %v2158_v57, 0 }
 0x541   : > { %6956 = vmatpush3.bf16.xpose.msra.mxu0 %v1946_v56 }
 0x542   : > { %6987 = vmatprep.subr.bf16.mxu0 %v8562_v12 }
 0x543   : > { %v1916_v58 = vpop.permute.xlu1 %1915  ;;  %v2160_v61 = vpop.permute.xlu0 %2159 }
 0x544   : > { %v2176_v63 = vsel %vm1699_vm2, %v2160_v61, 0 }
 0x547   : > { %v2162_v41 = vpop.permute.xlu0 %2161 }
 0x548   : > { %6958 = vmatmul.mubr.msk.bf16.vlgmr.msra.gmra.mrb[24].mxu0 %vm1699_vm2, %v1916_v58  ;;  %v2179_v45 = vsel %vm1699_vm2, %v2162_v41, 0 }
 0x549   : > { %6988 = vmatpush3.bf16.xpose.msra.mxu0 %v2173_v60  ;;  %6961 = vmatprep.mubr.msk.bf16.mxu0 %vm8563_vm0, %v8562_v12 }
 0x54a   : > { %6989 = vmatprep.subr.bf16.mxu0 %v8562_v12 }
 0x54b   : > { %v1918_v62 = vpop.permute.xlu1 %1917  ;;  %v2388_v3 = vpop.permute.xlu0 %2387 }
 0x54c   : > { %v2403_v5 = vsel %vm1699_vm2, %v2388_v3, 0 }
 0x54f   : > { %v2390_v7 = vpop.permute.xlu0 %2389 }
 0x550   : > { %6962 = vmatmul.mubr.msk.bf16.gmra.mrb[28].mxu0 %vm1699_vm2, %v1918_v62  ;;  %v1920_v1 = vpop.permute.xlu1 %1919  ;;  %v2406_v9 = vsel %vm1699_vm2, %v2390_v7, 0 }
 0x551   : > { %6990 = vmatpush3.bf16.xpose.msra.mxu0 %v2176_v63  ;;  %6965 = vmatprep.mubr.msk.bf16.mxu0 %vm8563_vm0, %v8562_v12 }
 0x552   : > { %6991 = vmatprep.subr.bf16.mxu0 %v8562_v12 }
 0x553   : > { %v2392_v10 = vpop.permute.xlu0 %2391 }
 0x554   : > { %v2152_v4 = vpop.permute.xlu1 %2151  ;;  %v2409_v49 = vsel %vm1699_vm2, %v2392_v10, 0 }
 0x557   : > { %v2384_v16 = vpop.permute.xlu0 %2383 }
 0x558   : > { %6966 = vmatmul.mubr.msk.bf16.gmra.mrb[32].mxu0 %vm1699_vm2, %v1920_v1  ;;  %v2154_v8 = vpop.permute.xlu1 %2153 }
 0x559   : > { %6992 = vmatpush3.bf16.xpose.msra.mxu0 %v2179_v45  ;;  %6993 = vmatprep.mubr.msk.bf16.mxu0 %vm8563_vm0, %v8562_v12 }
 0x55a   : > { %7023 = vmatprep.subr.bf16.mxu0 %v8562_v12 }
 0x55c   : > { %v2156_v11 = vpop.permute.xlu1 %2155 }
 0x560   : > { %6994 = vmatmul.mubr.msk.bf16.vlgmr.msra.gmra.mrb[36].mxu0 %vm1699_vm2, %v2152_v4  ;;  %v2382_v14 = vpop.permute.xlu1 %2381 }
 0x561   : > { %7024 = vmatpush3.bf16.xpose.msra.mxu0 %v2403_v5  ;;  %6997 = vmatprep.mubr.msk.bf16.mxu0 %vm8563_vm0, %v8562_v12 }
 0x562   : > { %7025 = vmatprep.subr.bf16.mxu0 %v8562_v12 }
 0x564   : > { %v2386_v19 = vpop.permute.xlu1 %2385 }
 0x568   : > { %6998 = vmatmul.mubr.msk.bf16.gmra.mrb[40].mxu0 %vm1699_vm2, %v2154_v8 }
 0x569   : > { %7026 = vmatpush3.bf16.xpose.msra.mxu0 %v2406_v9  ;;  %7001 = vmatprep.mubr.msk.bf16.mxu0 %vm8563_vm0, %v8562_v12 }
 0x56a   : > { %7027 = vmatprep.subr.bf16.mxu0 %v8562_v12 }
 0x570   : > { %7002 = vmatmul.mubr.msk.bf16.gmra.mrb[44].mxu0 %vm1699_vm2, %v2156_v11 }
 0x571   : > { %7028 = vmatpush3.bf16.xpose.msra.mxu0 %v2409_v49  ;;  %7029 = vmatprep.mubr.msk.bf16.mxu0 %vm8563_vm0, %v8562_v12 }
 0x572   : > { %7059 = vmatprep.subr.bf16.mxu0 %v8562_v12 }
 0x578   : > { %7030 = vmatmul.mubr.msk.bf16.vlgmr.msra.gmra.mrb[48].mxu0 %vm1699_vm2, %v2382_v14 }
 0x579   : > { %7033 = vmatprep.mubr.msk.bf16.mxu0 %vm8563_vm0, %v8562_v12 }
 0x580   : > { %7034 = vmatmul.mubr.msk.bf16.gmra.mrb[52].mxu0 %vm1699_vm2, %v2384_v16 }
 0x581   : > { %7037 = vmatprep.mubr.msk.bf16.mxu0 %vm8563_vm0, %v8562_v12 }
 0x588   : > { %7038 = vmatmul.mubr.msk.bf16.gmra.mrb[56].mxu0 %vm1699_vm2, %v2386_v19 }
 0x589   : > { %7075 = vmatprep.mubr.msk.bf16.mxu0 %vm8563_vm0, %v8562_v12 }
 0x5a8   : > { %v1752_v21 = vpop.f32.mrb[12].mxu1 }
 0x5a9   : > { %v1774_v23 = vmul.f32 0.17677669, %v1752_v21  ;;  %v6923_v24 = vpop.f32.mrb[13].mxu1 }
 0x5aa   : > { %v1755_v25 = vpop.f32.mrb[14].mxu1  ;;  %v9723_v24 = vpop.permute.xlu1 %2067 }
 0x5ab   : > { %v1775_v27 = vmul.f32 0.17677669, %v1755_v25  ;;  %v6924_v28 = vpop.f32.mrb[15].mxu1  ;;  %v9668_v15 = vadd.f32 %v1774_v23, %v9663_v22  ;;  %v2066_v23 = vpop.permute.xlu0 %2065 }
 0x5ad   : > { %v1785_v29 = vsel %vm1784_vm4, %v9668_v15, -inf  ;;  %v9673_v30 = vadd.f32 %v1775_v27, %v9665_v26 }
 0x5ae   : > { %1786 = vmax.xlane.f32.xlu0 %v1785_v29 }
 0x5af   : > { %v1788_v32 = vsel %vm1784_vm4, %v9673_v30, -inf }
 0x5b0   : > { %v1760_v36 = vpop.f32.mrb[16].mxu1  ;;  %1789 = vmax.xlane.f32.xlu1 %v1788_v32 }
 0x5b1   : > { %v1776_v18 = vmul.f32 0.17677669, %v1760_v36  ;;  %v6927_v20 = vpop.f32.mrb[17].mxu1 }
 0x5b2   : > { %v1763_v31 = vpop.f32.mrb[18].mxu1 }
 0x5b3   : > { %v1777_v38 = vmul.f32 0.17677669, %v1763_v31  ;;  %v6928_v42 = vpop.f32.mrb[19].mxu1  ;;  %v9682_v46 = vadd.f32 %v1776_v18, %v9677_v17  ;;  %v9730_v18 = vpop.permute.xlu0 %2069 }
 0x5b4   : > { %v9734_v31 = vpop.permute.xlu1 %2295 }
 0x5b5   : > { %v1791_v35 = vsel %vm1784_vm4, %v9682_v46, -inf  ;;  %v9687_v47 = vadd.f32 %v1777_v38, %v9679_v34 }
 0x5b6   : > { %1792 = vmax.xlane.f32.xlu0 %v1791_v35 }
 0x5b7   : > { %v1794_v33 = vsel %vm1784_vm4, %v9687_v47, -inf }
 0x5b8   : > { %v1768_v50 = vpop.f32.mrb[20].mxu1 }
 0x5b9   : > { %v1778_v40 = vmul.f32 0.17677669, %v1768_v50  ;;  %v6931_v44 = vpop.f32.mrb[21].mxu1 }
 0x5ba   : > { %1795 = vmax.xlane.f32.xlu0 %v1794_v33  ;;  %v1771_v43 = vpop.f32.mrb[22].mxu1 }
 0x5bb   : > { %v6932_v52 = vpop.f32.mrb[23].mxu1  ;;  %v9694_v48 = vadd.f32 %v1778_v40, %v9689_v51 }
 0x5bd   : > { %v1797_v2 = vsel %vm1784_vm4, %v9694_v48, -inf }
 0x5be   : > { %1798 = vmax.xlane.f32.xlu0 %v1797_v2 }
 0x61b   : > { %v1982_v39 = vpop.f32.mrb[24].mxu0 }
 0x61c   : > { %v2004_v53 = vmul.f32 0.17677669, %v1982_v39  ;;  %v6959_v54 = vpop.f32.mrb[25].mxu0 }
 0x61d   : > { %v1985_v55 = vpop.f32.mrb[26].mxu0 }
 0x61e   : > { %v2005_v56 = vmul.f32 0.17677669, %v1985_v55  ;;  %v6960_v57 = vpop.f32.mrb[27].mxu0  ;;  %v9699_v58 = vadd.f32 %v2004_v53, %v9663_v22 }
 0x620   : > { %v2014_v60 = vsel %vm1784_vm4, %v9699_v58, -inf  ;;  %v9704_v61 = vadd.f32 %v2005_v56, %v9665_v26 }
 0x621   : > { %2015 = vmax.xlane.f32.xlu1 %v2014_v60 }
 0x622   : > { %v2017_v62 = vsel %vm1784_vm4, %v9704_v61, -inf }
 0x623   : > { %2018 = vmax.xlane.f32.xlu0 %v2017_v62  ;;  %v1990_v63 = vpop.f32.mrb[28].mxu0 }
 0x624   : > { %v2006_v41 = vmul.f32 0.17677669, %v1990_v63  ;;  %v6963_v1 = vpop.f32.mrb[29].mxu0 }
 0x625   : > { %v1993_v45 = vpop.f32.mrb[30].mxu0 }
 0x626   : > { %v2007_v3 = vmul.f32 0.17677669, %v1993_v45  ;;  %v6964_v4 = vpop.f32.mrb[31].mxu0  ;;  %v9709_v5 = vadd.f32 %v2006_v41, %v9677_v17 }
 0x628   : > { %v2020_v7 = vsel %vm1784_vm4, %v9709_v5, -inf  ;;  %v9714_v8 = vadd.f32 %v2007_v3, %v9679_v34 }
 0x629   : > { %2021 = vmax.xlane.f32.xlu1 %v2020_v7 }
 0x62a   : > { %v2023_v9 = vsel %vm1784_vm4, %v9714_v8, -inf }
 0x62b   : > { %2024 = vmax.xlane.f32.xlu0 %v2023_v9  ;;  %v1998_v10 = vpop.f32.mrb[32].mxu0 }
 0x62c   : > { %v2008_v11 = vmul.f32 0.17677669, %v1998_v10  ;;  %v6967_v49 = vpop.f32.mrb[33].mxu0 }
 0x62d   : > { %v2001_v14 = vpop.f32.mrb[34].mxu0 }
 0x62e   : > { %v6968_v16 = vpop.f32.mrb[35].mxu0  ;;  %v9719_v19 = vadd.f32 %v2008_v11, %v9689_v51 }
 0x630   : > { %v2026_v21 = vsel %vm1784_vm4, %v9719_v19, -inf }
 0x631   : > { %2027 = vmax.xlane.f32.xlu1 %v2026_v21 }
 0x633   : > { %v2215_v25 = vpop.f32.mrb[36].mxu0 }
 0x634   : > { %v2237_v27 = vmul.f32 0.17677669, %v2215_v25  ;;  %v6995_v28 = vpop.f32.mrb[37].mxu0 }
 0x635   : > { %v9725_v29 = vpop.f32.mrb[38].mxu0 }
 0x636   : > { %v6996_v32 = vpop.f32.mrb[39].mxu0  ;;  %v9728_v36 = vadd.f32 %v2237_v27, %v9663_v22 }
 0x638   : > { %v2247_v20 = vsel %vm1784_vm4, %v9728_v36, -inf }
 0x639   : > { %2248 = vmax.xlane.f32.xlu1 %v2247_v20 }
 0x63b   : > { %v2223_v38 = vpop.f32.mrb[40].mxu0  ;;  %v1787_v42 = vpop.xlane.xlu0 %1786 }
 0x63c   : > { %v2239_v35 = vmul.f32 0.17677669, %v2223_v38  ;;  %v1800_v50 = vsub.f32 %v9668_v15, %v1787_v42  ;;  %v6999_v40 = vpop.f32.mrb[41].mxu0 }
 0x63d   : > { %v1790_v44 = vpop.xlane.xlu1 %1789  ;;  %v2226_v33 = vpop.f32.mrb[42].mxu0 }
 0x63e   : > { %v1805_v43 = vmul.f32 1.442695, %v1800_v50  ;;  %v1801_v52 = vsub.f32 %v9673_v30, %v1790_v44  ;;  %v2240_v2 = vmul.f32 0.17677669, %v2226_v33  ;;  %v7000_v39 = vpop.f32.mrb[43].mxu0  ;;  %v9739_v53 = vadd.f32 %v2239_v35, %v9677_v17 }
 0x63f   : > { %v2238_v50 = vmul.f32 0.17677669, %v9725_v29 }
 0x640   : > { %v1807_v54 = vmul.f32 1.442695, %v1801_v52  ;;  %v2253_v55 = vsel %vm1784_vm4, %v9739_v53, -inf  ;;  %v9744_v56 = vadd.f32 %v2240_v2, %v9679_v34  ;;  %7762 = vpow2.f32 %v1805_v43 }
 0x641   : > { %2297 = vrot.lane.b32.xlu0 %v9476_v0, %s8567_s5  ;;  %2254 = vmax.xlane.f32.xlu1 %v2253_v55 }
 0x642   : > { %7764 = vpow2.f32 %v1807_v54  ;;  %v2256_v63 = vsel %vm1784_vm4, %v9744_v56, -inf }
 0x643   : > { %v2231_v15 = vpop.f32.mrb[44].mxu0  ;;  %v1793_v30 = vpop.xlane.xlu0 %1792 }
 0x644   : > { %v2241_v57 = vmul.f32 0.17677669, %v2231_v15  ;;  %v1802_v60 = vsub.f32 %v9682_v46, %v1793_v30  ;;  %v7003_v62 = vpop.f32.mrb[45].mxu0 }
 0x645   : > { %2257 = vmax.xlane.f32.xlu1 %v2256_v63  ;;  %v2234_v41 = vpop.f32.mrb[46].mxu0 }
 0x646   : > { %v7004_v1 = vpop.f32.mrb[47].mxu0  ;;  %v9752_v45 = vadd.f32 %v2241_v57, %v9689_v51  ;;  %v1809_v3 = vmul.f32 1.442695, %v1802_v60 }
 0x647   : > { %v1796_v4 = vpop.xlane.xlu0 %1795 }
 0x648   : > { %v1803_v7 = vsub.f32 %v9687_v47, %v1796_v4  ;;  %v2259_v9 = vsel %vm1784_vm4, %v9752_v45, -inf  ;;  %7766 = vpow2.f32 %v1809_v3 }
 0x649   : > { %2260 = vmax.xlane.f32.xlu1 %v2259_v9 }
 0x64a   : > { %v1811_v10 = vmul.f32 1.442695, %v1803_v7  ;;  %v9757_v46 = vpop.eup %7762 }
 0x64b   : > { %v2445_v11 = vpop.f32.mrb[48].mxu0  ;;  %v1799_v49 = vpop.xlane.xlu0 %1798 }
 0x64c   : > { %v9759_v14 = vpop.eup %7764  ;;  %7768 = vpow2.f32 %v1811_v10  ;;  %v1804_v16 = vsub.f32 %v9694_v48, %v1799_v49  ;;  %v7031_v21 = vpop.f32.mrb[49].mxu0 }
 0x64d   : > { %v1830_v25 = vpack.c.bf16 %v9759_v14, %v9757_v46  ;;  %v2448_v47 = vpop.f32.mrb[50].mxu0 }
 0x64e   : > { %v1813_v27 = vmul.f32 1.442695, %v1804_v16  ;;  %v7032_v28 = vpop.f32.mrb[51].mxu0  ;;  %v2468_v55 = vmul.f32 0.17677669, %v2448_v47 }
 0x64f   : > { %6940 = vmatmul.mubr.msk.bf16.vlgmr.msra.gmra.mrb[24].mxu1 %vm1784_vm4, %v1830_v25 }
 0x650   : > { %6970 = vmatpush3.bf16.msra.mxu1 %v2066_v23  ;;  %6943 = vmatprep.mubr.msk.bf16.mxu1 %vm8563_vm0, %v8562_v12  ;;  %7770 = vpow2.f32 %v1813_v27  ;;  %v2083_v23 = vsel %vm1842_vm3, %v9730_v18, 0  ;;  %v9786_v18 = vadd.f32 %v2238_v50, %v9665_v26  ;;  %v9803_v30 = vadd.f32 %v2468_v55, %v9665_v26 }
 0x651   : > { %6971 = vmatprep.subr.bf16.mxu1 %v8562_v12 }
 0x652   : > { %v9769_v20 = vpop.eup %7766  ;;  %v2250_v2 = vsel %vm1784_vm4, %v9786_v18, -inf  ;;  %v2480_v57 = vsel %vm1784_vm4, %v9803_v30, -inf }
 0x653   : > { %v2453_v32 = vpop.f32.mrb[52].mxu0 }
 0x654   : > { %6972 = vmatpush3.bf16.msra.mxu1 %v9723_v24  ;;  %v7035_v48 = vpop.f32.mrb[53].mxu0  ;;  %v2467_v24 = vmul.f32 0.17677669, %v2445_v11  ;;  %v2469_v15 = vmul.f32 0.17677669, %v2453_v32 }
 0x655   : > { %v2456_v38 = vpop.f32.mrb[54].mxu0  ;;  %6973 = vmatprep.subr.bf16.mxu1 %v8562_v12 }
 0x656   : > { %v9772_v42 = vpop.eup %7768  ;;  %v7036_v35 = vpop.f32.mrb[55].mxu0  ;;  %v9810_v60 = vadd.f32 %v2469_v15, %v9677_v17 }
 0x657   : > { %v1831_v40 = vpack.c.bf16 %v9772_v42, %v9769_v20 }
 0x658   : > { %6974 = vmatpush3.bf16.msra.mxu1 %v2083_v23  ;;  %v2483_v62 = vsel %vm1784_vm4, %v9810_v60, -inf }
 0x659   : > { %6944 = vmatmul.mubr.msk.bf16.gmra.mrb[28].mxu1 %vm1784_vm4, %v1831_v40  ;;  %7005 = vmatprep.subr.bf16.mxu1 %v8562_v12 }
 0x65a   : > { %2525 = vrot.lane.b32.xlu1 %v9468_v59, %s8568_s15  ;;  %6947 = vmatprep.mubr.msk.bf16.mxu1 %vm8563_vm0, %v8562_v12  ;;  %v9788_v29 = vpop.eup %7770  ;;  %v9795_v59 = vadd.f32 %v2467_v24, %v9663_v22  ;;  %v2470_v22 = vmul.f32 0.17677669, %v2456_v38 }
 0x65b   : > { %v2461_v44 = vpop.f32.mrb[56].mxu0  ;;  %v1832_v39 = vpack.c.bf16 %v9788_v29, %v9788_v29 }
 0x65c   : > { %v7039_v33 = vpop.f32.mrb[57].mxu0  ;;  %v2477_v54 = vsel %vm1784_vm4, %v9795_v59, -inf  ;;  %v9815_v63 = vadd.f32 %v2470_v22, %v9679_v34  ;;  %v2471_v41 = vmul.f32 0.17677669, %v2461_v44 }
 0x65d   : > { %v2464_v43 = vpop.f32.mrb[58].mxu0 }
 0x65e   : > { %v7040_v52 = vpop.f32.mrb[59].mxu0  ;;  %v2486_v26 = vsel %vm1784_vm4, %v9815_v63, -inf  ;;  %v9820_v1 = vadd.f32 %v2471_v41, %v9689_v51 }
 0x660   : > { %2251 = vmax.xlane.f32.xlu0 %v2250_v2  ;;  %v2489_v17 = vsel %vm1784_vm4, %v9820_v1, -inf }
 0x661   : > { %6948 = vmatmul.mubr.msk.bf16.gmra.mrb[32].mxu1 %vm1784_vm4, %v1832_v39 }
 0x662   : > { %6975 = vmatprep.mubr.msk.bf16.mxu1 %vm8563_vm0, %v8562_v12 }
 0x664   : > { %2478 = vmax.xlane.f32.xlu0 %v2477_v54 }
 0x67a   : > { %2299 = vrot.lane.b32.xlu0 %v9584_v37, %s8567_s5 }
 0x67e   : > { %2481 = vmax.xlane.f32.xlu1 %v2480_v57 }
 0x682   : > { %2484 = vmax.xlane.f32.xlu1 %v2483_v62 }
 0x686   : > { %2487 = vmax.xlane.f32.xlu1 %v2486_v26 }
 0x697   : > { %2527 = vrot.lane.b32.xlu1 %v9476_v0, %s8568_s15 }
 0x699   : > { %2490 = vmax.xlane.f32.xlu0 %v2489_v17 }
 0x69b   : > { %2529 = vrot.lane.b32.xlu1 %v9584_v37, %s8568_s15 }
 0x6ae   : > { %v2016_v34 = vpop.xlane.xlu1 %2015 }
 0x6af   : > { %v2029_v3 = vsub.f32 %v9699_v58, %v2016_v34 }
 0x6b0   : > { %v2019_v4 = vpop.xlane.xlu0 %2018 }
 0x6b1   : > { %v2034_v7 = vmul.f32 1.442695, %v2029_v3  ;;  %v2030_v9 = vsub.f32 %v9704_v61, %v2019_v4 }
 0x6b3   : > { %7772 = vpow2.f32 %v2034_v7  ;;  %v2036_v51 = vmul.f32 1.442695, %v2030_v9 }
 0x6b5   : > { %7774 = vpow2.f32 %v2036_v51 }
 0x6b6   : > { %v2022_v10 = vpop.xlane.xlu1 %2021 }
 0x6b7   : > { %v2031_v0 = vsub.f32 %v9709_v5, %v2022_v10 }
 0x6b8   : > { %v2025_v11 = vpop.xlane.xlu0 %2024 }
 0x6b9   : > { %v2038_v49 = vmul.f32 1.442695, %v2031_v0  ;;  %v2032_v16 = vsub.f32 %v9714_v8, %v2025_v11 }
 0x6bb   : > { %7776 = vpow2.f32 %v2038_v49  ;;  %v2040_v21 = vmul.f32 1.442695, %v2032_v16 }
 0x6bc   : > { %v2298_v8 = vpop.permute.xlu0 %2297 }
 0x6bd   : > { %v7773_v37 = vpop.eup %7772  ;;  %7778 = vpow2.f32 %v2040_v21 }
 0x6be   : > { %v2028_v25 = vpop.xlane.xlu1 %2027  ;;  %v2044_v58 = vsel %vm1784_vm4, %v7773_v37, 0.0 }
 0x6bf   : > { %v7775_v47 = vpop.eup %7774  ;;  %v2033_v61 = vsub.f32 %v9719_v19, %v2028_v25  ;;  %2045 = vadd.xlane.f32.xlu1 %v2044_v58 }
 0x6c0   : > { %v2059_v27 = vpack.c.bf16 %v7775_v47, %v7773_v37  ;;  %v2047_v28 = vsel %vm1784_vm4, %v7775_v47, 0.0 }
 0x6c1   : > { %v2042_v32 = vmul.f32 1.442695, %v2033_v61  ;;  %2048 = vadd.xlane.f32.xlu0 %v2047_v28 }
 0x6c2   : > { %6976 = vmatmul.mubr.msk.bf16.vlgmr.msra.gmra.mrb[36].mxu1 %vm1784_vm4, %v2059_v27 }
 0x6c3   : > { %7780 = vpow2.f32 %v2042_v32  ;;  %7006 = vmatpush3.bf16.msra.mxu1 %v9734_v31  ;;  %6979 = vmatprep.mubr.msk.bf16.mxu1 %vm8563_vm0, %v8562_v12 }
 0x6c4   : > { %7007 = vmatprep.subr.bf16.mxu1 %v8562_v12 }
 0x6c5   : > { %v7777_v5 = vpop.eup %7776 }
 0x6c6   : > { %v2249_v48 = vpop.xlane.xlu1 %2248  ;;  %v2050_v19 = vsel %vm1784_vm4, %v7777_v5, 0.0 }
 0x6c7   : > { %v7779_v38 = vpop.eup %7778  ;;  %v2262_v35 = vsub.f32 %v9728_v36, %v2249_v48  ;;  %7008 = vmatpush3.bf16.msra.mxu1 %v2298_v8  ;;  %2051 = vadd.xlane.f32.xlu0 %v2050_v19 }
 0x6c8   : > { %v2060_v23 = vpack.c.bf16 %v7779_v38, %v7777_v5  ;;  %7009 = vmatprep.subr.bf16.mxu1 %v8562_v12  ;;  %v2053_v31 = vsel %vm1784_vm4, %v7779_v38, 0.0 }
 0x6c9   : > { %v2267_v50 = vmul.f32 1.442695, %v2262_v35 }
 0x6ca   : > { %6980 = vmatmul.mubr.msk.bf16.gmra.mrb[40].mxu1 %vm1784_vm4, %v2060_v23 }
 0x6cb   : > { %7782 = vpow2.f32 %v2267_v50  ;;  %2054 = vadd.xlane.f32.xlu0 %v2053_v31  ;;  %6983 = vmatprep.mubr.msk.bf16.mxu1 %vm8563_vm0, %v8562_v12 }
 0x6cd   : > { %v9847_v40 = vpop.eup %7780 }
 0x6ce   : > { %v2255_v24 = vpop.xlane.xlu1 %2254  ;;  %v2061_v44 = vpack.c.bf16 %v9847_v40, %v9847_v40  ;;  %v2056_v31 = vsel %vm1784_vm4, %v9847_v40, 0.0  ;;  %v1815_v40 = vsel %vm1784_vm4, %v9757_v46, 0.0 }
 0x6cf   : > { %v2264_v36 = vsub.f32 %v9739_v53, %v2255_v24 }
 0x6d1   : > { %v2271_v33 = vmul.f32 1.442695, %v2264_v36 }
 0x6d2   : > { %6984 = vmatmul.mubr.msk.bf16.gmra.mrb[44].mxu1 %vm1784_vm4, %v2061_v44  ;;  %v2258_v54 = vpop.xlane.xlu1 %2257 }
 0x6d3   : > { %7784 = vpow2.f32 %v2271_v33  ;;  %7011 = vmatprep.mubr.msk.bf16.mxu1 %vm8563_vm0, %v8562_v12  ;;  %v2265_v15 = vsub.f32 %v9744_v56, %v2258_v54 }
 0x6d5   : > { %v7783_v43 = vpop.eup %7782  ;;  %v2273_v26 = vmul.f32 1.442695, %v2265_v15  ;;  %v1821_v15 = vsel %vm1784_vm4, %v9769_v20, 0.0  ;;  %v1818_v20 = vsel %vm1784_vm4, %v9759_v14, 0.0 }
 0x6d6   : > { %v2277_v52 = vsel %vm1784_vm4, %v7783_v43, 0.0  ;;  %v2261_v17 = vpop.xlane.xlu1 %2260 }
 0x6d7   : > { %2278 = vadd.xlane.f32.xlu0 %v2277_v52  ;;  %v2266_v4 = vsub.f32 %v9752_v45, %v2261_v17 }
 0x6d9   : > { %v2275_v56 = vmul.f32 1.442695, %v2266_v4 }
 0x6dd   : > { %v7785_v2 = vpop.eup %7784 }
 0x6de   : > { %v2283_v39 = vsel %vm1784_vm4, %v7785_v2, 0.0 }
 0x6df   : > { %2284 = vadd.xlane.f32.xlu1 %v2283_v39 }
 0x6ed   : > { %v2252_v53 = vpop.xlane.xlu0 %2251 }
 0x6ee   : > { %v2263_v55 = vsub.f32 %v9786_v18, %v2252_v53 }
 0x6f0   : > { %v2269_v22 = vmul.f32 1.442695, %v2263_v55 }
 0x6f1   : > { %v2479_v57 = vpop.xlane.xlu0 %2478 }
 0x6f2   : > { %7786 = vpow2.f32 %v2269_v22  ;;  %v2492_v62 = vsub.f32 %v9795_v59, %v2479_v57  ;;  %v2526_v59 = vpop.permute.xlu1 %2525  ;;  %v1827_v22 = vsel %vm1784_vm4, %v9788_v29, 0.0  ;;  %v1824_v29 = vsel %vm1784_vm4, %v9772_v42, 0.0 }
 0x6f4   : > { %v2497_v41 = vmul.f32 1.442695, %v2492_v62 }
 0x6f5   : > { %v2300_v34 = vpop.permute.xlu0 %2299 }
 0x6f6   : > { %7788 = vpow2.f32 %v2497_v41  ;;  %v2313_v3 = vsel %vm1842_vm3, %v2300_v34, 0 }
 0x6f7   : > { %7010 = vmatpush3.bf16.msra.mxu1 %v2313_v3  ;;  %7790 = vpow2.f32 %v2273_v26 }
 0x6f8   : > { %7041 = vmatprep.subr.bf16.mxu1 %v8562_v12  ;;  %7792 = vpow2.f32 %v2275_v56 }
 0x6fc   : > { %v7787_v18 = vpop.eup %7786 }
 0x6fd   : > { %v2292_v7 = vpack.c.bf16 %v7787_v18, %v7783_v43  ;;  %v2280_v9 = vsel %vm1784_vm4, %v7787_v18, 0.0 }
 0x6fe   : > { %2281 = vadd.xlane.f32.xlu0 %v2280_v9 }
 0x6ff   : > { %7012 = vmatmul.mubr.msk.bf16.vlgmr.msra.gmra.mrb[48].mxu1 %vm1784_vm4, %v2292_v7 }
 0x700   : > { %v7789_v51 = vpop.eup %7788  ;;  %7042 = vmatpush3.bf16.msra.mxu1 %v2526_v59  ;;  %7015 = vmatprep.mubr.msk.bf16.mxu1 %vm8563_vm0, %v8562_v12 }
 0x701   : > { %v2507_v10 = vsel %vm1784_vm4, %v7789_v51, 0.0  ;;  %7043 = vmatprep.subr.bf16.mxu1 %v8562_v12  ;;  %v7791_v45 = vpop.eup %7790 }
 0x702   : > { %2508 = vadd.xlane.f32.xlu0 %v2507_v10  ;;  %v2293_v0 = vpack.c.bf16 %v7791_v45, %v7785_v2  ;;  %v7793_v11 = vpop.eup %7792  ;;  %v2286_v38 = vsel %vm1784_vm4, %v7791_v45, 0.0 }
 0x703   : > { %v2294_v21 = vpack.c.bf16 %v7793_v11, %v7793_v11  ;;  %v2289_v52 = vsel %vm1784_vm4, %v7793_v11, 0.0 }
 0x707   : > { %7016 = vmatmul.mubr.msk.bf16.gmra.mrb[52].mxu1 %vm1784_vm4, %v2293_v0 }
 0x708   : > { %7019 = vmatprep.mubr.msk.bf16.mxu1 %vm8563_vm0, %v8562_v12 }
 0x70b   : > { %v2482_v49 = vpop.xlane.xlu1 %2481 }
 0x70c   : > { %v2493_v16 = vsub.f32 %v9803_v30, %v2482_v49 }
 0x70e   : > { %v2499_v37 = vmul.f32 1.442695, %v2493_v16 }
 0x70f   : > { %v2485_v25 = vpop.xlane.xlu1 %2484  ;;  %7020 = vmatmul.mubr.msk.bf16.gmra.mrb[56].mxu1 %vm1784_vm4, %v2294_v21 }
 0x710   : > { %7794 = vpow2.f32 %v2499_v37  ;;  %v2494_v58 = vsub.f32 %v9810_v60, %v2485_v25  ;;  %7047 = vmatprep.mubr.msk.bf16.mxu1 %vm8563_vm0, %v8562_v12 }
 0x712   : > { %v2501_v47 = vmul.f32 1.442695, %v2494_v58 }
 0x713   : > { %v2488_v61 = vpop.xlane.xlu1 %2487 }
 0x714   : > { %7796 = vpow2.f32 %v2501_v47  ;;  %v2495_v27 = vsub.f32 %v9815_v63, %v2488_v61 }
 0x716   : > { %v2503_v28 = vmul.f32 1.442695, %v2495_v27 }
 0x717   : > { %v2528_v32 = vpop.permute.xlu1 %2527 }
 0x718   : > { %7798 = vpow2.f32 %v2503_v28  ;;  %7044 = vmatpush3.bf16.msra.mxu1 %v2528_v32 }
 0x719   : > { %7045 = vmatprep.subr.bf16.mxu1 %v8562_v12 }
 0x71a   : > { %v7795_v30 = vpop.eup %7794 }
 0x71b   : > { %v2530_v5 = vpop.permute.xlu1 %2529  ;;  %v2510_v8 = vsel %vm1784_vm4, %v7795_v30, 0.0  ;;  %v2522_v19 = vpack.c.bf16 %v7795_v30, %v7789_v51 }
 0x71c   : > { %v2543_v60 = vsel %vm1842_vm3, %v2530_v5, 0  ;;  %2511 = vadd.xlane.f32.xlu0 %v2510_v8 }
 0x71d   : > { %7046 = vmatpush3.bf16.msra.mxu1 %v2543_v60 }
 0x71e   : > { %v7797_v48 = vpop.eup %7796  ;;  %7087 = vmatprep.subr.bf16.mxu1 %v8562_v12 }
 0x71f   : > { %v2513_v63 = vsel %vm1784_vm4, %v7797_v48, 0.0 }
 0x720   : > { %2514 = vadd.xlane.f32.xlu1 %v2513_v63  ;;  %2287 = vadd.xlane.f32.xlu0 %v2286_v38  ;;  %v7632_v63 = vld [vmem:[%s9255_s3] sm:$0xff]  }
 0x721   : > { %7048 = vmatmul.mubr.msk.bf16.vlgmr.msra.gmra.mrb[60].mxu1 %vm1784_vm4, %v2522_v19  ;;  %7060 = vmatpush3.bf16.msra.mxu0 %v7632_v63 }
 0x722   : > { %v7799_v35 = vpop.eup %7798  ;;  %v9885_v23 = vpop.f32.mrb[24].mxu1  ;;  %7051 = vmatprep.mubr.msk.bf16.mxu1 %vm8563_vm0, %v8562_v12  ;;  %7061 = vmatprep.subr.bf16.mxu0 %v8562_v12 }
 0x723   : > { %v6941_v50 = vpop.f32.mrb[25].mxu1  ;;  %v2516_v24 = vsel %vm1784_vm4, %v7799_v35, 0.0  ;;  %v2523_v2 = vpack.c.bf16 %v7799_v35, %v7797_v48  ;;  %v7633_v35 = vld [vmem:[%s9255_s3 + $0x8] sm:$0xff]  }
 0x724   : > { %2057 = vadd.xlane.f32.xlu1 %v2056_v31  ;;  %v9892_v36 = vpop.f32.mrb[26].mxu1  ;;  %2517 = vadd.xlane.f32.xlu0 %v2516_v24 }
 0x725   : > { %v6942_v44 = vpop.f32.mrb[27].mxu1  ;;  %7062 = vmatpush3.bf16.msra.mxu0 %v7633_v35 }
 0x726   : > { %v2491_v33 = vpop.xlane.xlu0 %2490  ;;  %7063 = vmatprep.subr.bf16.mxu0 %v8562_v12 }
 0x727   : > { %v2496_v43 = vsub.f32 %v9820_v1, %v2491_v33 }
 0x728   : > { %2290 = vadd.xlane.f32.xlu0 %v2289_v52 }
 0x729   : > { %v2505_v39 = vmul.f32 1.442695, %v2496_v43  ;;  %7052 = vmatmul.mubr.msk.bf16.gmra.mrb[64].mxu1 %vm1784_vm4, %v2523_v2  ;;  %v7634_v43 = vld [vmem:[%s9255_s3 + $0x10] sm:$0xff]  }
 0x72a   : > { %7055 = vmatprep.mubr.msk.bf16.mxu1 %vm8563_vm0, %v8562_v12  ;;  %7064 = vmatpush3.bf16.msra.mxu0 %v7634_v43 }
 0x72b   : > { %7800 = vpow2.f32 %v2505_v39  ;;  %7065 = vmatprep.subr.bf16.mxu0 %v8562_v12 }
 0x72c   : > { %v9901_v54 = vpop.f32.mrb[28].mxu1  ;;  %1816 = vadd.xlane.f32.xlu0 %v1815_v40 }
 0x72d   : > { %v6945_v53 = vpop.f32.mrb[29].mxu1 }
 0x72e   : > { %v9903_v55 = vpop.f32.mrb[30].mxu1  ;;  %v7635_v53 = vld [vmem:[%s9255_s3 + $0x18] sm:$0xff]  }
 0x72f   : > { %v6946_v1 = vpop.f32.mrb[31].mxu1  ;;  %7066 = vmatpush3.bf16.msra.mxu0 %v7635_v53 }
 0x730   : > { %1822 = vadd.xlane.f32.xlu0 %v1821_v15  ;;  %7067 = vmatprep.subr.bf16.mxu0 %v8562_v12 }
 0x734   : > { %v9909_v57 = vpop.f32.mrb[32].mxu1  ;;  %1828 = vadd.xlane.f32.xlu0 %v1827_v22 }
 0x735   : > { %v7801_v62 = vpop.eup %7800  ;;  %v6949_v26 = vpop.f32.mrb[33].mxu1 }
 0x736   : > { %v1899_v46 = vpop.f32.mrb[34].mxu1  ;;  %v2519_v41 = vsel %vm1784_vm4, %v7801_v62, 0.0  ;;  %v2524_v17 = vpack.c.bf16 %v7801_v62, %v7801_v62 }
 0x737   : > { %v6950_v34 = vpop.f32.mrb[35].mxu1  ;;  %2520 = vadd.xlane.f32.xlu1 %v2519_v41  ;;  %v7636_v46 = vld [vmem:[%s9255_s3 + $0x20] sm:$0xff]  }
 0x738   : > { %7056 = vmatmul.mubr.msk.bf16.gmra.mrb[68].mxu1 %vm1784_vm4, %v2524_v17  ;;  %7068 = vmatpush3.bf16.msra.mxu0 %v7636_v46 }
 0x739   : > { %7103 = vmatprep.mubr.msk.bf16.mxu1 %vm8563_vm0, %v8562_v12  ;;  %7069 = vmatprep.subr.bf16.mxu0 %v8562_v12 }
 0x73b   : > { %1819 = vadd.xlane.f32.xlu1 %v1818_v20 }
 0x73f   : > { %1825 = vadd.xlane.f32.xlu1 %v1824_v29  ;;  %v7637_v29 = vld [vmem:[%s9255_s3 + $0x28] sm:$0xff]  }
 0x740   : > { %7070 = vmatpush3.bf16.msra.mxu0 %v7637_v29 }
 0x741   : > { %7071 = vmatprep.subr.bf16.mxu0 %v8562_v12 }
 0x74c   : > { %v2046_v4 = vpop.xlane.xlu1 %2045 }
 0x74d   : > { %7802 = vrcp.f32 %v2046_v4 }
 0x74e   : > { %v2049_v3 = vpop.xlane.xlu0 %2048 }
 0x74f   : > { %7804 = vrcp.f32 %v2049_v3 }
 0x754   : > { %v2052_v18 = vpop.xlane.xlu0 %2051 }
 0x755   : > { %7806 = vrcp.f32 %v2052_v18 }
 0x757   : > { %v7803_v9 = vpop.eup %7802 }
 0x758   : > { %v2055_v56 = vpop.xlane.xlu0 %2054 }
 0x759   : > { %7808 = vrcp.f32 %v2055_v56  ;;  %v7805_v51 = vpop.eup %7804  ;;  %v7638_v56 = vld [vmem:[%s9255_s3 + $0x30] sm:$0xff]  }
 0x75a   : > { %7072 = vmatpush3.bf16.msra.mxu0 %v7638_v56 }
 0x75b   : > { %7073 = vmatprep.subr.bf16.mxu0 %v8562_v12 }
 0x75f   : > { %v7807_v49 = vpop.eup %7806 }
 0x763   : > { %v7809_v21 = vpop.eup %7808 }
 0x764   : > { %v2279_v5 = vpop.xlane.xlu0 %2278 }
 0x765   : > { %7810 = vrcp.f32 %v2279_v5 }
 0x76c   : > { %v2285_v19 = vpop.xlane.xlu1 %2284 }
 0x76f   : > { %v7811_v31 = vpop.eup %7810 }
 0x78b   : > { %v2282_v8 = vpop.xlane.xlu0 %2281 }
 0x78c   : > { %7812 = vrcp.f32 %v2282_v8 }
 0x78d   : > { %7814 = vrcp.f32 %v2285_v19 }
 0x78f   : > { %v2509_v60 = vpop.xlane.xlu0 %2508 }
 0x795   : > { %v2119_v7 = vpop.f32.mrb[36].mxu1 }
 0x796   : > { %v6977_v59 = vpop.f32.mrb[37].mxu1  ;;  %v2142_v45 = vmul.f32 %v7803_v9, %v2119_v7  ;;  %v7813_v44 = vpop.eup %7812  ;;  %v7639_v9 = vld [vmem:[%s9255_s3 + $0x38] sm:$0xff]  }
 0x797   : > { %v2122_v10 = vpop.f32.mrb[38].mxu1  ;;  %v7815_v15 = vpop.eup %7814  ;;  %7074 = vmatpush3.bf16.msra.mxu0 %v7639_v9 }
 0x798   : > { %v2144_v14 = vmul.f32 %v7805_v51, %v2122_v10  ;;  %v6978_v0 = vpop.f32.mrb[39].mxu1  ;;  %7115 = vmatprep.subr.bf16.mxu0 %v8562_v12 }
 0x79a   : > { %v7548_v11 = vpack.i.bf16 %v2144_v14, %v2142_v45 }
 0x79c   : > { %7549 = vrot.lane.b32.xlu1 %v7548_v11, %s8568_s15 }
 0x79d   : > { %v2127_v42 = vpop.f32.mrb[40].mxu1 }
 0x79e   : > { %v6981_v16 = vpop.f32.mrb[41].mxu1  ;;  %v9920_v25 = vmul.f32 %v7807_v49, %v2127_v42 }
 0x79f   : > { %v2130_v37 = vpop.f32.mrb[42].mxu1 }
 0x7a0   : > { %v9922_v58 = vmul.f32 %v7809_v21, %v2130_v37  ;;  %v6982_v47 = vpop.f32.mrb[43].mxu1 }
 0x7a2   : > { %v7563_v61 = vpack.i.bf16 %v9922_v58, %v9920_v25 }
 0x7a5   : > { %v9926_v27 = vpop.f32.mrb[44].mxu1 }
 0x7a6   : > { %v6985_v28 = vpop.f32.mrb[45].mxu1 }
 0x7a7   : > { %v2138_v32 = vpop.f32.mrb[46].mxu1 }
 0x7a8   : > { %v6986_v30 = vpop.f32.mrb[47].mxu1 }
 0x7a9   : > { %v2512_v48 = vpop.xlane.xlu0 %2511 }
 0x7ad   : > { %v2288_v38 = vpop.xlane.xlu0 %2287  ;;  %v2515_v59 = vpop.xlane.xlu1 %2514 }
 0x7ae   : > { %7816 = vrcp.f32 %v2288_v38 }
 0x7af   : > { %7818 = vrcp.f32 %v2509_v60 }
 0x7b0   : > { %7820 = vrcp.f32 %v2512_v48 }
 0x7b1   : > { %v2518_v51 = vpop.xlane.xlu0 %2517  ;;  %7822 = vrcp.f32 %v2515_v59  ;;  %v2058_v14 = vpop.xlane.xlu1 %2057 }
 0x7b2   : > { %7824 = vrcp.f32 %v2518_v51 }
 0x7b3   : > { %7826 = vrcp.f32 %v2058_v14 }
 0x7b5   : > { %v2291_v49 = vpop.xlane.xlu0 %2290 }
 0x7b6   : > { %7828 = vrcp.f32 %v2291_v49 }
 0x7b8   : > { %v7817_v62 = vpop.eup %7816 }
 0x7b9   : > { %v7819_v45 = vpop.eup %7818 }
 0x7ba   : > { %v7821_v11 = vpop.eup %7820 }
 0x7bb   : > { %v7823_v32 = vpop.eup %7822 }
 0x7bc   : > { %v7825_v5 = vpop.eup %7824 }
 0x7bd   : > { %v7827_v35 = vpop.eup %7826 }
 0x7c4   : > { %v2521_v8 = vpop.xlane.xlu1 %2520 }
 0x7c5   : > { %7830 = vrcp.f32 %v2521_v8 }
 0x7d2   : > { %v2349_v50 = vpop.f32.mrb[48].mxu1 }
 0x7d3   : > { %v7013_v24 = vpop.f32.mrb[49].mxu1  ;;  %v2372_v52 = vmul.f32 %v7811_v31, %v2349_v50  ;;  %v7829_v50 = vpop.eup %7828 }
 0x7d4   : > { %v2352_v33 = vpop.f32.mrb[50].mxu1  ;;  %v2150_v24 = vmul.f32 %v7827_v35, %v9926_v27 }
 0x7d5   : > { %v2374_v2 = vmul.f32 %v7813_v44, %v2352_v33  ;;  %v7014_v39 = vpop.f32.mrb[51].mxu1  ;;  %v7831_v44 = vpop.eup %7830 }
 0x7d7   : > { %v7553_v40 = vpack.i.bf16 %v2374_v2, %v2372_v52  ;;  %v1817_v52 = vpop.xlane.xlu0 %1816  ;;  %v1820_v2 = vpop.xlane.xlu1 %1819 }
 0x7d8   : > { %7832 = vrcp.f32 %v1817_v52 }
 0x7d9   : > { %7554 = vrot.lane.b32.xlu0 %v7553_v40, %s8567_s5  ;;  %7834 = vrcp.f32 %v1820_v2 }
 0x7da   : > { %v2357_v1 = vpop.f32.mrb[52].mxu1 }
 0x7db   : > { %v7017_v22 = vpop.f32.mrb[53].mxu1  ;;  %v2376_v41 = vmul.f32 %v7815_v15, %v2357_v1  ;;  %v1823_v39 = vpop.xlane.xlu0 %1822 }
 0x7dc   : > { %v2360_v26 = vpop.f32.mrb[54].mxu1  ;;  %v1826_v40 = vpop.xlane.xlu1 %1825  ;;  %7836 = vrcp.f32 %v1823_v39  ;;  %v8023_v39 = vld [vmem:[#allocation2 + $0x8] sm:$0xff] }
 0x7dd   : > { %v2378_v17 = vmul.f32 %v7817_v62, %v2360_v26  ;;  %v7018_v34 = vpop.f32.mrb[55].mxu1  ;;  %7838 = vrcp.f32 %v1826_v40 }
 0x7df   : > { %v7568_v20 = vpack.i.bf16 %v2378_v17, %v2376_v41  ;;  %v1829_v53 = vpop.xlane.xlu0 %1828 }
 0x7e0   : > { %7840 = vrcp.f32 %v1829_v53 }
 0x7e2   : > { %v2365_v3 = vpop.f32.mrb[56].mxu1  ;;  %v7833_v1 = vpop.eup %7832 }
 0x7e3   : > { %v7021_v4 = vpop.f32.mrb[57].mxu1  ;;  %v2380_v31 = vmul.f32 %v7829_v50, %v2365_v3  ;;  %v7835_v22 = vpop.eup %7834  ;;  %v1903_v34 = vmul.f32 %v7833_v1, %v9885_v23 }
 0x7e4   : > { %v2368_v18 = vpop.f32.mrb[58].mxu1  ;;  %v1905_v17 = vmul.f32 %v7835_v22, %v9892_v36  ;;  %v8024_v22 = vld [vmem:[#allocation2 + $0x10] sm:$0xff] }
 0x7e5   : > { %v7022_v7 = vpop.f32.mrb[59].mxu1 }
 0x7e6   : > { %v7837_v59 = vpop.eup %7836 }
 0x7f4   : > { %v2579_v10 = vpop.f32.mrb[60].mxu1 }
 0x7f5   : > { %v7049_v0 = vpop.f32.mrb[61].mxu1  ;;  %v2602_v16 = vmul.f32 %v7819_v45, %v2579_v10  ;;  %v7839_v10 = vpop.eup %7838 }
 0x7f6   : > { %v2582_v42 = vpop.f32.mrb[62].mxu1  ;;  %v1909_v0 = vmul.f32 %v7839_v10, %v9903_v55 }
 0x7f7   : > { %v2604_v21 = vmul.f32 %v7821_v11, %v2582_v42  ;;  %v7050_v37 = vpop.f32.mrb[63].mxu1  ;;  %v1907_v11 = vmul.f32 %v7837_v59, %v9901_v54  ;;  %v7643_v59 = vld [vmem:[%s9258_s18 + $0x1c] ss:$12 sps:$4 sm:$0xff]  }
 0x7f9   : > { %v7558_v47 = vpack.i.bf16 %v2604_v21, %v2602_v16 }
 0x7fb   : > { %7559 = vrot.lane.b32.xlu1 %v7558_v47, %s8566_s20 }
 0x7fc   : > { %v2587_v28 = vpop.f32.mrb[64].mxu1 }
 0x7fd   : > { %v7053_v30 = vpop.f32.mrb[65].mxu1  ;;  %v2606_v48 = vmul.f32 %v7823_v32, %v2587_v28  ;;  %v7841_v28 = vpop.eup %7840 }
 0x7fe   : > { %v2590_v60 = vpop.f32.mrb[66].mxu1 }
 0x7ff   : > { %v2608_v19 = vmul.f32 %v7825_v5, %v2590_v60  ;;  %v7054_v63 = vpop.f32.mrb[67].mxu1  ;;  %7564 = vrot.lane.b32.xlu1 %v7563_v61, %s8568_s15 }
 0x801   : > { %v7573_v38 = vpack.i.bf16 %v2608_v19, %v2606_v48  ;;  %v1911_v19 = vmul.f32 %v7841_v28, %v9909_v57  ;;  %v6370_v57 = vld [vmem:[%s1096_s30] ss:$0 sm:$0xff] }
 0x803   : > { %7569 = vrot.lane.b32.xlu1 %v7568_v20, %s8567_s5  ;;  %7574 = vrot.lane.b32.xlu0 %v7573_v38, %s8566_s20 }
 0x807   : > { %2624 = vrot.lane.b32.xlu1 %v2150_v24, %s8568_s15  ;;  %2644 = vrot.lane.b32.xlu0 %v2380_v31, %s8567_s5 }
 0x80b   : > { %v2595_v33 = vpop.f32.mrb[68].mxu1 }
 0x80c   : > { %v2610_v43 = vmul.f32 %v7831_v44, %v2595_v33  ;;  %v7057_v25 = vpop.f32.mrb[69].mxu1 }
 0x80d   : > { %v2598_v58 = vpop.f32.mrb[70].mxu1 }
 0x80e   : > { %v7058_v61 = vpop.f32.mrb[71].mxu1  ;;  %2664 = vrot.lane.b32.xlu1 %v2610_v43, %s8566_s20  ;;  %v7550_v27 = vpop.permute.xlu1 %7549  ;;  %v8022_v58 = vld [vmem:[#allocation2] sm:$0xff] }
 0x80f   : > { %v7552_v62 = vunpack.i.h.bf16 %v7550_v27  ;;  %v7551_v26 = vunpack.i.l.bf16 %v7550_v27 }
 0x811   : > { %v2672_v29 = vsel %vm1699_vm2, %v1905_v17, %v7552_v62  ;;  %v2671_v3 = vsel %vm1699_vm2, %v1903_v34, %v7551_v26 }
 0x84b   : > { %v7555_v15 = vpop.permute.xlu0 %7554 }
 0x84c   : > { %v7557_v46 = vunpack.i.h.bf16 %v7555_v15  ;;  %v7556_v41 = vunpack.i.l.bf16 %v7555_v15 }
 0x84e   : > { %v2678_v56 = vsel %vm2676_vm5, %v2672_v29, %v7557_v46  ;;  %v2677_v7 = vsel %vm2676_vm5, %v2671_v3, %v7556_v41  ;;  %v8025_v41 = vld [vmem:[#allocation2 + $0x18] sm:$0xff] }
 0x86d   : > { %v7560_v20 = vpop.permute.xlu1 %7559 }
 0x86e   : > { %v7562_v4 = vunpack.i.h.bf16 %v7560_v20  ;;  %v7561_v18 = vunpack.i.l.bf16 %v7560_v20 }
 0x870   : > { %v2683_v9 = vsel %vm2682_vm6, %v2677_v7, %v7561_v18  ;;  %v2684_v36 = vsel %vm2682_vm6, %v2678_v56, %v7562_v4  ;;  %v8026_v4 = vld [vmem:[#allocation2 + $0x20] sm:$0xff]  ;;  %v7640_v7 = vld [vmem:[%s9258_s18] ss:$12 sps:$4 sm:$0xff]  }
 0x871   : > { %v2688_v23 = vpack.c.bf16 %v2684_v36, %v2683_v9  ;;  %v7565_v51 = vpop.permute.xlu1 %7564  ;;  %v7641_v9 = vld [vmem:[%s9258_s18 + $0x4] ss:$12 sps:$4 sm:$0xff]   ;;  %7088 = vmatpush3.bf16.msra.mxu1 %v7640_v7  ;;  %v6382_v7 = vld [vmem:[%s9245_s17 + $0x1] ss:$0 sm:$0xff] }
 0x872   : > { %v7567_v45 = vunpack.i.h.bf16 %v7565_v51  ;;  %v7566_v14 = vunpack.i.l.bf16 %v7565_v51  ;;  %v7642_v36 = vld [vmem:[%s9258_s18 + $0x18] ss:$12 sps:$4 sm:$0xff]   ;;  %7089 = vmatprep.subr.bf16.mxu1 %v8562_v12 }
 0x873   : > { %7076 = vmatmul.mubr.bf16.vlgmr.msra.gmra.mrb[60].mxu0 %v2688_v23 }
 0x874   : > { %7079 = vmatprep.mubr.msk.bf16.mxu0 %vm8563_vm0, %v8562_v12  ;;  %v2674_v32 = vsel %vm1699_vm2, %v1909_v0, %v7567_v45  ;;  %v2673_v30 = vsel %vm1699_vm2, %v1907_v11, %v7566_v14  ;;  %7116 = vmatpush3.bf16.msra.mxu0 %v7641_v9 }
 0x875   : > { %v7570_v42 = vpop.permute.xlu1 %7569  ;;  %v7575_v49 = vpop.permute.xlu0 %7574  ;;  %7117 = vmatprep.subr.bf16.mxu0 %v8562_v12  ;;  %7090 = vmatpush3.bf16.msra.mxu1 %v7642_v36 }
 0x876   : > { %v7572_v16 = vunpack.i.h.bf16 %v7570_v42  ;;  %v7571_v21 = vunpack.i.l.bf16 %v7570_v42  ;;  %v7577_v37 = vunpack.i.h.bf16 %v7575_v49  ;;  %v7576_v47 = vunpack.i.l.bf16 %v7575_v49  ;;  %7091 = vmatprep.subr.bf16.mxu1 %v8562_v12 }
 0x878   : > { %v2679_v5 = vsel %vm2676_vm5, %v2673_v30, %v7571_v21  ;;  %v2680_v8 = vsel %vm2676_vm5, %v2674_v32, %v7572_v16  ;;  %7118 = vmatpush3.bf16.msra.mxu0 %v7643_v59 }
 0x879   : > { %v2685_v55 = vsel %vm2682_vm6, %v2679_v5, %v7576_v47  ;;  %v2686_v54 = vsel %vm2682_vm6, %v2680_v8, %v7577_v37  ;;  %v2625_v60 = vpop.permute.xlu1 %2624  ;;  %v2645_v38 = vpop.permute.xlu0 %2644  ;;  %7119 = vmatprep.subr.bf16.mxu0 %v8562_v12 }
 0x87a   : > { %v2689_v48 = vpack.c.bf16 %v2686_v54, %v2685_v55  ;;  %v2675_v63 = vsel %vm1699_vm2, %v1911_v19, %v2625_v60  ;;  %v7644_v54 = vld [vmem:[%s9258_s18 + $0x30] ss:$12 sps:$4 sm:$0xff]   ;;  %v7645_v60 = vld [vmem:[%s9258_s18 + $0x34] ss:$12 sps:$4 sm:$0xff]  }
 0x87b   : > { %v2681_v35 = vsel %vm2676_vm5, %v2675_v63, %v2645_v38  ;;  %7092 = vmatpush3.bf16.msra.mxu1 %v7644_v54  ;;  %v7646_v19 = vld [vmem:[%s9258_s18 + $0x48] ss:$12 sps:$4 sm:$0xff]   ;;  %v7647_v63 = vld [vmem:[%s9258_s18 + $0x4c] ss:$12 sps:$4 sm:$0xff]  }
 0x87c   : > { %7080 = vmatmul.mubr.bf16.gmra.mrb[64].mxu0 %v2689_v48  ;;  %7093 = vmatprep.subr.bf16.mxu1 %v8562_v12  ;;  %v7648_v38 = vld [vmem:[%s9258_s18 + $0x60] ss:$12 sps:$4 sm:$0xff]  }
 0x87d   : > { %7083 = vmatprep.mubr.msk.bf16.mxu0 %vm8563_vm0, %v8562_v12  ;;  %7120 = vmatpush3.bf16.msra.mxu0 %v7645_v60 }
 0x87e   : > { %7121 = vmatprep.subr.bf16.mxu0 %v8562_v12 }
 0x87f   : > { %7094 = vmatpush3.bf16.msra.mxu1 %v7646_v19  ;;  %v7662_v19 = vld [vmem:[%s9258_s18 + $0x98] ss:$12 sps:$4 sm:$0xff]  }
 0x880   : > { %v2665_v50 = vpop.permute.xlu1 %2664  ;;  %7095 = vmatprep.subr.bf16.mxu1 %v8562_v12 }
 0x881   : > { %v2687_v31 = vsel %vm2682_vm6, %v2681_v35, %v2665_v50  ;;  %7122 = vmatpush3.bf16.msra.mxu0 %v7647_v63  ;;  %v7649_v35 = vld [vmem:[%s9258_s18 + $0x64] ss:$12 sps:$4 sm:$0xff]  }
 0x882   : > { %v2690_v24 = vpack.c.bf16 %v2687_v31, %v2687_v31  ;;  %7123 = vmatprep.subr.bf16.mxu0 %v8562_v12  ;;  %v7650_v50 = vld [vmem:[%s9258_s18 + $0x78] ss:$12 sps:$4 sm:$0xff]   ;;  %v7651_v31 = vld [vmem:[%s9258_s18 + $0x7c] ss:$12 sps:$4 sm:$0xff]  }
 0x883   : > { %7096 = vmatpush3.bf16.msra.mxu1 %v7648_v38  ;;  %v7663_v63 = vld [vmem:[%s9258_s18 + $0xb0] ss:$12 sps:$4 sm:$0xff]  }
 0x884   : > { %7084 = vmatmul.mubr.bf16.gmra.mrb[68].mxu0 %v2690_v24  ;;  %7097 = vmatprep.subr.bf16.mxu1 %v8562_v12  ;;  %v7652_v24 = vld [vmem:[%s9258_s18 + $0x90] ss:$12 sps:$4 sm:$0xff]  }
 0x885   : > { %7131 = vmatprep.mubr.msk.bf16.mxu0 %vm8563_vm0, %v8562_v12  ;;  %7124 = vmatpush3.bf16.msra.mxu0 %v7649_v35 }
 0x886   : > { %7125 = vmatprep.subr.bf16.mxu0 %v8562_v12 }
 0x887   : > { %7098 = vmatpush3.bf16.msra.mxu1 %v7650_v50 }
 0x888   : > { %7099 = vmatprep.subr.bf16.mxu1 %v8562_v12 }
 0x889   : > { %7126 = vmatpush3.bf16.msra.mxu0 %v7651_v31 }
 0x88a   : > { %7127 = vmatprep.subr.bf16.mxu0 %v8562_v12 }
 0x88b   : > { %7100 = vmatpush3.bf16.msra.mxu1 %v7652_v24 }
 0x88c   : > { %7101 = vmatprep.subr.bf16.mxu1 %v8562_v12 }
 0x946   : > { %v2795_v44 = vpop.f32.mrb[60].mxu0 }
 0x947   : > { %v2796_v33 = vadd.f32 %v6370_v57, %v2795_v44  ;;  %v7077_v43 = vpop.f32.mrb[61].mxu0  ;;  %v7654_v44 = vld [vmem:[%s9258_s18 + $0xa8] ss:$12 sps:$4 sm:$0xff]  }
 0x948   : > { %v2798_v25 = vpop.f32.mrb[62].mxu0  ;;  %7102 = vmatpush3.bf16.msra.mxu1 %v7654_v44 }
 0x949   : > { %v9987_v61 = vadd.f32 %v8022_v58, %v2796_v33  ;;  %v2799_v52 = vadd.f32 %v6370_v57, %v2798_v25  ;;  %v7078_v2 = vpop.f32.mrb[63].mxu0  ;;  %v7655_v33 = vld [vmem:[%s9258_s18 + $0xac] ss:$12 sps:$4 sm:$0xff]   ;;  %7143 = vmatprep.subr.bf16.mxu1 %v8562_v12 }
 0x94b   : > { %v9989_v40 = vadd.f32 %v8023_v39, %v2799_v52  ;;  %2826 = vadd.xlane.f32.xlu0 %v9987_v61 }
 0x94d   : > { %2828 = vadd.xlane.f32.xlu1 %v9989_v40 }
 0x94f   : > { %v2803_v53 = vpop.f32.mrb[64].mxu0 }
 0x950   : > { %v2804_v27 = vadd.f32 %v6370_v57, %v2803_v53  ;;  %v7081_v1 = vpop.f32.mrb[65].mxu0 }
 0x951   : > { %v2806_v15 = vpop.f32.mrb[66].mxu0 }
 0x952   : > { %v9993_v62 = vadd.f32 %v8024_v22, %v2804_v27  ;;  %v2807_v26 = vadd.f32 %v6370_v57, %v2806_v15  ;;  %v7082_v46 = vpop.f32.mrb[67].mxu0 }
 0x953   : > { %v6381_v46 = vld [vmem:[%s9238_s23 + $0x1] ss:$0 sm:$0xff] }
 0x954   : > { %2830 = vadd.xlane.f32.xlu0 %v9993_v62  ;;  %v9996_v17 = vadd.f32 %v8025_v41, %v2807_v26 }
 0x957   : > { %v2811_v34 = vpop.f32.mrb[68].mxu0 }
 0x958   : > { %2832 = vadd.xlane.f32.xlu0 %v9996_v17  ;;  %v2812_v20 = vadd.f32 %v6370_v57, %v2811_v34  ;;  %v7085_v29 = vpop.f32.mrb[69].mxu0  ;;  %v7653_v57 = vld [vmem:[%s9258_s18 + $0x94] ss:$12 sps:$4 sm:$0xff]  }
 0x959   : > { %v2814_v3 = vpop.f32.mrb[70].mxu0  ;;  %7128 = vmatpush3.bf16.msra.mxu0 %v7653_v57 }
 0x95a   : > { %v9999_v18 = vadd.f32 %v8026_v4, %v2812_v20  ;;  %v7086_v56 = vpop.f32.mrb[71].mxu0  ;;  %7129 = vmatprep.subr.bf16.mxu0 %v8562_v12 }
 0x95c   : > { %2834 = vadd.xlane.f32.xlu0 %v9999_v18 }
 0x95d   : > { %7130 = vmatpush3.bf16.msra.mxu0 %v7655_v33 }
 0x95e   : > { %7171 = vmatprep.subr.bf16.mxu0 %v8562_v12 }
 0x9d8   : > { %v2827_v23 = vpop.xlane.xlu0 %2826 }
 0x9d9   : > { %v2836_v51 = vmul.f32 0.0078125, %v2827_v23 }
 0x9da   : > { %v2829_v10 = vpop.xlane.xlu1 %2828 }
 0x9db   : > { %v10011_v45 = vsub.f32 %v9987_v61, %v2836_v51  ;;  %v2837_v14 = vmul.f32 0.0078125, %v2829_v10  ;;  %v7656_v51 = vld [vmem:[%s9258_s18 + $0x8] ss:$12 sps:$4 sm:$0xff]  }
 0x9dd   : > { %v10014_v0 = vsub.f32 %v9989_v40, %v2837_v14  ;;  %v2846_v11 = vmul.f32 %v10011_v45, %v10011_v45 }
 0x9df   : > { %2851 = vadd.xlane.f32.xlu1 %v2846_v11  ;;  %v2847_v42 = vmul.f32 %v10014_v0, %v10014_v0  ;;  %v7657_v11 = vld [vmem:[%s9258_s18 + $0x20] ss:$12 sps:$4 sm:$0xff]  }
 0x9e1   : > { %v2831_v49 = vpop.xlane.xlu0 %2830  ;;  %2853 = vadd.xlane.f32.xlu0 %v2847_v42 }
 0x9e2   : > { %v2838_v16 = vmul.f32 0.0078125, %v2831_v49 }
 0x9e4   : > { %v10021_v21 = vsub.f32 %v9993_v62, %v2838_v16  ;;  %v7658_v16 = vld [vmem:[%s9258_s18 + $0x38] ss:$12 sps:$4 sm:$0xff]  }
 0x9e5   : > { %v2833_v37 = vpop.xlane.xlu0 %2832 }
 0x9e6   : > { %v2839_v47 = vmul.f32 0.0078125, %v2833_v37  ;;  %v2848_v28 = vmul.f32 %v10021_v21, %v10021_v21 }
 0x9e8   : > { %v10026_v32 = vsub.f32 %v9996_v17, %v2839_v47  ;;  %2855 = vadd.xlane.f32.xlu1 %v2848_v28 }
 0x9e9   : > { %v2835_v30 = vpop.xlane.xlu0 %2834 }
 0x9ea   : > { %v2840_v5 = vmul.f32 0.0078125, %v2835_v30  ;;  %v2849_v8 = vmul.f32 %v10026_v32, %v10026_v32 }
 0x9ec   : > { %v10031_v55 = vsub.f32 %v9999_v18, %v2840_v5  ;;  %2857 = vadd.xlane.f32.xlu0 %v2849_v8  ;;  %v7659_v8 = vld [vmem:[%s9258_s18 + $0x50] ss:$12 sps:$4 sm:$0xff]  }
 0x9ee   : > { %v2850_v48 = vmul.f32 %v10031_v55, %v10031_v55 }
 0x9f0   : > { %2859 = vadd.xlane.f32.xlu1 %v2850_v48  ;;  %v7661_v48 = vld [vmem:[%s9258_s18 + $0x80] ss:$12 sps:$4 sm:$0xff]  }
 0xa6c   : > { %v2852_v43 = vpop.xlane.xlu1 %2851 }
 0xa6d   : > { %v2861_v25 = vmul.f32 0.0078125, %v2852_v43 }
 0xa6e   : > { %v2854_v58 = vpop.xlane.xlu0 %2853 }
 0xa6f   : > { %v2866_v52 = vadd.f32 1e-05, %v2861_v25  ;;  %v2862_v2 = vmul.f32 0.0078125, %v2854_v58 }
 0xa71   : > { %7842 = vrsqrt.f32 %v2866_v52  ;;  %v2867_v39 = vadd.f32 1e-05, %v2862_v2 }
 0xa73   : > { %7844 = vrsqrt.f32 %v2867_v39 }
 0xa75   : > { %v2856_v53 = vpop.xlane.xlu1 %2855 }
 0xa76   : > { %v2863_v27 = vmul.f32 0.0078125, %v2856_v53 }
 0xa78   : > { %v2868_v1 = vadd.f32 1e-05, %v2863_v27 }
 0xa79   : > { %v2858_v15 = vpop.xlane.xlu0 %2857 }
 0xa7a   : > { %7846 = vrsqrt.f32 %v2868_v1  ;;  %v2864_v22 = vmul.f32 0.0078125, %v2858_v15 }
 0xa7b   : > { %v7843_v26 = vpop.eup %7842 }
 0xa7c   : > { %v2876_v41 = vmul.f32 %v7843_v26, %v10011_v45  ;;  %v2869_v34 = vadd.f32 1e-05, %v2864_v22 }
 0xa7d   : > { %v7845_v20 = vpop.eup %7844  ;;  %v2860_v29 = vpop.xlane.xlu1 %2859 }
 0xa7e   : > { %v2887_v3 = vmul.f32 %v6381_v46, %v2876_v41  ;;  %v2877_v4 = vmul.f32 %v7845_v20, %v10014_v0  ;;  %7848 = vrsqrt.f32 %v2869_v34  ;;  %v2865_v56 = vmul.f32 0.0078125, %v2860_v29 }
 0xa80   : > { %v2888_v9 = vmul.f32 %v6381_v46, %v2877_v4  ;;  %v2870_v36 = vadd.f32 1e-05, %v2865_v56  ;;  %v2898_v59 = vadd.f32 %v6382_v7, %v2887_v3 }
 0xa82   : > { %7850 = vrsqrt.f32 %v2870_v36  ;;  %v2899_v23 = vadd.f32 %v6382_v7, %v2888_v9 }
 0xa84   : > { %v7847_v10 = vpop.eup %7846  ;;  %v2904_v14 = vpack.c.bf16 %v2899_v23, %v2898_v59 }
 0xa85   : > { %v2878_v45 = vmul.f32 %v7847_v10, %v10021_v21 }
 0xa86   : > { %7104 = vmatmul.mubr.bf16.vlgmr.msra.gmra.mrb[72].mxu1 %v2904_v14  ;;  %7132 = vmatmul.mubr.bf16.vlgmr.msra.gmra.mrb[72].mxu0 %v2904_v14 }
 0xa87   : > { %7144 = vmatpush3.bf16.msra.mxu1 %v7656_v51  ;;  %7107 = vmatprep.mubr.msk.bf16.mxu1 %vm8563_vm0, %v8562_v12  ;;  %v2889_v49 = vmul.f32 %v6381_v46, %v2878_v45 }
 0xa88   : > { %v7849_v0 = vpop.eup %7848  ;;  %7145 = vmatprep.subr.bf16.mxu1 %v8562_v12  ;;  %7135 = vmatprep.mubr.msk.bf16.mxu0 %vm8563_vm0, %v8562_v12 }
 0xa89   : > { %v2879_v42 = vmul.f32 %v7849_v0, %v10026_v32  ;;  %v2900_v47 = vadd.f32 %v6382_v7, %v2889_v49  ;;  %v7660_v32 = vld [vmem:[%s9258_s18 + $0x68] ss:$12 sps:$4 sm:$0xff]   ;;  %s11491_s18 = scalar_lea.vmem [#allocation20], %s9234_s14 }
 0xa8b   : > { %7146 = vmatpush3.bf16.msra.mxu1 %v7657_v11  ;;  %v2890_v21 = vmul.f32 %v6381_v46, %v2879_v42 }
 0xa8c   : > { %v7851_v37 = vpop.eup %7850  ;;  %7147 = vmatprep.subr.bf16.mxu1 %v8562_v12 }
 0xa8d   : > { %v2901_v28 = vadd.f32 %v6382_v7, %v2890_v21  ;;  %v2880_v30 = vmul.f32 %v7851_v37, %v10031_v55 }
 0xa8f   : > { %7148 = vmatpush3.bf16.msra.mxu1 %v7658_v16  ;;  %v2905_v5 = vpack.c.bf16 %v2901_v28, %v2900_v47  ;;  %v2891_v54 = vmul.f32 %v6381_v46, %v2880_v30  ;;  %v1137_v47 = vld [vmem:[#allocation7] sm:$0xff]  ;;  %v1132_v30 = vld [vmem:[#allocation5] sm:$0xff] }
 0xa90   : > { %7149 = vmatprep.subr.bf16.mxu1 %v8562_v12 }
 0xa91   : > { %7108 = vmatmul.mubr.bf16.gmra.mrb[76].mxu1 %v2905_v5  ;;  %7136 = vmatmul.mubr.bf16.gmra.mrb[76].mxu0 %v2905_v5  ;;  %v2902_v55 = vadd.f32 %v6382_v7, %v2891_v54  ;;  %v1138_v54 = vld [vmem:[#allocation7 + $0x8] sm:$0xff] }
 0xa92   : > { %7111 = vmatprep.mubr.msk.bf16.mxu1 %vm8563_vm0, %v8562_v12  ;;  %7139 = vmatprep.mubr.msk.bf16.mxu0 %vm8563_vm0, %v8562_v12 }
 0xa93   : > { %7150 = vmatpush3.bf16.msra.mxu1 %v7659_v8  ;;  %v2906_v60 = vpack.c.bf16 %v2902_v55, %v2902_v55 }
 0xa94   : > { %7151 = vmatprep.subr.bf16.mxu1 %v8562_v12 }
 0xa97   : > { %7152 = vmatpush3.bf16.msra.mxu1 %v7660_v32 }
 0xa98   : > { %7153 = vmatprep.subr.bf16.mxu1 %v8562_v12 }
 0xa99   : > { %7112 = vmatmul.mubr.bf16.gmra.mrb[80].mxu1 %v2906_v60  ;;  %7140 = vmatmul.mubr.bf16.gmra.mrb[80].mxu0 %v2906_v60 }
 0xa9a   : > { %7159 = vmatprep.mubr.msk.bf16.mxu1 %vm8563_vm0, %v8562_v12  ;;  %7177 = vmatprep.mubr.msk.bf16.mxu0 %vm8563_vm0, %v8562_v12 }
 0xa9b   : > { %7154 = vmatpush3.bf16.msra.mxu1 %v7661_v48 }
 0xa9c   : > { %7155 = vmatprep.subr.bf16.mxu1 %v8562_v12 }
 0xa9f   : > { %7156 = vmatpush3.bf16.msra.mxu1 %v7662_v19 }
 0xaa0   : > { %7157 = vmatprep.subr.bf16.mxu1 %v8562_v12 }
 0xaa3   : > { %7158 = vmatpush3.bf16.msra.mxu1 %v7663_v63 }
 0xaa4   : > { %7189 = vmatprep.subr.bf16.mxu1 %v8562_v12 }
 0xaa6   : > { %7160 = vmatmul.mubr.bf16.vlgmr.msra.gmra.mrb[84].mxu1 %v2904_v14 }
 0xaa7   : > { %7163 = vmatprep.mubr.msk.bf16.mxu1 %vm8563_vm0, %v8562_v12 }
 0xaae   : > { %7164 = vmatmul.mubr.bf16.gmra.mrb[88].mxu1 %v2905_v5  ;;  %v1133_v5 = vld [vmem:[#allocation5 + $0x8] sm:$0xff] }
 0xaaf   : > { %7167 = vmatprep.mubr.msk.bf16.mxu1 %vm8563_vm0, %v8562_v12 }
 0xab6   : > { %7168 = vmatmul.mubr.bf16.gmra.mrb[92].mxu1 %v2906_v60 }
 0xab7   : > { %7195 = vmatprep.mubr.msk.bf16.mxu1 %vm8563_vm0, %v8562_v12 }
 0xb59   : > { %v10100_v38 = vpop.f32.mrb[72].mxu1  ;;  %v10102_v35 = vpop.f32.mrb[72].mxu0 }
 0xb5a   : > { %v7105_v50 = vpop.f32.mrb[73].mxu1  ;;  %3317 = vrot.lane.b32.xlu1 %v10102_v35, %s8564_s6  ;;  %3327 = vrot.lane.b32.xlu0 %v10102_v35, %s8565_s10  ;;  %v7133_v31 = vpop.f32.mrb[73].mxu0  ;;  %v3312_v48 = vmul.f32 %v10102_v35, %v1132_v30 }
 0xb5b   : > { %v10108_v24 = vpop.f32.mrb[74].mxu1  ;;  %v10110_v57 = vpop.f32.mrb[74].mxu0 }
 0xb5c   : > { %v7106_v44 = vpop.f32.mrb[75].mxu1  ;;  %v7134_v33 = vpop.f32.mrb[75].mxu0  ;;  %v3313_v19 = vmul.f32 %v10110_v57, %v1133_v5 }
 0xb5e   : > { %3329 = vrot.lane.b32.xlu1 %v10110_v57, %s8565_s10 }
 0xb62   : > { %3319 = vrot.lane.b32.xlu1 %v10110_v57, %s8564_s6 }
 0xb64   : > { %v10116_v43 = vpop.f32.mrb[76].mxu1  ;;  %v10118_v25 = vpop.f32.mrb[76].mxu0 }
 0xb65   : > { %v7109_v58 = vpop.f32.mrb[77].mxu1  ;;  %3331 = vrot.lane.b32.xlu0 %v10118_v25, %s8565_s10  ;;  %v7137_v52 = vpop.f32.mrb[77].mxu0 }
 0xb66   : > { %v10122_v2 = vpop.f32.mrb[78].mxu1  ;;  %v10124_v39 = vpop.f32.mrb[78].mxu0 }
 0xb67   : > { %v7110_v53 = vpop.f32.mrb[79].mxu1  ;;  %3333 = vrot.lane.b32.xlu1 %v10124_v39, %s8565_s10  ;;  %v7138_v27 = vpop.f32.mrb[79].mxu0 }
 0xb68   : > { %v1139_v53 = vld [vmem:[#allocation7 + $0x10] sm:$0xff] }
 0xb69   : > { %3321 = vrot.lane.b32.xlu0 %v10118_v25, %s8564_s6 }
 0xb6b   : > { %3323 = vrot.lane.b32.xlu1 %v10124_v39, %s8564_s6 }
 0xb6c   : > { %v10132_v1 = vpop.f32.mrb[80].mxu1  ;;  %v10134_v15 = vpop.f32.mrb[80].mxu0 }
 0xb6d   : > { %v7113_v22 = vpop.f32.mrb[81].mxu1  ;;  %3335 = vrot.lane.b32.xlu0 %v10134_v15, %s8565_s10  ;;  %v7141_v26 = vpop.f32.mrb[81].mxu0 }
 0xb6e   : > { %v3024_v46 = vpop.f32.mrb[82].mxu1  ;;  %v3144_v41 = vpop.f32.mrb[82].mxu0  ;;  %v10181_v22 = vld [vmem:[#allocation5 + $0x10] sm:$0xff]  ;;  %v10183_v26 = vld [vmem:[#allocation5 + $0x18] sm:$0xff] }
 0xb6f   : > { %v7114_v34 = vpop.f32.mrb[83].mxu1  ;;  %3325 = vrot.lane.b32.xlu1 %v10134_v15, %s8564_s6  ;;  %v7142_v20 = vpop.f32.mrb[83].mxu0  ;;  %v1140_v41 = vld [vmem:[#allocation7 + $0x18] sm:$0xff] }
 0xb71   : > { %3282 = vrot.lane.b32.xlu0 %v10100_v38, %s8565_s10 }
 0xb73   : > { %3284 = vrot.lane.b32.xlu1 %v10108_v24, %s8565_s10 }
 0xb75   : > { %3272 = vrot.lane.b32.xlu0 %v10100_v38, %s8564_s6 }
 0xb77   : > { %3274 = vrot.lane.b32.xlu1 %v10108_v24, %s8564_s6 }
 0xb79   : > { %v3245_v29 = vpop.f32.mrb[84].mxu1  ;;  %3286 = vrot.lane.b32.xlu0 %v10116_v43, %s8565_s10 }
 0xb7a   : > { %v7161_v3 = vpop.f32.mrb[85].mxu1 }
 0xb7b   : > { %v3248_v4 = vpop.f32.mrb[86].mxu1  ;;  %3288 = vrot.lane.b32.xlu1 %v10122_v2, %s8565_s10  ;;  %v3314_v3 = vmul.f32 %v10118_v25, %v10181_v22 }
 0xb7c   : > { %v10152_v56 = vpack.c.bf16 %v3248_v4, %v3245_v29  ;;  %v7162_v7 = vpop.f32.mrb[87].mxu1  ;;  %v3315_v4 = vmul.f32 %v10124_v39, %v10183_v26 }
 0xb7d   : > { %3276 = vrot.lane.b32.xlu0 %v10116_v43, %s8564_s6 }
 0xb7e   : > { %7190 = vmatpush3.bf16.msra.mxu1 %v10152_v56 }
 0xb7f   : > { %3278 = vrot.lane.b32.xlu1 %v10122_v2, %s8564_s6  ;;  %7191 = vmatprep.subr.bf16.mxu1 %v8562_v12 }
 0xb81   : > { %v3253_v9 = vpop.f32.mrb[88].mxu1  ;;  %3290 = vrot.lane.b32.xlu0 %v10132_v1, %s8565_s10 }
 0xb82   : > { %v7165_v36 = vpop.f32.mrb[89].mxu1 }
 0xb83   : > { %v3256_v59 = vpop.f32.mrb[90].mxu1  ;;  %3280 = vrot.lane.b32.xlu1 %v10132_v1, %s8564_s6  ;;  %v1136_v36 = vld [vmem:[#allocation5 + $0x20] sm:$0xff] }
 0xb84   : > { %v10164_v23 = vpack.c.bf16 %v3256_v59, %v3253_v9  ;;  %v7166_v51 = vpop.f32.mrb[91].mxu1 }
 0xb85   : > { %v1141_v51 = vld [vmem:[#allocation7 + $0x20] sm:$0xff] }
 0xb86   : > { %7192 = vmatpush3.bf16.msra.mxu1 %v10164_v23 }
 0xb87   : > { %7193 = vmatprep.subr.bf16.mxu1 %v8562_v12 }
 0xb89   : > { %v3261_v10 = vpop.f32.mrb[92].mxu1 }
 0xb8a   : > { %v10168_v14 = vpack.c.bf16 %v3261_v10, %v3261_v10  ;;  %v7169_v45 = vpop.f32.mrb[93].mxu1 }
 0xb8b   : > { %v3264_v11 = vpop.f32.mrb[94].mxu1 }
 0xb8c   : > { %v7170_v0 = vpop.f32.mrb[95].mxu1  ;;  %v3508_v42 = vsel %vm1842_vm3, %v10168_v14, 0 }
 0xb8d   : > { %7194 = vmatpush3.bf16.msra.mxu1 %v3508_v42  ;;  %v3316_v42 = vmul.f32 %v10134_v15, %v1136_v36 }
 0xb8e   : > { %7225 = vmatprep.subr.bf16.mxu1 %v8562_v12 }
 0xbcc   : > { %v3318_v49 = vpop.permute.xlu1 %3317  ;;  %v3328_v16 = vpop.permute.xlu0 %3327 }
 0xbcd   : > { %v3337_v21 = vsub.f32 0.0, %v3328_v16 }
 0xbcf   : > { %v3342_v28 = vsel %vm9481_vm1, %v3337_v21, %v3318_v49 }
 0xbd0   : > { %v3330_v37 = vpop.permute.xlu1 %3329  ;;  %v3347_v32 = vmul.f32 %v3342_v28, %v1137_v47 }
 0xbd1   : > { %v3338_v8 = vsub.f32 0.0, %v3330_v37 }
 0xbd2   : > { %v3352_v31 = vadd.f32 %v3347_v32, %v3312_v48 }
 0xbd4   : > { %v3320_v55 = vpop.permute.xlu1 %3319 }
 0xbd5   : > { %v3343_v60 = vsel %vm9481_vm1, %v3338_v8, %v3320_v55 }
 0xbd6   : > { %v3348_v63 = vmul.f32 %v3343_v60, %v1138_v54 }
 0xbd7   : > { %v3332_v50 = vpop.permute.xlu0 %3331 }
 0xbd8   : > { %v3353_v44 = vadd.f32 %v3348_v63, %v3313_v19  ;;  %v3339_v52 = vsub.f32 0.0, %v3332_v50  ;;  %v3267_v63 = vmul.f32 %v10100_v38, %v1132_v30  ;;  %v3268_v50 = vmul.f32 %v10108_v24, %v1133_v5 }
 0xbd9   : > { %v3334_v33 = vpop.permute.xlu1 %3333 }
 0xbda   : > { %v10179_v58 = vpack.c.bf16 %v3353_v44, %v3352_v31  ;;  %v3340_v46 = vsub.f32 0.0, %v3334_v33 }
 0xbdb   : > { %v3322_v27 = vpop.permute.xlu0 %3321 }
 0xbdc   : > { %v3344_v35 = vsel %vm9481_vm1, %v3339_v52, %v3322_v27  ;;  %3588 = vrot.lane.b32.xlu0 %v10179_v58, %s8566_s20  ;;  %v3376_v57 = vsel %vm1699_vm2, %v10179_v58, 0 }
 0xbdd   : > { %v3349_v34 = vmul.f32 %v3344_v35, %v1139_v53  ;;  %7172 = vmatpush3.bf16.xpose.msra.mxu0 %v3376_v57  ;;  %v3324_v20 = vpop.permute.xlu1 %3323 }
 0xbde   : > { %v3345_v29 = vsel %vm9481_vm1, %v3340_v46, %v3324_v20  ;;  %7173 = vmatprep.subr.bf16.mxu0 %v8562_v12  ;;  %v3270_v20 = vmul.f32 %v10122_v2, %v10183_v26 }
 0xbdf   : > { %v3350_v7 = vmul.f32 %v3345_v29, %v1140_v41  ;;  %v3336_v9 = vpop.permute.xlu0 %3335  ;;  %v3354_v10 = vadd.f32 %v3349_v34, %v3314_v3 }
 0xbe0   : > { %v3341_v59 = vsub.f32 0.0, %v3336_v9 }
 0xbe1   : > { %v3355_v45 = vadd.f32 %v3350_v7, %v3315_v4  ;;  %v3326_v11 = vpop.permute.xlu1 %3325 }
 0xbe2   : > { %v3346_v0 = vsel %vm9481_vm1, %v3341_v59, %v3326_v11 }
 0xbe3   : > { %v3361_v49 = vpack.c.bf16 %v3355_v45, %v3354_v10  ;;  %v3351_v16 = vmul.f32 %v3346_v0, %v1141_v51  ;;  %v3283_v21 = vpop.permute.xlu0 %3282 }
 0xbe4   : > { %v3292_v28 = vsub.f32 0.0, %v3283_v21 }
 0xbe5   : > { %v3356_v25 = vadd.f32 %v3351_v16, %v3316_v42  ;;  %3590 = vrot.lane.b32.xlu1 %v3361_v49, %s8566_s20  ;;  %v3285_v39 = vpop.permute.xlu1 %3284  ;;  %v3379_v37 = vsel %vm1699_vm2, %v3361_v49, 0 }
 0xbe6   : > { %7174 = vmatpush3.bf16.xpose.msra.mxu0 %v3379_v37  ;;  %v3293_v55 = vsub.f32 0.0, %v3285_v39 }
 0xbe7   : > { %v3362_v8 = vpack.c.bf16 %v3356_v25, %v3356_v25  ;;  %v3273_v32 = vpop.permute.xlu0 %3272  ;;  %7175 = vmatprep.subr.bf16.mxu0 %v8562_v12 }
 0xbe8   : > { %v3297_v60 = vsel %vm9481_vm1, %v3292_v28, %v3273_v32 }
 0xbe9   : > { %v3302_v15 = vmul.f32 %v3297_v60, %v1137_v47  ;;  %v3275_v48 = vpop.permute.xlu1 %3274  ;;  %3592 = vrot.lane.b32.xlu0 %v3362_v8, %s8566_s20  ;;  %v3382_v47 = vsel %vm1699_vm2, %v3362_v8, 0 }
 0xbea   : > { %v3298_v19 = vsel %vm9481_vm1, %v3293_v55, %v3275_v48 }
 0xbeb   : > { %v3303_v31 = vmul.f32 %v3298_v19, %v1138_v54  ;;  %v3287_v44 = vpop.permute.xlu0 %3286  ;;  %v3307_v33 = vadd.f32 %v3302_v15, %v3267_v63  ;;  %v3269_v54 = vmul.f32 %v10116_v43, %v10181_v22  ;;  %v3271_v43 = vmul.f32 %v10132_v1, %v1136_v36 }
 0xbec   : > { %v3294_v46 = vsub.f32 0.0, %v3287_v44  ;;  %v10303_v44 = vld [vmem:[#allocation10] sm:$0xff] }
 0xbed   : > { %v3308_v52 = vadd.f32 %v3303_v31, %v3268_v50  ;;  %v3289_v27 = vpop.permute.xlu1 %3288  ;;  %3821 = vrot.lane.b32.xlu0 %v10179_v58, %s8567_s5 }
 0xbee   : > { %7176 = vmatpush3.bf16.xpose.msra.mxu0 %v3382_v47  ;;  %v3295_v34 = vsub.f32 0.0, %v3289_v27  ;;  %v10305_v47 = vld [vmem:[#allocation10 + $0x8] sm:$0xff] }
 0xbef   : > { %v3357_v35 = vpack.c.bf16 %v3308_v52, %v3307_v33  ;;  %v3277_v57 = vpop.permute.xlu0 %3276  ;;  %7207 = vmatprep.subr.bf16.mxu0 %v8562_v12 }
 0xbf0   : > { %v3299_v38 = vsel %vm9481_vm1, %v3294_v46, %v3277_v57 }
 0xbf1   : > { %v3304_v24 = vmul.f32 %v3299_v38, %v1139_v53  ;;  %v3279_v30 = vpop.permute.xlu1 %3278  ;;  %3579 = vrot.lane.b32.xlu1 %v3357_v35, %s8566_s20  ;;  %3823 = vrot.lane.b32.xlu0 %v3361_v49, %s8567_s5 }
 0xbf2   : > { %v3300_v5 = vsel %vm9481_vm1, %v3295_v34, %v3279_v30 }
 0xbf3   : > { %v3305_v29 = vmul.f32 %v3300_v5, %v1140_v41  ;;  %v3291_v3 = vpop.permute.xlu0 %3290  ;;  %v3309_v7 = vadd.f32 %v3304_v24, %v3269_v54  ;;  %v10317_v5 = vld [vmem:[#allocation10 + $0x10] sm:$0xff] }
 0xbf4   : > { %v3296_v4 = vsub.f32 0.0, %v3291_v3  ;;  %v10319_v3 = vld [vmem:[#allocation10 + $0x18] sm:$0xff] }
 0xbf5   : > { %v3310_v9 = vadd.f32 %v3305_v29, %v3270_v20  ;;  %v3281_v53 = vpop.permute.xlu1 %3280  ;;  %3825 = vrot.lane.b32.xlu0 %v3362_v8, %s8567_s5  ;;  %7178 = vmatmul.mubr.msk.bf16.vlgmr.msra.gmra.mrb[84].mxu0 %vm1699_vm2, %v3357_v35 }
 0xbf6   : > { %v3301_v59 = vsel %vm9481_vm1, %v3296_v4, %v3281_v53  ;;  %7181 = vmatprep.mubr.msk.bf16.mxu0 %vm8563_vm0, %v8562_v12 }
 0xbf7   : > { %v3358_v22 = vpack.c.bf16 %v3310_v9, %v3309_v7  ;;  %v3306_v2 = vmul.f32 %v3301_v59, %v1141_v51 }
 0xbf9   : > { %v3311_v26 = vadd.f32 %v3306_v2, %v3271_v43  ;;  %3581 = vrot.lane.b32.xlu1 %v3358_v22, %s8566_s20  ;;  %4051 = vrot.lane.b32.xlu0 %v10179_v58, %s8568_s15 }
 0xbfb   : > { %v3359_v41 = vpack.c.bf16 %v3311_v26, %v3311_v26 }
 0xbfd   : > { %3583 = vrot.lane.b32.xlu1 %v3359_v41, %s8566_s20  ;;  %4053 = vrot.lane.b32.xlu0 %v3361_v49, %s8568_s15 }
 0xbfe   : > { %7182 = vmatmul.mubr.msk.bf16.gmra.mrb[88].mxu0 %vm1699_vm2, %v3358_v22 }
 0xbff   : > { %7185 = vmatprep.mubr.msk.bf16.mxu0 %vm8563_vm0, %v8562_v12 }
 0xc01   : > { %3815 = vrot.lane.b32.xlu1 %v3357_v35, %s8567_s5  ;;  %4055 = vrot.lane.b32.xlu0 %v3362_v8, %s8568_s15 }
 0xc05   : > { %3817 = vrot.lane.b32.xlu1 %v3358_v22, %s8567_s5  ;;  %4047 = vrot.lane.b32.xlu0 %v3358_v22, %s8568_s15  ;;  %v10329_v22 = vld [vmem:[#allocation10 + $0x20] sm:$0xff] }
 0xc06   : > { %7186 = vmatmul.mubr.msk.bf16.gmra.mrb[92].mxu0 %vm1699_vm2, %v3359_v41 }
 0xc07   : > { %7213 = vmatprep.mubr.msk.bf16.mxu0 %vm8563_vm0, %v8562_v12 }
 0xc09   : > { %3819 = vrot.lane.b32.xlu1 %v3359_v41, %s8567_s5  ;;  %3729 = vrot.lane.b32.xlu0 %v10152_v56, %s8566_s20 }
 0xc0d   : > { %4045 = vrot.lane.b32.xlu1 %v3357_v35, %s8568_s15  ;;  %3733 = vrot.lane.b32.xlu0 %v10168_v14, %s8566_s20 }
 0xc11   : > { %4049 = vrot.lane.b32.xlu1 %v3359_v41, %s8568_s15 }
 0xc15   : > { %3731 = vrot.lane.b32.xlu1 %v10164_v23, %s8566_s20 }
 0xc19   : > { %3959 = vrot.lane.b32.xlu1 %v10152_v56, %s8567_s5 }
 0xc4e   : > { %v3589_v13 = vpop.permute.xlu0 %3588 }
 0xc4f   : > { %v3604_v1 = vsel %vm1699_vm2, %v3589_v13, 0 }
 0xc50   : > { %7208 = vmatpush3.bf16.xpose.msra.mxu0 %v3604_v1 }
 0xc51   : > { %7209 = vmatprep.subr.bf16.mxu0 %v8562_v12 }
 0xc57   : > { %v3591_v58 = vpop.permute.xlu1 %3590 }
 0xc58   : > { %v3607_v36 = vsel %vm1699_vm2, %v3591_v58, 0 }
 0xc59   : > { %7210 = vmatpush3.bf16.xpose.msra.mxu0 %v3607_v36 }
 0xc5a   : > { %7211 = vmatprep.subr.bf16.mxu0 %v8562_v12 }
 0xc5b   : > { %v3593_v51 = vpop.permute.xlu0 %3592 }
 0xc5c   : > { %v3610_v10 = vsel %vm1699_vm2, %v3593_v51, 0 }
 0xc5f   : > { %v3822_v45 = vpop.permute.xlu0 %3821 }
 0xc60   : > { %v3837_v0 = vsel %vm1699_vm2, %v3822_v45, 0 }
 0xc61   : > { %7212 = vmatpush3.bf16.xpose.msra.mxu0 %v3610_v10 }
 0xc62   : > { %7243 = vmatprep.subr.bf16.mxu0 %v8562_v12 }
 0xc63   : > { %v3580_v11 = vpop.permute.xlu1 %3579  ;;  %v3824_v42 = vpop.permute.xlu0 %3823 }
 0xc64   : > { %v3840_v16 = vsel %vm1699_vm2, %v3824_v42, 0 }
 0xc67   : > { %v3826_v21 = vpop.permute.xlu0 %3825 }
 0xc68   : > { %7214 = vmatmul.mubr.msk.bf16.vlgmr.msra.gmra.mrb[96].mxu0 %vm1699_vm2, %v3580_v11  ;;  %v3843_v39 = vsel %vm1699_vm2, %v3826_v21, 0 }
 0xc69   : > { %7244 = vmatpush3.bf16.xpose.msra.mxu0 %v3837_v0  ;;  %7217 = vmatprep.mubr.msk.bf16.mxu0 %vm8563_vm0, %v8562_v12 }
 0xc6a   : > { %7245 = vmatprep.subr.bf16.mxu0 %v8562_v12 }
 0xc6b   : > { %v3582_v49 = vpop.permute.xlu1 %3581  ;;  %v4052_v37 = vpop.permute.xlu0 %4051 }
 0xc6c   : > { %v4067_v8 = vsel %vm1699_vm2, %v4052_v37, 0 }
 0xc6f   : > { %v3584_v25 = vpop.permute.xlu1 %3583  ;;  %v4054_v32 = vpop.permute.xlu0 %4053 }
 0xc70   : > { %7218 = vmatmul.mubr.msk.bf16.gmra.mrb[100].mxu0 %vm1699_vm2, %v3582_v49  ;;  %v4070_v60 = vsel %vm1699_vm2, %v4054_v32, 0 }
 0xc71   : > { %7246 = vmatpush3.bf16.xpose.msra.mxu0 %v3840_v16  ;;  %7221 = vmatprep.mubr.msk.bf16.mxu0 %vm8563_vm0, %v8562_v12 }
 0xc72   : > { %7247 = vmatprep.subr.bf16.mxu0 %v8562_v12 }
 0xc73   : > { %v3816_v28 = vpop.permute.xlu1 %3815  ;;  %v4056_v15 = vpop.permute.xlu0 %4055 }
 0xc74   : > { %v4073_v19 = vsel %vm1699_vm2, %v4056_v15, 0 }
 0xc77   : > { %v3818_v55 = vpop.permute.xlu1 %3817  ;;  %v4048_v50 = vpop.permute.xlu0 %4047 }
 0xc78   : > { %7222 = vmatmul.mubr.msk.bf16.gmra.mrb[104].mxu0 %vm1699_vm2, %v3584_v25 }
 0xc79   : > { %7248 = vmatpush3.bf16.xpose.msra.mxu0 %v3843_v39  ;;  %7249 = vmatprep.mubr.msk.bf16.mxu0 %vm8563_vm0, %v8562_v12 }
 0xc7a   : > { %7279 = vmatprep.subr.bf16.mxu0 %v8562_v12 }
 0xc7b   : > { %v3820_v48 = vpop.permute.xlu1 %3819 }
 0xc7f   : > { %v4046_v63 = vpop.permute.xlu1 %4045 }
 0xc80   : > { %7250 = vmatmul.mubr.msk.bf16.vlgmr.msra.gmra.mrb[108].mxu0 %vm1699_vm2, %v3816_v28 }
 0xc81   : > { %7280 = vmatpush3.bf16.xpose.msra.mxu0 %v4067_v8  ;;  %7253 = vmatprep.mubr.msk.bf16.mxu0 %vm8563_vm0, %v8562_v12 }
 0xc82   : > { %7281 = vmatprep.subr.bf16.mxu0 %v8562_v12 }
 0xc83   : > { %v4050_v31 = vpop.permute.xlu1 %4049 }
 0xc88   : > { %7254 = vmatmul.mubr.msk.bf16.gmra.mrb[112].mxu0 %vm1699_vm2, %v3818_v55 }
 0xc89   : > { %7282 = vmatpush3.bf16.xpose.msra.mxu0 %v4070_v60  ;;  %7257 = vmatprep.mubr.msk.bf16.mxu0 %vm8563_vm0, %v8562_v12 }
 0xc8a   : > { %7283 = vmatprep.subr.bf16.mxu0 %v8562_v12 }
 0xc90   : > { %7258 = vmatmul.mubr.msk.bf16.gmra.mrb[116].mxu0 %vm1699_vm2, %v3820_v48 }
 0xc91   : > { %7284 = vmatpush3.bf16.xpose.msra.mxu0 %v4073_v19  ;;  %7285 = vmatprep.mubr.msk.bf16.mxu0 %vm8563_vm0, %v8562_v12 }
 0xc92   : > { %7315 = vmatprep.subr.bf16.mxu0 %v8562_v12 }
 0xc98   : > { %7286 = vmatmul.mubr.msk.bf16.vlgmr.msra.gmra.mrb[120].mxu0 %vm1699_vm2, %v4046_v63 }
 0xc99   : > { %7289 = vmatprep.mubr.msk.bf16.mxu0 %vm8563_vm0, %v8562_v12 }
 0xca0   : > { %7290 = vmatmul.mubr.msk.bf16.gmra.mrb[124].mxu0 %vm1699_vm2, %v4048_v50 }
 0xca1   : > { %7293 = vmatprep.mubr.msk.bf16.mxu0 %vm8563_vm0, %v8562_v12 }
 0xca8   : > { %7294 = vmatmul.mubr.msk.bf16.gmra.mrb[128].mxu0 %vm1699_vm2, %v4050_v31 }
 0xca9   : > { %7331 = vmatprep.mubr.msk.bf16.mxu0 %vm8563_vm0, %v8562_v12 }
 0xcc8   : > { %v3418_v33 = vpop.f32.mrb[84].mxu0 }
 0xcc9   : > { %v3440_v52 = vmul.f32 0.17677669, %v3418_v33  ;;  %v7179_v27 = vpop.f32.mrb[85].mxu0 }
 0xcca   : > { %v3421_v46 = vpop.f32.mrb[86].mxu0 }
 0xccb   : > { %v10308_v35 = vadd.f32 %v3440_v52, %v10303_v44  ;;  %v3441_v57 = vmul.f32 0.17677669, %v3421_v46  ;;  %v7180_v34 = vpop.f32.mrb[87].mxu0 }
 0xccc   : > { %v3730_v34 = vpop.permute.xlu0 %3729 }
 0xccd   : > { %v10311_v38 = vadd.f32 %v3441_v57, %v10305_v47  ;;  %v3450_v24 = vsel %vm1784_vm4, %v10308_v35, -inf }
 0xcce   : > { %3451 = vmax.xlane.f32.xlu0 %v3450_v24  ;;  %v10363_v24 = vpop.permute.xlu1 %3731 }
 0xccf   : > { %v3453_v30 = vsel %vm1784_vm4, %v10311_v38, -inf }
 0xcd0   : > { %3454 = vmax.xlane.f32.xlu1 %v3453_v30 }
 0xcd1   : > { %v3426_v54 = vpop.f32.mrb[88].mxu0 }
 0xcd2   : > { %v3442_v20 = vmul.f32 0.17677669, %v3426_v54  ;;  %v7183_v29 = vpop.f32.mrb[89].mxu0 }
 0xcd3   : > { %v3429_v4 = vpop.f32.mrb[90].mxu0 }
 0xcd4   : > { %v10322_v7 = vadd.f32 %v3442_v20, %v10317_v5  ;;  %v3443_v9 = vmul.f32 0.17677669, %v3429_v4  ;;  %v7184_v53 = vpop.f32.mrb[91].mxu0 }
 0xcd5   : > { %v10370_v53 = vpop.permute.xlu0 %3733 }
 0xcd6   : > { %v10325_v59 = vadd.f32 %v3443_v9, %v10319_v3  ;;  %v3456_v43 = vsel %vm1784_vm4, %v10322_v7, -inf }
 0xcd7   : > { %3457 = vmax.xlane.f32.xlu0 %v3456_v43 }
 0xcd8   : > { %v3459_v13 = vsel %vm1784_vm4, %v10325_v59, -inf }
 0xcd9   : > { %v3434_v2 = vpop.f32.mrb[92].mxu0 }
 0xcda   : > { %v3444_v26 = vmul.f32 0.17677669, %v3434_v2  ;;  %v7187_v41 = vpop.f32.mrb[93].mxu0  ;;  %v10374_v2 = vpop.permute.xlu1 %3959 }
 0xcdb   : > { %3460 = vmax.xlane.f32.xlu0 %v3459_v13  ;;  %v3437_v1 = vpop.f32.mrb[94].mxu0 }
 0xcdc   : > { %v10334_v58 = vadd.f32 %v3444_v26, %v10329_v22  ;;  %v7188_v36 = vpop.f32.mrb[95].mxu0 }
 0xcde   : > { %v3462_v51 = vsel %vm1784_vm4, %v10334_v58, -inf }
 0xcdf   : > { %3463 = vmax.xlane.f32.xlu0 %v3462_v51 }
 0xd3b   : > { %v3646_v10 = vpop.f32.mrb[96].mxu0 }
 0xd3c   : > { %v3668_v45 = vmul.f32 0.17677669, %v3646_v10  ;;  %v7215_v11 = vpop.f32.mrb[97].mxu0 }
 0xd3d   : > { %v3649_v0 = vpop.f32.mrb[98].mxu0 }
 0xd3e   : > { %v10339_v42 = vadd.f32 %v3668_v45, %v10303_v44  ;;  %v3669_v49 = vmul.f32 0.17677669, %v3649_v0  ;;  %v7216_v16 = vpop.f32.mrb[99].mxu0 }
 0xd40   : > { %v10342_v21 = vadd.f32 %v3669_v49, %v10305_v47  ;;  %v3678_v25 = vsel %vm1784_vm4, %v10339_v42, -inf }
 0xd41   : > { %3679 = vmax.xlane.f32.xlu1 %v3678_v25 }
 0xd42   : > { %v3681_v39 = vsel %vm1784_vm4, %v10342_v21, -inf }
 0xd43   : > { %3682 = vmax.xlane.f32.xlu0 %v3681_v39  ;;  %v3654_v37 = vpop.f32.mrb[100].mxu0 }
 0xd44   : > { %v3670_v28 = vmul.f32 0.17677669, %v3654_v37  ;;  %v7219_v8 = vpop.f32.mrb[101].mxu0 }
 0xd45   : > { %v3657_v32 = vpop.f32.mrb[102].mxu0 }
 0xd46   : > { %v10349_v55 = vadd.f32 %v3670_v28, %v10317_v5  ;;  %v3671_v60 = vmul.f32 0.17677669, %v3657_v32  ;;  %v7220_v15 = vpop.f32.mrb[103].mxu0 }
 0xd48   : > { %v10352_v48 = vadd.f32 %v3671_v60, %v10319_v3  ;;  %v3684_v19 = vsel %vm1784_vm4, %v10349_v55, -inf }
 0xd49   : > { %3685 = vmax.xlane.f32.xlu1 %v3684_v19 }
 0xd4a   : > { %v3687_v63 = vsel %vm1784_vm4, %v10352_v48, -inf }
 0xd4b   : > { %3688 = vmax.xlane.f32.xlu0 %v3687_v63  ;;  %v3662_v50 = vpop.f32.mrb[104].mxu0 }
 0xd4c   : > { %v3672_v31 = vmul.f32 0.17677669, %v3662_v50  ;;  %v7223_v33 = vpop.f32.mrb[105].mxu0 }
 0xd4d   : > { %v3665_v52 = vpop.f32.mrb[106].mxu0 }
 0xd4e   : > { %v10359_v27 = vadd.f32 %v3672_v31, %v10329_v22  ;;  %v7224_v46 = vpop.f32.mrb[107].mxu0 }
 0xd50   : > { %v3690_v57 = vsel %vm1784_vm4, %v10359_v27, -inf }
 0xd51   : > { %3691 = vmax.xlane.f32.xlu1 %v3690_v57 }
 0xd53   : > { %v3879_v30 = vpop.f32.mrb[108].mxu0 }
 0xd54   : > { %v3901_v54 = vmul.f32 0.17677669, %v3879_v30  ;;  %v7251_v20 = vpop.f32.mrb[109].mxu0 }
 0xd55   : > { %v10365_v29 = vpop.f32.mrb[110].mxu0 }
 0xd56   : > { %v10368_v4 = vadd.f32 %v3901_v54, %v10303_v44  ;;  %v7252_v9 = vpop.f32.mrb[111].mxu0 }
 0xd58   : > { %v3911_v43 = vsel %vm1784_vm4, %v10368_v4, -inf }
 0xd59   : > { %3912 = vmax.xlane.f32.xlu1 %v3911_v43 }
 0xd5b   : > { %v3452_v26 = vpop.xlane.xlu0 %3451  ;;  %v3887_v41 = vpop.f32.mrb[112].mxu0 }
 0xd5c   : > { %v3465_v13 = vsub.f32 %v10308_v35, %v3452_v26  ;;  %v3903_v1 = vmul.f32 0.17677669, %v3887_v41  ;;  %v7255_v36 = vpop.f32.mrb[113].mxu0 }
 0xd5d   : > { %v3455_v51 = vpop.xlane.xlu1 %3454  ;;  %v3890_v10 = vpop.f32.mrb[114].mxu0 }
 0xd5e   : > { %v3470_v45 = vmul.f32 1.442695, %v3465_v13  ;;  %v10378_v11 = vadd.f32 %v3903_v1, %v10317_v5  ;;  %v3466_v0 = vsub.f32 %v10311_v38, %v3455_v51  ;;  %v3904_v49 = vmul.f32 0.17677669, %v3890_v10  ;;  %v7256_v16 = vpop.f32.mrb[115].mxu0 }
 0xd60   : > { %v3472_v25 = vmul.f32 1.442695, %v3466_v0  ;;  %v10382_v39 = vadd.f32 %v3904_v49, %v10319_v3  ;;  %v3917_v37 = vsel %vm1784_vm4, %v10378_v11, -inf  ;;  %7852 = vpow2.f32 %v3470_v45 }
 0xd61   : > { %3961 = vrot.lane.b32.xlu0 %v10164_v23, %s8567_s5  ;;  %3918 = vmax.xlane.f32.xlu1 %v3917_v37  ;;  %v3902_v45 = vmul.f32 0.17677669, %v10365_v29 }
 0xd62   : > { %7854 = vpow2.f32 %v3472_v25  ;;  %v3920_v38 = vsel %vm1784_vm4, %v10382_v39, -inf }
 0xd63   : > { %v3895_v35 = vpop.f32.mrb[116].mxu0 }
 0xd64   : > { %v3458_v28 = vpop.xlane.xlu0 %3457  ;;  %v3905_v8 = vmul.f32 0.17677669, %v3895_v35  ;;  %v7259_v32 = vpop.f32.mrb[117].mxu0 }
 0xd65   : > { %v3467_v60 = vsub.f32 %v10322_v7, %v3458_v28  ;;  %3921 = vmax.xlane.f32.xlu1 %v3920_v38  ;;  %v3898_v15 = vpop.f32.mrb[118].mxu0 }
 0xd66   : > { %v10392_v19 = vadd.f32 %v3905_v8, %v10329_v22  ;;  %v7260_v63 = vpop.f32.mrb[119].mxu0 }
 0xd67   : > { %v3474_v50 = vmul.f32 1.442695, %v3467_v60 }
 0xd68   : > { %v3461_v31 = vpop.xlane.xlu0 %3460  ;;  %v3923_v33 = vsel %vm1784_vm4, %v10392_v19, -inf }
 0xd69   : > { %v3468_v52 = vsub.f32 %v10325_v59, %v3461_v31  ;;  %3924 = vmax.xlane.f32.xlu1 %v3923_v33  ;;  %7856 = vpow2.f32 %v3474_v50 }
 0xd6a   : > { %v10397_v46 = vpop.eup %7852 }
 0xd6b   : > { %v3476_v57 = vmul.f32 1.442695, %v3468_v52  ;;  %v4109_v30 = vpop.f32.mrb[120].mxu0 }
 0xd6c   : > { %v10399_v54 = vpop.eup %7854  ;;  %v3464_v7 = vpop.xlane.xlu0 %3463  ;;  %v4131_v49 = vmul.f32 0.17677669, %v4109_v30 }
 0xd6d   : > { %v7287_v20 = vpop.f32.mrb[121].mxu0  ;;  %v3495_v9 = vpack.c.bf16 %v10399_v54, %v10397_v46  ;;  %7858 = vpow2.f32 %v3476_v57  ;;  %v3469_v43 = vsub.f32 %v10334_v58, %v3464_v7 }
 0xd6e   : > { %v4112_v26 = vpop.f32.mrb[122].mxu0  ;;  %v10431_v35 = vadd.f32 %v4131_v49, %v10303_v44 }
 0xd6f   : > { %v7288_v41 = vpop.f32.mrb[123].mxu0  ;;  %v3478_v13 = vmul.f32 1.442695, %v3469_v43  ;;  %7196 = vmatmul.mubr.msk.bf16.vlgmr.msra.gmra.mrb[96].mxu1 %vm1784_vm4, %v3495_v9  ;;  %v4132_v32 = vmul.f32 0.17677669, %v4112_v26 }
 0xd70   : > { %7226 = vmatpush3.bf16.msra.mxu1 %v3730_v34  ;;  %7199 = vmatprep.mubr.msk.bf16.mxu1 %vm8563_vm0, %v8562_v12  ;;  %v3747_v34 = vsel %vm1842_vm3, %v10370_v53, 0  ;;  %v4141_v8 = vsel %vm1784_vm4, %v10431_v35, -inf }
 0xd71   : > { %7227 = vmatprep.subr.bf16.mxu1 %v8562_v12  ;;  %7860 = vpow2.f32 %v3478_v13  ;;  %v10443_v44 = vadd.f32 %v4132_v32, %v10305_v47 }
 0xd73   : > { %v4117_v59 = vpop.f32.mrb[124].mxu0  ;;  %v10410_v58 = vpop.eup %7856  ;;  %v4144_v63 = vsel %vm1784_vm4, %v10443_v44, -inf }
 0xd74   : > { %7228 = vmatpush3.bf16.msra.mxu1 %v10363_v24  ;;  %v7291_v1 = vpop.f32.mrb[125].mxu0  ;;  %v10424_v24 = vadd.f32 %v3902_v45, %v10305_v47  ;;  %v4133_v38 = vmul.f32 0.17677669, %v4117_v59 }
 0xd75   : > { %v4120_v36 = vpop.f32.mrb[126].mxu0  ;;  %7229 = vmatprep.subr.bf16.mxu1 %v8562_v12 }
 0xd76   : > { %v7292_v51 = vpop.f32.mrb[127].mxu0  ;;  %v3914_v28 = vsel %vm1784_vm4, %v10424_v24, -inf  ;;  %v10448_v60 = vadd.f32 %v4133_v38, %v10317_v5  ;;  %v4134_v15 = vmul.f32 0.17677669, %v4120_v36 }
 0xd77   : > { %v10412_v10 = vpop.eup %7858 }
 0xd78   : > { %7230 = vmatpush3.bf16.msra.mxu1 %v3747_v34  ;;  %v3496_v0 = vpack.c.bf16 %v10412_v10, %v10410_v58  ;;  %v10453_v50 = vadd.f32 %v4134_v15, %v10319_v3  ;;  %v4147_v31 = vsel %vm1784_vm4, %v10448_v60, -inf }
 0xd79   : > { %7261 = vmatprep.subr.bf16.mxu1 %v8562_v12 }
 0xd7a   : > { %7200 = vmatmul.mubr.msk.bf16.gmra.mrb[100].mxu1 %vm1784_vm4, %v3496_v0  ;;  %4189 = vrot.lane.b32.xlu1 %v10152_v56, %s8568_s15  ;;  %v4150_v47 = vsel %vm1784_vm4, %v10453_v50, -inf }
 0xd7b   : > { %v4125_v16 = vpop.f32.mrb[128].mxu0  ;;  %7203 = vmatprep.mubr.msk.bf16.mxu1 %vm8563_vm0, %v8562_v12  ;;  %v10428_v53 = vpop.eup %7860 }
 0xd7c   : > { %v7295_v29 = vpop.f32.mrb[129].mxu0  ;;  %v3497_v56 = vpack.c.bf16 %v10428_v53, %v10428_v53  ;;  %v4135_v33 = vmul.f32 0.17677669, %v4125_v16 }
 0xd7d   : > { %v4128_v25 = vpop.f32.mrb[130].mxu0 }
 0xd7e   : > { %v7296_v37 = vpop.f32.mrb[131].mxu0  ;;  %v10460_v5 = vadd.f32 %v4135_v33, %v10329_v22 }
 0xd80   : > { %3915 = vmax.xlane.f32.xlu0 %v3914_v28  ;;  %v4153_v52 = vsel %vm1784_vm4, %v10460_v5, -inf }
 0xd82   : > { %7204 = vmatmul.mubr.msk.bf16.gmra.mrb[104].mxu1 %vm1784_vm4, %v3497_v56 }
 0xd83   : > { %7231 = vmatprep.mubr.msk.bf16.mxu1 %vm8563_vm0, %v8562_v12 }
 0xd84   : > { %4142 = vmax.xlane.f32.xlu0 %v4141_v8 }
 0xd9a   : > { %3963 = vrot.lane.b32.xlu0 %v10168_v14, %s8567_s5 }
 0xd9e   : > { %4145 = vmax.xlane.f32.xlu1 %v4144_v63 }
 0xda2   : > { %4148 = vmax.xlane.f32.xlu1 %v4147_v31 }
 0xda6   : > { %4151 = vmax.xlane.f32.xlu1 %v4150_v47 }
 0xdb7   : > { %4191 = vrot.lane.b32.xlu1 %v10164_v23, %s8568_s15 }
 0xdb9   : > { %4154 = vmax.xlane.f32.xlu0 %v4153_v52 }
 0xdbb   : > { %4193 = vrot.lane.b32.xlu1 %v10168_v14, %s8568_s15 }
 0xdce   : > { %v3680_v3 = vpop.xlane.xlu1 %3679 }
 0xdcf   : > { %v3693_v57 = vsub.f32 %v10339_v42, %v3680_v3 }
 0xdd0   : > { %v3683_v30 = vpop.xlane.xlu0 %3682 }
 0xdd1   : > { %v3698_v7 = vmul.f32 1.442695, %v3693_v57  ;;  %v3694_v20 = vsub.f32 %v10342_v21, %v3683_v30 }
 0xdd3   : > { %7862 = vpow2.f32 %v3698_v7  ;;  %v3700_v22 = vmul.f32 1.442695, %v3694_v20 }
 0xdd5   : > { %7864 = vpow2.f32 %v3700_v22 }
 0xdd6   : > { %v3686_v9 = vpop.xlane.xlu1 %3685 }
 0xdd7   : > { %v3695_v23 = vsub.f32 %v10349_v55, %v3686_v9 }
 0xdd8   : > { %v3689_v43 = vpop.xlane.xlu0 %3688 }
 0xdd9   : > { %v3702_v26 = vmul.f32 1.442695, %v3695_v23  ;;  %v3696_v41 = vsub.f32 %v10352_v48, %v3689_v43 }
 0xddb   : > { %7866 = vpow2.f32 %v3702_v26  ;;  %v3704_v13 = vmul.f32 1.442695, %v3696_v41 }
 0xddc   : > { %v3962_v48 = vpop.permute.xlu0 %3961 }
 0xddd   : > { %v7863_v14 = vpop.eup %7862  ;;  %7868 = vpow2.f32 %v3704_v13 }
 0xdde   : > { %v3692_v59 = vpop.xlane.xlu1 %3691  ;;  %v3708_v42 = vsel %vm1784_vm4, %v7863_v14, 0.0 }
 0xddf   : > { %v7865_v1 = vpop.eup %7864  ;;  %v3697_v21 = vsub.f32 %v10359_v27, %v3692_v59  ;;  %3709 = vadd.xlane.f32.xlu1 %v3708_v42 }
 0xde0   : > { %v3723_v36 = vpack.c.bf16 %v7865_v1, %v7863_v14  ;;  %v3711_v51 = vsel %vm1784_vm4, %v7865_v1, 0.0 }
 0xde1   : > { %v3706_v34 = vmul.f32 1.442695, %v3697_v21  ;;  %3712 = vadd.xlane.f32.xlu0 %v3711_v51 }
 0xde2   : > { %7232 = vmatmul.mubr.msk.bf16.vlgmr.msra.gmra.mrb[108].mxu1 %vm1784_vm4, %v3723_v36 }
 0xde3   : > { %7870 = vpow2.f32 %v3706_v34  ;;  %7262 = vmatpush3.bf16.msra.mxu1 %v10374_v2  ;;  %7235 = vmatprep.mubr.msk.bf16.mxu1 %vm8563_vm0, %v8562_v12 }
 0xde4   : > { %7263 = vmatprep.subr.bf16.mxu1 %v8562_v12 }
 0xde5   : > { %v7867_v55 = vpop.eup %7866 }
 0xde6   : > { %v3913_v45 = vpop.xlane.xlu1 %3912  ;;  %v3714_v27 = vsel %vm1784_vm4, %v7867_v55, 0.0 }
 0xde7   : > { %v7869_v0 = vpop.eup %7868  ;;  %7264 = vmatpush3.bf16.msra.mxu1 %v3962_v48  ;;  %v3926_v49 = vsub.f32 %v10368_v4, %v3913_v45  ;;  %3715 = vadd.xlane.f32.xlu0 %v3714_v27 }
 0xde8   : > { %v3724_v16 = vpack.c.bf16 %v7869_v0, %v7867_v55  ;;  %7265 = vmatprep.subr.bf16.mxu1 %v8562_v12  ;;  %v3717_v2 = vsel %vm1784_vm4, %v7869_v0, 0.0 }
 0xde9   : > { %v3931_v29 = vmul.f32 1.442695, %v3926_v49 }
 0xdea   : > { %7236 = vmatmul.mubr.msk.bf16.gmra.mrb[112].mxu1 %vm1784_vm4, %v3724_v16 }
 0xdeb   : > { %7872 = vpow2.f32 %v3931_v29  ;;  %3718 = vadd.xlane.f32.xlu0 %v3717_v2  ;;  %7239 = vmatprep.mubr.msk.bf16.mxu1 %vm8563_vm0, %v8562_v12 }
 0xded   : > { %v10487_v25 = vpop.eup %7870 }
 0xdee   : > { %v3919_v37 = vpop.xlane.xlu1 %3918  ;;  %v3725_v4 = vpack.c.bf16 %v10487_v25, %v10487_v25 }
 0xdef   : > { %v3928_v28 = vsub.f32 %v10378_v11, %v3919_v37 }
 0xdf1   : > { %v3935_v56 = vmul.f32 1.442695, %v3928_v28 }
 0xdf2   : > { %7240 = vmatmul.mubr.msk.bf16.gmra.mrb[116].mxu1 %vm1784_vm4, %v3725_v4  ;;  %v3922_v63 = vpop.xlane.xlu1 %3921 }
 0xdf3   : > { %7874 = vpow2.f32 %v3935_v56  ;;  %7267 = vmatprep.mubr.msk.bf16.mxu1 %vm8563_vm0, %v8562_v12  ;;  %v3929_v47 = vsub.f32 %v10382_v39, %v3922_v63  ;;  %v3720_v56 = vsel %vm1784_vm4, %v10487_v25, 0.0  ;;  %v3480_v25 = vsel %vm1784_vm4, %v10397_v46, 0.0 }
 0xdf5   : > { %v7873_v8 = vpop.eup %7872  ;;  %v3937_v57 = vmul.f32 1.442695, %v3929_v47 }
 0xdf6   : > { %v3941_v32 = vsel %vm1784_vm4, %v7873_v8, 0.0  ;;  %v3925_v7 = vpop.xlane.xlu1 %3924 }
 0xdf7   : > { %3942 = vadd.xlane.f32.xlu0 %v3941_v32  ;;  %v3930_v9 = vsub.f32 %v10392_v19, %v3925_v7 }
 0xdf9   : > { %v3939_v39 = vmul.f32 1.442695, %v3930_v9 }
 0xdfd   : > { %v7875_v38 = vpop.eup %7874 }
 0xdfe   : > { %v3947_v15 = vsel %vm1784_vm4, %v7875_v38, 0.0 }
 0xdff   : > { %3948 = vadd.xlane.f32.xlu1 %v3947_v15 }
 0xe0d   : > { %v3916_v11 = vpop.xlane.xlu0 %3915 }
 0xe0e   : > { %v3927_v31 = vsub.f32 %v10424_v24, %v3916_v11 }
 0xe10   : > { %v3933_v33 = vmul.f32 1.442695, %v3927_v31 }
 0xe11   : > { %v4143_v52 = vpop.xlane.xlu0 %4142 }
 0xe12   : > { %7876 = vpow2.f32 %v3933_v33  ;;  %v4156_v3 = vsub.f32 %v10431_v35, %v4143_v52  ;;  %v4190_v35 = vpop.permute.xlu1 %4189 }
 0xe14   : > { %v4161_v30 = vmul.f32 1.442695, %v4156_v3 }
 0xe15   : > { %v3964_v20 = vpop.permute.xlu0 %3963 }
 0xe16   : > { %7878 = vpow2.f32 %v4161_v30  ;;  %v3977_v22 = vsel %vm1842_vm3, %v3964_v20, 0  ;;  %v3492_v30 = vsel %vm1784_vm4, %v10428_v53, 0.0  ;;  %v3489_v53 = vsel %vm1784_vm4, %v10412_v10, 0.0 }
 0xe17   : > { %7266 = vmatpush3.bf16.msra.mxu1 %v3977_v22  ;;  %7880 = vpow2.f32 %v3937_v57  ;;  %v3486_v57 = vsel %vm1784_vm4, %v10410_v58, 0.0  ;;  %v3483_v58 = vsel %vm1784_vm4, %v10399_v54, 0.0 }
 0xe18   : > { %7297 = vmatprep.subr.bf16.mxu1 %v8562_v12  ;;  %7882 = vpow2.f32 %v3939_v39 }
 0xe1c   : > { %v7877_v24 = vpop.eup %7876 }
 0xe1d   : > { %v3956_v23 = vpack.c.bf16 %v7877_v24, %v7873_v8  ;;  %v3944_v43 = vsel %vm1784_vm4, %v7877_v24, 0.0 }
 0xe1e   : > { %3945 = vadd.xlane.f32.xlu0 %v3944_v43 }
 0xe1f   : > { %7268 = vmatmul.mubr.msk.bf16.vlgmr.msra.gmra.mrb[120].mxu1 %vm1784_vm4, %v3956_v23 }
 0xe20   : > { %v7879_v26 = vpop.eup %7878  ;;  %7298 = vmatpush3.bf16.msra.mxu1 %v4190_v35  ;;  %7271 = vmatprep.mubr.msk.bf16.mxu1 %vm8563_vm0, %v8562_v12 }
 0xe21   : > { %v4171_v41 = vsel %vm1784_vm4, %v7879_v26, 0.0  ;;  %7299 = vmatprep.subr.bf16.mxu1 %v8562_v12  ;;  %v7881_v19 = vpop.eup %7880 }
 0xe22   : > { %4172 = vadd.xlane.f32.xlu0 %v4171_v41  ;;  %v3957_v13 = vpack.c.bf16 %v7881_v19, %v7875_v38  ;;  %v7883_v14 = vpop.eup %7882 }
 0xe23   : > { %v3958_v1 = vpack.c.bf16 %v7883_v14, %v7883_v14  ;;  %v3953_v31 = vsel %vm1784_vm4, %v7883_v14, 0.0 }
 0xe27   : > { %7272 = vmatmul.mubr.msk.bf16.gmra.mrb[124].mxu1 %vm1784_vm4, %v3957_v13 }
 0xe28   : > { %7275 = vmatprep.mubr.msk.bf16.mxu1 %vm8563_vm0, %v8562_v12 }
 0xe2b   : > { %v4146_v59 = vpop.xlane.xlu1 %4145 }
 0xe2c   : > { %v4157_v42 = vsub.f32 %v10443_v44, %v4146_v59 }
 0xe2e   : > { %v4163_v21 = vmul.f32 1.442695, %v4157_v42 }
 0xe2f   : > { %7276 = vmatmul.mubr.msk.bf16.gmra.mrb[128].mxu1 %vm1784_vm4, %v3958_v1  ;;  %v4149_v36 = vpop.xlane.xlu1 %4148 }
 0xe30   : > { %7884 = vpow2.f32 %v4163_v21  ;;  %v4158_v51 = vsub.f32 %v10448_v60, %v4149_v36  ;;  %7303 = vmatprep.mubr.msk.bf16.mxu1 %vm8563_vm0, %v8562_v12 }
 0xe32   : > { %v4165_v34 = vmul.f32 1.442695, %v4158_v51 }
 0xe33   : > { %v4152_v55 = vpop.xlane.xlu1 %4151 }
 0xe34   : > { %7886 = vpow2.f32 %v4165_v34  ;;  %v4159_v48 = vsub.f32 %v10453_v50, %v4152_v55  ;;  %v3950_v50 = vsel %vm1784_vm4, %v7881_v19, 0.0 }
 0xe36   : > { %v4167_v45 = vmul.f32 1.442695, %v4159_v48 }
 0xe37   : > { %v4192_v27 = vpop.permute.xlu1 %4191 }
 0xe38   : > { %7888 = vpow2.f32 %v4167_v45  ;;  %7300 = vmatpush3.bf16.msra.mxu1 %v4192_v27 }
 0xe39   : > { %7301 = vmatprep.subr.bf16.mxu1 %v8562_v12 }
 0xe3a   : > { %v7885_v44 = vpop.eup %7884 }
 0xe3b   : > { %v4194_v0 = vpop.permute.xlu1 %4193  ;;  %v4174_v49 = vsel %vm1784_vm4, %v7885_v44, 0.0  ;;  %v4186_v29 = vpack.c.bf16 %v7885_v44, %v7879_v26 }
 0xe3c   : > { %v4207_v60 = vsel %vm1842_vm3, %v4194_v0, 0  ;;  %4175 = vadd.xlane.f32.xlu0 %v4174_v49 }
 0xe3d   : > { %7302 = vmatpush3.bf16.msra.mxu1 %v4207_v60 }
 0xe3e   : > { %v7887_v16 = vpop.eup %7886 }
 0xe3f   : > { %v4177_v2 = vsel %vm1784_vm4, %v7887_v16, 0.0 }
 0xe40   : > { %4178 = vadd.xlane.f32.xlu1 %v4177_v2  ;;  %7304 = vmatmul.mubr.msk.bf16.vlgmr.msra.gmra.mrb[132].mxu1 %vm1784_vm4, %v4186_v29 }
 0xe41   : > { %3951 = vadd.xlane.f32.xlu0 %v3950_v50  ;;  %7307 = vmatprep.mubr.msk.bf16.mxu1 %vm8563_vm0, %v8562_v12 }
 0xe42   : > { %v7889_v37 = vpop.eup %7888  ;;  %v10526_v28 = vpop.f32.mrb[96].mxu1 }
 0xe43   : > { %v7197_v4 = vpop.f32.mrb[97].mxu1  ;;  %v4180_v8 = vsel %vm1784_vm4, %v7889_v37, 0.0  ;;  %v4187_v63 = vpack.c.bf16 %v7889_v37, %v7887_v16 }
 0xe44   : > { %v10531_v32 = vpop.f32.mrb[98].mxu1  ;;  %3721 = vadd.xlane.f32.xlu1 %v3720_v56  ;;  %v7664_v56 = vld [vmem:[%s9264_s21] sm:$0xff]  }
 0xe45   : > { %4181 = vadd.xlane.f32.xlu0 %v4180_v8  ;;  %v7198_v38 = vpop.f32.mrb[99].mxu1  ;;  %7316 = vmatpush3.bf16.msra.mxu0 %v7664_v56 }
 0xe46   : > { %v4155_v15 = vpop.xlane.xlu0 %4154  ;;  %v7665_v38 = vld [vmem:[%s9264_s21 + $0x8] sm:$0xff]   ;;  %7317 = vmatprep.subr.bf16.mxu0 %v8562_v12 }
 0xe47   : > { %v4160_v11 = vsub.f32 %v10460_v5, %v4155_v15 }
 0xe48   : > { %7308 = vmatmul.mubr.msk.bf16.gmra.mrb[136].mxu1 %vm1784_vm4, %v4187_v63 }
 0xe49   : > { %v4169_v47 = vmul.f32 1.442695, %v4160_v11  ;;  %3954 = vadd.xlane.f32.xlu0 %v3953_v31  ;;  %7311 = vmatprep.mubr.msk.bf16.mxu1 %vm8563_vm0, %v8562_v12 }
 0xe4a   : > { %7318 = vmatpush3.bf16.msra.mxu0 %v7665_v38 }
 0xe4b   : > { %7890 = vpow2.f32 %v4169_v47  ;;  %7319 = vmatprep.subr.bf16.mxu0 %v8562_v12 }
 0xe4d   : > { %v10540_v33 = vpop.f32.mrb[100].mxu1  ;;  %3481 = vadd.xlane.f32.xlu0 %v3480_v25  ;;  %v7666_v25 = vld [vmem:[%s9264_s21 + $0x10] sm:$0xff]  }
 0xe4e   : > { %v7201_v52 = vpop.f32.mrb[101].mxu1  ;;  %7320 = vmatpush3.bf16.msra.mxu0 %v7666_v25 }
 0xe4f   : > { %v10542_v3 = vpop.f32.mrb[102].mxu1  ;;  %7321 = vmatprep.subr.bf16.mxu0 %v8562_v12 }
 0xe50   : > { %v7202_v5 = vpop.f32.mrb[103].mxu1 }
 0xe51   : > { %3487 = vadd.xlane.f32.xlu0 %v3486_v57 }
 0xe55   : > { %v7891_v7 = vpop.eup %7890  ;;  %v10548_v20 = vpop.f32.mrb[104].mxu1  ;;  %3493 = vadd.xlane.f32.xlu0 %v3492_v30 }
 0xe56   : > { %v7205_v22 = vpop.f32.mrb[105].mxu1  ;;  %v4183_v46 = vsel %vm1784_vm4, %v7891_v7, 0.0  ;;  %v4188_v9 = vpack.c.bf16 %v7891_v7, %v7891_v7  ;;  %v7667_v7 = vld [vmem:[%s9264_s21 + $0x18] sm:$0xff]  }
 0xe57   : > { %v3563_v24 = vpop.f32.mrb[106].mxu1  ;;  %4184 = vadd.xlane.f32.xlu1 %v4183_v46  ;;  %7322 = vmatpush3.bf16.msra.mxu0 %v7667_v7 }
 0xe58   : > { %v7206_v39 = vpop.f32.mrb[107].mxu1  ;;  %7312 = vmatmul.mubr.msk.bf16.gmra.mrb[140].mxu1 %vm1784_vm4, %v4188_v9  ;;  %7323 = vmatprep.subr.bf16.mxu0 %v8562_v12 }
 0xe5b   : > { %3484 = vadd.xlane.f32.xlu1 %v3483_v58  ;;  %v7668_v58 = vld [vmem:[%s9264_s21 + $0x20] sm:$0xff]  }
 0xe5c   : > { %7324 = vmatpush3.bf16.msra.mxu0 %v7668_v58 }
 0xe5d   : > { %7325 = vmatprep.subr.bf16.mxu0 %v8562_v12 }
 0xe5f   : > { %3490 = vadd.xlane.f32.xlu1 %v3489_v53 }
 0xe6c   : > { %v3710_v43 = vpop.xlane.xlu1 %3709 }
 0xe6d   : > { %7892 = vrcp.f32 %v3710_v43 }
 0xe6e   : > { %v3713_v23 = vpop.xlane.xlu0 %3712 }
 0xe6f   : > { %7894 = vrcp.f32 %v3713_v23 }
 0xe74   : > { %v3716_v35 = vpop.xlane.xlu0 %3715 }
 0xe75   : > { %7896 = vrcp.f32 %v3716_v35 }
 0xe77   : > { %v7893_v19 = vpop.eup %7892 }
 0xe78   : > { %v3719_v26 = vpop.xlane.xlu0 %3718 }
 0xe79   : > { %7898 = vrcp.f32 %v3719_v26  ;;  %v7895_v14 = vpop.eup %7894  ;;  %v7669_v26 = vld [vmem:[%s9264_s21 + $0x28] sm:$0xff]  }
 0xe7a   : > { %7326 = vmatpush3.bf16.msra.mxu0 %v7669_v26 }
 0xe7b   : > { %7327 = vmatprep.subr.bf16.mxu0 %v8562_v12 }
 0xe7f   : > { %v7897_v36 = vpop.eup %7896 }
 0xe83   : > { %v7899_v34 = vpop.eup %7898 }
 0xe84   : > { %v3943_v29 = vpop.xlane.xlu0 %3942 }
 0xe85   : > { %7900 = vrcp.f32 %v3943_v29 }
 0xe8c   : > { %v3949_v4 = vpop.xlane.xlu1 %3948 }
 0xe8f   : > { %v7901_v63 = vpop.eup %7900 }
 0xeab   : > { %v3946_v2 = vpop.xlane.xlu0 %3945 }
 0xeac   : > { %7902 = vrcp.f32 %v3946_v2 }
 0xead   : > { %7904 = vrcp.f32 %v3949_v4 }
 0xeaf   : > { %v4173_v50 = vpop.xlane.xlu0 %4172 }
 0xeb5   : > { %v3783_v41 = vpop.f32.mrb[108].mxu1 }
 0xeb6   : > { %v7233_v13 = vpop.f32.mrb[109].mxu1  ;;  %v3806_v42 = vmul.f32 %v7893_v19, %v3783_v41  ;;  %v7903_v31 = vpop.eup %7902 }
 0xeb7   : > { %v3786_v59 = vpop.f32.mrb[110].mxu1  ;;  %v7905_v46 = vpop.eup %7904 }
 0xeb8   : > { %v3808_v54 = vmul.f32 %v7895_v14, %v3786_v59  ;;  %v7234_v1 = vpop.f32.mrb[111].mxu1  ;;  %v7670_v14 = vld [vmem:[%s9264_s21 + $0x30] sm:$0xff]  }
 0xeb9   : > { %7328 = vmatpush3.bf16.msra.mxu0 %v7670_v14 }
 0xeba   : > { %v7578_v21 = vpack.i.bf16 %v3808_v54, %v3806_v42  ;;  %7329 = vmatprep.subr.bf16.mxu0 %v8562_v12  ;;  %v7671_v54 = vld [vmem:[%s9264_s21 + $0x38] sm:$0xff]  }
 0xebc   : > { %7579 = vrot.lane.b32.xlu1 %v7578_v21, %s8568_s15 }
 0xebd   : > { %v3791_v10 = vpop.f32.mrb[112].mxu1  ;;  %7330 = vmatpush3.bf16.msra.mxu0 %v7671_v54 }
 0xebe   : > { %v7237_v51 = vpop.f32.mrb[113].mxu1  ;;  %v10557_v48 = vmul.f32 %v7897_v36, %v3791_v10 }
 0xebf   : > { %v3794_v55 = vpop.f32.mrb[114].mxu1 }
 0xec0   : > { %v10559_v45 = vmul.f32 %v7899_v34, %v3794_v55  ;;  %v7238_v27 = vpop.f32.mrb[115].mxu1 }
 0xec2   : > { %v7593_v44 = vpack.i.bf16 %v10559_v45, %v10557_v48 }
 0xec5   : > { %v10563_v0 = vpop.f32.mrb[116].mxu1 }
 0xec6   : > { %v7241_v49 = vpop.f32.mrb[117].mxu1 }
 0xec7   : > { %v3802_v60 = vpop.f32.mrb[118].mxu1 }
 0xec8   : > { %v7242_v16 = vpop.f32.mrb[119].mxu1 }
 0xec9   : > { %v4176_v37 = vpop.xlane.xlu0 %4175 }
 0xecd   : > { %v4179_v42 = vpop.xlane.xlu1 %4178 }
 0xece   : > { %v3952_v8 = vpop.xlane.xlu0 %3951 }
 0xecf   : > { %7906 = vrcp.f32 %v3952_v8 }
 0xed0   : > { %7908 = vrcp.f32 %v4173_v50 }
 0xed1   : > { %7910 = vrcp.f32 %v4176_v37  ;;  %v3722_v36 = vpop.xlane.xlu1 %3721 }
 0xed2   : > { %v4182_v1 = vpop.xlane.xlu0 %4181  ;;  %7912 = vrcp.f32 %v4179_v42 }
 0xed3   : > { %7914 = vrcp.f32 %v4182_v1 }
 0xed4   : > { %7916 = vrcp.f32 %v3722_v36 }
 0xed6   : > { %v3955_v27 = vpop.xlane.xlu0 %3954 }
 0xed7   : > { %7918 = vrcp.f32 %v3955_v27 }
 0xed9   : > { %v7907_v24 = vpop.eup %7906 }
 0xeda   : > { %v7909_v10 = vpop.eup %7908  ;;  %v3482_v7 = vpop.xlane.xlu0 %3481 }
 0xedb   : > { %v7911_v34 = vpop.eup %7910 }
 0xedc   : > { %v7913_v50 = vpop.eup %7912 }
 0xedd   : > { %v7915_v4 = vpop.eup %7914 }
 0xee4   : > { %v4185_v8 = vpop.xlane.xlu1 %4184 }
 0xee5   : > { %7920 = vrcp.f32 %v4185_v8 }
 0xee6   : > { %7922 = vrcp.f32 %v3482_v7 }
 0xef2   : > { %v4013_v15 = vpop.f32.mrb[120].mxu1 }
 0xef3   : > { %v7269_v11 = vpop.f32.mrb[121].mxu1  ;;  %v4036_v52 = vmul.f32 %v7901_v63, %v4013_v15 }
 0xef4   : > { %v4016_v47 = vpop.f32.mrb[122].mxu1 }
 0xef5   : > { %v4038_v5 = vmul.f32 %v7903_v31, %v4016_v47  ;;  %v7270_v57 = vpop.f32.mrb[123].mxu1  ;;  %v7917_v31 = vpop.eup %7916 }
 0xef6   : > { %v7919_v47 = vpop.eup %7918 }
 0xef7   : > { %v7583_v30 = vpack.i.bf16 %v4038_v5, %v4036_v52  ;;  %v3814_v52 = vmul.f32 %v7917_v31, %v10563_v0  ;;  %v7921_v5 = vpop.eup %7920 }
 0xef9   : > { %7584 = vrot.lane.b32.xlu0 %v7583_v30, %s8567_s5 }
 0xefa   : > { %v4021_v22 = vpop.f32.mrb[124].mxu1 }
 0xefb   : > { %v7273_v9 = vpop.f32.mrb[125].mxu1  ;;  %v4040_v53 = vmul.f32 %v7905_v46, %v4021_v22  ;;  %v3485_v22 = vpop.xlane.xlu1 %3484 }
 0xefc   : > { %v4024_v39 = vpop.f32.mrb[126].mxu1  ;;  %v3488_v46 = vpop.xlane.xlu0 %3487  ;;  %7924 = vrcp.f32 %v3485_v22 }
 0xefd   : > { %v4042_v23 = vmul.f32 %v7907_v24, %v4024_v39  ;;  %v7274_v43 = vpop.f32.mrb[127].mxu1  ;;  %7926 = vrcp.f32 %v3488_v46  ;;  %v7923_v39 = vpop.eup %7922 }
 0xeff   : > { %v7598_v35 = vpack.i.bf16 %v4042_v23, %v4040_v53  ;;  %v3491_v9 = vpop.xlane.xlu1 %3490 }
 0xf00   : > { %v3494_v24 = vpop.xlane.xlu0 %3493  ;;  %7928 = vrcp.f32 %v3491_v9 }
 0xf01   : > { %7930 = vrcp.f32 %v3494_v24 }
 0xf02   : > { %v4029_v41 = vpop.f32.mrb[128].mxu1 }
 0xf03   : > { %v7277_v19 = vpop.f32.mrb[129].mxu1  ;;  %v4044_v25 = vmul.f32 %v7919_v47, %v4029_v41 }
 0xf04   : > { %v4032_v13 = vpop.f32.mrb[130].mxu1  ;;  %v3567_v19 = vmul.f32 %v7923_v39, %v10526_v28 }
 0xf05   : > { %v7278_v59 = vpop.f32.mrb[131].mxu1 }
 0xf06   : > { %v7925_v53 = vpop.eup %7924 }
 0xf07   : > { %v3569_v41 = vmul.f32 %v7925_v53, %v10531_v32 }
 0xf13   : > { %v4243_v21 = vpop.f32.mrb[132].mxu1 }
 0xf14   : > { %v7305_v51 = vpop.f32.mrb[133].mxu1  ;;  %v4266_v49 = vmul.f32 %v7909_v10, %v4243_v21 }
 0xf15   : > { %v4246_v55 = vpop.f32.mrb[134].mxu1  ;;  %v7927_v51 = vpop.eup %7926 }
 0xf16   : > { %v4268_v60 = vmul.f32 %v7911_v34, %v4246_v55  ;;  %v7306_v16 = vpop.f32.mrb[135].mxu1  ;;  %v7929_v28 = vpop.eup %7928 }
 0xf18   : > { %v7588_v29 = vpack.i.bf16 %v4268_v60, %v4266_v49  ;;  %v3573_v49 = vmul.f32 %v7929_v28, %v10542_v3  ;;  %v3571_v60 = vmul.f32 %v7927_v51, %v10540_v33 }
 0xf1a   : > { %7589 = vrot.lane.b32.xlu1 %v7588_v29, %s8566_s20 }
 0xf1b   : > { %v4251_v2 = vpop.f32.mrb[136].mxu1 }
 0xf1c   : > { %v7309_v37 = vpop.f32.mrb[137].mxu1  ;;  %v4270_v38 = vmul.f32 %v7913_v50, %v4251_v2 }
 0xf1d   : > { %v4254_v56 = vpop.f32.mrb[138].mxu1 }
 0xf1e   : > { %v4272_v15 = vmul.f32 %v7915_v4, %v4254_v56  ;;  %v7310_v63 = vpop.f32.mrb[139].mxu1  ;;  %7594 = vrot.lane.b32.xlu1 %v7593_v44, %s8568_s15 }
 0xf1f   : > { %v7931_v63 = vpop.eup %7930 }
 0xf20   : > { %v7603_v11 = vpack.i.bf16 %v4272_v15, %v4270_v38  ;;  %v3575_v47 = vmul.f32 %v7931_v63, %v10548_v20  ;;  %v7689_v63 = vld [vmem:[%s9295_s0 + $0x4c] ss:$16 sps:$4 sm:$0xff]  }
 0xf22   : > { %7599 = vrot.lane.b32.xlu1 %v7598_v35, %s8567_s5  ;;  %7604 = vrot.lane.b32.xlu0 %v7603_v11, %s8566_s20 }
 0xf26   : > { %4288 = vrot.lane.b32.xlu1 %v3814_v52, %s8568_s15  ;;  %4308 = vrot.lane.b32.xlu0 %v4044_v25, %s8567_s5 }
 0xf2b   : > { %v4259_v57 = vpop.f32.mrb[140].mxu1 }
 0xf2c   : > { %v4274_v30 = vmul.f32 %v7921_v5, %v4259_v57  ;;  %v7313_v48 = vpop.f32.mrb[141].mxu1 }
 0xf2d   : > { %v4262_v45 = vpop.f32.mrb[142].mxu1 }
 0xf2e   : > { %v7314_v44 = vpop.f32.mrb[143].mxu1  ;;  %4328 = vrot.lane.b32.xlu1 %v4274_v30, %s8566_s20  ;;  %v7580_v0 = vpop.permute.xlu1 %7579  ;;  %v6431_v45 = vld [vmem:[%s11491_s18] ss:$0 sm:$0xff] }
 0xf2f   : > { %v7582_v23 = vunpack.i.h.bf16 %v7580_v0  ;;  %v7581_v43 = vunpack.i.l.bf16 %v7580_v0 }
 0xf31   : > { %v4336_v14 = vsel %vm1699_vm2, %v3569_v41, %v7582_v23  ;;  %v4335_v59 = vsel %vm1699_vm2, %v3567_v19, %v7581_v43 }
 0xf6b   : > { %v7585_v58 = vpop.permute.xlu0 %7584 }
 0xf6c   : > { %v7587_v35 = vunpack.i.h.bf16 %v7585_v58  ;;  %v7586_v26 = vunpack.i.l.bf16 %v7585_v58 }
 0xf6e   : > { %v4341_v1 = vsel %vm2676_vm5, %v4336_v14, %v7587_v35  ;;  %v4340_v21 = vsel %vm2676_vm5, %v4335_v59, %v7586_v26  ;;  %v7672_v14 = vld [vmem:[%s9295_s0] ss:$16 sps:$4 sm:$0xff]   ;;  %v7674_v59 = vld [vmem:[%s9295_s0 + $0x4] ss:$16 sps:$4 sm:$0xff]  }
 0xf6f   : > { %4782 = vmatprep.subr.bf16.mxu1 %v7674_v59 }
 0xf70   : > { %4783 = vmatpush1.bf16.msra.mxu1 %v7672_v14 }
 0xf8c   : > { %v7590_v13 = vpop.permute.xlu1 %7589 }
 0xf8d   : > { %v7592_v42 = vunpack.i.h.bf16 %v7590_v13  ;;  %v7591_v54 = vunpack.i.l.bf16 %v7590_v13 }
 0xf8f   : > { %v4345_v10 = vsel %vm2682_vm6, %v4340_v21, %v7591_v54  ;;  %v4346_v36 = vsel %vm2682_vm6, %v4341_v1, %v7592_v42  ;;  %v7675_v42 = vld [vmem:[%s9295_s0 + $0x8] ss:$16 sps:$4 sm:$0xff]   ;;  %v7677_v54 = vld [vmem:[%s9295_s0 + $0xc] ss:$16 sps:$4 sm:$0xff]   ;;  %v7678_v21 = vld [vmem:[%s9295_s0 + $0x20] ss:$16 sps:$4 sm:$0xff]  }
 0xf90   : > { %v4350_v32 = vpack.c.bf16 %v4346_v36, %v4345_v10  ;;  %v7595_v34 = vpop.permute.xlu1 %7594  ;;  %v7683_v1 = vld [vmem:[%s9295_s0 + $0x2c] ss:$16 sps:$4 sm:$0xff]   ;;  %4843 = vmatprep.subr.bf16.mxu0 %v7677_v54  ;;  %v7681_v10 = vld [vmem:[%s9295_s0 + $0x28] ss:$16 sps:$4 sm:$0xff]  }
 0xf91   : > { %v7597_v55 = vunpack.i.h.bf16 %v7595_v34  ;;  %v7596_v27 = vunpack.i.l.bf16 %v7595_v34 }
 0xf92   : > { %7332 = vmatmul.mubr.bf16.vlgmr.msra.gmra.mrb[132].mxu0 %v4350_v32 }
 0xf93   : > { %7335 = vmatprep.mubr.msk.bf16.mxu0 %vm8563_vm0, %v8562_v12  ;;  %v4338_v56 = vsel %vm1699_vm2, %v3573_v49, %v7597_v55  ;;  %v4337_v8 = vsel %vm1699_vm2, %v3571_v60, %v7596_v27  ;;  %4844 = vmatpush1.bf16.msra.mxu0 %v7675_v42 }
 0xf94   : > { %v7600_v16 = vpop.permute.xlu1 %7599  ;;  %v7605_v29 = vpop.permute.xlu0 %7604  ;;  %4845 = vmatprep.subr.bf16.mxu0 %v7683_v1 }
 0xf95   : > { %v7602_v2 = vunpack.i.h.bf16 %v7600_v16  ;;  %v7601_v50 = vunpack.i.l.bf16 %v7600_v16  ;;  %v7607_v37 = vunpack.i.h.bf16 %v7605_v29  ;;  %v7606_v4 = vunpack.i.l.bf16 %v7605_v29 }
 0xf97   : > { %v4343_v38 = vsel %vm2676_vm5, %v4338_v56, %v7602_v2  ;;  %v4342_v15 = vsel %vm2676_vm5, %v4337_v8, %v7601_v50  ;;  %4846 = vmatpush1.bf16.msra.mxu0 %v7681_v10  ;;  %v6442_v10 = vld [vmem:[%s9238_s23 + $0x2] ss:$0 sm:$0xff] }
 0xf98   : > { %v4347_v3 = vsel %vm2682_vm6, %v4342_v15, %v7606_v4  ;;  %v4348_v33 = vsel %vm2682_vm6, %v4343_v38, %v7607_v37  ;;  %v4289_v31 = vpop.permute.xlu1 %4288  ;;  %v4309_v52 = vpop.permute.xlu0 %4308  ;;  %v7686_v15 = vld [vmem:[%s9295_s0 + $0x44] ss:$16 sps:$4 sm:$0xff]   ;;  %4847 = vmatprep.subr.bf16.mxu0 %v7689_v63 }
 0xf99   : > { %v4351_v11 = vpack.c.bf16 %v4348_v33, %v4347_v3  ;;  %v4339_v25 = vsel %vm1699_vm2, %v3575_v47, %v4289_v31  ;;  %v7684_v3 = vld [vmem:[%s9295_s0 + $0x40] ss:$16 sps:$4 sm:$0xff]   ;;  %v7687_v33 = vld [vmem:[%s9295_s0 + $0x48] ss:$16 sps:$4 sm:$0xff]   ;;  %v7692_v31 = vld [vmem:[%s9295_s0 + $0x64] ss:$16 sps:$4 sm:$0xff]  }
 0xf9a   : > { %v4344_v5 = vsel %vm2676_vm5, %v4339_v25, %v4309_v52  ;;  %v7695_v47 = vld [vmem:[%s9295_s0 + $0x6c] ss:$16 sps:$4 sm:$0xff]   ;;  %v7690_v25 = vld [vmem:[%s9295_s0 + $0x60] ss:$16 sps:$4 sm:$0xff]   ;;  %v7693_v52 = vld [vmem:[%s9295_s0 + $0x68] ss:$16 sps:$4 sm:$0xff]  }
 0xf9b   : > { %7336 = vmatmul.mubr.bf16.gmra.mrb[136].mxu0 %v4351_v11 }
 0xf9c   : > { %7339 = vmatprep.mubr.msk.bf16.mxu0 %vm8563_vm0, %v8562_v12  ;;  %4848 = vmatpush1.bf16.msra.mxu0 %v7687_v33 }
 0xf9d   : > { %4849 = vmatprep.subr.bf16.mxu0 %v7695_v47 }
 0xfa0   : > { %v4329_v57 = vpop.permute.xlu1 %4328  ;;  %4850 = vmatpush1.bf16.msra.mxu0 %v7693_v52 }
 0xfa1   : > { %v4349_v30 = vsel %vm2682_vm6, %v4344_v5, %v4329_v57  ;;  %v7698_v5 = vld [vmem:[%s9295_s0 + $0x84] ss:$16 sps:$4 sm:$0xff]   ;;  %v7701_v57 = vld [vmem:[%s9295_s0 + $0x8c] ss:$16 sps:$4 sm:$0xff]  }
 0xfa2   : > { %v4352_v48 = vpack.c.bf16 %v4349_v30, %v4349_v30  ;;  %v7696_v30 = vld [vmem:[%s9295_s0 + $0x80] ss:$16 sps:$4 sm:$0xff]   ;;  %4851 = vmatprep.subr.bf16.mxu0 %v7701_v57 }
 0xfa3   : > { %v7720_v57 = vld [vmem:[%s9277_s4 + $0x40] sm:$0xff]  }
 0xfa4   : > { %7340 = vmatmul.mubr.bf16.gmra.mrb[140].mxu0 %v4352_v48  ;;  %v7699_v48 = vld [vmem:[%s9295_s0 + $0x88] ss:$16 sps:$4 sm:$0xff]  }
 0xfa5   : > { %4852 = vmatpush1.bf16.msra.mxu0 %v7699_v48  ;;  %v7723_v48 = vld [vmem:[%s9277_s4 + $0x80] sm:$0xff]  }
0x1065   : > { %v4457_v44 = vpop.f32.mrb[132].mxu0 }
0x1066   : > { %v4458_v7 = vadd.f32 %v6431_v45, %v4457_v44  ;;  %v7333_v22 = vpop.f32.mrb[133].mxu0  ;;  %v7707_v44 = vld [vmem:[%s9295_s0 + $0xac] ss:$16 sps:$4 sm:$0xff]  }
0x1067   : > { %v4460_v20 = vpop.f32.mrb[134].mxu0  ;;  %v7705_v22 = vld [vmem:[%s9295_s0 + $0xa8] ss:$16 sps:$4 sm:$0xff]   ;;  %4853 = vmatprep.subr.bf16.mxu0 %v7707_v44 }
0x1068   : > { %v10619_v46 = vadd.f32 %v4458_v7, %v9987_v61  ;;  %v4461_v12 = vadd.f32 %v6431_v45, %v4460_v20  ;;  %v7334_v9 = vpop.f32.mrb[135].mxu0  ;;  %v7702_v7 = vld [vmem:[%s9295_s0 + $0xa0] ss:$16 sps:$4 sm:$0xff]   ;;  %4854 = vmatpush1.bf16.msra.mxu0 %v7705_v22  ;;  %v7710_v20 = vld [vmem:[%s9295_s0 + $0xc4] ss:$16 sps:$4 sm:$0xff]  }
0x1069   : > { %v7708_v9 = vld [vmem:[%s9295_s0 + $0xc0] ss:$16 sps:$4 sm:$0xff]   ;;  %v7725_v22 = vld [vmem:[%s9277_s4 + $0xc8] sm:$0xff]  }
0x106a   : > { %11492 = vst [vmem:[#allocation40_spill] sm:$0xff] %v10619_v46  ;;  %v10622_v24 = vadd.f32 %v4461_v12, %v9989_v40  ;;  %4488 = vadd.xlane.f32.xlu0 %v10619_v46  ;;  %v7713_v12 = vld [vmem:[%s9295_s0 + $0xcc] ss:$16 sps:$4 sm:$0xff]  }
0x106b   : > { %4855 = vmatprep.subr.bf16.mxu0 %v7713_v12 }
0x106c   : > { %11493 = vst [vmem:[#allocation41_spill] sm:$0xff] %v10622_v24  ;;  %4490 = vadd.xlane.f32.xlu1 %v10622_v24 }
0x106e   : > { %v4465_v0 = vpop.f32.mrb[136].mxu0 }
0x106f   : > { %v4466_v39 = vadd.f32 %v6431_v45, %v4465_v0  ;;  %v7337_v58 = vpop.f32.mrb[137].mxu0  ;;  %v7711_v0 = vld [vmem:[%s9295_s0 + $0xc8] ss:$16 sps:$4 sm:$0xff]  }
0x1070   : > { %v4468_v53 = vpop.f32.mrb[138].mxu0  ;;  %4856 = vmatpush1.bf16.msra.mxu0 %v7711_v0  ;;  %v7719_v58 = vld [vmem:[%s9295_s0 + $0xec] ss:$16 sps:$4 sm:$0xff]  }
0x1071   : > { %v10627_v23 = vadd.f32 %v4466_v39, %v9993_v62  ;;  %v4469_v61 = vadd.f32 %v6431_v45, %v4468_v53  ;;  %v7338_v43 = vpop.f32.mrb[139].mxu0  ;;  %v7716_v39 = vld [vmem:[%s9295_s0 + $0xe4] ss:$16 sps:$4 sm:$0xff]   ;;  %v7714_v53 = vld [vmem:[%s9295_s0 + $0xe0] ss:$16 sps:$4 sm:$0xff]   ;;  %4857 = vmatprep.subr.bf16.mxu0 %v7719_v58 }
0x1072   : > { %v8569_v43 = vmov 0   ;;  %v7727_v0 = vld [vmem:[%s9277_s4 + $0x88] sm:$0xff]  }
0x1073   : > { %11494 = vst [vmem:[#allocation42_spill] sm:$0xff] %v10627_v23  ;;  %4492 = vadd.xlane.f32.xlu0 %v10627_v23  ;;  %v10631_v40 = vadd.f32 %v4469_v61, %v9996_v17  ;;  %v7680_v17 = vld [vmem:[%s9295_s0 + $0x24] ss:$16 sps:$4 sm:$0xff]   ;;  %v7717_v61 = vld [vmem:[%s9295_s0 + $0xe8] ss:$16 sps:$4 sm:$0xff]   ;;  %4814 = vmatprep.mubr.bf16.mxu1 %v8569_v43 }
0x1074   : > { %4784 = vmatprep.subr.bf16.mxu1 %v7680_v17  ;;  %4858 = vmatpush1.bf16.msra.mxu0 %v7717_v61  ;;  %v7729_v61 = vld [vmem:[%s9277_s4 + $0xd0] sm:$0xff]  }
0x1075   : > { %11495 = vst [vmem:[#allocation43_spill] sm:$0xff] %v10631_v40  ;;  %4785 = vmatpush1.bf16.msra.mxu1 %v7678_v21  ;;  %4875 = vmatprep.mubr.bf16.mxu0 %v8569_v43 }
0x1076   : > { %4786 = vmatprep.subr.bf16.mxu1 %v7686_v15 }
0x1077   : > { %4494 = vadd.xlane.f32.xlu0 %v10631_v40  ;;  %v4473_v35 = vpop.f32.mrb[140].mxu0 }
0x1078   : > { %v4474_v26 = vadd.f32 %v6431_v45, %v4473_v35  ;;  %v7341_v41 = vpop.f32.mrb[141].mxu0  ;;  %v7704_v45 = vld [vmem:[%s9295_s0 + $0xa4] ss:$16 sps:$4 sm:$0xff]   ;;  %s11513_s0 = sld [smem:[#allocation35_spill]] }
0x1079   : > { %v4476_v19 = vpop.f32.mrb[142].mxu0  ;;  %4787 = vmatpush1.bf16.msra.mxu1 %v7684_v3 }
0x107a   : > { %v10635_v62 = vadd.f32 %v4474_v26, %v9999_v18  ;;  %v7342_v13 = vpop.f32.mrb[143].mxu0  ;;  %4788 = vmatprep.subr.bf16.mxu1 %v7692_v31 }
0x107c   : > { %11496 = vst [vmem:[#allocation44_spill] sm:$0xff] %v10635_v62  ;;  %4496 = vadd.xlane.f32.xlu0 %v10635_v62 }
0x107d   : > { %4789 = vmatpush1.bf16.msra.mxu1 %v7690_v25 }
0x107e   : > { %4790 = vmatprep.subr.bf16.mxu1 %v7698_v5  ;;  %v4603_v5 = vshrl.u32 %v1621_v6, 7  ;;  %p6549_p12 = scmp.ne.s32.totalorder %s11513_s0, 2 }
0x107f   : > { %s11515_s3 = sld [smem:[#allocation70_spill]] (!%p6549_p12)  ;;  %s11516_s18 = sld [smem:[#allocation71_spill]] (!%p6549_p12) }
0x1080   : > { %v4612_v44 = vsub.s32 2, %v4603_v5  ;;  %v4608_v6 = vsub.s32 1, %v4603_v5  ;;  %v4616_v12 = vsub.s32 3, %v4603_v5 }
0x1081   : > { %4791 = vmatpush1.bf16.msra.mxu1 %v7696_v30  ;;  %v7721_v30 = vld [vmem:[%s9277_s4 + $0xc0] sm:$0xff]  }
0x1082   : > { %4792 = vmatprep.subr.bf16.mxu1 %v7704_v45  ;;  %6786 = vmatprep.subr.bf16.mxu0 %v7721_v30  ;;  %v4604_v45 = vsub.s32 0, %v4603_v5  ;;  %v7745_v30 = vld [vmem:[%s9277_s4 + $0xf0] sm:$0xff]  }
0x1085   : > { %4793 = vmatpush1.bf16.msra.mxu1 %v7702_v7  ;;  %v7724_v7 = vld [vmem:[%s9277_s4 + $0x48] sm:$0xff]  }
0x1086   : > { %4794 = vmatprep.subr.bf16.mxu1 %v7710_v20  ;;  %v4600_v20 = vld [vmem:[%s9274_s2] sm:$0xf] }
0x1087   : > { %v10714_v58 = vrot.slane %v4600_v20, %v4612_v44 }
0x1089   : > { %4795 = vmatpush1.bf16.msra.mxu1 %v7708_v9  ;;  %v7726_v9 = vld [vmem:[%s9277_s4 + $0x8] sm:$0xff]  }
0x108a   : > { %4796 = vmatprep.subr.bf16.mxu1 %v7716_v39  ;;  %v10712_v39 = vrot.slane %v4600_v20, %v4604_v45 }
0x108d   : > { %4797 = vmatpush1.bf16.msra.mxu1 %v7714_v53  ;;  %v7728_v53 = vld [vmem:[%s9277_s4 + $0x50] sm:$0xff]  }
0x108e   : > { %6752 = vmatprep.subr.bf16.mxu1 %v7720_v57  ;;  %v7744_v57 = vld [vmem:[%s9277_s4 + $0x70] sm:$0xff]  }
0x10f7   : > { %v4489_v18 = vpop.xlane.xlu0 %4488 }
0x10f8   : > { %v4498_v36 = vmul.f32 0.0078125, %v4489_v18 }
0x10f9   : > { %v4491_v51 = vpop.xlane.xlu1 %4490 }
0x10fa   : > { %v10647_v32 = vsub.f32 %v10619_v46, %v4498_v36  ;;  %v4499_v34 = vmul.f32 0.0078125, %v4491_v51 }
0x10fc   : > { %v10650_v28 = vsub.f32 %v10622_v24, %v4499_v34  ;;  %v4508_v55 = vmul.f32 %v10647_v32, %v10647_v32 }
0x10fe   : > { %4513 = vadd.xlane.f32.xlu1 %v4508_v55  ;;  %v4509_v27 = vmul.f32 %v10650_v28, %v10650_v28 }
0x1100   : > { %v4493_v49 = vpop.xlane.xlu0 %4492  ;;  %4515 = vadd.xlane.f32.xlu0 %v4509_v27 }
0x1101   : > { %v4500_v60 = vmul.f32 0.0078125, %v4493_v49 }
0x1103   : > { %v10657_v16 = vsub.f32 %v10627_v23, %v4500_v60  ;;  %v6443_v60 = vld [vmem:[%s9245_s17 + $0x2] ss:$0 sm:$0xff]  ;;  %s11514_s17 = sld [smem:[#allocation69_spill]] (!%p6549_p12) }
0x1104   : > { %v4495_v29 = vpop.xlane.xlu0 %4494 }
0x1105   : > { %v4501_v2 = vmul.f32 0.0078125, %v4495_v29  ;;  %v4510_v50 = vmul.f32 %v10657_v16, %v10657_v16 }
0x1107   : > { %v10662_v37 = vsub.f32 %v10631_v40, %v4501_v2  ;;  %4517 = vadd.xlane.f32.xlu1 %v4510_v50 }
0x1109   : > { %v4497_v4 = vpop.xlane.xlu0 %4496  ;;  %v4511_v56 = vmul.f32 %v10662_v37, %v10662_v37 }
0x110a   : > { %v4502_v8 = vmul.f32 0.0078125, %v4497_v4 }
0x110b   : > { %4519 = vadd.xlane.f32.xlu0 %v4511_v56 }
0x110c   : > { %v10667_v38 = vsub.f32 %v10635_v62, %v4502_v8 }
0x110e   : > { %v4512_v11 = vmul.f32 %v10667_v38, %v10667_v38 }
0x1110   : > { %4521 = vadd.xlane.f32.xlu1 %v4512_v11 }
0x118b   : > { %v4514_v35 = vpop.xlane.xlu1 %4513 }
0x118c   : > { %v4523_v26 = vmul.f32 0.0078125, %v4514_v35  ;;  %v10720_v35 = vrot.slane %v4600_v20, %v4616_v12 }
0x118d   : > { %v4516_v41 = vpop.xlane.xlu0 %4515 }
0x118e   : > { %v4528_v19 = vadd.f32 1e-05, %v4523_v26  ;;  %v4524_v13 = vmul.f32 0.0078125, %v4516_v41  ;;  %v7730_v26 = vld [vmem:[%s9277_s4 + $0x10] sm:$0xff]  }
0x118f   : > { %v7731_v41 = vld [vmem:[%s9277_s4 + $0x90] sm:$0xff]  }
0x1190   : > { %7932 = vrsqrt.f32 %v4528_v19  ;;  %v4529_v14 = vadd.f32 1e-05, %v4524_v13  ;;  %v7732_v19 = vld [vmem:[%s9277_s4 + $0x58] sm:$0xff]  }
0x1191   : > { %v7733_v13 = vld [vmem:[%s9277_s4 + $0xd8] sm:$0xff]  }
0x1192   : > { %7934 = vrsqrt.f32 %v4529_v14 }
0x1194   : > { %v4518_v59 = vpop.xlane.xlu1 %4517 }
0x1195   : > { %v4525_v42 = vmul.f32 0.0078125, %v4518_v59 }
0x1197   : > { %v4530_v54 = vadd.f32 1e-05, %v4525_v42  ;;  %v7734_v42 = vld [vmem:[%s9277_s4 + $0x18] sm:$0xff]  }
0x1198   : > { %v4520_v17 = vpop.xlane.xlu0 %4519 }
0x1199   : > { %7936 = vrsqrt.f32 %v4530_v54  ;;  %v4526_v1 = vmul.f32 0.0078125, %v4520_v17  ;;  %v7735_v54 = vld [vmem:[%s9277_s4 + $0x98] sm:$0xff]  }
0x119a   : > { %v7933_v21 = vpop.eup %7932 }
0x119b   : > { %v4538_v18 = vmul.f32 %v7933_v21, %v10647_v32  ;;  %v4531_v36 = vadd.f32 1e-05, %v4526_v1 }
0x119c   : > { %v7935_v51 = vpop.eup %7934 }
0x119d   : > { %v4549_v34 = vmul.f32 %v6442_v10, %v4538_v18  ;;  %v4539_v55 = vmul.f32 %v7935_v51, %v10650_v28  ;;  %7938 = vrsqrt.f32 %v4531_v36  ;;  %v4522_v27 = vpop.xlane.xlu1 %4521  ;;  %v7736_v18 = vld [vmem:[%s9277_s4 + $0x60] sm:$0xff]  }
0x119e   : > { %v4527_v49 = vmul.f32 0.0078125, %v4522_v27  ;;  %v7737_v36 = vld [vmem:[%s9277_s4 + $0xe0] sm:$0xff]  }
0x119f   : > { %v4550_v29 = vmul.f32 %v6442_v10, %v4539_v55  ;;  %v4560_v50 = vadd.f32 %v6443_v60, %v4549_v34 }
0x11a0   : > { %v4532_v2 = vadd.f32 1e-05, %v4527_v49 }
0x11a1   : > { %v4561_v4 = vadd.f32 %v6443_v60, %v4550_v29 }
0x11a2   : > { %7940 = vrsqrt.f32 %v4532_v2 }
0x11a3   : > { %v7937_v56 = vpop.eup %7936  ;;  %v4565_v8 = vpack.c.bf16 %v4561_v4, %v4560_v50  ;;  %v7738_v50 = vld [vmem:[%s9277_s4 + $0x20] sm:$0xff]  }
0x11a4   : > { %v4540_v15 = vmul.f32 %v7937_v56, %v10657_v16  ;;  %v7739_v4 = vld [vmem:[%s9277_s4 + $0xa0] sm:$0xff]  }
0x11a5   : > { %4815 = vmatmul.mubr.bf16.vlgmr.msra.gmra.mrb[144].mxu1 %v4565_v8  ;;  %4876 = vmatmul.mubr.bf16.vlgmr.msra.gmra.mrb[144].mxu0 %v4565_v8 }
0x11a6   : > { %4824 = vmatprep.mubr.bf16.mxu1 %v8569_v43  ;;  %4885 = vmatprep.mubr.bf16.mxu0 %v8569_v43  ;;  %v4551_v63 = vmul.f32 %v6442_v10, %v4540_v15  ;;  %v7740_v15 = vld [vmem:[%s9277_s4 + $0x68] sm:$0xff]  }
0x11a7   : > { %v7939_v32 = vpop.eup %7938  ;;  %6787 = vmatpush3.bf16.msra.mxu0 %v7723_v48 }
0x11a8   : > { %v4541_v28 = vmul.f32 %v7939_v32, %v10662_v37  ;;  %v4562_v11 = vadd.f32 %v6443_v60, %v4551_v63  ;;  %6788 = vmatprep.subr.bf16.mxu0 %v7725_v22  ;;  %v7741_v32 = vld [vmem:[%s9277_s4 + $0xe8] sm:$0xff]  }
0x11aa   : > { %v4552_v3 = vmul.f32 %v6442_v10, %v4541_v28 }
0x11ab   : > { %6789 = vmatpush3.bf16.msra.mxu0 %v7727_v0  ;;  %v7747_v0 = vld [vmem:[%s9277_s4 + $0xb0] sm:$0xff]  }
0x11ac   : > { %v7941_v33 = vpop.eup %7940  ;;  %v4563_v31 = vadd.f32 %v6443_v60, %v4552_v3  ;;  %6790 = vmatprep.subr.bf16.mxu0 %v7729_v61 }
0x11ad   : > { %v4542_v47 = vmul.f32 %v7941_v33, %v10667_v38  ;;  %v7722_v38 = vld [vmem:[%s9277_s4] sm:$0xff]  }
0x11ae   : > { %v4566_v25 = vpack.c.bf16 %v4563_v31, %v4562_v11  ;;  %6753 = vmatpush3.bf16.msra.mxu1 %v7722_v38 }
0x11af   : > { %v4553_v16 = vmul.f32 %v6442_v10, %v4542_v47  ;;  %6754 = vmatprep.subr.bf16.mxu1 %v7724_v7  ;;  %6791 = vmatpush3.bf16.msra.mxu0 %v7731_v41  ;;  %v7742_v47 = vld [vmem:[%s9277_s4 + $0x28] sm:$0xff]  }
0x11b0   : > { %4825 = vmatmul.mubr.bf16.gmra.mrb[148].mxu1 %v4566_v25  ;;  %4886 = vmatmul.mubr.bf16.gmra.mrb[148].mxu0 %v4566_v25  ;;  %v7743_v25 = vld [vmem:[%s9277_s4 + $0xa8] sm:$0xff]  }
0x11b1   : > { %4834 = vmatprep.mubr.bf16.mxu1 %v8569_v43  ;;  %4895 = vmatprep.mubr.bf16.mxu0 %v8569_v43  ;;  %v4564_v52 = vadd.f32 %v6443_v60, %v4553_v16  ;;  %v10718_v43 = vrot.slane %v4600_v20, %v4608_v6 }
0x11b2   : > { %6755 = vmatpush3.bf16.msra.mxu1 %v7726_v9  ;;  %6792 = vmatprep.subr.bf16.mxu0 %v7733_v13  ;;  %v7746_v9 = vld [vmem:[%s9277_s4 + $0x30] sm:$0xff]   ;;  %v7749_v13 = vld [vmem:[%s9277_s4 + $0xf8] sm:$0xff]  }
0x11b3   : > { %v4567_v37 = vpack.c.bf16 %v4564_v52, %v4564_v52  ;;  %6756 = vmatprep.subr.bf16.mxu1 %v7728_v53  ;;  %6793 = vmatpush3.bf16.msra.mxu0 %v7735_v54 }
0x11b4   : > { %6794 = vmatprep.subr.bf16.mxu0 %v7737_v36 }
0x11b6   : > { %6757 = vmatpush3.bf16.msra.mxu1 %v7730_v26 }
0x11b7   : > { %6758 = vmatprep.subr.bf16.mxu1 %v7732_v19  ;;  %6795 = vmatpush3.bf16.msra.mxu0 %v7739_v4  ;;  %v7748_v19 = vld [vmem:[%s9277_s4 + $0x78] sm:$0xff]  }
0x11b8   : > { %4835 = vmatmul.mubr.bf16.gmra.mrb[152].mxu1 %v4567_v37  ;;  %4896 = vmatmul.mubr.bf16.gmra.mrb[152].mxu0 %v4567_v37  ;;  %v7751_v4 = vld [vmem:[%s9277_s4 + $0xb8] sm:$0xff]  }
0x11b9   : > { %6796 = vmatprep.subr.bf16.mxu0 %v7741_v32 }
0x11ba   : > { %6759 = vmatpush3.bf16.msra.mxu1 %v7734_v42 }
0x11bb   : > { %6760 = vmatprep.subr.bf16.mxu1 %v7736_v18  ;;  %6797 = vmatpush3.bf16.msra.mxu0 %v7743_v25 }
0x11bc   : > { %6798 = vmatprep.subr.bf16.mxu0 %v7745_v30 }
0x11be   : > { %6761 = vmatpush3.bf16.msra.mxu1 %v7738_v50  ;;  %v7750_v50 = vld [vmem:[%s9277_s4 + $0x38] sm:$0xff]  }
0x11bf   : > { %6762 = vmatprep.subr.bf16.mxu1 %v7740_v15  ;;  %6799 = vmatpush3.bf16.msra.mxu0 %v7747_v0 }
0x11c0   : > { %6800 = vmatprep.subr.bf16.mxu0 %v7749_v13 }
0x11c2   : > { %6763 = vmatpush3.bf16.msra.mxu1 %v7742_v47 }
0x11c3   : > { %6764 = vmatprep.subr.bf16.mxu1 %v7744_v57  ;;  %6801 = vmatpush3.bf16.msra.mxu0 %v7751_v4 }
0x11c6   : > { %6765 = vmatpush3.bf16.msra.mxu1 %v7746_v9 }
0x11c7   : > { %6766 = vmatprep.subr.bf16.mxu1 %v7748_v19 }
0x11ca   : > { %6767 = vmatpush3.bf16.msra.mxu1 %v7750_v50 }
0x1278   : > { %v4816_v14 = vpop.f32.mrb[144].mxu1  ;;  %v4877_v59 = vpop.f32.mrb[144].mxu0 }
0x1279   : > { %v10729_v17 = vadd.f32 %v4816_v14, %v10712_v39  ;;  %v10732_v1 = vadd.f32 %v4877_v59, %v10714_v58  ;;  %v4818_v21 = vpop.f32.mrb[145].mxu1  ;;  %v4879_v10 = vpop.f32.mrb[145].mxu0 }
0x127a   : > { %v10737_v51 = vadd.f32 %v4818_v21, %v10718_v43  ;;  %v10740_v34 = vadd.f32 %v4879_v10, %v10720_v35  ;;  %v4820_v55 = vpop.f32.mrb[146].mxu1  ;;  %v4881_v27 = vpop.f32.mrb[146].mxu0 }
0x127b   : > { %v10743_v49 = vmul.f32 0.70710677, %v10729_v17  ;;  %v10746_v60 = vmul.f32 0.70710677, %v10732_v1  ;;  %v4822_v37 = vpop.f32.mrb[147].mxu1  ;;  %v4883_v5 = vpop.f32.mrb[147].mxu0  ;;  %v10776_v48 = vadd.f32 %v4820_v55, %v10712_v39  ;;  %v10783_v20 = vadd.f32 %v4881_v27, %v10714_v58 }
0x127c   : > { %v10749_v29 = vmul.f32 0.70710677, %v10737_v51  ;;  %v10752_v2 = vmul.f32 0.70710677, %v10740_v34  ;;  %v10795_v61 = vadd.f32 %v4822_v37, %v10718_v43  ;;  %v10815_v36 = vadd.f32 %v4883_v5, %v10720_v35 }
0x127d   : > { %v4944_v56 = vand.u32 2147483647, %v10743_v49  ;;  %v10758_v8 = vand.u32 2147483647, %v10746_v60  ;;  %v10792_v53 = vmul.f32 0.70710677, %v10776_v48 }
0x127e   : > { %v10763_v28 = vand.u32 2147483647, %v10749_v29  ;;  %v10766_v63 = vand.u32 2147483647, %v10752_v2  ;;  %v10806_v42 = vmul.f32 0.70710677, %v10783_v20 }
0x127f   : > { %v4964_v3 = vmul.f32 0.3275911, %v4944_v56  ;;  %v4966_v33 = vmul.f32 0.3275911, %v10758_v8  ;;  %v5224_v7 = vsub.f32 0.0, %v4944_v56  ;;  %v5226_v14 = vsub.f32 0.0, %v10758_v8 }
0x1280   : > { %v4965_v11 = vmul.f32 0.3275911, %v10763_v28  ;;  %v4967_v31 = vmul.f32 0.3275911, %v10766_v63  ;;  %v5225_v59 = vsub.f32 0.0, %v10763_v28  ;;  %v5227_v10 = vsub.f32 0.0, %v10766_v63 }
0x1281   : > { %v4984_v16 = vadd.f32 1.0, %v4964_v3  ;;  %v4986_v52 = vadd.f32 1.0, %v4966_v33  ;;  %v4948_v18 = vand.u32 2147483647, %v10792_v53  ;;  %v4950_v55 = vand.u32 2147483647, %v10806_v42 }
0x1282   : > { %v4985_v38 = vadd.f32 1.0, %v4965_v11  ;;  %v4987_v22 = vadd.f32 1.0, %v4967_v31  ;;  %v10819_v27 = vmul.f32 0.70710677, %v10795_v61  ;;  %v5244_v15 = vmul.f32 %v5224_v7, %v4944_v56 }
0x1283   : > { %7942 = vrcp.f32 %v4984_v16  ;;  %v10778_v45 = vpop.f32.mrb[148].mxu1  ;;  %v10780_v44 = vpop.f32.mrb[148].mxu0  ;;  %v4968_v32 = vmul.f32 0.3275911, %v4948_v18  ;;  %v4970_v3 = vmul.f32 0.3275911, %v4950_v55  ;;  %v5246_v11 = vmul.f32 %v5226_v14, %v10758_v8 }
0x1284   : > { %7944 = vrcp.f32 %v4986_v52  ;;  %v10785_v6 = vpop.f32.mrb[149].mxu1  ;;  %v10787_v12 = vpop.f32.mrb[149].mxu0  ;;  %v10824_v33 = vand.u32 2147483647, %v10819_v27  ;;  %v10828_v47 = vmul.f32 0.70710677, %v10815_v36  ;;  %v5245_v56 = vmul.f32 %v5225_v59, %v10763_v28 }
0x1285   : > { %v10797_v26 = vpop.f32.mrb[150].mxu1  ;;  %v10799_v41 = vpop.f32.mrb[150].mxu0  ;;  %7946 = vrcp.f32 %v4985_v38  ;;  %v4988_v31 = vadd.f32 1.0, %v4968_v32  ;;  %v5247_v52 = vmul.f32 %v5227_v10, %v10766_v63  ;;  %v4990_v37 = vadd.f32 1.0, %v4970_v3 }
0x1286   : > { %v10808_v54 = vpop.f32.mrb[151].mxu1  ;;  %v10810_v21 = vpop.f32.mrb[151].mxu0  ;;  %7948 = vrcp.f32 %v4987_v22  ;;  %v4969_v5 = vmul.f32 0.3275911, %v10824_v33  ;;  %v5264_v38 = vmul.f32 1.442695, %v5244_v15  ;;  %v10856_v3 = vadd.f32 %v10778_v45, %v10712_v39 }
0x1287   : > { %7950 = vrcp.f32 %v4988_v31  ;;  %v5228_v7 = vsub.f32 0.0, %v4948_v18  ;;  %v10844_v22 = vand.u32 2147483647, %v10828_v47  ;;  %v5230_v0 = vsub.f32 0.0, %v4950_v55 }
0x1288   : > { %7952 = vrcp.f32 %v4990_v37  ;;  %v4989_v19 = vadd.f32 1.0, %v4969_v5  ;;  %v10852_v4 = vmul.f32 0.5, %v10729_v17  ;;  %v5268_v32 = vmul.f32 1.442695, %v5246_v11 }
0x1289   : > { %v4971_v59 = vmul.f32 0.3275911, %v10844_v22  ;;  %v5248_v5 = vmul.f32 %v5228_v7, %v4948_v18  ;;  %v10862_v62 = vmul.f32 1.442695, %v5247_v52  ;;  %v5250_v45 = vmul.f32 %v5230_v0, %v4950_v55 }
0x128a   : > { %7954 = vrcp.f32 %v4989_v19  ;;  %vm5344_vm7 = vcmp.lt.f32.partialorder %v10743_v49, 0.0  ;;  %vm5346_vm8 = vcmp.lt.f32.partialorder %v10746_v60, 0.0  ;;  %vm5348_vm9 = vcmp.lt.f32.partialorder %v10792_v53, 0.0 }
0x128b   : > { %v10830_v25 = vpop.f32.mrb[152].mxu1  ;;  %v10832_v16 = vpop.f32.mrb[152].mxu0  ;;  %7956 = vpow2.f32 %v5264_v38  ;;  %vm5350_vm10 = vcmp.lt.f32.partialorder %v10806_v42, 0.0  ;;  %vm5345_vm11 = vcmp.lt.f32.partialorder %v10749_v29, 0.0  ;;  %vm5347_vm12 = vcmp.lt.f32.partialorder %v10752_v2, 0.0 }
0x128c   : > { %11497 = vst [vmem:[#allocation45_spill] sm:$0xff] %v10830_v25  ;;  %11498 = vst [vmem:[#allocation46_spill] sm:$0xff] %v10832_v16  ;;  %v10837_v57 = vpop.f32.mrb[153].mxu1  ;;  %v10839_v30 = vpop.f32.mrb[153].mxu0  ;;  %v10989_v29 = vadd.f32 %v10799_v41, %v10714_v58  ;;  %vm5349_vm13 = vcmp.lt.f32.partialorder %v10819_v27, 0.0  ;;  %vm5351_vm14 = vcmp.lt.f32.partialorder %v10828_v47, 0.0 }
0x128d   : > { %11499 = vst [vmem:[#allocation47_spill] sm:$0xff] %v10837_v57  ;;  %11500 = vst [vmem:[#allocation48_spill] sm:$0xff] %v10839_v30  ;;  %v10841_v8 = vpop.eup %7942  ;;  %v4840_v28 = vpop.f32.mrb[154].mxu1 }
0x128e   : > { %v10846_v9 = vpop.eup %7944  ;;  %v5044_v63 = vmul.f32 1.0614054, %v10841_v8  ;;  %v4901_v13 = vpop.f32.mrb[154].mxu0  ;;  %v4991_v28 = vadd.f32 1.0, %v4971_v59  ;;  %v5272_v59 = vmul.f32 1.442695, %v5248_v5 }
0x128f   : > { %v5046_v14 = vmul.f32 1.0614054, %v10846_v9  ;;  %v4841_v10 = vpop.f32.mrb[155].mxu1  ;;  %v4902_v50 = vpop.f32.mrb[155].mxu0  ;;  %v11003_v41 = vmul.f32 0.70710677, %v10989_v29 }
0x1290   : > { %v6476_v15 = vadd.f32 -1.4531521, %v5044_v63  ;;  %v10858_v31 = vpop.eup %7946  ;;  %v5266_v50 = vmul.f32 1.442695, %v5245_v56  ;;  %v10868_v63 = vmul.f32 0.70710677, %v10856_v3  ;;  %7958 = vrcp.f32 %v4991_v28 }
0x1291   : > { %v6478_v37 = vadd.f32 -1.4531521, %v5046_v14  ;;  %v5045_v10 = vmul.f32 1.0614054, %v10858_v31  ;;  %v10864_v17 = vpop.eup %7948  ;;  %7960 = vpow2.f32 %v5268_v32  ;;  %vm5358_vm3 = vcmp.lt.f32.partialorder %v11003_v41, 0.0 }
0x1292   : > { %v5084_v13 = vmul.f32 %v10841_v8, %v6476_v15  ;;  %11501 = vst [vmem:[#allocation49_spill] sm:$0xff] %v10868_v63  ;;  %v5047_v7 = vmul.f32 1.0614054, %v10864_v17  ;;  %v10872_v56 = vand.u32 2147483647, %v10868_v63  ;;  %7962 = vpow2.f32 %v5266_v50  ;;  %v10876_v0 = vpop.eup %7950 }
0x1293   : > { %v5086_v11 = vmul.f32 %v10846_v9, %v6478_v37  ;;  %v6477_v18 = vadd.f32 -1.4531521, %v5045_v10  ;;  %v5276_v37 = vmul.f32 1.442695, %v5250_v45  ;;  %v10881_v32 = vpop.eup %7952  ;;  %7964 = vpow2.f32 %v5272_v59 }
0x1294   : > { %v5104_v14 = vadd.f32 1.4214138, %v5084_v13  ;;  %v6479_v55 = vadd.f32 -1.4531521, %v5047_v7  ;;  %v5229_v13 = vsub.f32 0.0, %v10824_v33  ;;  %v10888_v24 = vpop.eup %7954 }
0x1295   : > { %v5106_v19 = vadd.f32 1.4214138, %v5086_v11  ;;  %v5085_v38 = vmul.f32 %v10858_v31, %v6477_v18  ;;  %v4972_v28 = vmul.f32 0.3275911, %v10872_v56  ;;  %v5050_v50 = vmul.f32 1.0614054, %v10881_v32  ;;  %v7957_v30 = vpop.eup %7956 }
0x1296   : > { %v5124_v52 = vmul.f32 %v10841_v8, %v5104_v14  ;;  %v5087_v11 = vmul.f32 %v10864_v17, %v6479_v55  ;;  %v5048_v14 = vmul.f32 1.0614054, %v10876_v0  ;;  %7966 = vpow2.f32 %v5276_v37 }
0x1297   : > { %v5126_v15 = vmul.f32 %v10846_v9, %v5106_v19  ;;  %v5105_v10 = vadd.f32 1.4214138, %v5085_v38  ;;  %v4992_v7 = vadd.f32 1.0, %v4972_v28  ;;  %v6482_v38 = vadd.f32 -1.4531521, %v5050_v50 }
0x1298   : > { %v6496_v5 = vadd.f32 -0.28449672, %v5124_v52  ;;  %v5107_v40 = vadd.f32 1.4214138, %v5087_v11  ;;  %v6480_v23 = vadd.f32 -1.4531521, %v5048_v14  ;;  %v5249_v55 = vmul.f32 %v5229_v13, %v10824_v33 }
0x1299   : > { %v6498_v18 = vadd.f32 -0.28449672, %v5126_v15  ;;  %v5125_v45 = vmul.f32 %v10858_v31, %v5105_v10  ;;  %v5090_v10 = vmul.f32 %v10881_v32, %v6482_v38  ;;  %v5049_v11 = vmul.f32 1.0614054, %v10888_v24 }
0x129a   : > { %v5164_v19 = vmul.f32 %v10841_v8, %v6496_v5  ;;  %v5127_v59 = vmul.f32 %v10864_v17, %v5107_v40  ;;  %v5088_v28 = vmul.f32 %v10876_v0, %v6480_v23  ;;  %v5231_v14 = vsub.f32 0.0, %v10844_v22  ;;  %v10897_v57 = vpop.eup %7958 }
0x129b   : > { %v5166_v52 = vmul.f32 %v10846_v9, %v6498_v18  ;;  %v6497_v15 = vadd.f32 -0.28449672, %v5125_v45  ;;  %7968 = vrcp.f32 %v4992_v7  ;;  %v7961_v13 = vpop.eup %7960  ;;  %v5110_v50 = vadd.f32 1.4214138, %v5090_v10 }
0x129c   : > { %v5184_v46 = vadd.f32 0.2548296, %v5164_v19  ;;  %v6499_v18 = vadd.f32 -0.28449672, %v5127_v59  ;;  %v5108_v33 = vadd.f32 1.4214138, %v5088_v28  ;;  %v7963_v45 = vpop.eup %7962  ;;  %7970 = vpow2.f32 %v10862_v62 }
0x129d   : > { %v5186_v5 = vadd.f32 0.2548296, %v5166_v52  ;;  %v6481_v23 = vadd.f32 -1.4531521, %v5049_v11  ;;  %v5051_v19 = vmul.f32 1.0614054, %v10897_v57  ;;  %v5165_v38 = vmul.f32 %v10858_v31, %v6497_v15  ;;  %v7965_v28 = vpop.eup %7964 }
0x129e   : > { %v5204_v37 = vmul.f32 %v10841_v8, %v5184_v46  ;;  %v5167_v16 = vmul.f32 %v10864_v17, %v6499_v18  ;;  %v5128_v25 = vmul.f32 %v10876_v0, %v5108_v33  ;;  %v5130_v46 = vmul.f32 %v10881_v32, %v5110_v50 }
0x129f   : > { %v5206_v40 = vmul.f32 %v10846_v9, %v5186_v5  ;;  %v5089_v8 = vmul.f32 %v10888_v24, %v6481_v23  ;;  %v6483_v7 = vadd.f32 -1.4531521, %v5051_v19  ;;  %v10908_v9 = vmul.f32 0.5, %v10732_v1 }
0x12a0   : > { %v5304_v52 = vmul.f32 %v7957_v30, %v5204_v37  ;;  %v6500_v59 = vadd.f32 -0.28449672, %v5128_v25  ;;  %v5251_v30 = vmul.f32 %v5231_v14, %v10844_v22  ;;  %v6502_v15 = vadd.f32 -0.28449672, %v5130_v46 }
0x12a1   : > { %v5306_v63 = vmul.f32 %v7961_v13, %v5206_v40  ;;  %v5109_v5 = vadd.f32 1.4214138, %v5089_v8  ;;  %v5274_v10 = vmul.f32 1.442695, %v5249_v55  ;;  %v5091_v11 = vmul.f32 %v10897_v57, %v6483_v7  ;;  %v7967_v13 = vpop.eup %7966 }
0x12a2   : > { %v5324_v37 = vsub.f32 1.0, %v5304_v52  ;;  %v5185_v33 = vadd.f32 0.2548296, %v5165_v38  ;;  %v5168_v1 = vmul.f32 %v10876_v0, %v6500_v59  ;;  %v5187_v62 = vadd.f32 0.2548296, %v5167_v16 }
0x12a3   : > { %v5326_v18 = vsub.f32 1.0, %v5306_v63  ;;  %v5170_v25 = vmul.f32 %v10881_v32, %v6502_v15  ;;  %v5129_v22 = vmul.f32 %v10888_v24, %v5109_v5  ;;  %v5111_v14 = vadd.f32 1.4214138, %v5091_v11 }
0x12a4   : > { %v4908_v40 = vmul.f32 0.5, %v10776_v48  ;;  %v5188_v50 = vadd.f32 0.2548296, %v5168_v1  ;;  %v4910_v23 = vmul.f32 0.5, %v10783_v20  ;;  %v5278_v55 = vmul.f32 1.442695, %v5251_v30 }
0x12a5   : > { %v5190_v19 = vadd.f32 0.2548296, %v5170_v25  ;;  %v6501_v63 = vadd.f32 -0.28449672, %v5129_v22  ;;  %7972 = vpow2.f32 %v5274_v10  ;;  %v10921_v52 = vpop.eup %7968  ;;  %v5364_v38 = vsub.f32 0.0, %v5324_v37 }
0x12a6   : > { %v5366_v16 = vsub.f32 0.0, %v5326_v18  ;;  %v5205_v46 = vmul.f32 %v10858_v31, %v5185_v33  ;;  %v5208_v8 = vmul.f32 %v10876_v0, %v5188_v50  ;;  %v5207_v48 = vmul.f32 %v10864_v17, %v5187_v62 }
0x12a7   : > { %v5210_v20 = vmul.f32 %v10881_v32, %v5190_v19  ;;  %v5169_v7 = vmul.f32 %v10888_v24, %v6501_v63  ;;  %v5131_v59 = vmul.f32 %v10897_v57, %v5111_v14  ;;  %7974 = vpow2.f32 %v5278_v55  ;;  %v7971_v32 = vpop.eup %7970 }
0x12a8   : > { %v5308_v30 = vmul.f32 %v7965_v28, %v5208_v8  ;;  %v10932_v15 = vadd.f32 %v10780_v44, %v10714_v58  ;;  %v10936_v31 = vadd.f32 %v10785_v6, %v10718_v43  ;;  %v5232_v17 = vsub.f32 0.0, %v10872_v56 }
0x12a9   : > { %v5310_v0 = vmul.f32 %v7967_v13, %v5210_v20  ;;  %v5189_v5 = vadd.f32 0.2548296, %v5169_v7  ;;  %v6503_v10 = vadd.f32 -0.28449672, %v5131_v59  ;;  %v5384_v11 = vsel %vm5344_vm7, %v5364_v38, %v5324_v37 }
0x12aa   : > { %v5386_v28 = vsel %vm5346_vm8, %v5366_v16, %v5326_v18  ;;  %v5328_v33 = vsub.f32 1.0, %v5308_v30  ;;  %v5052_v44 = vmul.f32 1.0614054, %v10921_v52  ;;  %v5305_v1 = vmul.f32 %v7963_v45, %v5205_v46 }
0x12ab   : > { %v5307_v62 = vmul.f32 %v7971_v32, %v5207_v48  ;;  %v5330_v25 = vsub.f32 1.0, %v5310_v0  ;;  %v5209_v6 = vmul.f32 %v10888_v24, %v5189_v5  ;;  %v5171_v22 = vmul.f32 %v10897_v57, %v6503_v10 }
0x12ac   : > { %v5368_v13 = vsub.f32 0.0, %v5328_v33  ;;  %v6484_v14 = vadd.f32 -1.4531521, %v5052_v44  ;;  %v10947_v50 = vmul.f32 0.70710677, %v10932_v15  ;;  %v5404_v49 = vadd.f32 1.0, %v5384_v11 }
0x12ad   : > { %v5406_v37 = vadd.f32 1.0, %v5386_v28  ;;  %v5370_v55 = vsub.f32 0.0, %v5330_v25  ;;  %v5252_v60 = vmul.f32 %v5232_v17, %v10872_v56  ;;  %v5191_v45 = vadd.f32 0.2548296, %v5171_v22 }
0x12ae   : > { %v5388_v18 = vsel %vm5348_vm9, %v5368_v13, %v5328_v33  ;;  %v5092_v19 = vmul.f32 %v10921_v52, %v6484_v14  ;;  %v4954_v24 = vand.u32 2147483647, %v10947_v50  ;;  %v5325_v38 = vsub.f32 1.0, %v5305_v1 }
0x12af   : > { %v7973_v63 = vpop.eup %7972  ;;  %v5327_v16 = vsub.f32 1.0, %v5307_v62  ;;  %v5408_v46 = vadd.f32 1.0, %v5388_v18  ;;  %v5390_v8 = vsel %vm5350_vm10, %v5370_v55, %v5330_v25  ;;  %v10957_v56 = vmul.f32 %v5404_v49, %v10852_v4 }
0x12b0   : > { %v5410_v48 = vadd.f32 1.0, %v5390_v8  ;;  %v5309_v20 = vmul.f32 %v7973_v63, %v5209_v6  ;;  %v5112_v7 = vadd.f32 1.4214138, %v5092_v19  ;;  %v4974_v59 = vmul.f32 0.3275911, %v4954_v24 }
0x12b1   : > { %v10960_v53 = vmul.f32 %v5406_v37, %v10908_v9  ;;  %v10962_v30 = vmul.f32 %v5408_v46, %v4908_v40  ;;  %v10965_v0 = vmul.f32 0.70710677, %v10936_v31  ;;  %v7975_v5 = vpop.eup %7974  ;;  %v5211_v42 = vmul.f32 %v10897_v57, %v5191_v45 }
0x12b2   : > { %v10967_v10 = vmul.f32 %v5410_v48, %v4910_v23  ;;  %v5132_v17 = vmul.f32 %v10921_v52, %v5112_v7  ;;  %v4994_v32 = vadd.f32 1.0, %v4974_v59  ;;  %v5280_v11 = vmul.f32 1.442695, %v5252_v60 }
0x12b3   : > { %v5444_v4 = vpack.c.bf16 %v10962_v30, %v10957_v56  ;;  %v4953_v9 = vand.u32 2147483647, %v10965_v0  ;;  %v4905_v40 = vmul.f32 0.5, %v10737_v51  ;;  %v5329_v33 = vsub.f32 1.0, %v5309_v20 }
0x12b4   : > { %v6504_v44 = vadd.f32 -0.28449672, %v5132_v17  ;;  %v5365_v23 = vsub.f32 0.0, %v5325_v38  ;;  %v4907_v1 = vmul.f32 0.5, %v10740_v34  ;;  %7976 = vrcp.f32 %v4994_v32 }
0x12b5   : > { %v4973_v57 = vmul.f32 0.3275911, %v4953_v9  ;;  %v5367_v62 = vsub.f32 0.0, %v5327_v16  ;;  %v5311_v25 = vmul.f32 %v7975_v5, %v5211_v42  ;;  %7978 = vpow2.f32 %v5280_v11 }
0x12b6   : > { %v5172_v6 = vmul.f32 %v10921_v52, %v6504_v44  ;;  %v4890_v13 = vadd.f32 %v10787_v12, %v10720_v35  ;;  %v5369_v22 = vsub.f32 0.0, %v5329_v33  ;;  %v5234_v14 = vsub.f32 0.0, %v4954_v24 }
0x12b7   : > { %v4993_v51 = vadd.f32 1.0, %v4973_v57  ;;  %v10985_v34 = vadd.f32 %v10797_v26, %v10712_v39  ;;  %v5385_v2 = vsel %vm5345_vm11, %v5365_v23, %v5325_v38  ;;  %v4909_v49 = vmul.f32 0.5, %v10795_v61 }
0x12b8   : > { %v10993_v37 = vmul.f32 0.5, %v10815_v36  ;;  %v5387_v55 = vsel %vm5347_vm12, %v5367_v62, %v5327_v16  ;;  %v5331_v60 = vsub.f32 1.0, %v5311_v25  ;;  %v10995_v12 = vmul.f32 0.70710677, %v4890_v13 }
0x12b9   : > { %7980 = vrcp.f32 %v4993_v51  ;;  %v10998_v18 = vmul.f32 0.70710677, %v10985_v34  ;;  %v5192_v26 = vadd.f32 0.2548296, %v5172_v6  ;;  %v5389_v61 = vsel %vm5349_vm13, %v5369_v22, %v5329_v33 }
0x12ba   : > { %v5254_v45 = vmul.f32 %v5234_v14, %v4954_v24  ;;  %v11006_v36 = vand.u32 2147483647, %v10995_v12  ;;  %v5405_v63 = vadd.f32 1.0, %v5385_v2  ;;  %v5407_v38 = vadd.f32 1.0, %v5387_v55  ;;  %v11502_v55 = vld [vmem:[#allocation49_spill] sm:$0xff] }
0x12bb   : > { %v11009_v19 = vand.u32 2147483647, %v10998_v18  ;;  %v5233_v16 = vsub.f32 0.0, %v4953_v9  ;;  %v11012_v46 = vand.u32 2147483647, %v11003_v41  ;;  %v5371_v27 = vsub.f32 0.0, %v5331_v60 }
0x12bc   : > { %v11015_v8 = vmul.f32 0.5, %v10856_v3  ;;  %v4975_v48 = vmul.f32 0.3275911, %v11006_v36  ;;  %v5409_v7 = vadd.f32 1.0, %v5389_v61  ;;  %v5212_v59 = vmul.f32 %v10921_v52, %v5192_v26 }
0x12bd   : > { %v4976_v24 = vmul.f32 0.3275911, %v11009_v19  ;;  %v11023_v5 = vmul.f32 0.5, %v10932_v15  ;;  %v4978_v42 = vmul.f32 0.3275911, %v11012_v46  ;;  %v4833_v3 = vadd.f32 %v10808_v54, %v10718_v43 }
0x12be   : > { %v11019_v20 = vpop.eup %7976  ;;  %v5284_v32 = vmul.f32 1.442695, %v5254_v45  ;;  %v4995_v11 = vadd.f32 1.0, %v4975_v48  ;;  %v11029_v44 = vmul.f32 %v5405_v63, %v4905_v40  ;;  %v11031_v23 = vmul.f32 %v5407_v38, %v4907_v1 }
0x12bf   : > { %v5054_v17 = vmul.f32 1.0614054, %v11019_v20  ;;  %v7979_v33 = vpop.eup %7978  ;;  %v5253_v57 = vmul.f32 %v5233_v16, %v4953_v9  ;;  %v4996_v62 = vadd.f32 1.0, %v4976_v24  ;;  %v5391_v52 = vsel %vm5351_vm14, %v5371_v27, %v5331_v60 }
0x12c0   : > { %7982 = vrcp.f32 %v4995_v11  ;;  %v4998_v25 = vadd.f32 1.0, %v4978_v42  ;;  %v11037_v51 = vmul.f32 %v5409_v7, %v4909_v49  ;;  %v5312_v22 = vmul.f32 %v7979_v33, %v5212_v59  ;;  %v11503_v7 = vld [vmem:[#allocation45_spill] sm:$0xff] }
0x12c1   : > { %v6486_v15 = vadd.f32 -1.4531521, %v5054_v17  ;;  %v11040_v54 = vmul.f32 0.5, %v10936_v31  ;;  %7984 = vrcp.f32 %v4996_v62  ;;  %v11044_v1 = vmul.f32 0.70710677, %v4833_v3 }
0x12c2   : > { %7986 = vpow2.f32 %v5284_v32  ;;  %v5411_v47 = vadd.f32 1.0, %v5391_v52  ;;  %v5282_v14 = vmul.f32 1.442695, %v5253_v57  ;;  %v11046_v2 = vmul.f32 0.5, %v4890_v13 }
0x12c3   : > { %v11035_v6 = vpop.eup %7980  ;;  %v5094_v40 = vmul.f32 %v11019_v20, %v6486_v15  ;;  %v11050_v49 = vadd.f32 %v10810_v21, %v10720_v35  ;;  %vm5352_vm15 = vcmp.lt.f32.partialorder %v11502_v55, 0.0  ;;  %7988 = vrcp.f32 %v4998_v25 }
0x12c4   : > { %v5053_v9 = vmul.f32 1.0614054, %v11035_v6  ;;  %v4957_v26 = vand.u32 2147483647, %v11044_v1  ;;  %v5332_v61 = vsub.f32 1.0, %v5312_v22  ;;  %v5235_v45 = vsub.f32 0.0, %v11006_v36 }
0x12c5   : > { %v5114_v31 = vadd.f32 1.4214138, %v5094_v40  ;;  %v5236_v63 = vsub.f32 0.0, %v11009_v19  ;;  %v11057_v38 = vmul.f32 0.70710677, %v11050_v49  ;;  %v11062_v16 = vmul.f32 0.5, %v10985_v34 }
0x12c6   : > { %v6485_v60 = vadd.f32 -1.4531521, %v5053_v9  ;;  %v4977_v27 = vmul.f32 0.3275911, %v4957_v26  ;;  %7990 = vpow2.f32 %v5282_v14  ;;  %v11065_v48 = vmul.f32 0.5, %v10989_v29 }
0x12c7   : > { %v5134_v13 = vmul.f32 %v11019_v20, %v5114_v31  ;;  %v4959_v24 = vand.u32 2147483647, %v11057_v38  ;;  %v11070_v59 = vadd.f32 %v11503_v7, %v10712_v39  ;;  %v5238_v32 = vsub.f32 0.0, %v11012_v46 }
0x12c8   : > { %v5093_v21 = vmul.f32 %v11035_v6, %v6485_v60  ;;  %v4997_v11 = vadd.f32 1.0, %v4977_v27  ;;  %v5372_v33 = vsub.f32 0.0, %v5332_v61  ;;  %v5255_v34 = vmul.f32 %v5235_v45, %v11006_v36 }
0x12c9   : > { %v6506_v42 = vadd.f32 -0.28449672, %v5134_v13  ;;  %v5256_v57 = vmul.f32 %v5236_v63, %v11009_v19  ;;  %v4979_v62 = vmul.f32 0.3275911, %v4959_v24  ;;  %v5237_v39 = vsub.f32 0.0, %v4957_v26 }
0x12ca   : > { %v5113_v17 = vadd.f32 1.4214138, %v5093_v21  ;;  %v11075_v52 = vpop.eup %7982  ;;  %7992 = vrcp.f32 %v4997_v11  ;;  %v11082_v40 = vmul.f32 0.5, %v4833_v3  ;;  %v11085_v36 = vmul.f32 0.70710677, %v11070_v59 }
0x12cb   : > { %v5174_v29 = vmul.f32 %v11019_v20, %v6506_v42  ;;  %v11079_v25 = vpop.eup %7984  ;;  %v5055_v22 = vmul.f32 1.0614054, %v11075_v52  ;;  %v4999_v9 = vadd.f32 1.0, %v4979_v62  ;;  %v5258_v45 = vmul.f32 %v5238_v32, %v11012_v46  ;;  %v11504_v46 = vld [vmem:[#allocation46_spill] sm:$0xff] }
0x12cc   : > { %v5133_v15 = vmul.f32 %v11035_v6, %v5113_v17  ;;  %v7987_v19 = vpop.eup %7986  ;;  %v5056_v60 = vmul.f32 1.0614054, %v11079_v25  ;;  %v5392_v63 = vsel %vm5352_vm15, %v5372_v33, %v5332_v61  ;;  %v5286_v21 = vmul.f32 1.442695, %v5255_v34 }
0x12cd   : > { %v5194_v14 = vadd.f32 0.2548296, %v5174_v29  ;;  %v6487_v13 = vadd.f32 -1.4531521, %v5055_v22  ;;  %7994 = vrcp.f32 %v4999_v9  ;;  %v11091_v27 = vpop.eup %7988  ;;  %v5288_v42 = vmul.f32 1.442695, %v5256_v57 }
0x12ce   : > { %v6505_v31 = vadd.f32 -0.28449672, %v5133_v15  ;;  %v6488_v7 = vadd.f32 -1.4531521, %v5056_v60  ;;  %v5257_v17 = vmul.f32 %v5237_v39, %v4957_v26  ;;  %v5058_v29 = vmul.f32 1.0614054, %v11091_v27 }
0x12cf   : > { %v5214_v11 = vmul.f32 %v11019_v20, %v5194_v14  ;;  %v5095_v62 = vmul.f32 %v11075_v52, %v6487_v13  ;;  %v11099_v55 = vadd.f32 %v11504_v46, %v10714_v58  ;;  %v11101_v61 = vadd.f32 1.0, %v5392_v63 }
0x12d0   : > { %v5173_v3 = vmul.f32 %v11035_v6, %v6505_v31  ;;  %v5096_v32 = vmul.f32 %v11079_v25, %v6488_v7  ;;  %v5239_v33 = vsub.f32 0.0, %v4959_v24  ;;  %v11105_v34 = vand.u32 2147483647, %v11085_v36  ;;  %v7991_v57 = vpop.eup %7990 }
0x12d1   : > { %v11108_v26 = vmul.f32 %v5411_v47, %v10993_v37  ;;  %v5115_v20 = vadd.f32 1.4214138, %v5095_v62  ;;  %v6490_v15 = vadd.f32 -1.4531521, %v5058_v29  ;;  %v5292_v39 = vmul.f32 1.442695, %v5258_v45 }
0x12d2   : > { %v5193_v22 = vadd.f32 0.2548296, %v5173_v3  ;;  %v5116_v9 = vadd.f32 1.4214138, %v5096_v32  ;;  %7996 = vpow2.f32 %v5288_v42  ;;  %v11111_v58 = vmul.f32 0.70710677, %v11099_v55 }
0x12d3   : > { %v5314_v14 = vmul.f32 %v7987_v19, %v5214_v11  ;;  %v5135_v31 = vmul.f32 %v11075_v52, %v5115_v20  ;;  %v5098_v60 = vmul.f32 %v11091_v27, %v6490_v15  ;;  %v5290_v63 = vmul.f32 1.442695, %v5257_v17 }
0x12d4   : > { %v11115_v13 = vpop.eup %7992  ;;  %v5136_v37 = vmul.f32 %v11079_v25, %v5116_v9  ;;  %v5259_v47 = vmul.f32 %v5239_v33, %v4959_v24  ;;  %v4980_v7 = vmul.f32 0.3275911, %v11105_v34  ;;  %v11120_v45 = vand.u32 2147483647, %v11111_v58 }
0x12d5   : > { %v6507_v3 = vadd.f32 -0.28449672, %v5135_v31  ;;  %7998 = vpow2.f32 %v5286_v21  ;;  %v5118_v42 = vadd.f32 1.4214138, %v5098_v60  ;;  %v5057_v19 = vmul.f32 1.0614054, %v11115_v13 }
0x12d6   : > { %vm5354_vm0 = vcmp.lt.f32.partialorder %v10947_v50, 0.0  ;;  %v5213_v11 = vmul.f32 %v11035_v6, %v5193_v22  ;;  %v6508_v17 = vadd.f32 -0.28449672, %v5136_v37  ;;  %8000 = vpow2.f32 %v5292_v39 }
0x12d7   : > { %v4982_v62 = vmul.f32 0.3275911, %v11120_v45  ;;  %v11126_v29 = vpop.eup %7994  ;;  %v5334_v24 = vsub.f32 1.0, %v5314_v14  ;;  %v5175_v46 = vmul.f32 %v11075_v52, %v6507_v3  ;;  %v5138_v32 = vmul.f32 %v11091_v27, %v5118_v42 }
0x12d8   : > { %v6489_v33 = vadd.f32 -1.4531521, %v5057_v19  ;;  %v5176_v21 = vmul.f32 %v11079_v25, %v6508_v17  ;;  %8002 = vpow2.f32 %v5290_v63  ;;  %v5059_v20 = vmul.f32 1.0614054, %v11126_v29  ;;  %v11505_v63 = vld [vmem:[#allocation47_spill] sm:$0xff] }
0x12d9   : > { %v5294_v15 = vmul.f32 1.442695, %v5259_v47  ;;  %v5195_v9 = vadd.f32 0.2548296, %v5175_v46  ;;  %v6510_v6 = vadd.f32 -0.28449672, %v5138_v32  ;;  %v5313_v31 = vmul.f32 %v7991_v57, %v5213_v11 }
0x12da   : > { %v5097_v39 = vmul.f32 %v11115_v13, %v6489_v33  ;;  %v5000_v22 = vadd.f32 1.0, %v4980_v7  ;;  %v5196_v60 = vadd.f32 0.2548296, %v5176_v21  ;;  %v6491_v37 = vadd.f32 -1.4531521, %v5059_v20 }
0x12db   : > { %v5002_v14 = vadd.f32 1.0, %v4982_v62  ;;  %v5374_v28 = vsub.f32 0.0, %v5334_v24  ;;  %vm5356_vm1 = vcmp.lt.f32.partialorder %v10998_v18, 0.0  ;;  %v5178_v3 = vmul.f32 %v11091_v27, %v6510_v6 }
0x12dc   : > { %v5117_v42 = vadd.f32 1.4214138, %v5097_v39  ;;  %v11137_v19 = vadd.f32 %v11505_v63, %v10718_v43  ;;  %v7997_v47 = vpop.eup %7996  ;;  %v5215_v17 = vmul.f32 %v11075_v52, %v5195_v9  ;;  %v5216_v46 = vmul.f32 %v11079_v25, %v5196_v60 }
0x12dd   : > { %v5099_v57 = vmul.f32 %v11126_v29, %v6491_v37  ;;  %8004 = vpow2.f32 %v5294_v15  ;;  %vm5353_vm2 = vcmp.lt.f32.partialorder %v10965_v0, 0.0  ;;  %v5198_v7 = vadd.f32 0.2548296, %v5178_v3 }
0x12de   : > { %v5137_v11 = vmul.f32 %v11115_v13, %v5117_v42  ;;  %8006 = vrcp.f32 %v5000_v22  ;;  %v5240_v62 = vsub.f32 0.0, %v11105_v34  ;;  %v5333_v32 = vsub.f32 1.0, %v5313_v31 }
0x12df   : > { %v5316_v33 = vmul.f32 %v7997_v47, %v5216_v46  ;;  %v5119_v43 = vadd.f32 1.4214138, %v5099_v57  ;;  %8008 = vrcp.f32 %v5002_v14  ;;  %v7999_v52 = vpop.eup %7998  ;;  %v5394_v25 = vsel %vm5354_vm0, %v5374_v28, %v5334_v24  ;;  %v11506_v57 = vld [vmem:[#allocation48_spill] sm:$0xff] }
0x12e0   : > { %v5218_v21 = vmul.f32 %v11091_v27, %v5198_v7  ;;  %v6509_v20 = vadd.f32 -0.28449672, %v5137_v11  ;;  %v11150_v15 = vmul.f32 0.70710677, %v11137_v19  ;;  %v8001_v9 = vpop.eup %8000  ;;  %v11154_v6 = vmul.f32 %v11101_v61, %v11015_v8 }
0x12e1   : > { %v5315_v39 = vmul.f32 %v7999_v52, %v5215_v17  ;;  %v5336_v22 = vsub.f32 1.0, %v5316_v33  ;;  %v5139_v31 = vmul.f32 %v11126_v29, %v5119_v43  ;;  %v5260_v50 = vmul.f32 %v5240_v62, %v11105_v34 }
0x12e2   : > { %v5318_v60 = vmul.f32 %v8001_v9, %v5218_v21  ;;  %v5177_v37 = vmul.f32 %v11115_v13, %v6509_v20  ;;  %v11160_v28 = vand.u32 2147483647, %v11150_v15  ;;  %v8003_v27 = vpop.eup %8002  ;;  %v5414_v24 = vadd.f32 1.0, %v5394_v25 }
0x12e3   : > { %v5373_v14 = vsub.f32 0.0, %v5333_v32  ;;  %v5376_v3 = vsub.f32 0.0, %v5336_v22  ;;  %v6511_v42 = vadd.f32 -0.28449672, %v5139_v31  ;;  %vm5355_vm4 = vcmp.lt.f32.partialorder %v10995_v12, 0.0 }
0x12e4   : > { %v5338_v8 = vsub.f32 1.0, %v5318_v60  ;;  %v5197_v61 = vadd.f32 0.2548296, %v5177_v37  ;;  %v11164_v63 = vmul.f32 0.5, %v11050_v49  ;;  %v4981_v47 = vmul.f32 0.3275911, %v11160_v28 }
0x12e5   : > { %v5335_v17 = vsub.f32 1.0, %v5315_v39  ;;  %v5396_v34 = vsel %vm5356_vm1, %v5376_v3, %v5336_v22  ;;  %vm5357_vm5 = vcmp.lt.f32.partialorder %v11044_v1, 0.0  ;;  %v5179_v46 = vmul.f32 %v11126_v29, %v6511_v42 }
0x12e6   : > { %v11173_v7 = vadd.f32 %v11506_v57, %v10720_v35  ;;  %v5416_v11 = vadd.f32 1.0, %v5396_v34  ;;  %v5378_v62 = vsub.f32 0.0, %v5338_v8  ;;  %v5217_v33 = vmul.f32 %v11115_v13, %v5197_v61 }
0x12e7   : > { %v5001_v49 = vadd.f32 1.0, %v4981_v47  ;;  %v8005_v43 = vpop.eup %8004  ;;  %v11177_v52 = vmul.f32 %v5414_v24, %v11023_v5  ;;  %v5393_v18 = vsel %vm5353_vm2, %v5373_v14, %v5333_v32  ;;  %v5199_v25 = vadd.f32 0.2548296, %v5179_v46 }
0x12e8   : > { %v5296_v21 = vmul.f32 1.442695, %v5260_v50  ;;  %v11181_v20 = vpop.eup %8006  ;;  %v5436_v9 = vmul.f32 %v5416_v11, %v11062_v16  ;;  %v5398_v35 = vsel %vm5358_vm3, %v5378_v62, %v5338_v8  ;;  %v5317_v39 = vmul.f32 %v8003_v27, %v5217_v33 }
0x12e9   : > { %8010 = vrcp.f32 %v5001_v49  ;;  %v11186_v13 = vpop.eup %8008  ;;  %v5375_v22 = vsub.f32 0.0, %v5335_v17  ;;  %v5418_v31 = vadd.f32 1.0, %v5398_v35  ;;  %v5219_v5 = vmul.f32 %v11126_v29, %v5199_v25 }
0x12ea   : > { %v11190_v0 = vmul.f32 0.70710677, %v11173_v7  ;;  %v5337_v32 = vsub.f32 1.0, %v5317_v39  ;;  %v5445_v60 = vpack.c.bf16 %v11037_v51, %v11029_v44  ;;  %v5447_v16 = vpack.c.bf16 %v11108_v26, %v11031_v23 }
0x12eb   : > { %v5448_v41 = vpack.c.bf16 %v5436_v9, %v11154_v6  ;;  %v5438_v37 = vmul.f32 %v5418_v31, %v11065_v48  ;;  %v5319_v50 = vmul.f32 %v8005_v43, %v5219_v5  ;;  %v5242_v27 = vsub.f32 0.0, %v11120_v45 }
0x12ec   : > { %v4963_v24 = vand.u32 2147483647, %v11190_v0  ;;  %v5413_v29 = vadd.f32 1.0, %v5393_v18  ;;  %v5377_v14 = vsub.f32 0.0, %v5337_v32  ;;  %5744 = vmatprep.mubr.bf16.mxu1 %v5445_v60  ;;  %5800 = vmatprep.mubr.bf16.mxu0 %v5447_v16  ;;  %v5060_v3 = vmul.f32 1.0614054, %v11181_v20 }
0x12ed   : > { %v5062_v44 = vmul.f32 1.0614054, %v11186_v13  ;;  %v5395_v23 = vsel %vm5355_vm4, %v5375_v22, %v5335_v17  ;;  %v5339_v51 = vsub.f32 1.0, %v5319_v50  ;;  %5745 = vmatmul.mubr.bf16.vlgmr.msra.gmra.mrb[156].mxu1 %v5444_v4  ;;  %v11507_v48 = vpack.c.bf16 %v10967_v10, %v10960_v53 }
0x12ee   : > { %v4983_v26 = vmul.f32 0.3275911, %v4963_v24  ;;  %v5450_v6 = vpack.c.bf16 %v5438_v37, %v11177_v52  ;;  %v5397_v42 = vsel %vm5357_vm5, %v5377_v14, %v5337_v32  ;;  %v5241_v8 = vsub.f32 0.0, %v11160_v28 }
0x12ef   : > { %5801 = vmatmul.mubr.bf16.vlgmr.msra.gmra.mrb[156].mxu0 %v11507_v48  ;;  %v6492_v61 = vadd.f32 -1.4531521, %v5060_v3  ;;  %v6494_v12 = vadd.f32 -1.4531521, %v5062_v44  ;;  %v5417_v47 = vadd.f32 1.0, %v5397_v42  ;;  %v5379_v17 = vsub.f32 0.0, %v5339_v51 }
0x12f0   : > { %v5262_v34 = vmul.f32 %v5242_v27, %v11120_v45  ;;  %v5003_v46 = vadd.f32 1.0, %v4983_v26  ;;  %v5415_v56 = vadd.f32 1.0, %v5395_v23  ;;  %vm5359_vm6 = vcmp.lt.f32.partialorder %v11057_v38, 0.0 }
0x12f1   : > { %v5100_v53 = vmul.f32 %v11181_v20, %v6492_v61  ;;  %v5102_v30 = vmul.f32 %v11186_v13, %v6494_v12  ;;  %v5433_v10 = vmul.f32 %v5413_v29, %v11040_v54  ;;  %v5437_v4 = vmul.f32 %v5417_v47, %v11082_v40 }
0x12f2   : > { %v5399_v1 = vsel %vm5359_vm6, %v5379_v17, %v5339_v51  ;;  %8012 = vrcp.f32 %v5003_v46  ;;  %v5261_v62 = vmul.f32 %v5241_v8, %v11160_v28  ;;  %v5300_v49 = vmul.f32 1.442695, %v5262_v34 }
0x12f3   : > { %v8011_v57 = vpop.eup %8010  ;;  %v5419_v11 = vadd.f32 1.0, %v5399_v1  ;;  %v5120_v33 = vadd.f32 1.4214138, %v5100_v53  ;;  %v5122_v45 = vadd.f32 1.4214138, %v5102_v30  ;;  %8014 = vpow2.f32 %v5296_v21 }
0x12f4   : > { %v5449_v43 = vpack.c.bf16 %v5437_v4, %v5433_v10  ;;  %v5061_v38 = vmul.f32 1.0614054, %v8011_v57  ;;  %v5435_v52 = vmul.f32 %v5415_v56, %v11046_v2  ;;  %v5298_v9 = vmul.f32 1.442695, %v5261_v62 }
0x12f5   : > { %v5439_v18 = vmul.f32 %v5419_v11, %v11164_v63  ;;  %v5140_v54 = vmul.f32 %v11181_v20, %v5120_v33  ;;  %v5142_v40 = vmul.f32 %v11186_v13, %v5122_v45  ;;  %v5243_v22 = vsub.f32 0.0, %v4963_v24 }
0x12f6   : > { %5752 = vmatprep.mubr.bf16.mxu1 %v5449_v43  ;;  %v6493_v25 = vadd.f32 -1.4531521, %v5061_v38  ;;  %8016 = vpow2.f32 %v5300_v49  ;;  %vm5360_vm7 = vcmp.lt.f32.partialorder %v11085_v36, 0.0  ;;  %vm5361_vm8 = vcmp.lt.f32.partialorder %v11150_v15, 0.0 }
0x12f7   : > { %v5451_v35 = vpack.c.bf16 %v5439_v18, %v5435_v52  ;;  %5753 = vmatmul.mubr.bf16.gmra.mrb[160].mxu1 %v5448_v41  ;;  %v6512_v28 = vadd.f32 -0.28449672, %v5140_v54  ;;  %v6514_v39 = vadd.f32 -0.28449672, %v5142_v40  ;;  %8018 = vpow2.f32 %v5298_v9 }
0x12f8   : > { %v5101_v21 = vmul.f32 %v8011_v57, %v6493_v25  ;;  %v5263_v60 = vmul.f32 %v5243_v22, %v4963_v24  ;;  %v4920_v1 = vmul.f32 0.5, %v11070_v59  ;;  %v4921_v62 = vmul.f32 0.5, %v11137_v19 }
0x12f9   : > { %5808 = vmatprep.mubr.bf16.mxu0 %v5451_v35  ;;  %v5180_v31 = vmul.f32 %v11181_v20, %v6512_v28  ;;  %v5182_v2 = vmul.f32 %v11186_v13, %v6514_v39  ;;  %vm5362_vm9 = vcmp.lt.f32.partialorder %v11111_v58, 0.0  ;;  %vm5363_vm10 = vcmp.lt.f32.partialorder %v11190_v0, 0.0 }
0x12fa   : > { %5809 = vmatmul.mubr.bf16.gmra.mrb[160].mxu0 %v5450_v6  ;;  %v5121_v63 = vadd.f32 1.4214138, %v5101_v21  ;;  %v5302_v44 = vmul.f32 1.442695, %v5263_v60  ;;  %v4922_v59 = vmul.f32 0.5, %v11099_v55  ;;  %v4923_v9 = vmul.f32 0.5, %v11173_v7 }
0x12fb   : > { %v5200_v5 = vadd.f32 0.2548296, %v5180_v31  ;;  %v5202_v37 = vadd.f32 0.2548296, %v5182_v2  ;;  %vm8571_vm11 = vmmov (!%p6549_p12), 0  }
0x12fc   : > { %v8013_v32 = vpop.eup %8012  ;;  %v5141_v16 = vmul.f32 %v8011_v57, %v5121_v63  ;;  %8020 = vpow2.f32 %v5302_v44  ;;  %v11509_v44 = vld [vmem:[#allocation41_spill] sm:$0xff] }
0x12fd   : > { %v5063_v50 = vmul.f32 1.0614054, %v8013_v32  ;;  %v5220_v41 = vmul.f32 %v11181_v20, %v5200_v5  ;;  %v8015_v27 = vpop.eup %8014  ;;  %v5222_v51 = vmul.f32 %v11186_v13, %v5202_v37 }
0x12fe   : > { %v6513_v29 = vadd.f32 -0.28449672, %v5141_v16 }
0x12ff   : > { %v6495_v14 = vadd.f32 -1.4531521, %v5063_v50  ;;  %v5320_v3 = vmul.f32 %v8015_v27, %v5220_v41  ;;  %v6548_v41 = vld [vmem:[%s987_s29] ss:$0 sm:$0xff] }
0x1300   : > { %v5181_v23 = vmul.f32 %v8011_v57, %v6513_v29  ;;  %v8017_v42 = vpop.eup %8016  ;;  %v11508_v27 = vld [vmem:[#allocation40_spill] sm:$0xff] }
0x1301   : > { %v5103_v26 = vmul.f32 %v8013_v32, %v6495_v14  ;;  %v5340_v48 = vsub.f32 1.0, %v5320_v3  ;;  %v5322_v12 = vmul.f32 %v8017_v42, %v5222_v51  ;;  %v8019_v47 = vpop.eup %8018 }
0x1302   : > { %v5201_v6 = vadd.f32 0.2548296, %v5181_v23 }
0x1303   : > { %v5123_v8 = vadd.f32 1.4214138, %v5103_v26  ;;  %v5380_v61 = vsub.f32 0.0, %v5340_v48  ;;  %v5342_v53 = vsub.f32 1.0, %v5322_v12 }
0x1304   : > { %v5221_v24 = vmul.f32 %v8011_v57, %v5201_v6 }
0x1305   : > { %v5143_v17 = vmul.f32 %v8013_v32, %v5123_v8  ;;  %v5400_v46 = vsel %vm5360_vm7, %v5380_v61, %v5340_v48  ;;  %v5382_v57 = vsub.f32 0.0, %v5342_v53 }
0x1306   : > { %v5321_v20 = vmul.f32 %v8019_v47, %v5221_v24  ;;  %v5420_v10 = vadd.f32 1.0, %v5400_v46  ;;  %v8021_v36 = vpop.eup %8020 }
0x1307   : > { %v6515_v34 = vadd.f32 -0.28449672, %v5143_v17  ;;  %v5402_v52 = vsel %vm5362_vm9, %v5382_v57, %v5342_v53 }
0x1308   : > { %v5341_v56 = vsub.f32 1.0, %v5321_v20  ;;  %v5440_v49 = vmul.f32 %v5420_v10, %v4920_v1  ;;  %v5422_v25 = vadd.f32 1.0, %v5402_v52  ;;  %v11511_v10 = vld [vmem:[#allocation43_spill] sm:$0xff] }
0x1309   : > { %v5183_v30 = vmul.f32 %v8013_v32, %v6515_v34 }
0x130a   : > { %v5381_v13 = vsub.f32 0.0, %v5341_v56  ;;  %v5452_v40 = vpack.c.bf16 %v5440_v49, %v5440_v49  ;;  %v5442_v28 = vmul.f32 %v5422_v25, %v4922_v59  ;;  %v8027_v25 = vld [vmem:[%s11514_s17] sm:$0xff] (!%p6549_p12)   ;;  %v8570_v59 = vmov (!%p6549_p12), 0.0  }
0x130b   : > { %v5203_v4 = vadd.f32 0.2548296, %v5183_v30  ;;  %7371 = vmatprep.subr.bf16.mxu1 (!%p6549_p12), %v8570_v59  ;;  %7343 = vmatprep.subr.bf16.mxu0 (!%p6549_p12), %v8570_v59 }
0x130c   : > { %v5401_v11 = vsel %vm5361_vm8, %v5381_v13, %v5341_v56  ;;  %v5454_v22 = vpack.c.bf16 %v5442_v28, %v5442_v28  ;;  %v11510_v56 = vld [vmem:[#allocation42_spill] sm:$0xff]  ;;  %7379 = vmatpush3.bf16.msra.mxu1 (!%p6549_p12), %v8027_v25  ;;  %7344 = vmatpush3.bf16.msra.mxu0 (!%p6549_p12), %v8027_v25  ;;  %v8031_v28 = vld [vmem:[%s11514_s17 + $0x20] sm:$0xff] (!%p6549_p12)  }
0x130d   : > { %v5421_v33 = vadd.f32 1.0, %v5401_v11  ;;  %v5223_v45 = vmul.f32 %v8013_v32, %v5203_v4  ;;  %7372 = vmatprep.subr.bf16.mxu1 (!%p6549_p12), %v8570_v59  ;;  %7345 = vmatprep.subr.bf16.mxu0 (!%p6549_p12), %v8570_v59 }
0x130f   : > { %v5441_v43 = vmul.f32 %v5421_v33, %v4921_v62  ;;  %v5323_v38 = vmul.f32 %v8021_v36, %v5223_v45 }
0x1311   : > { %v5453_v18 = vpack.c.bf16 %v5441_v43, %v5441_v43  ;;  %v5343_v54 = vsub.f32 1.0, %v5323_v38 }
0x1313   : > { %5760 = vmatprep.mubr.bf16.mxu1 %v5453_v18  ;;  %v5383_v15 = vsub.f32 0.0, %v5343_v54 }
0x1314   : > { %5761 = vmatmul.mubr.bf16.gmra.mrb[164].mxu1 %v5452_v40 }
0x1315   : > { %v5403_v19 = vsel %vm5363_vm10, %v5383_v15, %v5343_v54  ;;  %v11512_v54 = vld [vmem:[#allocation44_spill] sm:$0xff]  ;;  %7363 = vmatprep.mubr.msk.bf16.mxu1 (!%p6549_p12), %vm8571_vm11, %v8570_v59 }
0x1316   : > { %v5423_v35 = vadd.f32 1.0, %v5403_v19  ;;  %v8028_v19 = vld [vmem:[%s11514_s17 + $0x8] sm:$0xff] (!%p6549_p12)  }
0x1317   : > { %7380 = vmatpush3.bf16.msra.mxu1 (!%p6549_p12), %v8028_v19  ;;  %7346 = vmatpush3.bf16.msra.mxu0 (!%p6549_p12), %v8028_v19 }
0x1318   : > { %v5443_v58 = vmul.f32 %v5423_v35, %v4923_v9  ;;  %v8029_v9 = vld [vmem:[%s11514_s17 + $0x10] sm:$0xff] (!%p6549_p12)   ;;  %7373 = vmatprep.subr.bf16.mxu1 (!%p6549_p12), %v8570_v59  ;;  %7347 = vmatprep.subr.bf16.mxu0 (!%p6549_p12), %v8570_v59  ;;  %v8030_v35 = vld [vmem:[%s11514_s17 + $0x18] sm:$0xff] (!%p6549_p12)  }
0x131a   : > { %v5455_v39 = vpack.c.bf16 %v5443_v58, %v5443_v58  ;;  %v8032_v58 = vld [vmem:[%s11514_s17 + $0x28] sm:$0xff] (!%p6549_p12)  }
0x131b   : > { %7381 = vmatpush3.bf16.msra.mxu1 (!%p6549_p12), %v8029_v9  ;;  %7348 = vmatpush3.bf16.msra.mxu0 (!%p6549_p12), %v8029_v9 }
0x131c   : > { %5816 = vmatprep.mubr.bf16.mxu0 %v5455_v39  ;;  %7374 = vmatprep.subr.bf16.mxu1 (!%p6549_p12), %v8570_v59  ;;  %v8033_v39 = vld [vmem:[%s11514_s17 + $0x30] sm:$0xff] (!%p6549_p12)  }
0x131d   : > { %5817 = vmatmul.mubr.bf16.gmra.mrb[164].mxu0 %v5454_v22  ;;  %7349 = vmatprep.subr.bf16.mxu0 (!%p6549_p12), %v8570_v59  ;;  %v8034_v22 = vld [vmem:[%s11514_s17 + $0x38] sm:$0xff] (!%p6549_p12)  }
0x131e   : > { %7359 = vmatprep.mubr.msk.bf16.mxu0 (!%p6549_p12), %vm8571_vm11, %v8570_v59 }
0x131f   : > { %7382 = vmatpush3.bf16.msra.mxu1 (!%p6549_p12), %v8030_v35  ;;  %7350 = vmatpush3.bf16.msra.mxu0 (!%p6549_p12), %v8030_v35 }
0x1320   : > { %7375 = vmatprep.subr.bf16.mxu1 (!%p6549_p12), %v8570_v59  ;;  %7351 = vmatprep.subr.bf16.mxu0 (!%p6549_p12), %v8570_v59 }
0x1323   : > { %7383 = vmatpush3.bf16.msra.mxu1 (!%p6549_p12), %v8031_v28  ;;  %7352 = vmatpush3.bf16.msra.mxu0 (!%p6549_p12), %v8031_v28 }
0x1324   : > { %7376 = vmatprep.subr.bf16.mxu1 (!%p6549_p12), %v8570_v59  ;;  %7353 = vmatprep.subr.bf16.mxu0 (!%p6549_p12), %v8570_v59 }
0x1327   : > { %7384 = vmatpush3.bf16.msra.mxu1 (!%p6549_p12), %v8032_v58  ;;  %7354 = vmatpush3.bf16.msra.mxu0 (!%p6549_p12), %v8032_v58 }
0x1328   : > { %7377 = vmatprep.subr.bf16.mxu1 (!%p6549_p12), %v8570_v59  ;;  %7355 = vmatprep.subr.bf16.mxu0 (!%p6549_p12), %v8570_v59 }
0x132b   : > { %7385 = vmatpush3.bf16.msra.mxu1 (!%p6549_p12), %v8033_v39  ;;  %7356 = vmatpush3.bf16.msra.mxu0 (!%p6549_p12), %v8033_v39 }
0x132c   : > { %7378 = vmatprep.subr.bf16.mxu1 (!%p6549_p12), %v8570_v59  ;;  %7357 = vmatprep.subr.bf16.mxu0 (!%p6549_p12), %v8570_v59 }
0x132f   : > { %7386 = vmatpush3.bf16.msra.mxu1 (!%p6549_p12), %v8034_v22  ;;  %7358 = vmatpush3.bf16.msra.mxu0 (!%p6549_p12), %v8034_v22 }
0x13c0   : > { %v6768_v21 = vpop.f32.mrb[156].mxu1 }
0x13c1   : > { %v6769_v2 = vpop.f32.mrb[157].mxu1 }
0x13c2   : > { %v6802_v31 = vpop.f32.mrb[156].mxu0  ;;  %v6770_v5 = vadd.f32 %v6769_v2, %v6768_v21  ;;  %v6771_v32 = vpop.f32.mrb[158].mxu1 }
0x13c3   : > { %v6803_v63 = vpop.f32.mrb[157].mxu0  ;;  %v6772_v55 = vpop.f32.mrb[159].mxu1 }
0x13c4   : > { %v6804_v0 = vadd.f32 %v6803_v63, %v6802_v31  ;;  %v6805_v60 = vpop.f32.mrb[158].mxu0  ;;  %v6773_v7 = vadd.f32 %v6772_v55, %v6771_v32  ;;  %v6550_v63 = vld [vmem:[%s11515_s3] ss:$0 sm:$0xff] (!%p6549_p12) }
0x13c5   : > { %v6806_v16 = vpop.f32.mrb[159].mxu0 }
0x13c6   : > { %v5803_v37 = vadd.f32 %v6804_v0, %v6770_v5  ;;  %v6807_v50 = vadd.f32 %v6806_v16, %v6805_v60 }
0x13c8   : > { %v5824_v29 = vadd.f32 %v5803_v37, %v11508_v27  ;;  %v5806_v14 = vadd.f32 %v6807_v50, %v6773_v7 }
0x13ca   : > { %v11240_v3 = vadd.f32 %v6548_v41, %v5824_v29  ;;  %v5825_v23 = vadd.f32 %v5806_v14, %v11509_v44  ;;  %v6774_v51 = vpop.f32.mrb[160].mxu1 }
0x13cb   : > { %v6775_v48 = vpop.f32.mrb[161].mxu1 }
0x13cc   : > { %5841 = vst [vmem:[#allocation2] sm:$0xff] %v11240_v3  ;;  %v11244_v26 = vadd.f32 %v6548_v41, %v5825_v23  ;;  %v6776_v6 = vadd.f32 %v6775_v48, %v6774_v51  ;;  %v6777_v42 = vpop.f32.mrb[162].mxu1 }
0x13cd   : > { %v6808_v8 = vpop.f32.mrb[160].mxu0  ;;  %v6778_v61 = vpop.f32.mrb[163].mxu1 }
0x13ce   : > { %5842 = vst [vmem:[#allocation2 + $0x8] sm:$0xff] %v11244_v26  ;;  %v6809_v24 = vpop.f32.mrb[161].mxu0  ;;  %v6779_v12 = vadd.f32 %v6778_v61, %v6777_v42  ;;  %v5850_v31 = vpack.c.bf16 (!%p6549_p12), %v11244_v26, %v11240_v3 }
0x13cf   : > { %v6810_v47 = vadd.f32 %v6809_v24, %v6808_v8  ;;  %v6811_v17 = vpop.f32.mrb[162].mxu0 }
0x13d0   : > { %v6812_v20 = vpop.f32.mrb[163].mxu0  ;;  %7360 = vmatmul.mubr.bf16.vlgmr.msra.gmra.mrb[0].mxu0 (!%p6549_p12), %v5850_v31 }
0x13d1   : > { %v5811_v34 = vadd.f32 %v6810_v47, %v6776_v6  ;;  %v6813_v46 = vadd.f32 %v6812_v20, %v6811_v17 }
0x13d3   : > { %v5826_v53 = vadd.f32 %v5811_v34, %v11510_v56  ;;  %v5814_v30 = vadd.f32 %v6813_v46, %v6779_v12 }
0x13d5   : > { %v11248_v13 = vadd.f32 %v6548_v41, %v5826_v53  ;;  %v5827_v4 = vadd.f32 %v5814_v30, %v11511_v10 }
0x13d7   : > { %5843 = vst [vmem:[#allocation2 + $0x10] sm:$0xff] %v11248_v13  ;;  %v11252_v1 = vadd.f32 %v6548_v41, %v5827_v4 }
0x13d9   : > { %5844 = vst [vmem:[#allocation2 + $0x18] sm:$0xff] %v11252_v1  ;;  %v5851_v21 = vpack.c.bf16 (!%p6549_p12), %v11252_v1, %v11248_v13 }
0x13db   : > { %7364 = vmatmul.mubr.bf16.vlgmr.msra.gmra.mrb[0].mxu1 (!%p6549_p12), %v5851_v21 }
0x13dc   : > { %7367 = vmatprep.mubr.msk.bf16.mxu1 (!%p6549_p12), %vm8571_vm11, %v8570_v59 }
0x13e7   : > { %v6780_v11 = vpop.f32.mrb[164].mxu1 }
0x13e8   : > { %v6781_v57 = vpop.f32.mrb[165].mxu1 }
0x13e9   : > { %v6782_v62 = vadd.f32 %v6781_v57, %v6780_v11  ;;  %v6783_v33 = vpop.f32.mrb[166].mxu1 }
0x13ea   : > { %v6784_v45 = vpop.f32.mrb[167].mxu1 }
0x13f0   : > { %v6814_v36 = vpop.f32.mrb[164].mxu0 }
0x13f1   : > { %v6815_v49 = vpop.f32.mrb[165].mxu0 }
0x13f2   : > { %v6816_v43 = vadd.f32 %v6815_v49, %v6814_v36  ;;  %v6817_v38 = vpop.f32.mrb[166].mxu0 }
0x13f3   : > { %v6818_v52 = vpop.f32.mrb[167].mxu0 }
0x13f4   : > { %v5819_v18 = vadd.f32 %v6816_v43, %v6782_v62  ;;  %5849 = sbr.rel (%p6549_p12) target bundleno = 5331 (0x14d3), region = 172 }
0x13f6   : > { %v5828_v40 = vadd.f32 %v5819_v18, %v11512_v54 }
0x13f8   : > { %v5840_v15 = vadd.f32 %v6548_v41, %v5828_v40 }
0x13fa   : > { %5845 = vst [vmem:[#allocation2 + $0x20] sm:$0xff] %v5840_v15  ;;  %v5852_v2 = vpack.c.bf16 (!%p6549_p12), %v5840_v15, %v5840_v15 }
0x13fc   : > { %7368 = vmatmul.mubr.bf16.gmra.mrb[4].mxu1 %v5852_v2 }
0x14a3   : > { %v5958_v0 = vpop.f32.mrb[0].mxu0 }
0x14a4   : > { %v5959_v55 = vadd.f32 %v6550_v63, %v5958_v0  ;;  %v7361_v16 = vpop.f32.mrb[1].mxu0 }
0x14a5   : > { %v5961_v7 = vpop.f32.mrb[2].mxu0 }
0x14a6   : > { %5980 = vst [vmem:[%s11516_s18] sm:$0xff] %v5959_v55  ;;  %v5962_v27 = vadd.f32 %v6550_v63, %v5961_v7  ;;  %v7362_v29 = vpop.f32.mrb[3].mxu0 }
0x14a8   : > { %5981 = vst [vmem:[%s11516_s18 + $0x8] sm:$0xff] %v5962_v27 }
0x14ae   : > { %v5966_v5 = vpop.f32.mrb[0].mxu1 }
0x14af   : > { %v5967_v32 = vadd.f32 %v6550_v63, %v5966_v5  ;;  %v7365_v60 = vpop.f32.mrb[1].mxu1 }
0x14b0   : > { %v5969_v37 = vpop.f32.mrb[2].mxu1 }
0x14b1   : > { %5982 = vst [vmem:[%s11516_s18 + $0x10] sm:$0xff] %v5967_v32  ;;  %v5970_v50 = vadd.f32 %v6550_v63, %v5969_v37  ;;  %v7366_v41 = vpop.f32.mrb[3].mxu1 }
0x14b3   : > { %5983 = vst [vmem:[%s11516_s18 + $0x18] sm:$0xff] %v5970_v50 }
0x14cf   : > { %v5974_v14 = vpop.f32.mrb[4].mxu1 }
0x14d0   : > { %v5975_v3 = vadd.f32 %v6550_v63, %v5974_v14  ;;  %v7369_v44 = vpop.f32.mrb[5].mxu1 }
0x14d1   : > { %v5977_v23 = vpop.f32.mrb[6].mxu1 }
0x14d2   : > { %5984 = vst [vmem:[%s11516_s18 + $0x20] sm:$0xff] %v5975_v3  ;;  %v7370_v51 = vpop.f32.mrb[7].mxu1 }
0x14d3 PF: > { %s11517_s27 = sld [smem:[#allocation36_spill]]  ;;  %s11518_s2 = sld [smem:[#allocation34_spill]] }
0x14d4   : > { %s11519_s29 = sld [smem:[#allocation37_spill]]  ;;  %s11520_s25 = smov %s8533_s26 }
0x14d9   : > { %p46_p7 = scmp.ge.s32.totalorder %s11517_s27, 5  }
0x14da   : > { %s11521_s26 = smov %s11519_s29 }
0x14db   :  { %48 = sbr.rel (!%p46_p7) target bundleno = 37 (0x25), region = 286 }
0x14e2   :  { %5996 = vsyncpa [#allocation4], 1 }
0x14e3   :  { %5998 = vsyncpa [#allocation4 + $0x1], 1 }
0x14e4   :  { %5999 = vsyncpa [#allocation6], 1 }
0x14e5   :  { %6000 = vsyncpa [#allocation9], 1 }
0x14e6   :  { %6001 = vsyncpa [#allocation12], 1 }
0x14e7   :  { %6003 = vsyncpa [#allocation12 + $0x1], 1 }
0x14e8   :  { %6004 = vsyncpa [#allocation15], 1 }
0x14e9   :  { %6006 = vsyncpa [#allocation15 + $0x1], 1 }
0x14ea   :  { %6007 = vsyncpa [#allocation18], 1 }
0x14eb   :  { %6009 = vsyncpa [#allocation18 + $0x1], 1 }
0x14ec   :  { %6010 = vsyncpa [#allocation21], 1 }
0x14ed   :  { %6012 = vsyncpa [#allocation21 + $0x1], 1 }
0x14ee   :  { %6013 = vsyncpa [#allocation24], 1 }
0x14ef   :  { %6015 = vsyncpa [#allocation24 + $0x1], 1 }

</bundles_post_ra>
